<compile_context>
chip_gen: v7x
topology: tpu7x:2x2x1
jax: 0.10.0
libtpu: 0.0.40
codegen_flags: <defaults>
</compile_context>

<pallas_src>
import functools

import jax
import jax.numpy as jnp
from jax.experimental import pallas as pl
from jax.experimental.pallas import tpu as pltpu


# ----------------------------------------------------------------------------
# Fused Pallas kernel: full DenseGNN3 forward for a block of BB batch elements.
# ----------------------------------------------------------------------------
def _gnn_fused_kernel(
    # per-grid-step batch-blocked data
    x_ref, a_ref, m_ref,
    # linear_in_x (Linear -> ReLU -> Linear), linear_in_e (single Linear)
    ix_w1, ix_b1, ix_w2, ix_b2, ie_w, ie_b,
    # stacked message-passing layer weights (leading dim = layer index)
    wa, wxi, wxj, be, wx, wm, bn,
    # linear_out_x (Linear -> ReLU -> lane-reduce nhf->1), linear_out_e
    ox_w1, ox_b1, ox_w2t, ox_b2, oe_w, oe_b,
    # outputs
    xo_ref, ao_ref,
    *, fh, nhf, n_layers, unroll_layers):
  bb, n, _ = x_ref.shape
  nn = n * n

  def mm(lhs, rhs):
    # bf16 MXU matmul, f32 accumulation (weights arrive pre-cast to bf16).
    return jnp.dot(lhs.astype(jnp.bfloat16), rhs.astype(jnp.bfloat16),
                   preferred_element_type=jnp.float32)

  # ---- masks: VPU only (no MXU pass), computed once per grid step ----------
  m3 = m_ref[...]                                     # (BB, N, 1)  f32
  m2d = m3.reshape(bb * n, 1)                         # (BB*N, 1)
  mask_e = m3[:, :, None, :] * m3[:, None, :, :]      # (BB, N, N, 1)

  # ---- linear_in_x: Linear -> ReLU -> Linear --------------------------------
  x0 = x_ref[...].reshape(bb * n, -1)                 # (BB*N, nnf_in)
  h = jnp.maximum(mm(x0, ix_w1[...]) + ix_b1[...], 0.0)
  x = mm(h, ix_w2[...]) + ix_b2[...]                  # (BB*N, nhf)  f32

  # ---- linear_in_e: single Linear (overwritten in __init__) -----------------
  a0 = a_ref[...].reshape(bb * nn, -1)                # (BB*NN, nef_in)
  a = (mm(a0, ie_w[...]) + ie_b[...]).reshape(bb, n, n, fh)   # f32

  # ---- one message-passing layer (residual adds fused in, f32) --------------
  def layer(l, x, a):
    msg_i = (mm(x, wxi[l]) + be[l]).reshape(bb, n, fh)   # edge bias folded in
    msg_j = mm(x, wxj[l]).reshape(bb, n, fh)
    a_lin = mm(a.reshape(bb * nn, fh), wa[l]).reshape(bb, n, n, fh)
    # broadcasts over i / j are plain VPU adds (no routing matmuls)
    e = a_lin + msg_i[:, :, None, :] + msg_j[:, None, :, :]
    a_new = jnp.maximum(e, 0.0) * mask_e                 # (BB, N, N, fh)
    agg = jnp.sum(a_new, axis=2).reshape(bb * n, fh)     # sum over neighbors j
    hx = mm(x, wx[l]) + mm(agg, wm[l]) + bn[l]
    x_new = jnp.maximum(hx, 0.0) * m2d                   # (BB*N, nhf)
    return x + x_new, a + a_new                          # residuals in f32

  if n_layers <= unroll_layers:
    for l in range(n_layers):                            # unrolled (small L)
      x, a = layer(l, x, a)
  else:                                                  # bounded live ranges
    x, a = jax.lax.fori_loop(
        0, n_layers, lambda l, carry: layer(l, carry[0], carry[1]), (x, a))

  # ---- linear_out_x: Linear -> ReLU -> Linear(nhf -> 1) ---------------------
  # The final 1-wide projection is a lane reduction (VPU/XLU): it avoids a
  # 1-wide MXU pass and yields a lane-dense (BB, N) store.
  xh = jnp.maximum(mm(x, ox_w1[...]) + ox_b1[...], 0.0).reshape(bb, n, nhf)
  x_out = jnp.sum(xh * ox_w2t[...], axis=-1) + ox_b2[...]      # (BB, N)
  xo_ref[...] = x_out.astype(xo_ref.dtype)

  # ---- linear_out_e: single Linear; symmetrization happens in the wrapper ---
  ae = mm(a.reshape(bb * nn, fh), oe_w[...]) + oe_b[...]        # (BB*NN, nef_out)
  ao_ref[...] = ae.reshape(bb, n, n, ae.shape[-1]).astype(ao_ref.dtype)


def _pick_block_b(batch, max_bb=16):
  """Batch elements per grid step.

  Valid BB: divides `batch` and is a multiple of 8 (or == batch) so the 2-D
  lane-dense X output block satisfies the (8, 128) sublane constraint.  Prefer
  leaving >= 2 grid steps so both v7x TensorCores get work.
  """
  valid = [bb for bb in range(1, batch + 1)
           if batch % bb == 0 and (bb % 8 == 0 or bb == batch)]
  multi = [bb for bb in valid if bb <= max_bb and batch // bb >= 2]
  if multi:
    return max(multi)
  return min(valid)


# ----------------------------------------------------------------------------
# Python wrapper: one fused pallas_call for the whole forward.
# ----------------------------------------------------------------------------
def dense_gnn3_forward(X_in, A_in, mask, params, *, block_b=None,
                       unroll_layers=4):
  B, N, nnf_in = X_in.shape
  nef_in = A_in.shape[-1]
  nhf = params['in_x_w1'].shape[1]
  fh = params['in_e_w'].shape[1]
  nef_out = params['out_e_w'].shape[1]
  n_layers = params['wa'].shape[0]

  bb = _pick_block_b(B) if block_b is None else block_b
  assert B % bb == 0 and (bb % 8 == 0 or bb == B)
  grid = (B // bb,)

  mask_f = mask.astype(X_in.dtype).reshape(B, N, 1)

  bf16, f32 = jnp.bfloat16, jnp.float32
  # Weights go to the MXU in bf16 (halves resident VMEM); biases stay f32.
  weights = (
      params['in_x_w1'].astype(bf16), params['in_x_b1'].astype(f32),
      params['in_x_w2'].astype(bf16), params['in_x_b2'].astype(f32),
      params['in_e_w'].astype(bf16), params['in_e_b'].astype(f32),
      params['wa'].astype(bf16), params['wxi'].astype(bf16),
      params['wxj'].astype(bf16), params['be'].astype(f32),
      params['wx'].astype(bf16), params['wm'].astype(bf16),
      params['bn'].astype(f32),
      params['out_x_w1'].astype(bf16), params['out_x_b1'].astype(f32),
      params['out_x_w2'].reshape(1, nhf).astype(f32),   # row vector, VPU path
      params['out_x_b2'].reshape(1, 1).astype(f32),
      params['out_e_w'].astype(bf16), params['out_e_b'].astype(f32),
  )

  def _resident(arr):
    # Full-array block, same (only) block every grid step.
    # (On v7x, pipeline_mode=pl.Buffered(1) would single-buffer these
    #  constants; left at the default here for portability.)
    nd = arr.ndim
    return pl.BlockSpec(arr.shape, lambda b, _nd=nd: (0,) * _nd)

  kernel = functools.partial(_gnn_fused_kernel, fh=fh, nhf=nhf,
                             n_layers=n_layers, unroll_layers=unroll_layers)

  X_flat, A4 = pl.pallas_call(
      kernel,
      out_shape=(jax.ShapeDtypeStruct((B, N), X_in.dtype),
                 jax.ShapeDtypeStruct((B, N, N, nef_out), A_in.dtype)),
      grid=grid,
      in_specs=([pl.BlockSpec((bb, N, nnf_in), lambda b: (b, 0, 0)),
                 pl.BlockSpec((bb, N, N, nef_in), lambda b: (b, 0, 0, 0)),
                 pl.BlockSpec((bb, N, 1), lambda b: (b, 0, 0))]
                + [_resident(w) for w in weights]),
      out_specs=(pl.BlockSpec((bb, N), lambda b: (b, 0)),
                 pl.BlockSpec((bb, N, N, nef_out), lambda b: (b, 0, 0, 0))),
      compiler_params=pltpu.CompilerParams(
          dimension_semantics=("parallel",),
          vmem_limit_bytes=48 * 1024 * 1024),   # fits v7x's 64 MiB physical
  )(X_in, A_in, mask_f, *weights)

  # Final edge symmetrization: trivially memory-bound -> plain XLA (this
  # replaces the former in-kernel (NN, NN) `sym` matmul).
  A_out = 0.5 * (A4 + jnp.transpose(A4, (0, 2, 1, 3)))
  return X_flat[..., None], A_out            # X back to (B, N, 1)


# ----------------------------------------------------------------------------
# Pure-JAX reference with identical semantics (for correctness checking).
# ----------------------------------------------------------------------------
def _reference_forward(X_in, A_in, mask, p, *, bf16_matmuls=True):
  n_layers = p['wa'].shape[0]

  def dm(lhs, rhs):
    if bf16_matmuls:
      lhs, rhs = lhs.astype(jnp.bfloat16), rhs.astype(jnp.bfloat16)
    return jnp.dot(lhs, rhs, preferred_element_type=jnp.float32)

  m1 = mask.astype(jnp.float32)[..., None]              # (B, N, 1)
  m2 = m1[:, :, None, :] * m1[:, None, :, :]            # (B, N, N, 1)

  X = dm(jnp.maximum(dm(X_in, p['in_x_w1']) + p['in_x_b1'], 0.0),
         p['in_x_w2']) + p['in_x_b2']
  A = dm(A_in, p['in_e_w']) + p['in_e_b']
  for l in range(n_layers):
    msg_i = dm(X, p['wxi'][l]) + p['be'][l]
    msg_j = dm(X, p['wxj'][l])
    e = dm(A, p['wa'][l]) + msg_i[:, :, None, :] + msg_j[:, None, :, :]
    a_new = jnp.maximum(e, 0.0) * m2
    agg = a_new.sum(axis=2)
    hx = dm(X, p['wx'][l]) + dm(agg, p['wm'][l]) + p['bn'][l]
    x_new = jnp.maximum(hx, 0.0) * m1
    X = X + x_new
    A = A + a_new
  Xh = jnp.maximum(dm(X, p['out_x_w1']) + p['out_x_b1'], 0.0)
  X = Xh @ p['out_x_w2'] + p['out_x_b2']                # final proj in f32
  A = dm(A, p['out_e_w']) + p['out_e_b']
  A = 0.5 * (A + jnp.transpose(A, (0, 2, 1, 3)))
  return X, A


# ----------------------------------------------------------------------------
# Deterministic parameter init (PyTorch-Linear-style uniform)
# ----------------------------------------------------------------------------
def _init_linear(key, fin, fout):
  k1, k2 = jax.random.split(key)
  bound = 1.0 / (fin ** 0.5)
  w = jax.random.uniform(k1, (fin, fout), jnp.float32, -bound, bound)
  b = jax.random.uniform(k2, (1, fout), jnp.float32, -bound, bound)
  return w, b


def init_params(key, nnf_in, nef_in, nef_out, nhf, fact, n_layers):
  fh = nhf // fact
  keys = iter(jax.random.split(key, 6 + 5 * n_layers))
  p = {}
  p['in_x_w1'], p['in_x_b1'] = _init_linear(next(keys), nnf_in, nhf)
  p['in_x_w2'], p['in_x_b2'] = _init_linear(next(keys), nhf, nhf)
  p['in_e_w'], p['in_e_b'] = _init_linear(next(keys), nef_in, fh)
  p['out_x_w1'], p['out_x_b1'] = _init_linear(next(keys), nhf, nhf)
  p['out_x_w2'], p['out_x_b2'] = _init_linear(next(keys), nhf, 1)
  p['out_e_w'], p['out_e_b'] = _init_linear(next(keys), fh, nef_out)
  wa, wxi, wxj, be, wx, wm, bn = [], [], [], [], [], [], []
  for _ in range(n_layers):
    wa_l, be_l = _init_linear(next(keys), fh, fh)
    wxi_l, _ = _init_linear(next(keys), nhf, fh)
    wxj_l, _ = _init_linear(next(keys), nhf, fh)
    wx_l, bn_l = _init_linear(next(keys), nhf, nhf)
    wm_l, _ = _init_linear(next(keys), fh, nhf)
    wa.append(wa_l); wxi.append(wxi_l); wxj.append(wxj_l)
    be.append(be_l); wx.append(wx_l); wm.append(wm_l); bn.append(bn_l)
  p['wa'] = jnp.stack(wa)
  p['wxi'] = jnp.stack(wxi)
  p['wxj'] = jnp.stack(wxj)
  p['be'] = jnp.stack(be)
  p['wx'] = jnp.stack(wx)
  p['wm'] = jnp.stack(wm)
  p['bn'] = jnp.stack(bn)
  return p


# ----------------------------------------------------------------------------
if __name__ == "__main__":
  # Small shapes consistent with the module's forward.
  B, N = 16, 8                    # batch, num nodes  (BB=8 -> grid of 2 steps)
  nnf_in, nef_in = 4, 2           # input node / edge feature dims
  nef_out = 2                     # output edge feature dim
  nhf, fact = 32, 2               # hidden size, edge_node_ratio
  n_layers = 2

  root = jax.random.PRNGKey(0)
  k_param, k_x, k_a = jax.random.split(root, 3)
  params = init_params(k_param, nnf_in, nef_in, nef_out, nhf, fact, n_layers)

  X_in = jax.random.normal(k_x, (B, N, nnf_in), jnp.float32)
  A_raw = jax.random.normal(k_a, (B, N, N, nef_in), jnp.float32)
  A_in = 0.5 * (A_raw + jnp.transpose(A_raw, (0, 2, 1, 3)))     # symmetric edges
  mask = jnp.ones((B, N), dtype=bool).at[1, N - 2:].set(False)  # pad last 2 nodes

  fwd = jax.jit(dense_gnn3_forward)
  X_out, A_out = fwd(X_in, A_in, mask, params)
  jax.block_until_ready((X_out, A_out))

  assert X_out.shape == (B, N, 1)
  assert A_out.shape == (B, N, N, nef_out)

  # Correctness check against pure-JAX references of the same semantics
  # (bf16-matched and pure-f32, so the test is robust to accumulation-order
  #  and casting differences on the MXU).
  X_bf, A_bf = _reference_forward(X_in, A_in, mask, params, bf16_matmuls=True)
  X_f32, A_f32 = _reference_forward(X_in, A_in, mask, params, bf16_matmuls=False)

  def close(a, b, tol):
    return bool(jnp.allclose(a, b, atol=tol, rtol=tol))

  assert close(X_out, X_bf, 2e-2) or close(X_out, X_f32, 5e-2), "X mismatch"
  assert close(A_out, A_bf, 2e-2) or close(A_out, A_f32, 5e-2), "A mismatch"

  print("KERNEL_OK")
</pallas_src>

<mosaic_0001>
module attributes {stable_mosaic.version = 11 : i64} {
  func.func @_gnn_fused_kernel(%arg0: i32, %arg1: memref<8x8x4xf32, #tpu.memory_space<vmem>>, %arg2: memref<8x8x8x2xf32, #tpu.memory_space<vmem>>, %arg3: memref<8x8x1xf32, #tpu.memory_space<vmem>>, %arg4: memref<4x32xbf16, #tpu.memory_space<vmem>>, %arg5: memref<1x32xf32, #tpu.memory_space<vmem>>, %arg6: memref<32x32xbf16, #tpu.memory_space<vmem>>, %arg7: memref<1x32xf32, #tpu.memory_space<vmem>>, %arg8: memref<2x16xbf16, #tpu.memory_space<vmem>>, %arg9: memref<1x16xf32, #tpu.memory_space<vmem>>, %arg10: memref<2x16x16xbf16, #tpu.memory_space<vmem>>, %arg11: memref<2x32x16xbf16, #tpu.memory_space<vmem>>, %arg12: memref<2x32x16xbf16, #tpu.memory_space<vmem>>, %arg13: memref<2x1x16xf32, #tpu.memory_space<vmem>>, %arg14: memref<2x32x32xbf16, #tpu.memory_space<vmem>>, %arg15: memref<2x16x32xbf16, #tpu.memory_space<vmem>>, %arg16: memref<2x1x32xf32, #tpu.memory_space<vmem>>, %arg17: memref<32x32xbf16, #tpu.memory_space<vmem>>, %arg18: memref<1x32xf32, #tpu.memory_space<vmem>>, %arg19: memref<1x32xf32, #tpu.memory_space<vmem>>, %arg20: memref<1x1xf32, #tpu.memory_space<vmem>>, %arg21: memref<16x2xbf16, #tpu.memory_space<vmem>>, %arg22: memref<1x2xf32, #tpu.memory_space<vmem>>, %arg23: memref<8x8xf32, #tpu.memory_space<vmem>>, %arg24: memref<8x8x8x2xf32, #tpu.memory_space<vmem>>) attributes {dimension_semantics = [#tpu.dimension_semantics<parallel>], iteration_bounds = array<i64: 2>, scalar_prefetch = 0 : i64, scratch_operands = 0 : i64, tpu.core_type = #tpu.core_type<tc>, window_params = [{transform_indices = @transform_0, window_bounds = array<i64: 8, 8, 4>}, {transform_indices = @transform_1, window_bounds = array<i64: 8, 8, 8, 2>}, {transform_indices = @transform_2, window_bounds = array<i64: 8, 8, 1>}, {pipeline_mode = #tpu.pipeline_mode<synchronous>, transform_indices = @transform_3, window_bounds = array<i64: 4, 32>}, {pipeline_mode = #tpu.pipeline_mode<synchronous>, transform_indices = @transform_4, window_bounds = array<i64: 1, 32>}, {pipeline_mode = #tpu.pipeline_mode<synchronous>, transform_indices = @transform_5, window_bounds = array<i64: 32, 32>}, {pipeline_mode = #tpu.pipeline_mode<synchronous>, transform_indices = @transform_6, window_bounds = array<i64: 1, 32>}, {pipeline_mode = #tpu.pipeline_mode<synchronous>, transform_indices = @transform_7, window_bounds = array<i64: 2, 16>}, {pipeline_mode = #tpu.pipeline_mode<synchronous>, transform_indices = @transform_8, window_bounds = array<i64: 1, 16>}, {pipeline_mode = #tpu.pipeline_mode<synchronous>, transform_indices = @transform_9, window_bounds = array<i64: 2, 16, 16>}, {pipeline_mode = #tpu.pipeline_mode<synchronous>, transform_indices = @transform_10, window_bounds = array<i64: 2, 32, 16>}, {pipeline_mode = #tpu.pipeline_mode<synchronous>, transform_indices = @transform_11, window_bounds = array<i64: 2, 32, 16>}, {pipeline_mode = #tpu.pipeline_mode<synchronous>, transform_indices = @transform_12, window_bounds = array<i64: 2, 1, 16>}, {pipeline_mode = #tpu.pipeline_mode<synchronous>, transform_indices = @transform_13, window_bounds = array<i64: 2, 32, 32>}, {pipeline_mode = #tpu.pipeline_mode<synchronous>, transform_indices = @transform_14, window_bounds = array<i64: 2, 16, 32>}, {pipeline_mode = #tpu.pipeline_mode<synchronous>, transform_indices = @transform_15, window_bounds = array<i64: 2, 1, 32>}, {pipeline_mode = #tpu.pipeline_mode<synchronous>, transform_indices = @transform_16, window_bounds = array<i64: 32, 32>}, {pipeline_mode = #tpu.pipeline_mode<synchronous>, transform_indices = @transform_17, window_bounds = array<i64: 1, 32>}, {pipeline_mode = #tpu.pipeline_mode<synchronous>, transform_indices = @transform_18, window_bounds = array<i64: 1, 32>}, {pipeline_mode = #tpu.pipeline_mode<synchronous>, transform_indices = @transform_19, window_bounds = array<i64: 1, 1>}, {pipeline_mode = #tpu.pipeline_mode<synchronous>, transform_indices = @transform_20, window_bounds = array<i64: 16, 2>}, {pipeline_mode = #tpu.pipeline_mode<synchronous>, transform_indices = @transform_21, window_bounds = array<i64: 1, 2>}, {transform_indices = @transform_22, window_bounds = array<i64: 8, 8>}, {transform_indices = @transform_23, window_bounds = array<i64: 8, 8, 8, 2>}]} {
    %c0 = arith.constant 0 : index
    %c0_0 = arith.constant 0 : index
    %c0_1 = arith.constant 0 : index
    %0 = vector.load %arg3[%c0, %c0_0, %c0_1] : memref<8x8x1xf32, #tpu.memory_space<vmem>>, vector<8x8x1xf32>
    %1 = vector.shape_cast %0 : vector<8x8x1xf32> to vector<64x1xf32>
    %2 = vector.shape_cast %0 : vector<8x8x1xf32> to vector<8x8x1x1xf32>
    %3 = vector.shape_cast %0 : vector<8x8x1xf32> to vector<8x1x8x1xf32>
    %4 = vector.broadcast %2 : vector<8x8x1x1xf32> to vector<8x8x8x1xf32>
    %5 = vector.broadcast %3 : vector<8x1x8x1xf32> to vector<8x8x8x1xf32>
    %6 = arith.mulf %4, %5 : vector<8x8x8x1xf32>
    %c0_2 = arith.constant 0 : index
    %c0_3 = arith.constant 0 : index
    %c0_4 = arith.constant 0 : index
    %7 = vector.load %arg1[%c0_2, %c0_3, %c0_4] : memref<8x8x4xf32, #tpu.memory_space<vmem>>, vector<8x8x4xf32>
    %8 = vector.shape_cast %7 : vector<8x8x4xf32> to vector<64x4xf32>
    %c0_5 = arith.constant 0 : index
    %c0_6 = arith.constant 0 : index
    %9 = vector.load %arg4[%c0_5, %c0_6] : memref<4x32xbf16, #tpu.memory_space<vmem>>, vector<4x32xbf16>
    %10 = arith.truncf %8 : vector<64x4xf32> to vector<64x4xbf16>
    %cst = arith.constant dense<0.000000e+00> : vector<64x32xf32>
    %11 = tpu.matmul %10, %9, %cst {dimension_numbers = #tpu.dot_dimension_numbers<[1], [0], [0], [1], [0, 0, 1, 1], [], []>} : vector<64x4xbf16>, vector<4x32xbf16>, vector<64x32xf32> -> vector<64x32xf32>
    %c0_7 = arith.constant 0 : index
    %c0_8 = arith.constant 0 : index
    %12 = vector.load %arg5[%c0_7, %c0_8] : memref<1x32xf32, #tpu.memory_space<vmem>>, vector<1x32xf32>
    %13 = vector.broadcast %12 : vector<1x32xf32> to vector<64x32xf32>
    %14 = arith.addf %11, %13 : vector<64x32xf32>
    %cst_9 = arith.constant 0.000000e+00 : f32
    %15 = vector.broadcast %cst_9 : f32 to vector<64x32xf32>
    %16 = arith.maximumf %14, %15 : vector<64x32xf32>
    %c0_10 = arith.constant 0 : index
    %c0_11 = arith.constant 0 : index
    %17 = vector.load %arg6[%c0_10, %c0_11] : memref<32x32xbf16, #tpu.memory_space<vmem>>, vector<32x32xbf16>
    %18 = arith.truncf %16 : vector<64x32xf32> to vector<64x32xbf16>
    %cst_12 = arith.constant dense<0.000000e+00> : vector<64x32xf32>
    %19 = tpu.matmul %18, %17, %cst_12 {dimension_numbers = #tpu.dot_dimension_numbers<[1], [0], [0], [1], [0, 0, 1, 1], [], []>} : vector<64x32xbf16>, vector<32x32xbf16>, vector<64x32xf32> -> vector<64x32xf32>
    %c0_13 = arith.constant 0 : index
    %c0_14 = arith.constant 0 : index
    %20 = vector.load %arg7[%c0_13, %c0_14] : memref<1x32xf32, #tpu.memory_space<vmem>>, vector<1x32xf32>
    %21 = vector.broadcast %20 : vector<1x32xf32> to vector<64x32xf32>
    %22 = arith.addf %19, %21 : vector<64x32xf32>
    %c0_15 = arith.constant 0 : index
    %c0_16 = arith.constant 0 : index
    %c0_17 = arith.constant 0 : index
    %c0_18 = arith.constant 0 : index
    %23 = vector.load %arg2[%c0_15, %c0_16, %c0_17, %c0_18] : memref<8x8x8x2xf32, #tpu.memory_space<vmem>>, vector<8x8x8x2xf32>
    %24 = vector.shape_cast %23 : vector<8x8x8x2xf32> to vector<512x2xf32>
    %c0_19 = arith.constant 0 : index
    %c0_20 = arith.constant 0 : index
    %25 = vector.load %arg8[%c0_19, %c0_20] : memref<2x16xbf16, #tpu.memory_space<vmem>>, vector<2x16xbf16>
    %26 = arith.truncf %24 : vector<512x2xf32> to vector<512x2xbf16>
    %cst_21 = arith.constant dense<0.000000e+00> : vector<512x16xf32>
    %27 = tpu.matmul %26, %25, %cst_21 {dimension_numbers = #tpu.dot_dimension_numbers<[1], [0], [0], [1], [0, 0, 1, 1], [], []>} : vector<512x2xbf16>, vector<2x16xbf16>, vector<512x16xf32> -> vector<512x16xf32>
    %c0_22 = arith.constant 0 : index
    %c0_23 = arith.constant 0 : index
    %28 = vector.load %arg9[%c0_22, %c0_23] : memref<1x16xf32, #tpu.memory_space<vmem>>, vector<1x16xf32>
    %29 = vector.broadcast %28 : vector<1x16xf32> to vector<512x16xf32>
    %30 = arith.addf %27, %29 : vector<512x16xf32>
    %31 = vector.shape_cast %30 : vector<512x16xf32> to vector<8x8x8x16xf32>
    %c0_24 = arith.constant 0 : index
    %c0_25 = arith.constant 0 : index
    %c0_26 = arith.constant 0 : index
    %32 = vector.load %arg11[%c0_24, %c0_25, %c0_26] : memref<2x32x16xbf16, #tpu.memory_space<vmem>>, vector<1x32x16xbf16>
    %33 = vector.shape_cast %32 : vector<1x32x16xbf16> to vector<32x16xbf16>
    %34 = arith.truncf %22 : vector<64x32xf32> to vector<64x32xbf16>
    %cst_27 = arith.constant dense<0.000000e+00> : vector<64x16xf32>
    %35 = tpu.matmul %34, %33, %cst_27 {dimension_numbers = #tpu.dot_dimension_numbers<[1], [0], [0], [1], [0, 0, 1, 1], [], []>} : vector<64x32xbf16>, vector<32x16xbf16>, vector<64x16xf32> -> vector<64x16xf32>
    %c0_28 = arith.constant 0 : index
    %c0_29 = arith.constant 0 : index
    %c0_30 = arith.constant 0 : index
    %36 = vector.load %arg13[%c0_28, %c0_29, %c0_30] : memref<2x1x16xf32, #tpu.memory_space<vmem>>, vector<1x1x16xf32>
    %37 = vector.shape_cast %36 : vector<1x1x16xf32> to vector<1x16xf32>
    %38 = vector.broadcast %37 : vector<1x16xf32> to vector<64x16xf32>
    %39 = arith.addf %35, %38 : vector<64x16xf32>
    %40 = vector.shape_cast %39 : vector<64x16xf32> to vector<8x8x16xf32>
    %c0_31 = arith.constant 0 : index
    %c0_32 = arith.constant 0 : index
    %c0_33 = arith.constant 0 : index
    %41 = vector.load %arg12[%c0_31, %c0_32, %c0_33] : memref<2x32x16xbf16, #tpu.memory_space<vmem>>, vector<1x32x16xbf16>
    %42 = vector.shape_cast %41 : vector<1x32x16xbf16> to vector<32x16xbf16>
    %43 = arith.truncf %22 : vector<64x32xf32> to vector<64x32xbf16>
    %cst_34 = arith.constant dense<0.000000e+00> : vector<64x16xf32>
    %44 = tpu.matmul %43, %42, %cst_34 {dimension_numbers = #tpu.dot_dimension_numbers<[1], [0], [0], [1], [0, 0, 1, 1], [], []>} : vector<64x32xbf16>, vector<32x16xbf16>, vector<64x16xf32> -> vector<64x16xf32>
    %45 = vector.shape_cast %44 : vector<64x16xf32> to vector<8x8x16xf32>
    %46 = vector.shape_cast %31 : vector<8x8x8x16xf32> to vector<512x16xf32>
    %c0_35 = arith.constant 0 : index
    %c0_36 = arith.constant 0 : index
    %c0_37 = arith.constant 0 : index
    %47 = vector.load %arg10[%c0_35, %c0_36, %c0_37] : memref<2x16x16xbf16, #tpu.memory_space<vmem>>, vector<1x16x16xbf16>
    %48 = vector.shape_cast %47 : vector<1x16x16xbf16> to vector<16x16xbf16>
    %49 = arith.truncf %46 : vector<512x16xf32> to vector<512x16xbf16>
    %cst_38 = arith.constant dense<0.000000e+00> : vector<512x16xf32>
    %50 = tpu.matmul %49, %48, %cst_38 {dimension_numbers = #tpu.dot_dimension_numbers<[1], [0], [0], [1], [0, 0, 1, 1], [], []>} : vector<512x16xbf16>, vector<16x16xbf16>, vector<512x16xf32> -> vector<512x16xf32>
    %51 = vector.shape_cast %50 : vector<512x16xf32> to vector<8x8x8x16xf32>
    %52 = vector.shape_cast %40 : vector<8x8x16xf32> to vector<8x8x1x16xf32>
    %53 = vector.broadcast %52 : vector<8x8x1x16xf32> to vector<8x8x8x16xf32>
    %54 = arith.addf %51, %53 : vector<8x8x8x16xf32>
    %55 = vector.shape_cast %45 : vector<8x8x16xf32> to vector<8x1x8x16xf32>
    %56 = vector.broadcast %55 : vector<8x1x8x16xf32> to vector<8x8x8x16xf32>
    %57 = arith.addf %54, %56 : vector<8x8x8x16xf32>
    %cst_39 = arith.constant 0.000000e+00 : f32
    %58 = vector.broadcast %cst_39 : f32 to vector<8x8x8x16xf32>
    %59 = arith.maximumf %57, %58 : vector<8x8x8x16xf32>
    %60 = vector.broadcast %6 : vector<8x8x8x1xf32> to vector<8x8x8x16xf32>
    %61 = arith.mulf %59, %60 : vector<8x8x8x16xf32>
    %cst_40 = arith.constant dense<0.000000e+00> : vector<8x8x16xf32>
    %62 = vector.multi_reduction <add>, %61, %cst_40 [2] : vector<8x8x8x16xf32> to vector<8x8x16xf32>
    %63 = vector.shape_cast %62 : vector<8x8x16xf32> to vector<64x16xf32>
    %c0_41 = arith.constant 0 : index
    %c0_42 = arith.constant 0 : index
    %c0_43 = arith.constant 0 : index
    %64 = vector.load %arg14[%c0_41, %c0_42, %c0_43] : memref<2x32x32xbf16, #tpu.memory_space<vmem>>, vector<1x32x32xbf16>
    %65 = vector.shape_cast %64 : vector<1x32x32xbf16> to vector<32x32xbf16>
    %66 = arith.truncf %22 : vector<64x32xf32> to vector<64x32xbf16>
    %cst_44 = arith.constant dense<0.000000e+00> : vector<64x32xf32>
    %67 = tpu.matmul %66, %65, %cst_44 {dimension_numbers = #tpu.dot_dimension_numbers<[1], [0], [0], [1], [0, 0, 1, 1], [], []>} : vector<64x32xbf16>, vector<32x32xbf16>, vector<64x32xf32> -> vector<64x32xf32>
    %c0_45 = arith.constant 0 : index
    %c0_46 = arith.constant 0 : index
    %c0_47 = arith.constant 0 : index
    %68 = vector.load %arg15[%c0_45, %c0_46, %c0_47] : memref<2x16x32xbf16, #tpu.memory_space<vmem>>, vector<1x16x32xbf16>
    %69 = vector.shape_cast %68 : vector<1x16x32xbf16> to vector<16x32xbf16>
    %70 = arith.truncf %63 : vector<64x16xf32> to vector<64x16xbf16>
    %cst_48 = arith.constant dense<0.000000e+00> : vector<64x32xf32>
    %71 = tpu.matmul %70, %69, %cst_48 {dimension_numbers = #tpu.dot_dimension_numbers<[1], [0], [0], [1], [0, 0, 1, 1], [], []>} : vector<64x16xbf16>, vector<16x32xbf16>, vector<64x32xf32> -> vector<64x32xf32>
    %72 = arith.addf %67, %71 : vector<64x32xf32>
    %c0_49 = arith.constant 0 : index
    %c0_50 = arith.constant 0 : index
    %c0_51 = arith.constant 0 : index
    %73 = vector.load %arg16[%c0_49, %c0_50, %c0_51] : memref<2x1x32xf32, #tpu.memory_space<vmem>>, vector<1x1x32xf32>
    %74 = vector.shape_cast %73 : vector<1x1x32xf32> to vector<1x32xf32>
    %75 = vector.broadcast %74 : vector<1x32xf32> to vector<64x32xf32>
    %76 = arith.addf %72, %75 : vector<64x32xf32>
    %cst_52 = arith.constant 0.000000e+00 : f32
    %77 = vector.broadcast %cst_52 : f32 to vector<64x32xf32>
    %78 = arith.maximumf %76, %77 : vector<64x32xf32>
    %79 = vector.broadcast %1 : vector<64x1xf32> to vector<64x32xf32>
    %80 = arith.mulf %78, %79 : vector<64x32xf32>
    %81 = arith.addf %22, %80 : vector<64x32xf32>
    %82 = arith.addf %31, %61 : vector<8x8x8x16xf32>
    %c1 = arith.constant 1 : index
    %c0_53 = arith.constant 0 : index
    %c0_54 = arith.constant 0 : index
    %83 = vector.load %arg11[%c1, %c0_53, %c0_54] : memref<2x32x16xbf16, #tpu.memory_space<vmem>>, vector<1x32x16xbf16>
    %84 = vector.shape_cast %83 : vector<1x32x16xbf16> to vector<32x16xbf16>
    %85 = arith.truncf %81 : vector<64x32xf32> to vector<64x32xbf16>
    %cst_55 = arith.constant dense<0.000000e+00> : vector<64x16xf32>
    %86 = tpu.matmul %85, %84, %cst_55 {dimension_numbers = #tpu.dot_dimension_numbers<[1], [0], [0], [1], [0, 0, 1, 1], [], []>} : vector<64x32xbf16>, vector<32x16xbf16>, vector<64x16xf32> -> vector<64x16xf32>
    %c1_56 = arith.constant 1 : index
    %c0_57 = arith.constant 0 : index
    %c0_58 = arith.constant 0 : index
    %87 = vector.load %arg13[%c1_56, %c0_57, %c0_58] : memref<2x1x16xf32, #tpu.memory_space<vmem>>, vector<1x1x16xf32>
    %88 = vector.shape_cast %87 : vector<1x1x16xf32> to vector<1x16xf32>
    %89 = vector.broadcast %88 : vector<1x16xf32> to vector<64x16xf32>
    %90 = arith.addf %86, %89 : vector<64x16xf32>
    %91 = vector.shape_cast %90 : vector<64x16xf32> to vector<8x8x16xf32>
    %c1_59 = arith.constant 1 : index
    %c0_60 = arith.constant 0 : index
    %c0_61 = arith.constant 0 : index
    %92 = vector.load %arg12[%c1_59, %c0_60, %c0_61] : memref<2x32x16xbf16, #tpu.memory_space<vmem>>, vector<1x32x16xbf16>
    %93 = vector.shape_cast %92 : vector<1x32x16xbf16> to vector<32x16xbf16>
    %94 = arith.truncf %81 : vector<64x32xf32> to vector<64x32xbf16>
    %cst_62 = arith.constant dense<0.000000e+00> : vector<64x16xf32>
    %95 = tpu.matmul %94, %93, %cst_62 {dimension_numbers = #tpu.dot_dimension_numbers<[1], [0], [0], [1], [0, 0, 1, 1], [], []>} : vector<64x32xbf16>, vector<32x16xbf16>, vector<64x16xf32> -> vector<64x16xf32>
    %96 = vector.shape_cast %95 : vector<64x16xf32> to vector<8x8x16xf32>
    %97 = vector.shape_cast %82 : vector<8x8x8x16xf32> to vector<512x16xf32>
    %c1_63 = arith.constant 1 : index
    %c0_64 = arith.constant 0 : index
    %c0_65 = arith.constant 0 : index
    %98 = vector.load %arg10[%c1_63, %c0_64, %c0_65] : memref<2x16x16xbf16, #tpu.memory_space<vmem>>, vector<1x16x16xbf16>
    %99 = vector.shape_cast %98 : vector<1x16x16xbf16> to vector<16x16xbf16>
    %100 = arith.truncf %97 : vector<512x16xf32> to vector<512x16xbf16>
    %cst_66 = arith.constant dense<0.000000e+00> : vector<512x16xf32>
    %101 = tpu.matmul %100, %99, %cst_66 {dimension_numbers = #tpu.dot_dimension_numbers<[1], [0], [0], [1], [0, 0, 1, 1], [], []>} : vector<512x16xbf16>, vector<16x16xbf16>, vector<512x16xf32> -> vector<512x16xf32>
    %102 = vector.shape_cast %101 : vector<512x16xf32> to vector<8x8x8x16xf32>
    %103 = vector.shape_cast %91 : vector<8x8x16xf32> to vector<8x8x1x16xf32>
    %104 = vector.broadcast %103 : vector<8x8x1x16xf32> to vector<8x8x8x16xf32>
    %105 = arith.addf %102, %104 : vector<8x8x8x16xf32>
    %106 = vector.shape_cast %96 : vector<8x8x16xf32> to vector<8x1x8x16xf32>
    %107 = vector.broadcast %106 : vector<8x1x8x16xf32> to vector<8x8x8x16xf32>
    %108 = arith.addf %105, %107 : vector<8x8x8x16xf32>
    %cst_67 = arith.constant 0.000000e+00 : f32
    %109 = vector.broadcast %cst_67 : f32 to vector<8x8x8x16xf32>
    %110 = arith.maximumf %108, %109 : vector<8x8x8x16xf32>
    %111 = vector.broadcast %6 : vector<8x8x8x1xf32> to vector<8x8x8x16xf32>
    %112 = arith.mulf %110, %111 : vector<8x8x8x16xf32>
    %cst_68 = arith.constant dense<0.000000e+00> : vector<8x8x16xf32>
    %113 = vector.multi_reduction <add>, %112, %cst_68 [2] : vector<8x8x8x16xf32> to vector<8x8x16xf32>
    %114 = vector.shape_cast %113 : vector<8x8x16xf32> to vector<64x16xf32>
    %c1_69 = arith.constant 1 : index
    %c0_70 = arith.constant 0 : index
    %c0_71 = arith.constant 0 : index
    %115 = vector.load %arg14[%c1_69, %c0_70, %c0_71] : memref<2x32x32xbf16, #tpu.memory_space<vmem>>, vector<1x32x32xbf16>
    %116 = vector.shape_cast %115 : vector<1x32x32xbf16> to vector<32x32xbf16>
    %117 = arith.truncf %81 : vector<64x32xf32> to vector<64x32xbf16>
    %cst_72 = arith.constant dense<0.000000e+00> : vector<64x32xf32>
    %118 = tpu.matmul %117, %116, %cst_72 {dimension_numbers = #tpu.dot_dimension_numbers<[1], [0], [0], [1], [0, 0, 1, 1], [], []>} : vector<64x32xbf16>, vector<32x32xbf16>, vector<64x32xf32> -> vector<64x32xf32>
    %c1_73 = arith.constant 1 : index
    %c0_74 = arith.constant 0 : index
    %c0_75 = arith.constant 0 : index
    %119 = vector.load %arg15[%c1_73, %c0_74, %c0_75] : memref<2x16x32xbf16, #tpu.memory_space<vmem>>, vector<1x16x32xbf16>
    %120 = vector.shape_cast %119 : vector<1x16x32xbf16> to vector<16x32xbf16>
    %121 = arith.truncf %114 : vector<64x16xf32> to vector<64x16xbf16>
    %cst_76 = arith.constant dense<0.000000e+00> : vector<64x32xf32>
    %122 = tpu.matmul %121, %120, %cst_76 {dimension_numbers = #tpu.dot_dimension_numbers<[1], [0], [0], [1], [0, 0, 1, 1], [], []>} : vector<64x16xbf16>, vector<16x32xbf16>, vector<64x32xf32> -> vector<64x32xf32>
    %123 = arith.addf %118, %122 : vector<64x32xf32>
    %c1_77 = arith.constant 1 : index
    %c0_78 = arith.constant 0 : index
    %c0_79 = arith.constant 0 : index
    %124 = vector.load %arg16[%c1_77, %c0_78, %c0_79] : memref<2x1x32xf32, #tpu.memory_space<vmem>>, vector<1x1x32xf32>
    %125 = vector.shape_cast %124 : vector<1x1x32xf32> to vector<1x32xf32>
    %126 = vector.broadcast %125 : vector<1x32xf32> to vector<64x32xf32>
    %127 = arith.addf %123, %126 : vector<64x32xf32>
    %cst_80 = arith.constant 0.000000e+00 : f32
    %128 = vector.broadcast %cst_80 : f32 to vector<64x32xf32>
    %129 = arith.maximumf %127, %128 : vector<64x32xf32>
    %130 = vector.broadcast %1 : vector<64x1xf32> to vector<64x32xf32>
    %131 = arith.mulf %129, %130 : vector<64x32xf32>
    %132 = arith.addf %81, %131 : vector<64x32xf32>
    %133 = arith.addf %82, %112 : vector<8x8x8x16xf32>
    %c0_81 = arith.constant 0 : index
    %c0_82 = arith.constant 0 : index
    %134 = vector.load %arg17[%c0_81, %c0_82] : memref<32x32xbf16, #tpu.memory_space<vmem>>, vector<32x32xbf16>
    %135 = arith.truncf %132 : vector<64x32xf32> to vector<64x32xbf16>
    %cst_83 = arith.constant dense<0.000000e+00> : vector<64x32xf32>
    %136 = tpu.matmul %135, %134, %cst_83 {dimension_numbers = #tpu.dot_dimension_numbers<[1], [0], [0], [1], [0, 0, 1, 1], [], []>} : vector<64x32xbf16>, vector<32x32xbf16>, vector<64x32xf32> -> vector<64x32xf32>
    %c0_84 = arith.constant 0 : index
    %c0_85 = arith.constant 0 : index
    %137 = vector.load %arg18[%c0_84, %c0_85] : memref<1x32xf32, #tpu.memory_space<vmem>>, vector<1x32xf32>
    %138 = vector.broadcast %137 : vector<1x32xf32> to vector<64x32xf32>
    %139 = arith.addf %136, %138 : vector<64x32xf32>
    %cst_86 = arith.constant 0.000000e+00 : f32
    %140 = vector.broadcast %cst_86 : f32 to vector<64x32xf32>
    %141 = arith.maximumf %139, %140 : vector<64x32xf32>
    %142 = vector.shape_cast %141 : vector<64x32xf32> to vector<8x8x32xf32>
    %c0_87 = arith.constant 0 : index
    %c0_88 = arith.constant 0 : index
    %143 = vector.load %arg19[%c0_87, %c0_88] : memref<1x32xf32, #tpu.memory_space<vmem>>, vector<1x32xf32>
    %144 = vector.shape_cast %143 : vector<1x32xf32> to vector<1x1x32xf32>
    %145 = vector.broadcast %144 : vector<1x1x32xf32> to vector<8x8x32xf32>
    %146 = arith.mulf %142, %145 : vector<8x8x32xf32>
    %cst_89 = arith.constant dense<0.000000e+00> : vector<8x8xf32>
    %147 = vector.multi_reduction <add>, %146, %cst_89 [2] : vector<8x8x32xf32> to vector<8x8xf32>
    %c0_90 = arith.constant 0 : index
    %c0_91 = arith.constant 0 : index
    %148 = vector.load %arg20[%c0_90, %c0_91] : memref<1x1xf32, #tpu.memory_space<vmem>>, vector<1x1xf32>
    %149 = vector.broadcast %148 : vector<1x1xf32> to vector<8x8xf32>
    %150 = arith.addf %147, %149 : vector<8x8xf32>
    %c0_92 = arith.constant 0 : index
    %c0_93 = arith.constant 0 : index
    %151 = vector.load %arg23[%c0_92, %c0_93] : memref<8x8xf32, #tpu.memory_space<vmem>>, vector<8x8xf32>
    tpu.vector_store %arg23[%c0_92, %c0_93], %150 {strides = array<i32>} : memref<8x8xf32, #tpu.memory_space<vmem>>, vector<8x8xf32>,
    %152 = vector.shape_cast %133 : vector<8x8x8x16xf32> to vector<512x16xf32>
    %c0_94 = arith.constant 0 : index
    %c0_95 = arith.constant 0 : index
    %153 = vector.load %arg21[%c0_94, %c0_95] : memref<16x2xbf16, #tpu.memory_space<vmem>>, vector<16x2xbf16>
    %154 = arith.truncf %152 : vector<512x16xf32> to vector<512x16xbf16>
    %cst_96 = arith.constant dense<0.000000e+00> : vector<512x2xf32>
    %155 = tpu.matmul %154, %153, %cst_96 {dimension_numbers = #tpu.dot_dimension_numbers<[1], [0], [0], [1], [0, 0, 1, 1], [], []>} : vector<512x16xbf16>, vector<16x2xbf16>, vector<512x2xf32> -> vector<512x2xf32>
    %c0_97 = arith.constant 0 : index
    %c0_98 = arith.constant 0 : index
    %156 = vector.load %arg22[%c0_97, %c0_98] : memref<1x2xf32, #tpu.memory_space<vmem>>, vector<1x2xf32>
    %157 = vector.broadcast %156 : vector<1x2xf32> to vector<512x2xf32>
    %158 = arith.addf %155, %157 : vector<512x2xf32>
    %159 = vector.shape_cast %158 : vector<512x2xf32> to vector<8x8x8x2xf32>
    %c0_99 = arith.constant 0 : index
    %c0_100 = arith.constant 0 : index
    %c0_101 = arith.constant 0 : index
    %c0_102 = arith.constant 0 : index
    %160 = vector.load %arg24[%c0_99, %c0_100, %c0_101, %c0_102] : memref<8x8x8x2xf32, #tpu.memory_space<vmem>>, vector<8x8x8x2xf32>
    tpu.vector_store %arg24[%c0_99, %c0_100, %c0_101, %c0_102], %159 {strides = array<i32>} : memref<8x8x8x2xf32, #tpu.memory_space<vmem>>, vector<8x8x8x2xf32>,
    return
  }
  func.func @transform_0(%arg0: i32) -> (i32, i32, i32) {
    %c0_i32 = arith.constant 0 : i32
    %c0_i32_0 = arith.constant 0 : i32
    %c0_i32_1 = arith.constant 0 : i32
    return %arg0, %c0_i32, %c0_i32_0 : i32, i32, i32
  }
  func.func @transform_1(%arg0: i32) -> (i32, i32, i32, i32) {
    %c0_i32 = arith.constant 0 : i32
    %c0_i32_0 = arith.constant 0 : i32
    %c0_i32_1 = arith.constant 0 : i32
    %c0_i32_2 = arith.constant 0 : i32
    return %arg0, %c0_i32, %c0_i32_0, %c0_i32_1 : i32, i32, i32, i32
  }
  func.func @transform_2(%arg0: i32) -> (i32, i32, i32) {
    %c0_i32 = arith.constant 0 : i32
    %c0_i32_0 = arith.constant 0 : i32
    %c0_i32_1 = arith.constant 0 : i32
    return %arg0, %c0_i32, %c0_i32_0 : i32, i32, i32
  }
  func.func @transform_3(%arg0: i32) -> (i32, i32) {
    %c0_i32 = arith.constant 0 : i32
    %c0_i32_0 = arith.constant 0 : i32
    %c0_i32_1 = arith.constant 0 : i32
    return %c0_i32, %c0_i32_0 : i32, i32
  }
  func.func @transform_4(%arg0: i32) -> (i32, i32) {
    %c0_i32 = arith.constant 0 : i32
    %c0_i32_0 = arith.constant 0 : i32
    %c0_i32_1 = arith.constant 0 : i32
    return %c0_i32, %c0_i32_0 : i32, i32
  }
  func.func @transform_5(%arg0: i32) -> (i32, i32) {
    %c0_i32 = arith.constant 0 : i32
    %c0_i32_0 = arith.constant 0 : i32
    %c0_i32_1 = arith.constant 0 : i32
    return %c0_i32, %c0_i32_0 : i32, i32
  }
  func.func @transform_6(%arg0: i32) -> (i32, i32) {
    %c0_i32 = arith.constant 0 : i32
    %c0_i32_0 = arith.constant 0 : i32
    %c0_i32_1 = arith.constant 0 : i32
    return %c0_i32, %c0_i32_0 : i32, i32
  }
  func.func @transform_7(%arg0: i32) -> (i32, i32) {
    %c0_i32 = arith.constant 0 : i32
    %c0_i32_0 = arith.constant 0 : i32
    %c0_i32_1 = arith.constant 0 : i32
    return %c0_i32, %c0_i32_0 : i32, i32
  }
  func.func @transform_8(%arg0: i32) -> (i32, i32) {
    %c0_i32 = arith.constant 0 : i32
    %c0_i32_0 = arith.constant 0 : i32
    %c0_i32_1 = arith.constant 0 : i32
    return %c0_i32, %c0_i32_0 : i32, i32
  }
  func.func @transform_9(%arg0: i32) -> (i32, i32, i32) {
    %c0_i32 = arith.constant 0 : i32
    %c0_i32_0 = arith.constant 0 : i32
    %c0_i32_1 = arith.constant 0 : i32
    %c0_i32_2 = arith.constant 0 : i32
    return %c0_i32, %c0_i32_0, %c0_i32_1 : i32, i32, i32
  }
  func.func @transform_10(%arg0: i32) -> (i32, i32, i32) {
    %c0_i32 = arith.constant 0 : i32
    %c0_i32_0 = arith.constant 0 : i32
    %c0_i32_1 = arith.constant 0 : i32
    %c0_i32_2 = arith.constant 0 : i32
    return %c0_i32, %c0_i32_0, %c0_i32_1 : i32, i32, i32
  }
  func.func @transform_11(%arg0: i32) -> (i32, i32, i32) {
    %c0_i32 = arith.constant 0 : i32
    %c0_i32_0 = arith.constant 0 : i32
    %c0_i32_1 = arith.constant 0 : i32
    %c0_i32_2 = arith.constant 0 : i32
    return %c0_i32, %c0_i32_0, %c0_i32_1 : i32, i32, i32
  }
  func.func @transform_12(%arg0: i32) -> (i32, i32, i32) {
    %c0_i32 = arith.constant 0 : i32
    %c0_i32_0 = arith.constant 0 : i32
    %c0_i32_1 = arith.constant 0 : i32
    %c0_i32_2 = arith.constant 0 : i32
    return %c0_i32, %c0_i32_0, %c0_i32_1 : i32, i32, i32
  }
  func.func @transform_13(%arg0: i32) -> (i32, i32, i32) {
    %c0_i32 = arith.constant 0 : i32
    %c0_i32_0 = arith.constant 0 : i32
    %c0_i32_1 = arith.constant 0 : i32
    %c0_i32_2 = arith.constant 0 : i32
    return %c0_i32, %c0_i32_0, %c0_i32_1 : i32, i32, i32
  }
  func.func @transform_14(%arg0: i32) -> (i32, i32, i32) {
    %c0_i32 = arith.constant 0 : i32
    %c0_i32_0 = arith.constant 0 : i32
    %c0_i32_1 = arith.constant 0 : i32
    %c0_i32_2 = arith.constant 0 : i32
    return %c0_i32, %c0_i32_0, %c0_i32_1 : i32, i32, i32
  }
  func.func @transform_15(%arg0: i32) -> (i32, i32, i32) {
    %c0_i32 = arith.constant 0 : i32
    %c0_i32_0 = arith.constant 0 : i32
    %c0_i32_1 = arith.constant 0 : i32
    %c0_i32_2 = arith.constant 0 : i32
    return %c0_i32, %c0_i32_0, %c0_i32_1 : i32, i32, i32
  }
  func.func @transform_16(%arg0: i32) -> (i32, i32) {
    %c0_i32 = arith.constant 0 : i32
    %c0_i32_0 = arith.constant 0 : i32
    %c0_i32_1 = arith.constant 0 : i32
    return %c0_i32, %c0_i32_0 : i32, i32
  }
  func.func @transform_17(%arg0: i32) -> (i32, i32) {
    %c0_i32 = arith.constant 0 : i32
    %c0_i32_0 = arith.constant 0 : i32
    %c0_i32_1 = arith.constant 0 : i32
    return %c0_i32, %c0_i32_0 : i32, i32
  }
  func.func @transform_18(%arg0: i32) -> (i32, i32) {
    %c0_i32 = arith.constant 0 : i32
    %c0_i32_0 = arith.constant 0 : i32
    %c0_i32_1 = arith.constant 0 : i32
    return %c0_i32, %c0_i32_0 : i32, i32
  }
  func.func @transform_19(%arg0: i32) -> (i32, i32) {
    %c0_i32 = arith.constant 0 : i32
    %c0_i32_0 = arith.constant 0 : i32
    %c0_i32_1 = arith.constant 0 : i32
    return %c0_i32, %c0_i32_0 : i32, i32
  }
  func.func @transform_20(%arg0: i32) -> (i32, i32) {
    %c0_i32 = arith.constant 0 : i32
    %c0_i32_0 = arith.constant 0 : i32
    %c0_i32_1 = arith.constant 0 : i32
    return %c0_i32, %c0_i32_0 : i32, i32
  }
  func.func @transform_21(%arg0: i32) -> (i32, i32) {
    %c0_i32 = arith.constant 0 : i32
    %c0_i32_0 = arith.constant 0 : i32
    %c0_i32_1 = arith.constant 0 : i32
    return %c0_i32, %c0_i32_0 : i32, i32
  }
  func.func @transform_22(%arg0: i32) -> (i32, i32) {
    %c0_i32 = arith.constant 0 : i32
    %c0_i32_0 = arith.constant 0 : i32
    return %arg0, %c0_i32 : i32, i32
  }
  func.func @transform_23(%arg0: i32) -> (i32, i32, i32, i32) {
    %c0_i32 = arith.constant 0 : i32
    %c0_i32_0 = arith.constant 0 : i32
    %c0_i32_1 = arith.constant 0 : i32
    %c0_i32_2 = arith.constant 0 : i32
    return %arg0, %c0_i32, %c0_i32_0, %c0_i32_1 : i32, i32, i32, i32
  }
}

</mosaic_0001>

<bundles_post_ra>
// kernel: dense_gnn3_forward.1
= control target key start
LH: loop header
LB: loop body
LE: loop exit
PB: predicated region body
PF: predicated region fallthrough
CT: control target
= control target key end

     0   :  { %s9607_s24 = smov 0   ;;  %s13958_s0 = inlined_call_operand.vmem [shape: f32[16,8,4], index: 0, kind: input, shape index: {}]   ;;  %s13959_s1 = inlined_call_operand.vmem [shape: f32[16,8,8,2], index: 1, kind: input, shape index: {}]   ;;  %s13960_s2 = inlined_call_operand.vmem [shape: f32[16,8,1], index: 2, kind: input, shape index: {}]   ;;  %s13961_s3 = inlined_call_operand.vmem [shape: bf16[4,32], index: 3, kind: input, shape index: {}]   ;;  %s13962_s4 = inlined_call_operand.vmem [shape: f32[1,32], index: 4, kind: input, shape index: {}]   ;;  %s13963_s5 = inlined_call_operand.vmem [shape: bf16[32,32], index: 5, kind: input, shape index: {}]   ;;  %s13964_s6 = inlined_call_operand.vmem [shape: f32[1,32], index: 6, kind: input, shape index: {}]   ;;  %s13965_s7 = inlined_call_operand.vmem [shape: bf16[2,16], index: 7, kind: input, shape index: {}]   ;;  %s13966_s8 = inlined_call_operand.vmem [shape: f32[1,16], index: 8, kind: input, shape index: {}]   ;;  %s13967_s9 = inlined_call_operand.vmem [shape: bf16[2,16,16], index: 9, kind: input, shape index: {}]   ;;  %s13968_s10 = inlined_call_operand.vmem [shape: bf16[2,32,16], index: 10, kind: input, shape index: {}]   ;;  %s13969_s11 = inlined_call_operand.vmem [shape: bf16[2,32,16], index: 11, kind: input, shape index: {}]   ;;  %s13970_s12 = inlined_call_operand.vmem [shape: f32[2,1,16], index: 12, kind: input, shape index: {}]   ;;  %s13971_s13 = inlined_call_operand.vmem [shape: bf16[2,32,32], index: 13, kind: input, shape index: {}]   ;;  %s13972_s14 = inlined_call_operand.vmem [shape: bf16[2,16,32], index: 14, kind: input, shape index: {}]   ;;  %s13973_s15 = inlined_call_operand.vmem [shape: f32[2,1,32], index: 15, kind: input, shape index: {}]   ;;  %s13974_s16 = inlined_call_operand.vmem [shape: bf16[32,32], index: 16, kind: input, shape index: {}]   ;;  %s13975_s17 = inlined_call_operand.vmem [shape: f32[1,32], index: 17, kind: input, shape index: {}]   ;;  %s13976_s18 = inlined_call_operand.vmem [shape: f32[1,32], index: 18, kind: input, shape index: {}]   ;;  %s13977_s19 = inlined_call_operand.<no memory space> [shape: f32[1,1], index: 19, kind: input, shape index: {}]   ;;  %s13978_s20 = inlined_call_operand.vmem [shape: bf16[16,2], index: 20, kind: input, shape index: {}]   ;;  %s13979_s21 = inlined_call_operand.vmem [shape: f32[1,2], index: 21, kind: input, shape index: {}]   ;;  %s13980_s22 = inlined_call_operand.vmem [shape: f32[16,8], index: 22, kind: output, shape index: {0}]   ;;  %s13981_s23 = inlined_call_operand.vmem [shape: f32[16,8,8,2], index: 23, kind: output, shape index: {1}]  }
   0x1   :  { %14349 = sst [smem:[#allocation199_spill]] %s13958_s0  ;;  %v29_v0 = vstv %s13977_s19 }
   0x2   :  { %14350 = sst [smem:[#allocation200_spill]] %s13959_s1  ;;  %30 = vst [vmem:[#allocation2] sm:$0x1] %v29_v0 }
   0x3   :  { %14351 = sst [smem:[#allocation201_spill]] %s13960_s2 }
   0x4   :  { %14352 = sst [smem:[#allocation202_spill]] %s13961_s3 }
   0x5   :  { %14353 = sst [smem:[#allocation203_spill]] %s13962_s4 }
   0x6   :  { %14354 = sst [smem:[#allocation204_spill]] %s13963_s5 }
   0x7   :  { %14355 = sst [smem:[#allocation205_spill]] %s13964_s6 }
   0x8   :  { %14356 = sst [smem:[#allocation206_spill]] %s13965_s7 }
   0x9 LB: > { %s9613_s25 = sadd.s32 4294967295, %s9480_s24   ;;  %p8589_p0 = scmp.ge.s32.totalorder %s9480_s24, 1  ;;  %s9480_s24 = sphi %s9607_s24, %s36_s24  }
   0xa   : > { %p666_p1 = scmp.lt.s32.totalorder %s9480_s24, 3 }
   0xc   : > { %p667_p2 = pnand %p8589_p0, %p666_p1 }
   0xe   : > { %670 = sbr.rel (%p667_p2) target bundleno = 2359 (0x937), region = 108 }
  0x15   : > { %s14357_s19 = sld [smem:[#allocation202_spill]]  ;;  %vm1602_vm0 = vcmask 1041408   ;;  %s8590_s26 = sshll.u32 %s9613_s25, 3  ;;  %vm1589_vm1 = vcmask 31744   ;;  %vm1985_vm2 = vcmask 1040384   ;;  %vm1888_vm3 = vcmask 15360  }
  0x16   : > { %p747_p3 = scmp.lt.s32.totalorder %s8590_s26, 15  ;;  %s14358_s7 = sld [smem:[#allocation199_spill]]  ;;  %v9482_v40 = vmov 0   ;;  %v9483_v46 = vmov 1966171168   ;;  %v13983_v48 = vlaneseq  ;;  %vm1706_vm4 = vcmask 261120  }
  0x17   : > { %s14359_s4 = sld [smem:[#allocation200_spill]]  ;;  %9443 = vset.pattern.permute.xlu1 %v9482_v40  ;;  %9442 = vset.pattern.permute.xlu0 %v9482_v40  ;;  %v795_v47 = vunpack.c.l.s4 %v9483_v46  ;;  %s14363_s5 = sld [smem:[#allocation201_spill]]  ;;  %vm2503_vm5 = vcmask 130048   ;;  %vm4831_vm6 = vcmask 1041409   ;;  %vm4833_vm7 = vcmask 1042434  }
  0x18   : > { %s15233_s26 = smov (!%p747_p3, %s8590_s26), 15  ;;  %v9673_v51 = vshrl.u32 %v13983_v48, 7  ;;  %s14366_s0 = sld [smem:[#allocation203_spill]]  ;;  %vm4835_vm8 = vcmask 1043459   ;;  %vm4837_vm9 = vcmask 1044484   ;;  %vm4839_vm10 = vcmask 1045509  }
  0x19   : > { %s8591_s2 = sshll.u32 %s15233_s26, 3  ;;  %s8825_s29 = sshll.u32 %s15233_s26, 6  ;;  %v796_v50 = vunpack.c.0.s8 %v795_v47  ;;  %vm4841_vm11 = vcmask 1046534   ;;  %vm4843_vm12 = vcmask 1047559   ;;  %vm7974_vm13 = vcmask 64512  }
  0x1a   : > { %14362 = vst [vmem:[#allocation3_spill] sm:$0xff] %v9673_v51  ;;  %v9702_v0 = vsub.s32 0, %v9673_v51  ;;  %p765_p4 = scmp.lt.s32.totalorder %s9613_s25, 1 }
  0x1b   : > { %v1577_v1 = vld [vmem:[%s14357_s19] sm:$0x3]  ;;  %s14360_s19 = sld [smem:[#allocation206_spill]]  ;;  %v9688_v57 = vsub.s32 %v796_v50, %v9673_v51 }
  0x1c   : > { %9430 = vmatprep.subr.msk.bf16.mxu0 %vm1602_vm0, %v1577_v1  ;;  %v1604_v2 = vsel %vm1602_vm0, %v1577_v1, 0  ;;  %s750_s28 = scalar_lea.vmem %s14358_s7, %s8591_s2  ;;  %s14361_s7 = sld [smem:[#allocation204_spill]]  ;;  %14365 = vst [vmem:[#allocation5_spill] sm:$0xff] %v9702_v0 }
  0x1d   : > { %9023 = vmatpush3.bf16.msra.mxu0 %v1604_v2  ;;  %v1569_v3 = vld [vmem:[%s750_s28] sm:$0xff]  ;;  %v1570_v4 = vld [vmem:[%s750_s28 + $0x8] sm:$0xff]  ;;  %v1571_v5 = vld [vmem:[%s750_s28 + $0x10] sm:$0xff]  ;;  %s9635_s30 = scalar_lea.vmem %s14359_s4, %s8825_s29  ;;  %s9685_s1 = scalar_lea.vmem %s14363_s5, %s8591_s2  ;;  %14364 = vst [vmem:[#allocation4_spill] sm:$0xff] %v9688_v57 }
  0x1e   : > { %v1578_v6 = vpack.c.bf16 %v1570_v4, %v1569_v3  ;;  %v1572_v7 = vld [vmem:[%s750_s28 + $0x18] sm:$0xff]  ;;  %v1573_v8 = vld [vmem:[%s750_s28 + $0x20] sm:$0xff]  ;;  %v1574_v9 = vld [vmem:[%s750_s28 + $0x28] sm:$0xff]  ;;  %s13744_s5 = scalar_lea.vmem %s13981_s23, %s8825_s29  ;;  %s15235_s25 = smov (!%p765_p4, %s9613_s25), 1 }
  0x1f   : > { %v1579_v10 = vpack.c.bf16 %v1572_v7, %v1571_v5  ;;  %v1580_v11 = vpack.c.bf16 %v1574_v9, %v1573_v8  ;;  %v1575_v12 = vld [vmem:[%s750_s28 + $0x30] sm:$0xff]  ;;  %v1576_v13 = vld [vmem:[%s750_s28 + $0x38] sm:$0xff]  ;;  %v1784_v18 = vld [vmem:[%s9635_s30] sm:$0xff]  ;;  %s14383_s28 = sld [smem:[#allocation205_spill]]  ;;  %s8597_s26 = sshll.u32 %s15235_s25, 3 }
  0x20   : > { %9024 = vmatprep.mubr.msk.bf16.mxu0 %vm1589_vm1, %v1578_v6  ;;  %v1581_v14 = vpack.c.bf16 %v1576_v13, %v1575_v12  ;;  %v1785_v19 = vld [vmem:[%s9635_s30 + $0x8] sm:$0xff]  ;;  %v1786_v21 = vld [vmem:[%s9635_s30 + $0x10] sm:$0xff]  ;;  %v1787_v22 = vld [vmem:[%s9635_s30 + $0x18] sm:$0xff] }
  0x21   : > { %9025 = vmatmul.mubr.msk.bf16.vlgmr.msra.gmra.mrb[0].mxu0 %vm1589_vm1, %v1579_v10  ;;  %v1848_v15 = vld [vmem:[%s14360_s19] sm:$0x1]  ;;  %v1849_v20 = vpack.c.bf16 %v1785_v19, %v1784_v18  ;;  %v1850_v23 = vpack.c.bf16 %v1787_v22, %v1786_v21  ;;  %v1789_v26 = vld [vmem:[%s9635_s30 + $0x28] sm:$0xff]  ;;  %v1790_v28 = vld [vmem:[%s9635_s30 + $0x30] sm:$0xff]  ;;  %s768_s19 = scalar_lea.vmem %s13980_s22, %s8597_s26 }
  0x22   : > { %9028 = vmatprep.mubr.msk.bf16.mxu0 %vm1589_vm1, %v1580_v11  ;;  %9431 = vmatprep.subr.msk.bf16.mxu0 %vm1985_vm2, %v1848_v15  ;;  %v1987_v16 = vsel %vm1985_vm2, %v1848_v15, 0  ;;  %v9444_v17 = vld [vmem:[%s14361_s7] sm:$0xff]   ;;  %v9445_v24 = vld [vmem:[%s14361_s7 + $0x8] sm:$0xff]   ;;  %v1791_v29 = vld [vmem:[%s9635_s30 + $0x38] sm:$0xff] }
  0x23   : > { %9045 = vmatpush3.bf16.msra.mxu0 %v1987_v16  ;;  %9032 = vmatprep.subr.bf16.mxu1 %v9444_v17  ;;  %v1788_v25 = vld [vmem:[%s9635_s30 + $0x20] sm:$0xff]  ;;  %v1852_v30 = vpack.c.bf16 %v1791_v29, %v1790_v28  ;;  %v1793_v32 = vld [vmem:[%s9635_s30 + $0x48] sm:$0xff]  ;;  %v1794_v34 = vld [vmem:[%s9635_s30 + $0x50] sm:$0xff] }
  0x24   : > { %9033 = vmatpush3.bf16.msra.mxu1 %v9444_v17  ;;  %v1851_v27 = vpack.c.bf16 %v1789_v26, %v1788_v25  ;;  %v1792_v31 = vld [vmem:[%s9635_s30 + $0x40] sm:$0xff]  ;;  %v1795_v35 = vld [vmem:[%s9635_s30 + $0x58] sm:$0xff]  ;;  %v1797_v38 = vld [vmem:[%s9635_s30 + $0x68] sm:$0xff] }
  0x25   : > { %9034 = vmatprep.subr.bf16.mxu1 %v9445_v24  ;;  %v1853_v33 = vpack.c.bf16 %v1793_v32, %v1792_v31  ;;  %v1854_v36 = vpack.c.bf16 %v1795_v35, %v1794_v34  ;;  %v1796_v37 = vld [vmem:[%s9635_s30 + $0x60] sm:$0xff]  ;;  %v1798_v41 = vld [vmem:[%s9635_s30 + $0x70] sm:$0xff]  ;;  %v1799_v42 = vld [vmem:[%s9635_s30 + $0x78] sm:$0xff] }
  0x26   : > { %v1855_v39 = vpack.c.bf16 %v1797_v38, %v1796_v37  ;;  %v1800_v43 = vld [vmem:[%s9635_s30 + $0x80] sm:$0xff]  ;;  %v1801_v44 = vld [vmem:[%s9635_s30 + $0x88] sm:$0xff]  ;;  %v1856_v45 = vpack.c.bf16 %v1799_v42, %v1798_v41  ;;  %v1802_v52 = vld [vmem:[%s9635_s30 + $0x90] sm:$0xff] }
  0x27   : > { %v1857_v49 = vpack.c.bf16 %v1801_v44, %v1800_v43  ;;  %v1803_v53 = vld [vmem:[%s9635_s30 + $0x98] sm:$0xff]  ;;  %v1804_v54 = vld [vmem:[%s9635_s30 + $0xa0] sm:$0xff]  ;;  %v1805_v55 = vld [vmem:[%s9635_s30 + $0xa8] sm:$0xff] }
  0x28   : > { %9035 = vmatpush3.bf16.msra.mxu1 %v9445_v24  ;;  %v1858_v56 = vpack.c.bf16 %v1803_v53, %v1802_v52  ;;  %v1859_v58 = vpack.c.bf16 %v1805_v55, %v1804_v54  ;;  %v1806_v59 = vld [vmem:[%s9635_s30 + $0xb0] sm:$0xff]  ;;  %v1807_v60 = vld [vmem:[%s9635_s30 + $0xb8] sm:$0xff]  ;;  %v9693_v61 = vld [vmem:[%s9685_s1 + $0x8] sm:$0xff] }
  0x29   : > { %9029 = vmatmul.mubr.msk.bf16.gmra.mrb[4].mxu0 %vm1589_vm1, %v1581_v14  ;;  %v9696_v62 = vld [vmem:[%s9685_s1] sm:$0xff]  ;;  %v849_v63 = vrot.slane %v9693_v61, %v9688_v57  ;;  %v9707_v2 = vld [vmem:[%s9685_s1 + $0x10] sm:$0xff]  ;;  %v9710_v3 = vld [vmem:[%s9685_s1 + $0x18] sm:$0xff]  ;;  %v1860_v13 = vpack.c.bf16 %v1807_v60, %v1806_v59 }
  0x2a   : > { %9046 = vmatprep.mubr.msk.bf16.mxu0 %vm1888_vm3, %v1849_v20  ;;  %v800_v1 = vrot.slane %v9696_v62, %v9688_v57  ;;  %v9446_v4 = vld [vmem:[%s13967_s9] sm:$0xff]   ;;  %v898_v5 = vrot.slane %v9707_v2, %v9688_v57  ;;  %v947_v6 = vrot.slane %v9710_v3, %v9688_v57  ;;  %v1809_v9 = vld [vmem:[%s9635_s30 + $0xc8] sm:$0xff]  ;;  %v1810_v31 = vld [vmem:[%s9635_s30 + $0xd0] sm:$0xff] }
  0x2b   : > { %v9723_v7 = vld [vmem:[%s13968_s10] sm:$0xff]   ;;  %v865_v10 = vrot.slane %v849_v63, %v9688_v57  ;;  %v857_v11 = vcombine.high %v849_v63, %v849_v63  ;;  %9134 = vmatprep.subr.bf16.mxu0 %v9446_v4  ;;  %v1811_v32 = vld [vmem:[%s9635_s30 + $0xd8] sm:$0xff]  ;;  %v1813_v37 = vld [vmem:[%s9635_s30 + $0xe8] sm:$0xff] }
  0x2c   : > { %v1808_v8 = vld [vmem:[%s9635_s30 + $0xc0] sm:$0xff]  ;;  %v816_v12 = vrot.slane %v800_v1, %v9688_v57  ;;  %v9730_v14 = vrot.slane %v898_v5, %v9688_v57  ;;  %v9733_v15 = vrot.slane %v947_v6, %v9688_v57  ;;  %v906_v19 = vcombine.high %v898_v5, %v898_v5  ;;  %9110 = vmatprep.subr.bf16.mxu1 %v9723_v7  ;;  %v1814_v50 = vld [vmem:[%s9635_s30 + $0xf0] sm:$0xff]  ;;  %v1815_v52 = vld [vmem:[%s9635_s30 + $0xf8] sm:$0xff] }
  0x2d   : > { %v1220_v16 = vrot.slane %v865_v10, %v9702_v0  ;;  %v887_v17 = vcombine.high %v865_v10, %v865_v10  ;;  %v1861_v20 = vpack.c.bf16 %v1809_v9, %v1808_v8  ;;  %v808_v21 = vcombine.high %v800_v1, %v800_v1 }
  0x2e   : > { %v1188_v18 = vrot.slane %v816_v12, %v9702_v0  ;;  %v879_v22 = vrot.slane %v857_v11, %v9688_v57  ;;  %v1284_v29 = vrot.slane %v9733_v15, %v9702_v0  ;;  %v1862_v38 = vpack.c.bf16 %v1811_v32, %v1810_v31  ;;  %v1818_v11 = vld [vmem:[%s9635_s30 + $0x110] sm:$0xff]  ;;  %v1829_v31 = vld [vmem:[%s9635_s30 + $0x168] sm:$0xff] }
  0x2f   : > { %v1513_v24 = vmul.f32 %v1220_v16, %v9693_v61  ;;  %v1228_v28 = vrot.slane %v887_v17, %v9702_v0  ;;  %v830_v35 = vrot.slane %v808_v21, %v9688_v57  ;;  %v838_v43 = vcombine.high %v816_v12, %v816_v12  ;;  %v1819_v12 = vld [vmem:[%s9635_s30 + $0x118] sm:$0xff]  ;;  %v1821_v16 = vld [vmem:[%s9635_s30 + $0x128] sm:$0xff]  ;;  %v1822_v21 = vld [vmem:[%s9635_s30 + $0x130] sm:$0xff] }
  0x30   : > { %v1505_v25 = vmul.f32 %v1188_v18, %v9696_v62  ;;  %v1224_v26 = vrot.slane %v879_v22, %v9702_v0  ;;  %v1529_v44 = vmul.f32 %v1284_v29, %v9710_v3  ;;  %v1864_v59 = vpack.c.bf16 %v1815_v52, %v1814_v50  ;;  %v1828_v29 = vld [vmem:[%s9635_s30 + $0x160] sm:$0xff] }
  0x31   : > { %9047 = vmatmul.mubr.msk.bf16.vlgmr.msra.gmra.mrb[8].mxu0 %vm1888_vm3, %v1850_v23  ;;  %v1252_v23 = vrot.slane %v9730_v14, %v9702_v0  ;;  %3843 = vperm.xlu1 %9443, %v1513_v24   ;;  %v1196_v54 = vrot.slane %v838_v43, %v9702_v0  ;;  %v840_v55 = vcombine.high %v830_v35, %v830_v35  ;;  %v1825_v24 = vld [vmem:[%s9635_s30 + $0x148] sm:$0xff] }
  0x32   : > { %9050 = vmatprep.mubr.msk.bf16.mxu0 %vm1888_vm3, %v1851_v27  ;;  %9135 = vmatpush3.bf16.msra.mxu0 %v9446_v4  ;;  %v955_v27 = vcombine.high %v947_v6, %v947_v6  ;;  %v985_v1 = vcombine.high %v9733_v15, %v9733_v15  ;;  %v936_v8 = vcombine.high %v9730_v14, %v9730_v14  ;;  %v1820_v14 = vld [vmem:[%s9635_s30 + $0x120] sm:$0xff] }
  0x33   : > { %3803 = vperm.xlu0 %9442, %v1505_v25   ;;  %v1521_v34 = vmul.f32 %v1252_v23, %v9707_v2  ;;  %v1507_v5 = vmul.f32 %v1196_v54, %v9696_v62  ;;  %v1200_v6 = vrot.slane %v840_v55, %v9702_v0  ;;  %v1866_v17 = vpack.c.bf16 %v1819_v12, %v1818_v11  ;;  %v1824_v23 = vld [vmem:[%s9635_s30 + $0x140] sm:$0xff]  ;;  %v1837_v54 = vld [vmem:[%s9635_s30 + $0x1a8] sm:$0xff]  ;;  %v1842_v12 = vld [vmem:[%s9635_s30 + $0x1d0] sm:$0xff] }
  0x34   : > { %v9763_v41 = vrot.slane %v955_v27, %v9688_v57  ;;  %v1292_v10 = vrot.slane %v985_v1, %v9702_v0  ;;  %v1260_v15 = vrot.slane %v936_v8, %v9702_v0  ;;  %v1826_v27 = vld [vmem:[%s9635_s30 + $0x150] sm:$0xff]  ;;  %v1840_v8 = vld [vmem:[%s9635_s30 + $0x1c0] sm:$0xff] }
  0x36   : > { %v1288_v47 = vrot.slane %v9763_v41, %v9702_v0  ;;  %v1531_v18 = vmul.f32 %v1292_v10, %v9710_v3  ;;  %v987_v50 = vcombine.high %v9763_v41, %v9763_v41 }
  0x37   : > { %3883 = vperm.xlu0 %9442, %v1521_v34   ;;  %v1830_v34 = vld [vmem:[%s9635_s30 + $0x170] sm:$0xff] }
  0x38   : > { %v1530_v60 = vmul.f32 %v1288_v47, %v9710_v3 }
  0x39   : > { %9051 = vmatmul.mubr.msk.bf16.gmra.mrb[12].mxu0 %vm1888_vm3, %v1852_v30  ;;  %v9749_v30 = vrot.slane %v906_v19, %v9688_v57  ;;  %v1867_v19 = vpack.c.bf16 %v1821_v16, %v1820_v14  ;;  %v1845_v14 = vld [vmem:[%s9635_s30 + $0x1e8] sm:$0xff] }
  0x3a   : > { %9054 = vmatprep.mubr.msk.bf16.mxu0 %vm1888_vm3, %v1853_v33  ;;  %v1514_v33 = vmul.f32 %v1224_v26, %v9693_v61  ;;  %v1869_v26 = vpack.c.bf16 %v1825_v24, %v1824_v23 }
  0x3b   : > { %v1256_v40 = vrot.slane %v9749_v30, %v9702_v0  ;;  %3923 = vperm.xlu0 %9442, %v1529_v44   ;;  %v938_v52 = vcombine.high %v9749_v30, %v9749_v30 }
  0x3c   : > { %3848 = vperm.xlu1 %9443, %v1514_v33   ;;  %v1871_v33 = vpack.c.bf16 %v1829_v31, %v1828_v29 }
  0x3d   : > { %v1522_v46 = vmul.f32 %v1256_v40, %v9707_v2  ;;  %v842_v40 = vcombine.high %v9693_v61, %v9693_v61 }
  0x3f   : > { %v9821_v43 = vrot.slane %v842_v40, %v9688_v57 }
  0x41   : > { %9055 = vmatmul.mubr.msk.bf16.gmra.mrb[16].mxu0 %vm1888_vm3, %v1854_v36  ;;  %v1812_v36 = vld [vmem:[%s9635_s30 + $0xe0] sm:$0xff]  ;;  %v9832_v47 = vrot.slane %v9821_v43, %v9688_v57 }
  0x42   : > { %9058 = vmatprep.mubr.msk.bf16.mxu0 %vm1888_vm3, %v1855_v39  ;;  %v1515_v39 = vmul.f32 %v1228_v28, %v9693_v61  ;;  %v1863_v42 = vpack.c.bf16 %v1813_v37, %v1812_v36  ;;  %v1827_v28 = vld [vmem:[%s9635_s30 + $0x158] sm:$0xff]  ;;  %v1832_v36 = vld [vmem:[%s9635_s30 + $0x180] sm:$0xff]  ;;  %v1833_v37 = vld [vmem:[%s9635_s30 + $0x188] sm:$0xff] }
  0x43   : > { %v1870_v32 = vpack.c.bf16 %v1827_v28, %v1826_v27  ;;  %v1236_v55 = vrot.slane %v9832_v47, %v9702_v0 }
  0x44   : > { %3853 = vperm.xlu1 %9443, %v1515_v39   ;;  %v1873_v39 = vpack.c.bf16 %v1833_v37, %v1832_v36 }
  0x45   : > { %v1517_v30 = vmul.f32 %v1236_v55, %v9693_v61 }
  0x48   : > { %3888 = vperm.xlu1 %9443, %v1522_v46   ;;  %v1835_v46 = vld [vmem:[%s9635_s30 + $0x198] sm:$0xff] }
  0x49   : > { %9059 = vmatmul.mubr.msk.bf16.gmra.mrb[20].mxu0 %vm1888_vm3, %v1856_v45  ;;  %v1192_v45 = vrot.slane %v830_v35, %v9702_v0  ;;  %v1831_v35 = vld [vmem:[%s9635_s30 + $0x178] sm:$0xff] }
  0x4a   : > { %9062 = vmatprep.mubr.msk.bf16.mxu0 %vm1888_vm3, %v1857_v49  ;;  %v889_v49 = vcombine.high %v879_v22, %v879_v22  ;;  %v1823_v22 = vld [vmem:[%s9635_s30 + $0x138] sm:$0xff] }
  0x4b   : > { %v1506_v53 = vmul.f32 %v1192_v45, %v9696_v62  ;;  %v1868_v25 = vpack.c.bf16 %v1823_v22, %v1822_v21  ;;  %v1834_v45 = vld [vmem:[%s9635_s30 + $0x190] sm:$0xff]  ;;  %v8601_v21 = vld [vmem:[%s14366_s0] ss:$0 sm:$0xff] }
  0x4c   : > { %v1232_v63 = vrot.slane %v889_v49, %v9702_v0  ;;  %3928 = vperm.xlu1 %9443, %v1530_v60   ;;  %v1874_v41 = vpack.c.bf16 %v1835_v46, %v1834_v45 }
  0x4d   : > { %3808 = vperm.xlu0 %9442, %v1506_v53   ;;  %v1836_v53 = vld [vmem:[%s9635_s30 + $0x1a0] sm:$0xff] }
  0x4e   : > { %v1516_v9 = vmul.f32 %v1232_v63, %v9693_v61  ;;  %v1875_v60 = vpack.c.bf16 %v1837_v54, %v1836_v53 }
  0x50   : > { %3858 = vperm.xlu1 %9443, %v1516_v9   ;;  %v1841_v9 = vld [vmem:[%s9635_s30 + $0x1c8] sm:$0xff] }
  0x51   : > { %9063 = vmatmul.mubr.msk.bf16.gmra.mrb[24].mxu0 %vm1888_vm3, %v1858_v56  ;;  %v1816_v56 = vld [vmem:[%s9635_s30 + $0x100] sm:$0xff]  ;;  %3813 = vperm.xlu0 %9442, %v1507_v5   ;;  %v1838_v5 = vld [vmem:[%s9635_s30 + $0x1b0] sm:$0xff]  ;;  %v1877_v11 = vpack.c.bf16 %v1841_v9, %v1840_v8 }
  0x52   : > { %9066 = vmatprep.mubr.msk.bf16.mxu0 %vm1888_vm3, %v1859_v58  ;;  %v1817_v58 = vld [vmem:[%s9635_s30 + $0x108] sm:$0xff] }
  0x53   : > { %v1865_v4 = vpack.c.bf16 %v1817_v58, %v1816_v56  ;;  %v1296_v58 = vrot.slane %v987_v50, %v9702_v0 }
  0x54   : > { %3933 = vperm.xlu1 %9443, %v1531_v18   ;;  %v1846_v18 = vld [vmem:[%s9635_s30 + $0x1f0] sm:$0xff] }
  0x55   : > { %v1532_v1 = vmul.f32 %v1296_v58, %v9710_v3 }
  0x58   : > { %3863 = vperm.xlu1 %9443, %v1517_v30  }
  0x59   : > { %9067 = vmatmul.mubr.msk.bf16.gmra.mrb[28].mxu0 %vm1888_vm3, %v1860_v13  ;;  %v1508_v13 = vmul.f32 %v1200_v6, %v9696_v62  ;;  %v1839_v6 = vld [vmem:[%s9635_s30 + $0x1b8] sm:$0xff] }
  0x5a   : > { %9070 = vmatprep.mubr.msk.bf16.mxu0 %vm1888_vm3, %v1861_v20  ;;  %v1523_v20 = vmul.f32 %v1260_v15, %v9707_v2  ;;  %v1876_v10 = vpack.c.bf16 %v1839_v6, %v1838_v5  ;;  %v1844_v15 = vld [vmem:[%s9635_s30 + $0x1e0] sm:$0xff] }
  0x5b   : > { %3818 = vperm.xlu0 %9442, %v1508_v13   ;;  %v1843_v13 = vld [vmem:[%s9635_s30 + $0x1d8] sm:$0xff] }
  0x5c   : > { %3938 = vperm.xlu1 %9443, %v1532_v1   ;;  %v1878_v16 = vpack.c.bf16 %v1843_v13, %v1842_v12  ;;  %v858_v1 = vcombine.high %v9821_v43, %v9821_v43 }
  0x5e   : > { %v9901_v9 = vrot.slane %v858_v1, %v9688_v57 }
  0x5f   : > { %3893 = vperm.xlu0 %9442, %v1523_v20  }
  0x60   : > { %v1240_v13 = vrot.slane %v9901_v9, %v9702_v0 }
  0x61   : > { %9071 = vmatmul.mubr.msk.bf16.gmra.mrb[32].mxu0 %vm1888_vm3, %v1862_v38  ;;  %v1872_v38 = vpack.c.bf16 %v1831_v35, %v1830_v34 }
  0x62   : > { %9074 = vmatprep.mubr.msk.bf16.mxu0 %vm1888_vm3, %v1863_v42  ;;  %v793_v42 = vcombine.high %v9696_v62, %v9696_v62 }
  0x64   : > { %v9824_v44 = vrot.slane %v793_v42, %v9688_v57 }
  0x66   : > { %v9836_v49 = vrot.slane %v9824_v44, %v9688_v57 }
  0x68   : > { %v1204_v56 = vrot.slane %v9836_v49, %v9702_v0 }
  0x69   : > { %9075 = vmatmul.mubr.msk.bf16.gmra.mrb[36].mxu0 %vm1888_vm3, %v1864_v59  ;;  %v1264_v59 = vrot.slane %v938_v52, %v9702_v0 }
  0x6a   : > { %9078 = vmatprep.mubr.msk.bf16.mxu0 %vm1888_vm3, %v1865_v4  ;;  %v1509_v63 = vmul.f32 %v1204_v56, %v9696_v62 }
  0x6b   : > { %v1524_v4 = vmul.f32 %v1264_v59, %v9707_v2  ;;  %v9882_v59 = vld [vmem:[%s13966_s8] ss:$0 sm:$0xff] }
  0x6c   : > { %3823 = vperm.xlu0 %9442, %v1509_v63  }
  0x70   : > { %3898 = vperm.xlu0 %9442, %v1524_v4   ;;  %v809_v4 = vcombine.high %v9824_v44, %v9824_v44  ;;  %v891_v44 = vcombine.high %v9707_v2, %v9707_v2 }
  0x71   : > { %9079 = vmatmul.mubr.msk.bf16.gmra.mrb[40].mxu0 %vm1888_vm3, %v1866_v17  ;;  %v1879_v17 = vpack.c.bf16 %v1845_v14, %v1844_v15 }
  0x72   : > { %9082 = vmatprep.mubr.msk.bf16.mxu0 %vm1888_vm3, %v1867_v19  ;;  %v1847_v19 = vld [vmem:[%s9635_s30 + $0x1f8] sm:$0xff] }
  0x73   : > { %v1880_v20 = vpack.c.bf16 %v1847_v19, %v1846_v18  ;;  %v1518_v19 = vmul.f32 %v1240_v13, %v9693_v61 }
  0x75   : > { %3868 = vperm.xlu1 %9443, %v1518_v19  }
  0x79   : > { %9083 = vmatmul.mubr.msk.bf16.gmra.mrb[44].mxu0 %vm1888_vm3, %v1868_v25 }
  0x7a   : > { %9086 = vmatprep.mubr.msk.bf16.mxu0 %vm1888_vm3, %v1869_v26 }
  0x81   : > { %9087 = vmatmul.mubr.msk.bf16.gmra.mrb[48].mxu0 %vm1888_vm3, %v1870_v32 }
  0x82   : > { %9090 = vmatprep.mubr.msk.bf16.mxu0 %vm1888_vm3, %v1871_v33 }
  0x89   : > { %9091 = vmatmul.mubr.msk.bf16.gmra.mrb[52].mxu0 %vm1888_vm3, %v1872_v38 }
  0x8a   : > { %9094 = vmatprep.mubr.msk.bf16.mxu0 %vm1888_vm3, %v1873_v39 }
  0x91   : > { %9095 = vmatmul.mubr.msk.bf16.gmra.mrb[56].mxu0 %vm1888_vm3, %v1874_v41 }
  0x92   : > { %9098 = vmatprep.mubr.msk.bf16.mxu0 %vm1888_vm3, %v1875_v60 }
  0x99   : > { %9099 = vmatmul.mubr.msk.bf16.gmra.mrb[60].mxu0 %vm1888_vm3, %v1876_v10  ;;  %v9904_v10 = vrot.slane %v809_v4, %v9688_v57 }
  0x9a   : > { %9102 = vmatprep.mubr.msk.bf16.mxu0 %vm1888_vm3, %v1877_v11  ;;  %v940_v11 = vcombine.high %v9710_v3, %v9710_v3 }
  0x9b   : > { %v1208_v15 = vrot.slane %v9904_v10, %v9702_v0 }
  0x9c   : > { %v954_v14 = vrot.slane %v940_v11, %v9688_v57 }
  0xa1   : > { %9103 = vmatmul.mubr.msk.bf16.gmra.mrb[64].mxu0 %vm1888_vm3, %v1878_v16  ;;  %v9450_v16 = vld [vmem:[%s13968_s10 + $0x8] sm:$0xff]  }
  0xa2   : > { %9106 = vmatprep.mubr.msk.bf16.mxu0 %vm1888_vm3, %v1879_v17  ;;  %v905_v17 = vrot.slane %v891_v44, %v9688_v57  ;;  %v841_v44 = vcombine.high %v9904_v10, %v9904_v10 }
  0xa9   : > { %9107 = vmatmul.mubr.msk.bf16.gmra.mrb[68].mxu0 %vm1888_vm3, %v1880_v20  ;;  %v1510_v20 = vmul.f32 %v1208_v15, %v9696_v62 }
  0xab   : > { %3828 = vperm.xlu0 %9442, %v1510_v20   ;;  %v10005_v20 = vld [vmem:[%s9685_s1 + $0x20] sm:$0xff] }
  0xf4   : > { %v9026_v22 = vpop.f32.mrb[0].mxu0 }
  0xf5   : > { %v1649_v23 = vadd.f32 %v9026_v22, %v8601_v21  ;;  %v1640_v24 = vpop.f32.mrb[1].mxu0 }
  0xf6   : > { %v1641_v25 = vadd.f32 %v8601_v21, %v1640_v24  ;;  %v9027_v26 = vpop.f32.mrb[2].mxu0 }
  0xf7   : > { %v1652_v27 = vadd.f32 %v9027_v26, %v8601_v21  ;;  %v1643_v28 = vpop.f32.mrb[3].mxu0  ;;  %v1673_v31 = vmax.f32 %v1649_v23, 0.0  ;;  %v921_v23 = vrot.slane %v905_v17, %v9688_v57 }
  0xf8   : > { %v1644_v29 = vadd.f32 %v8601_v21, %v1643_v28  ;;  %v1671_v33 = vmax.f32 %v1641_v25, 0.0 }
  0xf9   : > { %v1674_v32 = vmax.f32 %v1652_v27, 0.0  ;;  %v1268_v28 = vrot.slane %v921_v23, %v9702_v0 }
  0xfa   : > { %v1672_v34 = vmax.f32 %v1644_v29, 0.0 }
  0xfb   : > { %v1684_v35 = vpack.c.bf16 %v1674_v32, %v1673_v31 }
  0xfc   : > { %v9030_v36 = vpop.f32.mrb[4].mxu0  ;;  %v1683_v37 = vpack.c.bf16 %v1672_v34, %v1671_v33  ;;  %v1525_v34 = vmul.f32 %v1268_v28, %v9707_v2 }
  0xfd   : > { %v1665_v38 = vadd.f32 %v9030_v36, %v8601_v21  ;;  %v1656_v39 = vpop.f32.mrb[5].mxu0  ;;  %v839_v36 = vcombine.high %v9836_v49, %v9836_v49 }
  0xfe   : > { %v1657_v40 = vadd.f32 %v8601_v21, %v1656_v39  ;;  %v9031_v42 = vpop.f32.mrb[6].mxu0  ;;  %9036 = vmatprep.mubr.msk.bf16.mxu1 %vm1706_vm4, %v1683_v37  ;;  %v956_v39 = vcombine.high %v954_v14, %v954_v14  ;;  %3903 = vperm.xlu0 %9442, %v1525_v34   ;;  %v10014_v34 = vld [vmem:[%s9685_s1 + $0x28] sm:$0xff] }
  0xff   : > { %v1668_v45 = vadd.f32 %v9031_v42, %v8601_v21  ;;  %v1659_v46 = vpop.f32.mrb[7].mxu0  ;;  %9037 = vmatmul.mubr.msk.bf16.vlgmr.msra.gmra.mrb[0].mxu1 %vm1706_vm4, %v1684_v35  ;;  %v1677_v52 = vmax.f32 %v1665_v38, 0.0  ;;  %v888_v35 = vcombine.high %v9832_v47, %v9832_v47  ;;  %v9959_v42 = vld [vmem:[%s13969_s11] sm:$0xff]  }
 0x100   : > { %v1660_v50 = vadd.f32 %v8601_v21, %v1659_v46  ;;  %9111 = vmatpush3.bf16.msra.mxu1 %v9723_v7  ;;  %v1675_v54 = vmax.f32 %v1657_v40, 0.0  ;;  %v9927_v21 = vrot.slane %v954_v14, %v9688_v57  ;;  %v907_v40 = vcombine.high %v905_v17, %v905_v17 }
 0x101   : > { %v1678_v53 = vmax.f32 %v1668_v45, 0.0  ;;  %9112 = vmatprep.subr.bf16.mxu1 %v9450_v16  ;;  %v1244_v47 = vrot.slane %v888_v35, %v9702_v0  ;;  %v1212_v45 = vrot.slane %v839_v36, %v9702_v0  ;;  %v984_v46 = vrot.slane %v956_v39, %v9688_v57 }
 0x102   : > { %v1676_v55 = vmax.f32 %v1660_v50, 0.0  ;;  %v1300_v25 = vrot.slane %v9927_v21, %v9702_v0  ;;  %v935_v50 = vrot.slane %v907_v40, %v9688_v57  ;;  %v1216_v14 = vrot.slane %v841_v44, %v9702_v0 }
 0x103   : > { %v1686_v56 = vpack.c.bf16 %v1678_v53, %v1677_v52  ;;  %v1519_v53 = vmul.f32 %v1244_v47, %v9693_v61  ;;  %v1045_v39 = vrot.slane %v10014_v34, %v9688_v57 }
 0x104   : > { %v1685_v58 = vpack.c.bf16 %v1676_v55, %v1675_v54  ;;  %v9048_v41 = vpop.f32.mrb[8].mxu0  ;;  %9113 = vmatpush3.bf16.msra.mxu1 %v9450_v16  ;;  %v1533_v33 = vmul.f32 %v1300_v25, %v9710_v3  ;;  %v1511_v54 = vmul.f32 %v1212_v45, %v9696_v62  ;;  %v937_v16 = vcombine.high %v921_v23, %v921_v23 }
 0x105   : > { %v9885_v60 = vadd.f32 %v9048_v41, %v9882_v59  ;;  %v2023_v7 = vpop.f32.mrb[9].mxu0  ;;  %9122 = vmatprep.subr.bf16.mxu1 %v9959_v42  ;;  %v1512_v17 = vmul.f32 %v1216_v14, %v9696_v62  ;;  %v988_v23 = vcombine.high %v984_v46, %v984_v46  ;;  %v996_v25 = vrot.slane %v10005_v20, %v9688_v57 }
 0x106   : > { %9040 = vmatprep.mubr.msk.bf16.mxu1 %vm1706_vm4, %v1685_v58  ;;  %v9888_v30 = vadd.f32 %v9882_v59, %v2023_v7  ;;  %v9049_v63 = vpop.f32.mrb[10].mxu0  ;;  %3943 = vperm.xlu1 %9443, %v1533_v33   ;;  %v1272_v58 = vrot.slane %v935_v50, %v9702_v0  ;;  %v1276_v19 = vrot.slane %v937_v16, %v9702_v0 }
 0x107   : > { %9041 = vmatmul.mubr.msk.bf16.gmra.mrb[4].mxu1 %vm1706_vm4, %v1686_v56  ;;  %14367 = vst [vmem:[#allocation6_spill] sm:$0xff] %v9885_v60  ;;  %v9895_v5 = vadd.f32 %v9049_v63, %v9882_v59  ;;  %v2026_v6 = vpop.f32.mrb[11].mxu0  ;;  %v1304_v56 = vrot.slane %v984_v46, %v9702_v0  ;;  %3833 = vperm.xlu0 %9442, %v1511_v54  }
 0x108   : > { %14368 = vst [vmem:[#allocation7_spill] sm:$0xff] %v9888_v30  ;;  %v9898_v8 = vadd.f32 %v9882_v59, %v2026_v6  ;;  %v1526_v11 = vmul.f32 %v1272_v58, %v9707_v2  ;;  %v1004_v33 = vcombine.high %v996_v25, %v996_v25  ;;  %v1053_v46 = vcombine.high %v1045_v39, %v1045_v39 }
 0x109   : > { %14369 = vst [vmem:[#allocation8_spill] sm:$0xff] %v9895_v5  ;;  %v2466_v43 = vpack.c.bf16 %v9895_v5, %v9885_v60  ;;  %v1534_v6 = vmul.f32 %v1304_v56, %v9710_v3 }
 0x10a   : > { %14370 = vst [vmem:[#allocation9_spill] sm:$0xff] %v9898_v8  ;;  %v2465_v12 = vpack.c.bf16 %v9898_v8, %v9888_v30  ;;  %3873 = vperm.xlu1 %9443, %v1519_v53   ;;  %v1026_v47 = vrot.slane %v1004_v33, %v9688_v57  ;;  %v1075_v54 = vrot.slane %v1053_v46, %v9688_v57 }
 0x10b   : > { %3908 = vperm.xlu0 %9442, %v1526_v11   ;;  %v10041_v11 = vld [vmem:[%s9685_s1 + $0x30] sm:$0xff] }
 0x10c   : > { %v9052_v18 = vpop.f32.mrb[12].mxu0  ;;  %9136 = vmatprep.mubr.msk.bf16.mxu0 %vm2503_vm5, %v2465_v12  ;;  %v1352_v58 = vrot.slane %v1075_v54, %v9702_v0 }
 0x10d   : > { %v2039_v22 = vpop.f32.mrb[13].mxu0  ;;  %9137 = vmatmul.mubr.msk.bf16.vlgmr.msra.gmra.mrb[72].mxu0 %vm2503_vm5, %v2466_v43  ;;  %v9934_v26 = vadd.f32 %v9052_v18, %v9882_v59  ;;  %v890_v43 = vcombine.high %v9901_v9, %v9901_v9  ;;  %v986_v9 = vcombine.high %v9927_v21, %v9927_v21  ;;  %v1527_v21 = vmul.f32 %v1276_v19, %v9707_v2  ;;  %v10056_v19 = vld [vmem:[%s9685_s1 + $0x38] sm:$0xff] }
 0x10e   : > { %v9053_v24 = vpop.f32.mrb[14].mxu0  ;;  %v9938_v29 = vadd.f32 %v9882_v59, %v2039_v22  ;;  %3948 = vperm.xlu1 %9443, %v1534_v6  }
 0x10f   : > { %14371 = vst [vmem:[#allocation10_spill] sm:$0xff] %v9934_v26  ;;  %v2042_v27 = vpop.f32.mrb[15].mxu0  ;;  %v9941_v31 = vadd.f32 %v9053_v24, %v9882_v59  ;;  %v1248_v15 = vrot.slane %v890_v43, %v9702_v0  ;;  %v1308_v18 = vrot.slane %v986_v9, %v9702_v0  ;;  %3838 = vperm.xlu0 %9442, %v1512_v17  }
 0x110   : > { %14372 = vst [vmem:[#allocation11_spill] sm:$0xff] %v9938_v29  ;;  %v9944_v32 = vadd.f32 %v9882_v59, %v2042_v27  ;;  %v939_v24 = vcombine.high %v935_v50, %v935_v50  ;;  %v1312_v27 = vrot.slane %v988_v23, %v9702_v0  ;;  %v1320_v50 = vrot.slane %v1026_v47, %v9702_v0 }
 0x111   : > { %14373 = vst [vmem:[#allocation12_spill] sm:$0xff] %v9941_v31  ;;  %v2468_v37 = vpack.c.bf16 %v9941_v31, %v9934_v26  ;;  %v1520_v10 = vmul.f32 %v1248_v15, %v9693_v61  ;;  %v1535_v22 = vmul.f32 %v1308_v18, %v9710_v3  ;;  %v1546_v43 = vmul.f32 %v1352_v58, %v10014_v34 }
 0x112   : > { %14374 = vst [vmem:[#allocation13_spill] sm:$0xff] %v9944_v32  ;;  %v2467_v38 = vpack.c.bf16 %v9944_v32, %v9938_v29  ;;  %v1280_v28 = vrot.slane %v939_v24, %v9702_v0  ;;  %v1536_v35 = vmul.f32 %v1312_v27, %v9710_v3  ;;  %v1538_v56 = vmul.f32 %v1320_v50, %v10005_v20 }
 0x113   : > { %3878 = vperm.xlu1 %9443, %v1520_v10   ;;  %3913 = vperm.xlu0 %9442, %v1527_v21   ;;  %v1094_v9 = vrot.slane %v10041_v11, %v9688_v57  ;;  %v1143_v23 = vrot.slane %v10056_v19, %v9688_v57 }
 0x114   : > { %v9056_v49 = vpop.f32.mrb[16].mxu0  ;;  %9140 = vmatprep.mubr.msk.bf16.mxu0 %vm2503_vm5, %v2467_v38  ;;  %v1528_v36 = vmul.f32 %v1280_v28, %v9707_v2  ;;  %v1012_v38 = vrot.slane %v996_v25, %v9688_v57 }
 0x115   : > { %v2055_v52 = vpop.f32.mrb[17].mxu0  ;;  %9141 = vmatmul.mubr.msk.bf16.gmra.mrb[76].mxu0 %vm2503_vm5, %v2468_v37  ;;  %v9973_v41 = vadd.f32 %v9056_v49, %v9882_v59  ;;  %v1102_v18 = vcombine.high %v1094_v9, %v1094_v9  ;;  %v1110_v21 = vrot.slane %v1094_v9, %v9688_v57  ;;  %v1151_v28 = vcombine.high %v1143_v23, %v1143_v23 }
 0x116   : > { %v9057_v55 = vpop.f32.mrb[18].mxu0  ;;  %v9976_v63 = vadd.f32 %v9882_v59, %v2055_v52  ;;  %v1316_v49 = vrot.slane %v1012_v38, %v9702_v0  ;;  %v1034_v14 = vcombine.high %v1012_v38, %v1012_v38 }
 0x117   : > { %14375 = vst [vmem:[#allocation14_spill] sm:$0xff] %v9973_v41  ;;  %v2058_v7 = vpop.f32.mrb[19].mxu0  ;;  %v9979_v1 = vadd.f32 %v9057_v55, %v9882_v59  ;;  %3953 = vperm.xlu1 %9443, %v1535_v22   ;;  %3918 = vperm.xlu0 %9442, %v1528_v36   ;;  %v1061_v55 = vrot.slane %v1045_v39, %v9688_v57 }
 0x118   : > { %14376 = vst [vmem:[#allocation15_spill] sm:$0xff] %v9976_v63  ;;  %v9982_v4 = vadd.f32 %v9882_v59, %v2058_v7  ;;  %v1537_v53 = vmul.f32 %v1316_v49, %v10005_v20  ;;  %v1324_v17 = vrot.slane %v1034_v14, %v9702_v0  ;;  %v1124_v25 = vrot.slane %v1102_v18, %v9688_v57 }
 0x119   : > { %14377 = vst [vmem:[#allocation16_spill] sm:$0xff] %v9979_v1  ;;  %v2470_v12 = vpack.c.bf16 %v9979_v1, %v9973_v41  ;;  %v1348_v7 = vrot.slane %v1061_v55, %v9702_v0  ;;  %v1380_v27 = vrot.slane %v1110_v21, %v9702_v0  ;;  %v1173_v39 = vrot.slane %v1151_v28, %v9688_v57 }
 0x11a   : > { %14378 = vst [vmem:[#allocation17_spill] sm:$0xff] %v9982_v4  ;;  %v2469_v13 = vpack.c.bf16 %v9982_v4, %v9976_v63  ;;  %v1539_v24 = vmul.f32 %v1324_v17, %v10005_v20  ;;  %v1384_v33 = vrot.slane %v1124_v25, %v9702_v0  ;;  %v1159_v49 = vrot.slane %v1143_v23, %v9688_v57 }
 0x11b   : > { %3958 = vperm.xlu1 %9443, %v1536_v35   ;;  %3963 = vperm.xlu0 %9442, %v1537_v53   ;;  %v1545_v44 = vmul.f32 %v1348_v7, %v10014_v34  ;;  %v1553_v36 = vmul.f32 %v1380_v27, %v10041_v11  ;;  %v1416_v53 = vrot.slane %v1173_v39, %v9702_v0 }
 0x11c   : > { %9144 = vmatprep.mubr.msk.bf16.mxu0 %vm2503_vm5, %v2469_v13  ;;  %v10018_v37 = vpop.f32.mrb[20].mxu0  ;;  %v1083_v13 = vcombine.high %v1061_v55, %v1061_v55  ;;  %v1554_v46 = vmul.f32 %v1384_v33, %v10041_v11  ;;  %v1412_v55 = vrot.slane %v1159_v49, %v9702_v0  ;;  %v1181_v18 = vcombine.high %v1159_v49, %v1159_v49 }
 0x11d   : > { %9145 = vmatmul.mubr.msk.bf16.gmra.mrb[80].mxu0 %vm2503_vm5, %v2470_v12  ;;  %v10023_v40 = vpop.f32.mrb[21].mxu0  ;;  %v1562_v58 = vmul.f32 %v1416_v53, %v10056_v19 }
 0x11e   : > { %v10026_v45 = vpop.f32.mrb[22].mxu0  ;;  %v1356_v16 = vrot.slane %v1083_v13, %v9702_v0  ;;  %v1561_v7 = vmul.f32 %v1412_v55, %v10056_v19  ;;  %v1420_v27 = vrot.slane %v1181_v18, %v9702_v0 }
 0x11f   : > { %v10030_v52 = vpop.f32.mrb[23].mxu0  ;;  %3968 = vperm.xlu1 %9443, %v1538_v56   ;;  %4003 = vperm.xlu0 %9442, %v1545_v44   ;;  %v1036_v44 = vcombine.high %v1026_v47, %v1026_v47  ;;  %v1038_v47 = vcombine.high %v10014_v34, %v10014_v34 }
 0x120   : > { %v1547_v22 = vmul.f32 %v1356_v16, %v10014_v34  ;;  %v1563_v49 = vmul.f32 %v1420_v27, %v10056_v19 }
 0x121   : > { %v1328_v14 = vrot.slane %v1036_v44, %v9702_v0 }
 0x123   : > { %4008 = vperm.xlu1 %9443, %v1546_v43   ;;  %3973 = vperm.xlu0 %9442, %v1539_v24   ;;  %v1085_v43 = vcombine.high %v1075_v54, %v1075_v54  ;;  %v1540_v23 = vmul.f32 %v1328_v14, %v10005_v20  ;;  %v989_v54 = vcombine.high %v10005_v20, %v10005_v20 }
 0x124   : > { %v10038_v6 = vpop.f32.mrb[24].mxu0  ;;  %v1134_v14 = vcombine.high %v1124_v25, %v1124_v25 }
 0x125   : > { %v10045_v12 = vpop.f32.mrb[25].mxu0  ;;  %v1360_v13 = vrot.slane %v1085_v43, %v9702_v0 }
 0x126   : > { %v10047_v15 = vpop.f32.mrb[26].mxu0 }
 0x127   : > { %v10052_v10 = vpop.f32.mrb[27].mxu0  ;;  %4013 = vperm.xlu1 %9443, %v1547_v22   ;;  %4043 = vperm.xlu0 %9442, %v1553_v36   ;;  %v1548_v16 = vmul.f32 %v1360_v13, %v10014_v34  ;;  %v1132_v22 = vcombine.high %v1110_v21, %v1110_v21  ;;  %v1052_v21 = vrot.slane %v1038_v47, %v9688_v57 }
 0x128   : > { %v1003_v36 = vrot.slane %v989_v54, %v9688_v57  ;;  %v1183_v13 = vcombine.high %v1173_v39, %v1173_v39  ;;  %v1392_v47 = vrot.slane %v1134_v14, %v9702_v0 }
 0x129   : > { %v1388_v28 = vrot.slane %v1132_v22, %v9702_v0  ;;  %v1068_v53 = vrot.slane %v1052_v21, %v9688_v57  ;;  %v1054_v27 = vcombine.high %v1052_v21, %v1052_v21 }
 0x12a   : > { %v1019_v55 = vrot.slane %v1003_v36, %v9688_v57  ;;  %v1556_v25 = vmul.f32 %v1392_v47, %v10041_v11 }
 0x12b   : > { %4048 = vperm.xlu1 %9443, %v1554_v46   ;;  %4083 = vperm.xlu0 %9442, %v1561_v7   ;;  %v1555_v46 = vmul.f32 %v1388_v28, %v10041_v11  ;;  %v1005_v28 = vcombine.high %v1003_v36, %v1003_v36  ;;  %v1082_v39 = vrot.slane %v1054_v27, %v9688_v57 }
 0x12c   : > { %v10066_v35 = vpop.f32.mrb[28].mxu0  ;;  %v1332_v7 = vrot.slane %v1019_v55, %v9702_v0  ;;  %v1084_v48 = vcombine.high %v1068_v53, %v1068_v53 }
 0x12d   : > { %v10069_v38 = vpop.f32.mrb[29].mxu0 }
 0x12e   : > { %v10074_v50 = vpop.f32.mrb[30].mxu0  ;;  %v1541_v18 = vmul.f32 %v1332_v7, %v10005_v20  ;;  %v1087_v7 = vcombine.high %v10041_v11, %v10041_v11  ;;  %v1372_v1 = vrot.slane %v1084_v48, %v9702_v0 }
 0x12f   : > { %v10078_v56 = vpop.f32.mrb[31].mxu0  ;;  %4088 = vperm.xlu1 %9443, %v1562_v58   ;;  %3978 = vperm.xlu0 %9442, %v1540_v23   ;;  %v1364_v58 = vrot.slane %v1068_v53, %v9702_v0  ;;  %v1424_v23 = vrot.slane %v1183_v13, %v9702_v0  ;;  %v1368_v13 = vrot.slane %v1082_v39, %v9702_v0 }
 0x133   : > { %4018 = vperm.xlu1 %9443, %v1548_v16   ;;  %4053 = vperm.xlu0 %9442, %v1555_v46   ;;  %v1549_v16 = vmul.f32 %v1364_v58, %v10014_v34  ;;  %v1033_v46 = vrot.slane %v1005_v28, %v9688_v57  ;;  %v1136_v58 = vcombine.high %v10056_v19, %v10056_v19 }
 0x134   : > { %v10084_v9 = vpop.f32.mrb[32].mxu0 }
 0x135   : > { %v10087_v17 = vpop.f32.mrb[33].mxu0  ;;  %v1336_v21 = vrot.slane %v1033_v46, %v9702_v0  ;;  %v1150_v14 = vrot.slane %v1136_v58, %v9688_v57 }
 0x136   : > { %v10090_v24 = vpop.f32.mrb[34].mxu0 }
 0x137   : > { %v10098_v33 = vpop.f32.mrb[35].mxu0  ;;  %4093 = vperm.xlu1 %9443, %v1563_v49   ;;  %3983 = vperm.xlu0 %9442, %v1541_v18   ;;  %v1564_v49 = vmul.f32 %v1424_v23, %v10056_v19  ;;  %v1550_v18 = vmul.f32 %v1368_v13, %v10014_v34  ;;  %v1542_v47 = vmul.f32 %v1336_v21, %v10005_v20 }
 0x138   : > { %v1166_v28 = vrot.slane %v1150_v14, %v9688_v57  ;;  %v1035_v13 = vcombine.high %v1019_v55, %v1019_v55  ;;  %v1152_v4 = vcombine.high %v1150_v14, %v1150_v14 }
 0x13a   : > { %v1428_v58 = vrot.slane %v1166_v28, %v9702_v0  ;;  %v1340_v41 = vrot.slane %v1035_v13, %v9702_v0  ;;  %v1180_v55 = vrot.slane %v1152_v4, %v9688_v57  ;;  %v1182_v32 = vcombine.high %v1166_v28, %v1166_v28 }
 0x13b   : > { %4023 = vperm.xlu1 %9443, %v1549_v16   ;;  %4058 = vperm.xlu0 %9442, %v1556_v25   ;;  %v1101_v16 = vrot.slane %v1087_v7, %v9688_v57 }
 0x13c   : > { %v10108_v43 = vpop.f32.mrb[36].mxu0  ;;  %v1565_v51 = vmul.f32 %v1428_v58, %v10056_v19  ;;  %v1543_v31 = vmul.f32 %v1340_v41, %v10005_v20  ;;  %v1037_v41 = vcombine.high %v1033_v46, %v1033_v46  ;;  %v1436_v46 = vrot.slane %v1182_v32, %v9702_v0 }
 0x13d   : > { %v10110_v44 = vpop.f32.mrb[37].mxu0  ;;  %v1103_v63 = vcombine.high %v1101_v16, %v1101_v16 }
 0x13e   : > { %v10114_v22 = vpop.f32.mrb[38].mxu0 }
 0x13f   : > { %v10118_v54 = vpop.f32.mrb[39].mxu0  ;;  %4098 = vperm.xlu1 %9443, %v1564_v49   ;;  %v1117_v49 = vrot.slane %v1101_v16, %v9688_v57  ;;  %3988 = vperm.xlu0 %9442, %v1542_v47   ;;  %v1551_v47 = vmul.f32 %v1372_v1, %v10014_v34  ;;  %v1131_v48 = vrot.slane %v1103_v63, %v9688_v57 }
 0x140   : > { %v1086_v16 = vcombine.high %v1082_v39, %v1082_v39 }
 0x141   : > { %v1396_v7 = vrot.slane %v1117_v49, %v9702_v0  ;;  %v1133_v39 = vcombine.high %v1117_v49, %v1117_v49 }
 0x142   : > { %v1376_v4 = vrot.slane %v1086_v16, %v9702_v0  ;;  %v1567_v16 = vmul.f32 %v1436_v46, %v10056_v19 }
 0x143   : > { %4028 = vperm.xlu1 %9443, %v1550_v18   ;;  %v1557_v21 = vmul.f32 %v1396_v7, %v10041_v11  ;;  %v1432_v7 = vrot.slane %v1180_v55, %v9702_v0 }
 0x144   : > { %v10130_v36 = vpop.f32.mrb[40].mxu0  ;;  %v1552_v26 = vmul.f32 %v1376_v4, %v10014_v34 }
 0x145   : > { %v10135_v23 = vpop.f32.mrb[41].mxu0  ;;  %4063 = vperm.xlu0 %9442, %v1557_v21   ;;  %v1566_v1 = vmul.f32 %v1432_v7, %v10056_v19  ;;  %v1344_v21 = vrot.slane %v1037_v41, %v9702_v0  ;;  %v1184_v41 = vcombine.high %v1180_v55, %v1180_v55 }
 0x146   : > { %v10138_v27 = vpop.f32.mrb[42].mxu0 }
 0x147   : > { %v10142_v25 = vpop.f32.mrb[43].mxu0  ;;  %4103 = vperm.xlu1 %9443, %v1565_v51   ;;  %v1400_v51 = vrot.slane %v1131_v48, %v9702_v0 }
 0x149   : > { %3993 = vperm.xlu0 %9442, %v1543_v31   ;;  %v1558_v13 = vmul.f32 %v1400_v51, %v10041_v11  ;;  %v1544_v31 = vmul.f32 %v1344_v21, %v10005_v20  ;;  %v1440_v21 = vrot.slane %v1184_v41, %v9702_v0 }
 0x14b   : > { %4033 = vperm.xlu1 %9443, %v1551_v47   ;;  %v1568_v32 = vmul.f32 %v1440_v21, %v10056_v19 }
 0x14c   : > { %v10150_v18 = vpop.f32.mrb[44].mxu0 }
 0x14d   : > { %v10154_v53 = vpop.f32.mrb[45].mxu0  ;;  %4068 = vperm.xlu0 %9442, %v1558_v13   ;;  %v1135_v13 = vcombine.high %v1131_v48, %v1131_v48 }
 0x14e   : > { %v10157_v58 = vpop.f32.mrb[46].mxu0 }
 0x14f   : > { %v10161_v14 = vpop.f32.mrb[47].mxu0  ;;  %4108 = vperm.xlu1 %9443, %v1566_v1   ;;  %v1404_v1 = vrot.slane %v1133_v39, %v9702_v0  ;;  %v1408_v28 = vrot.slane %v1135_v13, %v9702_v0 }
 0x151   : > { %3998 = vperm.xlu0 %9442, %v1544_v31   ;;  %v1559_v4 = vmul.f32 %v1404_v1, %v10041_v11 }
 0x153   : > { %4038 = vperm.xlu1 %9443, %v1552_v26   ;;  %v1560_v26 = vmul.f32 %v1408_v28, %v10041_v11 }
 0x154   : > { %v10168_v63 = vpop.f32.mrb[48].mxu0 }
 0x155   : > { %v10172_v47 = vpop.f32.mrb[49].mxu0  ;;  %4073 = vperm.xlu0 %9442, %v1559_v4  }
 0x156   : > { %v10174_v7 = vpop.f32.mrb[50].mxu0 }
 0x157   : > { %v10177_v51 = vpop.f32.mrb[51].mxu0  ;;  %4113 = vperm.xlu1 %9443, %v1567_v16  }
 0x159   : > { %4078 = vperm.xlu0 %9442, %v1560_v26  }
 0x15b   : > { %4118 = vperm.xlu1 %9443, %v1568_v32  }
 0x15c   : > { %v10184_v49 = vpop.f32.mrb[52].mxu0 }
 0x15d   : > { %v10188_v31 = vpop.f32.mrb[53].mxu0  ;;  %5082 = vperm.xlu0 %9442, %v9696_v62  }
 0x15e   : > { %v10190_v39 = vpop.f32.mrb[54].mxu0 }
 0x15f   : > { %v10192_v55 = vpop.f32.mrb[55].mxu0  ;;  %5086 = vperm.xlu1 %9443, %v9693_v61  }
 0x161   : > { %5090 = vperm.xlu0 %9442, %v9707_v2  }
 0x163   : > { %5094 = vperm.xlu1 %9443, %v9710_v3  }
 0x164   : > { %v10196_v48 = vpop.f32.mrb[56].mxu0 }
 0x165   : > { %v10198_v46 = vpop.f32.mrb[57].mxu0  ;;  %5098 = vperm.xlu0 %9442, %v10005_v20  }
 0x166   : > { %v10200_v1 = vpop.f32.mrb[58].mxu0 }
 0x167   : > { %v10204_v16 = vpop.f32.mrb[59].mxu0  ;;  %5102 = vperm.xlu1 %9443, %v10014_v34  }
 0x169   : > { %5106 = vperm.xlu0 %9442, %v10041_v11   ;;  %v8606_v11 = vld [vmem:[%s14383_s28] ss:$0 sm:$0xff] }
 0x16b   : > { %5110 = vperm.xlu1 %9443, %v10056_v19  }
 0x16c   : > { %v10208_v41 = vpop.f32.mrb[60].mxu0 }
 0x16d   : > { %v10210_v61 = vpop.f32.mrb[61].mxu0 }
 0x16e   : > { %v10212_v62 = vpop.f32.mrb[62].mxu0 }
 0x16f   : > { %v10216_v13 = vpop.f32.mrb[63].mxu0 }
 0x174   : > { %v10218_v3 = vpop.f32.mrb[64].mxu0 }
 0x175   : > { %14379 = vst [vmem:[#allocation18_spill] sm:$0xff] %v10218_v3  ;;  %v10220_v2 = vpop.f32.mrb[65].mxu0 }
 0x176   : > { %v10222_v4 = vpop.f32.mrb[66].mxu0 }
 0x177   : > { %14380 = vst [vmem:[#allocation19_spill] sm:$0xff] %v10222_v4  ;;  %v10224_v34 = vpop.f32.mrb[67].mxu0 }
 0x17c   : > { %v10226_v20 = vpop.f32.mrb[68].mxu0 }
 0x17d   : > { %14381 = vst [vmem:[#allocation20_spill] sm:$0xff] %v10226_v20  ;;  %v10228_v21 = vpop.f32.mrb[69].mxu0 }
 0x17e   : > { %v10230_v28 = vpop.f32.mrb[70].mxu0 }
 0x17f   : > { %14382 = vst [vmem:[#allocation21_spill] sm:$0xff] %v10230_v28  ;;  %v10232_v32 = vpop.f32.mrb[71].mxu0 }
 0x1d2   : > { %v9038_v19 = vpop.f32.mrb[0].mxu1 }
 0x1d3   : > { %v1753_v26 = vpop.f32.mrb[1].mxu1  ;;  %v10243_v0 = vadd.f32 %v9038_v19, %v8606_v11 }
 0x1d4   : > { %v9039_v29 = vpop.f32.mrb[2].mxu1  ;;  %v10239_v8 = vadd.f32 %v8606_v11, %v1753_v26 }
 0x1d5   : > { %v10237_v5 = vadd.f32 %v9039_v29, %v8606_v11  ;;  %v1756_v60 = vpop.f32.mrb[3].mxu1  ;;  %14387 = vst [vmem:[#allocation25_spill] sm:$0xff] %v10243_v0  ;;  %v9454_v29 = vld [vmem:[%s13969_s11 + $0x8] sm:$0xff]  }
 0x1d6   : > { %14385 = vst [vmem:[#allocation23_spill] sm:$0xff] %v10239_v8  ;;  %v10241_v30 = vadd.f32 %v8606_v11, %v1756_v60 }
 0x1d7   : > { %14384 = vst [vmem:[#allocation22_spill] sm:$0xff] %v10237_v5  ;;  %v10251_v28 = vpack.c.bf16 %v10237_v5, %v10243_v0 }
 0x1d8   : > { %14386 = vst [vmem:[#allocation24_spill] sm:$0xff] %v10241_v30  ;;  %v10247_v57 = vpack.c.bf16 %v10241_v30, %v10239_v8 }
 0x1d9   : > { %14389 = vst [vmem:[#allocation27_spill] sm:$0xff] %v10251_v28 }
 0x1da   : > { %14388 = vst [vmem:[#allocation26_spill] sm:$0xff] %v10247_v57  ;;  %v9042_v20 = vpop.f32.mrb[4].mxu1  ;;  %9114 = vmatprep.mubr.msk.bf16.mxu1 %vm1706_vm4, %v10247_v57 }
 0x1db   : > { %v1769_v60 = vpop.f32.mrb[5].mxu1  ;;  %9115 = vmatmul.mubr.msk.bf16.vlgmr.msra.gmra.mrb[8].mxu1 %vm1706_vm4, %v10251_v28  ;;  %v10267_v5 = vadd.f32 %v9042_v20, %v8606_v11  ;;  %v10296_v20 = vadd.f32 %v9882_v59, %v10030_v52  ;;  %v10313_v52 = vadd.f32 %v10018_v37, %v9882_v59  ;;  %v10331_v37 = vadd.f32 %v9882_v59, %v10078_v56 }
 0x1dc   : > { %9123 = vmatpush3.bf16.msra.mxu1 %v9959_v42  ;;  %v9043_v19 = vpop.f32.mrb[6].mxu1  ;;  %v10263_v0 = vadd.f32 %v8606_v11, %v1769_v60  ;;  %v9473_v42 = vld [vmem:[%s13967_s9] sm:$0xff]   ;;  %v10317_v60 = vadd.f32 %v10026_v45, %v9882_v59  ;;  %v10335_v45 = vadd.f32 %v10038_v6, %v9882_v59  ;;  %v10353_v6 = vadd.f32 %v9882_v59, %v10098_v33 }
 0x1dd   : > { %v10261_v26 = vadd.f32 %v9043_v19, %v8606_v11  ;;  %v1772_v30 = vpop.f32.mrb[7].mxu1  ;;  %9124 = vmatprep.subr.bf16.mxu1 %v9454_v29  ;;  %14393 = vst [vmem:[#allocation31_spill] sm:$0xff] %v10267_v5  ;;  %14397 = vst [vmem:[#allocation35_spill] sm:$0xff] %v10296_v20  ;;  %v10361_v56 = vadd.f32 %v10074_v50, %v9882_v59  ;;  %v10379_v50 = vadd.f32 %v10084_v9, %v9882_v59 }
 0x1de   : > { %14391 = vst [vmem:[#allocation29_spill] sm:$0xff] %v10263_v0  ;;  %v10265_v8 = vadd.f32 %v8606_v11, %v1772_v30  ;;  %v10292_v30 = vadd.f32 %v9882_v59, %v10023_v40  ;;  %v10309_v40 = vadd.f32 %v9882_v59, %v10052_v10  ;;  %14400 = vst [vmem:[#allocation38_spill] sm:$0xff] %v10313_v52 }
 0x1df   : > { %14390 = vst [vmem:[#allocation28_spill] sm:$0xff] %v10261_v26  ;;  %v10275_v3 = vpack.c.bf16 %v10261_v26, %v10267_v5  ;;  %14401 = vst [vmem:[#allocation39_spill] sm:$0xff] %v10317_v60  ;;  %v10339_v10 = vadd.f32 %v10047_v15, %v9882_v59  ;;  %v10357_v15 = vadd.f32 %v10066_v35, %v9882_v59 }
 0x1e0   : > { %14392 = vst [vmem:[#allocation30_spill] sm:$0xff] %v10265_v8  ;;  %v10271_v4 = vpack.c.bf16 %v10265_v8, %v10263_v0  ;;  %9125 = vmatpush3.bf16.msra.mxu1 %v9454_v29  ;;  %14396 = vst [vmem:[#allocation34_spill] sm:$0xff] %v10292_v30  ;;  %v2471_v11 = vpack.c.bf16 %v10296_v20, %v10292_v30  ;;  %v10305_v29 = vadd.f32 %v9882_v59, %v10045_v12 }
 0x1e1   : > { %14395 = vst [vmem:[#allocation33_spill] sm:$0xff] %v10275_v3  ;;  %9412 = vmatprep.subr.bf16.mxu1 %v9473_v42  ;;  %14399 = vst [vmem:[#allocation37_spill] sm:$0xff] %v10309_v40  ;;  %v10327_v12 = vadd.f32 %v9882_v59, %v10069_v38  ;;  %v10349_v38 = vadd.f32 %v9882_v59, %v10087_v17  ;;  %v10371_v17 = vadd.f32 %v9882_v59, %v10110_v44 }
 0x1e2   : > { %14394 = vst [vmem:[#allocation32_spill] sm:$0xff] %v10271_v4  ;;  %9118 = vmatprep.mubr.msk.bf16.mxu1 %vm1706_vm4, %v10271_v4  ;;  %14398 = vst [vmem:[#allocation36_spill] sm:$0xff] %v10305_v29  ;;  %v2473_v19 = vpack.c.bf16 %v10309_v40, %v10305_v29  ;;  %v10375_v35 = vadd.f32 %v9882_v59, %v10118_v54  ;;  %v10383_v33 = vadd.f32 %v10090_v24, %v9882_v59 }
 0x1e3   : > { %9119 = vmatmul.mubr.msk.bf16.gmra.mrb[12].mxu1 %vm1706_vm4, %v10275_v3  ;;  %14402 = vst [vmem:[#allocation40_spill] sm:$0xff] %v10327_v12  ;;  %14403 = vst [vmem:[#allocation41_spill] sm:$0xff] %v10331_v37  ;;  %v10393_v44 = vadd.f32 %v9882_v59, %v10135_v23  ;;  %v10397_v9 = vadd.f32 %v9882_v59, %v10142_v25  ;;  %v10401_v24 = vadd.f32 %v10108_v43, %v9882_v59 }
 0x1e4   : > { %9126 = vmatprep.mubr.msk.bf16.mxu1 %vm1706_vm4, %v10247_v57  ;;  %14404 = vst [vmem:[#allocation42_spill] sm:$0xff] %v10335_v45  ;;  %14405 = vst [vmem:[#allocation43_spill] sm:$0xff] %v10339_v10  ;;  %v10405_v54 = vadd.f32 %v10114_v22, %v9882_v59  ;;  %v10415_v23 = vadd.f32 %v9882_v59, %v10154_v53  ;;  %v10419_v43 = vadd.f32 %v9882_v59, %v10161_v14 }
 0x1e5   : > { %14406 = vst [vmem:[#allocation44_spill] sm:$0xff] %v10349_v38  ;;  %14407 = vst [vmem:[#allocation45_spill] sm:$0xff] %v10353_v6  ;;  %v10423_v22 = vadd.f32 %v10130_v36, %v9882_v59  ;;  %v10427_v25 = vadd.f32 %v10138_v27, %v9882_v59  ;;  %v10437_v53 = vadd.f32 %v9882_v59, %v10172_v47 }
 0x1e6   : > { %14408 = vst [vmem:[#allocation46_spill] sm:$0xff] %v10357_v15  ;;  %14409 = vst [vmem:[#allocation47_spill] sm:$0xff] %v10361_v56  ;;  %v10441_v36 = vadd.f32 %v9882_v59, %v10177_v51  ;;  %v10445_v27 = vadd.f32 %v10150_v18, %v9882_v59  ;;  %v10449_v14 = vadd.f32 %v10157_v58, %v9882_v59 }
 0x1e7   : > { %14410 = vst [vmem:[#allocation48_spill] sm:$0xff] %v10371_v17  ;;  %14411 = vst [vmem:[#allocation49_spill] sm:$0xff] %v10375_v35  ;;  %v10459_v47 = vadd.f32 %v9882_v59, %v10188_v31  ;;  %v10463_v18 = vadd.f32 %v9882_v59, %v10192_v55  ;;  %v10467_v58 = vadd.f32 %v10168_v63, %v9882_v59 }
 0x1e8   : > { %14412 = vst [vmem:[#allocation50_spill] sm:$0xff] %v10379_v50  ;;  %14413 = vst [vmem:[#allocation51_spill] sm:$0xff] %v10383_v33  ;;  %v10471_v51 = vadd.f32 %v10174_v7, %v9882_v59  ;;  %v10487_v63 = vadd.f32 %v9882_v59, %v10198_v46  ;;  %v10491_v7 = vadd.f32 %v9882_v59, %v10204_v16 }
 0x1e9   : > { %14414 = vst [vmem:[#allocation52_spill] sm:$0xff] %v10393_v44  ;;  %14415 = vst [vmem:[#allocation53_spill] sm:$0xff] %v10397_v9 }
 0x1ea   : > { %14416 = vst [vmem:[#allocation54_spill] sm:$0xff] %v10401_v24  ;;  %14417 = vst [vmem:[#allocation55_spill] sm:$0xff] %v10405_v54  ;;  %v2486_v31 = vpack.c.bf16 %v10471_v51, %v10467_v58  ;;  %v2489_v46 = vpack.c.bf16 %v10491_v7, %v10487_v63 }
 0x1eb   : > { %9127 = vmatmul.mubr.msk.bf16.vlgmr.msra.gmra.mrb[16].mxu1 %vm1706_vm4, %v10251_v28  ;;  %14418 = vst [vmem:[#allocation56_spill] sm:$0xff] %v10415_v23  ;;  %14419 = vst [vmem:[#allocation57_spill] sm:$0xff] %v10419_v43 }
 0x1ec   : > { %9413 = vmatpush3.bf16.msra.mxu1 %v9473_v42  ;;  %9130 = vmatprep.mubr.msk.bf16.mxu1 %vm1706_vm4, %v10271_v4  ;;  %v2472_v42 = vpack.c.bf16 %v10317_v60, %v10313_v52  ;;  %14420 = vst [vmem:[#allocation58_spill] sm:$0xff] %v10423_v22  ;;  %14421 = vst [vmem:[#allocation59_spill] sm:$0xff] %v10427_v25 }
 0x1ed   : > { %14422 = vst [vmem:[#allocation60_spill] sm:$0xff] %v10437_v53  ;;  %14423 = vst [vmem:[#allocation61_spill] sm:$0xff] %v10441_v36 }
 0x1ee   : > { %14424 = vst [vmem:[#allocation62_spill] sm:$0xff] %v10445_v27  ;;  %14425 = vst [vmem:[#allocation63_spill] sm:$0xff] %v10449_v14 }
 0x1ef   : > { %14426 = vst [vmem:[#allocation64_spill] sm:$0xff] %v10459_v47  ;;  %14427 = vst [vmem:[#allocation65_spill] sm:$0xff] %v10463_v18 }
 0x1f0   : > { %14428 = vst [vmem:[#allocation66_spill] sm:$0xff] %v10467_v58  ;;  %14429 = vst [vmem:[#allocation67_spill] sm:$0xff] %v10471_v51  ;;  %v10497_v58 = vadd.f32 %v10184_v49, %v9882_v59  ;;  %v10517_v49 = vadd.f32 %v9882_v59, %v10210_v61 }
 0x1f1   : > { %14430 = vst [vmem:[#allocation68_spill] sm:$0xff] %v10487_v63  ;;  %14431 = vst [vmem:[#allocation69_spill] sm:$0xff] %v10491_v7  ;;  %v10527_v7 = vadd.f32 %v10196_v48, %v9882_v59  ;;  %v10545_v48 = vadd.f32 %v9882_v59, %v10220_v2 }
 0x1f2   : > { %14432 = vst [vmem:[#allocation70_spill] sm:$0xff] %v10497_v58  ;;  %14434 = vst [vmem:[#allocation72_spill] sm:$0xff] %v10517_v49 }
 0x1f3   : > { %9131 = vmatmul.mubr.msk.bf16.gmra.mrb[20].mxu1 %vm1706_vm4, %v10275_v3  ;;  %14436 = vst [vmem:[#allocation74_spill] sm:$0xff] %v10527_v7  ;;  %14438 = vst [vmem:[#allocation76_spill] sm:$0xff] %v10545_v48 }
 0x1f4   : > { %9148 = vmatprep.mubr.msk.bf16.mxu1 %vm2503_vm5, %v2471_v11  ;;  %v2475_v11 = vpack.c.bf16 %v10331_v37, %v10327_v12 }
 0x1fb   : > { %9149 = vmatmul.mubr.msk.bf16.vlgmr.msra.gmra.mrb[24].mxu1 %vm2503_vm5, %v2472_v42  ;;  %v2477_v42 = vpack.c.bf16 %v10353_v6, %v10349_v38 }
 0x1fc   : > { %9152 = vmatprep.mubr.msk.bf16.mxu1 %vm2503_vm5, %v2473_v19  ;;  %v2474_v19 = vpack.c.bf16 %v10339_v10, %v10335_v45 }
 0x203   : > { %9153 = vmatmul.mubr.msk.bf16.gmra.mrb[28].mxu1 %vm2503_vm5, %v2474_v19  ;;  %v2479_v19 = vpack.c.bf16 %v10375_v35, %v10371_v17 }
 0x204   : > { %9156 = vmatprep.mubr.msk.bf16.mxu1 %vm2503_vm5, %v2475_v11  ;;  %v2476_v11 = vpack.c.bf16 %v10361_v56, %v10357_v15 }
 0x20b   : > { %9157 = vmatmul.mubr.msk.bf16.gmra.mrb[32].mxu1 %vm2503_vm5, %v2476_v11  ;;  %v2481_v11 = vpack.c.bf16 %v10397_v9, %v10393_v44 }
 0x20c   : > { %9160 = vmatprep.mubr.msk.bf16.mxu1 %vm2503_vm5, %v2477_v42  ;;  %v2478_v42 = vpack.c.bf16 %v10383_v33, %v10379_v50 }
 0x213   : > { %9161 = vmatmul.mubr.msk.bf16.gmra.mrb[36].mxu1 %vm2503_vm5, %v2478_v42  ;;  %v2483_v42 = vpack.c.bf16 %v10419_v43, %v10415_v23 }
 0x214   : > { %9164 = vmatprep.mubr.msk.bf16.mxu1 %vm2503_vm5, %v2479_v19  ;;  %v2480_v19 = vpack.c.bf16 %v10405_v54, %v10401_v24  ;;  %v14461_v24 = vld [vmem:[#allocation5_spill] sm:$0xff] }
 0x21b   : > { %9165 = vmatmul.mubr.msk.bf16.gmra.mrb[40].mxu1 %vm2503_vm5, %v2480_v19  ;;  %v2485_v19 = vpack.c.bf16 %v10441_v36, %v10437_v53 }
 0x21c   : > { %9168 = vmatprep.mubr.msk.bf16.mxu1 %vm2503_vm5, %v2481_v11  ;;  %v2482_v11 = vpack.c.bf16 %v10427_v25, %v10423_v22 }
 0x223   : > { %9169 = vmatmul.mubr.msk.bf16.gmra.mrb[44].mxu1 %vm2503_vm5, %v2482_v11  ;;  %v10473_v11 = vpop.f32.mrb[72].mxu0 }
 0x224   : > { %9172 = vmatprep.mubr.msk.bf16.mxu1 %vm2503_vm5, %v2483_v42  ;;  %v2484_v42 = vpack.c.bf16 %v10449_v14, %v10445_v27 }
 0x22b   : > { %9173 = vmatmul.mubr.msk.bf16.gmra.mrb[48].mxu1 %vm2503_vm5, %v2484_v42  ;;  %v10479_v42 = vpop.f32.mrb[73].mxu0 }
 0x22c   : > { %9176 = vmatprep.mubr.msk.bf16.mxu1 %vm2503_vm5, %v2485_v19  ;;  %v2487_v19 = vpack.c.bf16 %v10463_v18, %v10459_v47  ;;  %v10482_v55 = vpop.f32.mrb[74].mxu0 }
 0x22d   : > { %v10493_v47 = vpop.f32.mrb[75].mxu0 }
 0x22e   : > { %v10503_v18 = vpop.f32.mrb[76].mxu0 }
 0x233   : > { %9177 = vmatmul.mubr.msk.bf16.gmra.mrb[52].mxu1 %vm2503_vm5, %v2486_v31  ;;  %v10501_v31 = vadd.f32 %v10190_v39, %v9882_v59  ;;  %v10521_v39 = vadd.f32 %v9882_v59, %v10216_v13 }
 0x234   : > { %9180 = vmatprep.mubr.msk.bf16.mxu1 %vm2503_vm5, %v2487_v19  ;;  %v10507_v19 = vpop.f32.mrb[77].mxu0 }
 0x235   : > { %14433 = vst [vmem:[#allocation71_spill] sm:$0xff] %v10501_v31  ;;  %v2488_v16 = vpack.c.bf16 %v10501_v31, %v10497_v58  ;;  %v10511_v51 = vpop.f32.mrb[78].mxu0  ;;  %14435 = vst [vmem:[#allocation73_spill] sm:$0xff] %v10521_v39  ;;  %v10531_v58 = vadd.f32 %v10200_v1, %v9882_v59  ;;  %v2491_v61 = vpack.c.bf16 %v10521_v39, %v10517_v49  ;;  %v14458_v31 = vld [vmem:[#allocation4_spill] sm:$0xff] }
 0x236   : > { %v10523_v63 = vpop.f32.mrb[79].mxu0  ;;  %v10549_v1 = vadd.f32 %v9882_v59, %v10224_v34  ;;  %v10553_v49 = vadd.f32 %v10208_v41, %v9882_v59  ;;  %v10571_v41 = vadd.f32 %v9882_v59, %v10228_v21  ;;  %v14444_v34 = vld [vmem:[#allocation18_spill] sm:$0xff]  ;;  %v14448_v21 = vld [vmem:[#allocation20_spill] sm:$0xff] }
 0x237   : > { %14437 = vst [vmem:[#allocation75_spill] sm:$0xff] %v10531_v58 }
 0x238   : > { %14439 = vst [vmem:[#allocation77_spill] sm:$0xff] %v10549_v1  ;;  %14440 = vst [vmem:[#allocation78_spill] sm:$0xff] %v10553_v49  ;;  %v2493_v2 = vpack.c.bf16 %v10549_v1, %v10545_v48  ;;  %v14446_v48 = vld [vmem:[#allocation19_spill] sm:$0xff] }
 0x239   : > { %14442 = vst [vmem:[#allocation80_spill] sm:$0xff] %v10571_v41  ;;  %v10583_v1 = vadd.f32 %v14446_v48, %v9882_v59 }
 0x23b   : > { %9181 = vmatmul.mubr.msk.bf16.gmra.mrb[56].mxu1 %vm2503_vm5, %v2488_v16  ;;  %v10533_v16 = vpop.f32.mrb[80].mxu0  ;;  %14447 = vst [vmem:[#allocation19_spill] sm:$0xff] %v10583_v1 }
 0x23c   : > { %9184 = vmatprep.mubr.msk.bf16.mxu1 %vm2503_vm5, %v2489_v46  ;;  %v2490_v46 = vpack.c.bf16 %v10531_v58, %v10527_v7  ;;  %v10539_v13 = vpop.f32.mrb[81].mxu0  ;;  %v10557_v7 = vadd.f32 %v10212_v62, %v9882_v59  ;;  %v10575_v62 = vadd.f32 %v9882_v59, %v10232_v32  ;;  %v10579_v58 = vadd.f32 %v14444_v34, %v9882_v59  ;;  %v14450_v34 = vld [vmem:[#allocation21_spill] sm:$0xff] }
 0x23d   : > { %v10559_v39 = vpop.f32.mrb[82].mxu0  ;;  %v10593_v32 = vadd.f32 %v14448_v21, %v9882_v59 }
 0x23e   : > { %14441 = vst [vmem:[#allocation79_spill] sm:$0xff] %v10557_v7  ;;  %14443 = vst [vmem:[#allocation81_spill] sm:$0xff] %v10575_v62 }
 0x23f   : > { %14445 = vst [vmem:[#allocation18_spill] sm:$0xff] %v10579_v58  ;;  %14449 = vst [vmem:[#allocation20_spill] sm:$0xff] %v10593_v32 }
 0x243   : > { %9185 = vmatmul.mubr.msk.bf16.gmra.mrb[60].mxu1 %vm2503_vm5, %v2490_v46  ;;  %v10561_v46 = vpop.f32.mrb[83].mxu0 }
 0x244   : > { %9188 = vmatprep.mubr.msk.bf16.mxu1 %vm2503_vm5, %v2491_v61  ;;  %v2492_v61 = vpack.c.bf16 %v10557_v7, %v10553_v49  ;;  %v10597_v49 = vadd.f32 %v14450_v34, %v9882_v59  ;;  %v10615_v59 = vld [vmem:[%s13970_s12] ss:$0 sm:$0xff] }
 0x246   : > { %14451 = vst [vmem:[#allocation21_spill] sm:$0xff] %v10597_v49  ;;  %v2496_v48 = vpack.c.bf16 %v10597_v49, %v10593_v32 }
 0x24b   : > { %9189 = vmatmul.mubr.msk.bf16.gmra.mrb[64].mxu1 %vm2503_vm5, %v2492_v61  ;;  %v2495_v61 = vpack.c.bf16 %v10575_v62, %v10571_v41  ;;  %v10602_v41 = vpop.permute.xlu0 %3803 }
 0x24c   : > { %9192 = vmatprep.mubr.msk.bf16.mxu1 %vm2503_vm5, %v2493_v2  ;;  %v2494_v2 = vpack.c.bf16 %v10583_v1, %v10579_v58  ;;  %14452 = vst [vmem:[#allocation82_spill] sm:$0xff] %v10602_v41  ;;  %v10604_v58 = vpop.permute.xlu1 %3843 }
 0x24d   : > { %14453 = vst [vmem:[#allocation83_spill] sm:$0xff] %v10604_v58 }
 0x253   : > { %9193 = vmatmul.mubr.msk.bf16.gmra.mrb[68].mxu1 %vm2503_vm5, %v2494_v2  ;;  %v10606_v2 = vpop.permute.xlu0 %3883 }
 0x254   : > { %9196 = vmatprep.mubr.msk.bf16.mxu1 %vm2503_vm5, %v2495_v61  ;;  %14454 = vst [vmem:[#allocation84_spill] sm:$0xff] %v10606_v2  ;;  %v10608_v61 = vpop.permute.xlu1 %3848 }
 0x255   : > { %14455 = vst [vmem:[#allocation85_spill] sm:$0xff] %v10608_v61 }
 0x257   : > { %v10610_v62 = vpop.permute.xlu0 %3923 }
 0x258   : > { %14456 = vst [vmem:[#allocation86_spill] sm:$0xff] %v10610_v62  ;;  %v10620_v49 = vpop.permute.xlu1 %3853 }
 0x259   : > { %14457 = vst [vmem:[#allocation87_spill] sm:$0xff] %v10620_v49 }
 0x25b   : > { %9197 = vmatmul.mubr.msk.bf16.gmra.mrb[72].mxu1 %vm2503_vm5, %v2496_v48  ;;  %v10623_v27 = vpop.permute.xlu0 %3808 }
 0x25c   : > { %14459 = vst [vmem:[#allocation4_spill] sm:$0xff] %v10623_v27  ;;  %v10630_v44 = vpop.permute.xlu1 %3888 }
 0x25d   : > { %14460 = vst [vmem:[#allocation88_spill] sm:$0xff] %v10630_v44 }
 0x25f   : > { %v10638_v35 = vpop.permute.xlu0 %3813 }
 0x260   : > { %14462 = vst [vmem:[#allocation5_spill] sm:$0xff] %v10638_v35 }
 0x2ae   : > { %v10617_v21 = vpop.f32.mrb[8].mxu1 }
 0x2af   : > { %v2351_v34 = vpop.f32.mrb[9].mxu1 }
 0x2b0   : > { %v2352_v48 = vadd.f32 %v10615_v59, %v2351_v34  ;;  %v9117_v32 = vpop.f32.mrb[10].mxu1 }
 0x2b1   : > { %v2354_v1 = vpop.f32.mrb[11].mxu1 }
 0x2b2   : > { %v2897_v7 = vcombine.high %v2352_v48, %v2352_v48  ;;  %v2904_v53 = vrot.slane %v2352_v48, %v14458_v31  ;;  %v10626_v36 = vadd.f32 %v10615_v59, %v2354_v1 }
 0x2b4   : > { %v2911_v14 = vrot.slane %v2897_v7, %v14458_v31  ;;  %v2912_v23 = vcombine.high %v2904_v53, %v2904_v53  ;;  %v2920_v22 = vrot.slane %v2904_v53, %v14458_v31  ;;  %v2953_v48 = vrot.slane %v10626_v36, %v14458_v31 }
 0x2b6   : > { %v2913_v43 = vcombine.high %v2911_v14, %v2911_v14  ;;  %v2942_v25 = vcombine.high %v2920_v22, %v2920_v22  ;;  %v9120_v34 = vpop.f32.mrb[12].mxu1  ;;  %v3292_v9 = vrot.slane %v2920_v22, %v14461_v24  ;;  %v2934_v1 = vrot.slane %v2912_v23, %v14458_v31 }
 0x2b7   : > { %v2367_v54 = vpop.f32.mrb[13].mxu1  ;;  %v2927_v7 = vrot.slane %v2911_v14, %v14458_v31  ;;  %v10642_v33 = vadd.f32 %v9120_v34, %v10615_v59  ;;  %v2969_v23 = vrot.slane %v2953_v48, %v14458_v31  ;;  %v10655_v34 = vpop.permute.xlu1 %3928 }
 0x2b8   : > { %v3300_v17 = vrot.slane %v2942_v25, %v14461_v24  ;;  %v9121_v50 = vpop.f32.mrb[14].mxu1  ;;  %v3609_v53 = vadd.f32 %v3292_v9, %v10479_v42  ;;  %v2941_v22 = vrot.slane %v2913_v43, %v14458_v31  ;;  %v2944_v6 = vcombine.high %v2934_v1, %v2934_v1  ;;  %14463 = vst [vmem:[#allocation89_spill] sm:$0xff] %v10655_v34 }
 0x2b9   : > { %v2370_v38 = vpop.f32.mrb[15].mxu1  ;;  %v3296_v25 = vrot.slane %v2934_v1, %v14461_v24  ;;  %v2943_v56 = vcombine.high %v2927_v7, %v2927_v7  ;;  %v3308_v14 = vrot.slane %v2927_v7, %v14461_v24  ;;  %v10653_v43 = vadd.f32 %v10615_v59, %v2367_v54 }
 0x2ba   : > { %v3611_v15 = vadd.f32 %v10473_v11, %v3300_v17  ;;  %v2945_v12 = vcombine.high %v2941_v22, %v2941_v22  ;;  %v3304_v45 = vrot.slane %v2944_v6, %v14461_v24  ;;  %v10663_v6 = vpop.permute.xlu0 %3818  ;;  %v10667_v54 = vadd.f32 %v9121_v50, %v10615_v59 }
 0x2bb   : > { %v3610_v9 = vadd.f32 %v3296_v25, %v10493_v47  ;;  %v3316_v42 = vrot.slane %v2943_v56, %v14461_v24  ;;  %v3613_v17 = vadd.f32 %v3308_v14, %v10507_v19  ;;  %14464 = vst [vmem:[#allocation90_spill] sm:$0xff] %v10663_v6  ;;  %v2961_v47 = vcombine.high %v2953_v48, %v2953_v48  ;;  %v10679_v14 = vpop.permute.xlu1 %3858 }
 0x2bc   : > { %v3612_v11 = vadd.f32 %v10482_v55, %v3304_v45  ;;  %v3320_v7 = vrot.slane %v2945_v12, %v14461_v24  ;;  %v3312_v56 = vrot.slane %v2941_v22, %v14461_v24  ;;  %14465 = vst [vmem:[#allocation91_spill] sm:$0xff] %v10667_v54  ;;  %v2991_v19 = vcombine.high %v2969_v23, %v2969_v23 }
 0x2bd   : > { %v3615_v1 = vadd.f32 %v10503_v18, %v3316_v42  ;;  %v10671_v45 = vadd.f32 %v10615_v59, %v2370_v38  ;;  %14467 = vst [vmem:[#allocation93_spill] sm:$0xff] %v10679_v14  ;;  %v3324_v50 = vrot.slane %v2969_v23, %v14461_v24  ;;  %v2983_v22 = vrot.slane %v2961_v47, %v14458_v31 }
 0x2be   : > { %v10661_v37 = vpop.f32.mrb[16].mxu1  ;;  %v3616_v10 = vadd.f32 %v10511_v51, %v3320_v7  ;;  %v3614_v12 = vadd.f32 %v3312_v56, %v10523_v63  ;;  %v3332_v48 = vrot.slane %v2991_v19, %v14461_v24  ;;  %v10684_v42 = vpop.permute.xlu0 %3893  ;;  %v2360_v38 = vadd.f32 %v10617_v21, %v10615_v59 }
 0x2bf   : > { %v2432_v25 = vpop.f32.mrb[17].mxu1  ;;  %14466 = vst [vmem:[#allocation92_spill] sm:$0xff] %v10671_v45  ;;  %14468 = vst [vmem:[#allocation94_spill] sm:$0xff] %v10684_v42  ;;  %v3617_v7 = vadd.f32 %v3324_v50, %v10539_v13  ;;  %v2363_v63 = vadd.f32 %v9117_v32, %v10615_v59  ;;  %v2993_v56 = vcombine.high %v2983_v22, %v2983_v22 }
 0x2c0   : > { %v10673_v18 = vpop.f32.mrb[18].mxu1  ;;  %v3619_v51 = vadd.f32 %v10533_v16, %v3332_v48  ;;  %v3328_v19 = vrot.slane %v2983_v22, %v14461_v24  ;;  %v3673_v29 = vadd.f32 %v3609_v53, %v2432_v25  ;;  %v3674_v23 = vadd.f32 %v3610_v9, %v2432_v25  ;;  %v10707_v53 = vpop.permute.xlu1 %3933 }
 0x2c1   : > { %v10676_v55 = vpop.f32.mrb[19].mxu1  ;;  %v3675_v40 = vadd.f32 %v3611_v15, %v2432_v25  ;;  %v10693_v47 = vadd.f32 %v3612_v11, %v2432_v25  ;;  %v10695_v16 = vadd.f32 %v3613_v17, %v2432_v25  ;;  %v3336_v21 = vrot.slane %v2993_v56, %v14461_v24  ;;  %14472 = vst [vmem:[#allocation98_spill] sm:$0xff] %v10707_v53 }
 0x2c2   : > { %v3618_v13 = vadd.f32 %v3328_v19, %v10561_v46  ;;  %v10701_v50 = vadd.f32 %v3614_v12, %v2432_v25  ;;  %v10703_v32 = vadd.f32 %v3615_v1, %v2432_v25  ;;  %v10709_v9 = vadd.f32 %v3616_v10, %v2432_v25  ;;  %v10714_v22 = vpop.permute.xlu0 %3823 }
 0x2c3   : > { %v2995_v17 = vcombine.high %v2360_v38, %v2360_v38  ;;  %v3620_v11 = vadd.f32 %v10559_v39, %v3336_v21  ;;  %14474 = vst [vmem:[#allocation100_spill] sm:$0xff] %v10714_v22  ;;  %v2946_v46 = vcombine.high %v10626_v36, %v10626_v36  ;;  %v3044_v12 = vcombine.high %v2363_v63, %v2363_v63 }
 0x2c4   : > { %v10719_v1 = vrot.slane %v2360_v38, %v14458_v31  ;;  %v10722_v56 = vadd.f32 %v3617_v7, %v10676_v55  ;;  %v10727_v19 = vpop.permute.xlu1 %3863  ;;  %v3093_v21 = vcombine.high %v10653_v43, %v10653_v43  ;;  %v3737_v60 = vmax.f32 %v3673_v29, 0.0 }
 0x2c5   : > { %v10725_v10 = vrot.slane %v2995_v17, %v14458_v31  ;;  %14475 = vst [vmem:[#allocation101_spill] sm:$0xff] %v10727_v19  ;;  %v2960_v39 = vrot.slane %v2946_v46, %v14458_v31  ;;  %v10733_v36 = vadd.f32 %v3618_v13, %v10676_v55  ;;  %v10736_v30 = vrot.slane %v2363_v63, %v14458_v31 }
 0x2c6   : > { %v10691_v52 = vpop.f32.mrb[20].mxu1  ;;  %v10739_v7 = vrot.slane %v3044_v12, %v14458_v31  ;;  %v10742_v17 = vadd.f32 %v3619_v51, %v10676_v55  ;;  %v10746_v46 = vpop.permute.xlu0 %3898  ;;  %v3191_v13 = vcombine.high %v10642_v33, %v10642_v33  ;;  %v10753_v5 = vadd.f32 %v3620_v11, %v10676_v55 }
 0x2c7   : > { %14469 = vst [vmem:[#allocation95_spill] sm:$0xff] %v10691_v52  ;;  %v10697_v48 = vpop.f32.mrb[21].mxu1  ;;  %14476 = vst [vmem:[#allocation102_spill] sm:$0xff] %v10746_v46  ;;  %v10757_v12 = vrot.slane %v10719_v1, %v14458_v31  ;;  %v10761_v51 = vrot.slane %v10653_v43, %v14458_v31  ;;  %v3738_v8 = vmax.f32 %v3674_v23, 0.0  ;;  %v3739_v0 = vmax.f32 %v3675_v40, 0.0 }
 0x2c8   : > { %14470 = vst [vmem:[#allocation96_spill] sm:$0xff] %v10697_v48  ;;  %v10705_v59 = vpop.f32.mrb[22].mxu1  ;;  %v10766_v26 = vrot.slane %v3093_v21, %v14458_v31  ;;  %v10769_v11 = vmul.f32 %v10602_v41, %v3737_v60  ;;  %v2976_v3 = vrot.slane %v2960_v39, %v14458_v31  ;;  %v10778_v40 = vrot.slane %v10736_v30, %v14458_v31  ;;  %v10780_v29 = vpop.permute.xlu1 %3938 }
 0x2c9   : > { %14471 = vst [vmem:[#allocation97_spill] sm:$0xff] %v10705_v59  ;;  %v10711_v15 = vpop.f32.mrb[23].mxu1  ;;  %14477 = vst [vmem:[#allocation103_spill] sm:$0xff] %v10761_v51  ;;  %v2962_v23 = vcombine.high %v2960_v39, %v2960_v39  ;;  %v10784_v21 = vrot.slane %v10642_v33, %v14458_v31  ;;  %v10787_v60 = vrot.slane %v3191_v13, %v14458_v31  ;;  %v3740_v41 = vmax.f32 %v10693_v47, 0.0 }
 0x2ca   : > { %14473 = vst [vmem:[#allocation99_spill] sm:$0xff] %v10711_v15  ;;  %14478 = vst [vmem:[#allocation104_spill] sm:$0xff] %v10766_v26  ;;  %v2992_v4 = vcombine.high %v2976_v3, %v2976_v3  ;;  %v10793_v28 = vmul.f32 %v10623_v27, %v3738_v8  ;;  %v10796_v39 = vmul.f32 %v10638_v35, %v3739_v0  ;;  %v10799_v33 = vpop.permute.xlu0 %3828  ;;  %v4185_v43 = vsel %vm2503_vm5, %v10769_v11, 0.0 }
 0x2cb   : > { %14479 = vst [vmem:[#allocation105_spill] sm:$0xff] %v10769_v11  ;;  %14480 = vst [vmem:[#allocation106_spill] sm:$0xff] %v10780_v29  ;;  %v3340_v57 = vrot.slane %v2976_v3, %v14461_v24  ;;  %v10805_v47 = vrot.slane %v10761_v51, %v14458_v31  ;;  %v3741_v0 = vmax.f32 %v10695_v16, 0.0  ;;  %v3742_v3 = vmax.f32 %v10701_v50, 0.0 }
 0x2cc   : > { %14481 = vst [vmem:[#allocation107_spill] sm:$0xff] %v10784_v21  ;;  %14482 = vst [vmem:[#allocation108_spill] sm:$0xff] %v10787_v60  ;;  %v3348_v8 = vrot.slane %v2992_v4, %v14461_v24  ;;  %v3743_v35 = vmax.f32 %v10703_v32, 0.0  ;;  %v10816_v13 = vmul.f32 %v10663_v6, %v3740_v41  ;;  %v2990_v54 = vrot.slane %v2962_v23, %v14458_v31  ;;  %v10828_v32 = vpop.permute.xlu1 %3868 }
 0x2cd   : > { %14483 = vst [vmem:[#allocation109_spill] sm:$0xff] %v10793_v28  ;;  %14484 = vst [vmem:[#allocation110_spill] sm:$0xff] %v10796_v39  ;;  %v3040_v11 = vcombine.high %v10757_v12, %v10757_v12  ;;  %v4186_v60 = vrot.slane %v4185_v43, 4  ;;  %v4192_v16 = vsel %vm2503_vm5, %v10793_v28, 0.0  ;;  %v3745_v41 = vmax.f32 %v10722_v56, 0.0 }
 0x2ce   : > { %v9150_v25 = vpop.f32.mrb[24].mxu1  ;;  %14485 = vst [vmem:[#allocation111_spill] sm:$0xff] %v10799_v33  ;;  %14486 = vst [vmem:[#allocation112_spill] sm:$0xff] %v10805_v47  ;;  %v3344_v23 = vrot.slane %v2990_v54, %v14461_v24  ;;  %v10837_v6 = vmul.f32 %v10714_v22, %v3741_v0  ;;  %v10840_v28 = vmul.f32 %v10799_v33, %v3742_v3  ;;  %v4193_v21 = vrot.slane %v4192_v16, 4 }
 0x2cf   : > { %v2682_v38 = vpop.f32.mrb[25].mxu1  ;;  %14487 = vst [vmem:[#allocation113_spill] sm:$0xff] %v10816_v13  ;;  %v3623_v45 = vadd.f32 %v9150_v25, %v3348_v8  ;;  %14488 = vst [vmem:[#allocation114_spill] sm:$0xff] %v10828_v32  ;;  %v3746_v8 = vmax.f32 %v10733_v36, 0.0  ;;  %v3356_v0 = vrot.slane %v10757_v12, %v14461_v24  ;;  %v4187_v33 = vadd.f32 %v4186_v60, %v4185_v43 }
 0x2d0   : > { %v10744_v20 = vpop.f32.mrb[26].mxu1  ;;  %v3621_v52 = vadd.f32 %v3340_v57, %v2682_v38  ;;  %v4199_v57 = vsel %vm2503_vm5, %v10796_v39, 0.0  ;;  %v2994_v38 = vcombine.high %v2990_v54, %v2990_v54  ;;  %14489 = vst [vmem:[#allocation115_spill] sm:$0xff] %v10837_v6  ;;  %14490 = vst [vmem:[#allocation116_spill] sm:$0xff] %v10840_v28  ;;  %v10843_v39 = vpop.permute.xlu0 %3903  ;;  %v3747_v36 = vmax.f32 %v10742_v17, 0.0 }
 0x2d1   : > { %v2685_v63 = vpop.f32.mrb[27].mxu1  ;;  %v10832_v25 = vadd.f32 %v3623_v45, %v10676_v55  ;;  %14491 = vst [vmem:[#allocation117_spill] sm:$0xff] %v10843_v39  ;;  %v4206_v45 = vsel %vm2503_vm5, %v10816_v13, 0.0  ;;  %v4200_v54 = vrot.slane %v4199_v57, 4  ;;  %v4194_v43 = vadd.f32 %v4193_v21, %v4192_v16 }
 0x2d2   : > { %v3685_v50 = vadd.f32 %v3621_v52, %v10676_v55  ;;  %v3364_v52 = vrot.slane %v3040_v11, %v14461_v24  ;;  %v3352_v56 = vrot.slane %v2994_v38, %v14461_v24  ;;  %v3622_v26 = vadd.f32 %v3344_v23, %v2685_v63 }
 0x2d3   : > { %v10854_v11 = vmul.f32 %v10604_v58, %v3745_v41  ;;  %v4207_v63 = vrot.slane %v4206_v45, 4  ;;  %v10870_v60 = vsel %vm2503_vm5, %v10837_v6, 0.0  ;;  %v10879_v17 = vmul.f32 %v10608_v61, %v3746_v8 }
 0x2d4   : > { %v3624_v22 = vadd.f32 %v10744_v20, %v3352_v56  ;;  %v10858_v13 = vadd.f32 %v3622_v26, %v10676_v55  ;;  %v3748_v26 = vmax.f32 %v10753_v5, 0.0  ;;  %v4188_v21 = vrot.slane %v4187_v33, 2 }
 0x2d5   : > { %14492 = vst [vmem:[#allocation118_spill] sm:$0xff] %v10854_v11  ;;  %14494 = vst [vmem:[#allocation120_spill] sm:$0xff] %v10879_v17  ;;  %v10884_v16 = vadd.f32 %v4200_v54, %v4199_v57  ;;  %v4241_v5 = vsel %vm2503_vm5, %v10854_v11, 0.0  ;;  %v4195_v57 = vrot.slane %v4194_v43, 2  ;;  %v10920_v54 = vadd.f32 %v4207_v63, %v4206_v45 }
 0x2d6   : > { %v9154_v59 = vpop.f32.mrb[28].mxu1  ;;  %v10874_v20 = vadd.f32 %v3624_v22, %v10676_v55  ;;  %v14496_v55 = vcombine.high %v10719_v1, %v10719_v1  ;;  %v10904_v61 = vmul.f32 %v10679_v14, %v3748_v26  ;;  %v4242_v1 = vrot.slane %v4241_v5, 4 }
 0x2d7   : > { %v2698_v27 = vpop.f32.mrb[29].mxu1  ;;  %v3627_v48 = vadd.f32 %v9154_v59, %v3364_v52  ;;  %v10866_v52 = vpop.permute.xlu1 %3943 }
 0x2d8   : > { %v10813_v15 = vpop.f32.mrb[30].mxu1  ;;  %v3625_v23 = vadd.f32 %v3356_v0, %v2698_v27  ;;  %14493 = vst [vmem:[#allocation119_spill] sm:$0xff] %v10866_v52  ;;  %v3749_v27 = vmax.f32 %v3685_v50, 0.0  ;;  %v10882_v0 = vpop.permute.xlu0 %3833  ;;  %v3032_v22 = vrot.slane %v14496_v55, %v14458_v31  ;;  %v10896_v50 = vmul.f32 %v10620_v49, %v3747_v36  ;;  %14500 = vst [vmem:[#allocation125_spill] sm:$0xff] %v10904_v61 }
 0x2d9   : > { %v10821_v4 = vpop.f32.mrb[31].mxu1  ;;  %v3691_v59 = vadd.f32 %v10661_v37, %v3627_v48  ;;  %14495 = vst [vmem:[#allocation121_spill] sm:$0xff] %v10882_v0  ;;  %v10893_v8 = vmul.f32 %v10882_v0, %v3743_v35  ;;  %v4248_v35 = vsel %vm2503_vm5, %v10879_v17, 0.0  ;;  %v4262_v45 = vsel %vm2503_vm5, %v10904_v61, 0.0 }
 0x2da   : > { %v3689_v56 = vadd.f32 %v10661_v37, %v3625_v23  ;;  %14498 = vst [vmem:[#allocation123_spill] sm:$0xff] %v10896_v50  ;;  %v10909_v55 = vmul.f32 %v10727_v19, %v3749_v27  ;;  %v4255_v27 = vsel %vm2503_vm5, %v10896_v50, 0.0  ;;  %v3360_v0 = vrot.slane %v3032_v22, %v14461_v24 }
 0x2db   : > { %v3755_v48 = vmax.f32 %v3691_v59, 0.0  ;;  %14497 = vst [vmem:[#allocation122_spill] sm:$0xff] %v10893_v8  ;;  %v3751_v59 = vmax.f32 %v10832_v25, 0.0  ;;  %v4243_v50 = vadd.f32 %v4242_v1, %v4241_v5  ;;  %v4263_v11 = vrot.slane %v4262_v45, 4 }
 0x2dc   : > { %v3753_v58 = vmax.f32 %v3689_v56, 0.0  ;;  %14501 = vst [vmem:[#allocation126_spill] sm:$0xff] %v10909_v55  ;;  %v3042_v56 = vcombine.high %v3032_v22, %v3032_v22  ;;  %v3626_v22 = vadd.f32 %v3360_v0, %v10821_v4  ;;  %v3025_v4 = vrot.slane %v10725_v10, %v14458_v31  ;;  %v10966_v47 = vpop.permute.xlu0 %3908 }
 0x2dd   : > { %v10900_v23 = vmul.f32 %v10684_v42, %v3755_v48  ;;  %v10915_v48 = vpop.permute.xlu1 %3873  ;;  %v10917_v42 = vadd.f32 %v4188_v21, %v4187_v33  ;;  %v10932_v33 = vadd.f32 %v4195_v57, %v4194_v43  ;;  %v4249_v21 = vrot.slane %v4248_v35, 4  ;;  %14507 = vst [vmem:[#allocation132_spill] sm:$0xff] %v10966_v47 }
 0x2de   : > { %v10851_v3 = vpop.f32.mrb[32].mxu1  ;;  %14502 = vst [vmem:[#allocation127_spill] sm:$0xff] %v10915_v48  ;;  %v10927_v19 = vmul.f32 %v10915_v48, %v3751_v59  ;;  %v10937_v63 = vmul.f32 %v10606_v2, %v3753_v58  ;;  %v4269_v59 = vsel %vm2503_vm5, %v10909_v55, 0.0  ;;  %v4256_v43 = vrot.slane %v4255_v27, 4 }
 0x2df   : > { %v10860_v38 = vpop.f32.mrb[33].mxu1  ;;  %14499 = vst [vmem:[#allocation124_spill] sm:$0xff] %v10900_v23  ;;  %v4311_v25 = vsel %vm2503_vm5, %v10900_v23, 0.0  ;;  %14503 = vst [vmem:[#allocation128_spill] sm:$0xff] %v10917_v42  ;;  %v3368_v61 = vrot.slane %v3042_v56, %v14461_v24  ;;  %v4270_v1 = vrot.slane %v4269_v59, 4  ;;  %v10955_v17 = vadd.f32 %v4249_v21, %v4248_v35 }
 0x2e0   : > { %v10864_v12 = vpop.f32.mrb[34].mxu1  ;;  %14504 = vst [vmem:[#allocation129_spill] sm:$0xff] %v10927_v19  ;;  %v4312_v49 = vrot.slane %v4311_v25, 4  ;;  %14505 = vst [vmem:[#allocation130_spill] sm:$0xff] %v10937_v63  ;;  %v4297_v57 = vsel %vm2503_vm5, %v10937_v63, 0.0  ;;  %v4283_v58 = vsel %vm2503_vm5, %v10927_v19, 0.0  ;;  %v10961_v19 = vadd.f32 %v4256_v43, %v4255_v27 }
 0x2e1   : > { %v10876_v41 = vpop.f32.mrb[35].mxu1  ;;  %v4298_v5 = vrot.slane %v4297_v57, 4  ;;  %v3628_v55 = vadd.f32 %v10813_v15, %v3368_v61  ;;  %v10959_v6 = vpop.permute.xlu1 %3948  ;;  %v4284_v51 = vrot.slane %v4283_v58, 4  ;;  %v10968_v42 = vadd.f32 %v4263_v11, %v4262_v45 }
 0x2e2   : > { %v4313_v48 = vadd.f32 %v4312_v49, %v4311_v25  ;;  %v3690_v49 = vadd.f32 %v10661_v37, %v3626_v22  ;;  %v4244_v25 = vrot.slane %v4243_v50, 2  ;;  %14506 = vst [vmem:[#allocation131_spill] sm:$0xff] %v10959_v6  ;;  %v3750_v35 = vmax.f32 %v10858_v13, 0.0 }
 0x2e3   : > { %v4299_v56 = vadd.f32 %v4298_v5, %v4297_v57  ;;  %v3692_v61 = vadd.f32 %v10661_v37, %v3628_v55  ;;  %v10973_v0 = vadd.f32 %v4270_v1, %v4269_v59  ;;  %v3041_v55 = vcombine.high %v3025_v4, %v3025_v4 }
 0x2e4   : > { %v4314_v2 = vrot.slane %v4313_v48, 2  ;;  %v3754_v15 = vmax.f32 %v3690_v49, 0.0  ;;  %v10980_v6 = vadd.f32 %v4244_v25, %v4243_v50  ;;  %v3752_v45 = vmax.f32 %v10874_v20, 0.0 }
 0x2e5   : > { %v4300_v57 = vrot.slane %v4299_v56, 2  ;;  %v3756_v27 = vmax.f32 %v3692_v61, 0.0  ;;  %v10993_v61 = vmul.f32 %v10828_v32, %v3750_v35  ;;  %v10995_v11 = vpop.permute.xlu1 %3878 }
 0x2e6   : > { %v10913_v36 = vpop.f32.mrb[36].mxu1  ;;  %v4315_v21 = vadd.f32 %v4314_v2, %v4313_v48  ;;  %v10976_v43 = vmul.f32 %v10630_v44, %v3754_v15  ;;  %v10985_v48 = vadd.f32 %v4284_v51, %v4283_v58  ;;  %14511 = vst [vmem:[#allocation136_spill] sm:$0xff] %v10995_v11  ;;  %v3380_v58 = vrot.slane %v3041_v55, %v14461_v24 }
 0x2e7   : > { %v10922_v14 = vpop.f32.mrb[37].mxu1  ;;  %v4301_v13 = vadd.f32 %v4300_v57, %v4299_v56  ;;  %v10988_v59 = vmul.f32 %v10746_v46, %v3756_v27  ;;  %14510 = vst [vmem:[#allocation135_spill] sm:$0xff] %v10993_v61  ;;  %v3372_v56 = vrot.slane %v3025_v4, %v14461_v24  ;;  %v11002_v57 = vpop.permute.xlu0 %3838  ;;  %v11005_v27 = vmul.f32 %v10995_v11, %v3752_v45 }
 0x2e8   : > { %v10930_v23 = vpop.f32.mrb[38].mxu1  ;;  %14508 = vst [vmem:[#allocation133_spill] sm:$0xff] %v10976_v43  ;;  %v4304_v1 = vsel %vm2503_vm5, %v10976_v43, 0.0  ;;  %v4316_v50 = vrot.slane %v4315_v21, 1  ;;  %14512 = vst [vmem:[#allocation137_spill] sm:$0xff] %v11002_v57  ;;  %v3631_v32 = vadd.f32 %v10851_v3, %v3380_v58  ;;  %v14515_v55 = vcombine.high %v10725_v10, %v10725_v10 }
 0x2e9   : > { %v10939_v26 = vpop.f32.mrb[39].mxu1  ;;  %14509 = vst [vmem:[#allocation134_spill] sm:$0xff] %v10988_v59  ;;  %v4302_v25 = vrot.slane %v4301_v13, 1  ;;  %v4305_v15 = vrot.slane %v4304_v1, 4  ;;  %v4318_v51 = vsel %vm2503_vm5, %v10988_v59, 0.0  ;;  %14513 = vst [vmem:[#allocation138_spill] sm:$0xff] %v11005_v27  ;;  %v3629_v20 = vadd.f32 %v3372_v56, %v10860_v38 }
 0x2ea   : > { %v4319_v2 = vrot.slane %v4318_v51, 4  ;;  %v3039_v59 = vrot.slane %v14515_v55, %v14458_v31  ;;  %v3089_v4 = vcombine.high %v10778_v40, %v10778_v40  ;;  %v4317_v45 = vadd.f32 %v4316_v50, %v4315_v21 }
 0x2eb   : > { %v4303_v35 = vadd.f32 %v4302_v25, %v4301_v13  ;;  %v4306_v44 = vadd.f32 %v4305_v15, %v4304_v1  ;;  %v3695_v3 = vadd.f32 %v10661_v37, %v3631_v32  ;;  %v3693_v38 = vadd.f32 %v10661_v37, %v3629_v20  ;;  %v11031_v20 = vpop.permute.xlu0 %3913 }
 0x2ec   : > { %v4320_v25 = vadd.f32 %v4319_v2, %v4318_v51  ;;  %v3043_v58 = vcombine.high %v3039_v59, %v3039_v59  ;;  %v3376_v56 = vrot.slane %v3039_v59, %v14461_v24  ;;  %v3388_v21 = vrot.slane %v10778_v40, %v14461_v24  ;;  %14517 = vst [vmem:[#allocation141_spill] sm:$0xff] %v11031_v20  ;;  %v9459_v40 = vld [vmem:[%s13972_s14] sm:$0xff]  }
 0x2ed   : > { %v4655_v13 = vpack.c.bf16 %v4303_v35, %v4303_v35  ;;  %v4307_v1 = vrot.slane %v4306_v44, 2  ;;  %v3759_v2 = vmax.f32 %v3695_v3, 0.0  ;;  %v3757_v50 = vmax.f32 %v3693_v38, 0.0  ;;  %9200 = vmatprep.subr.bf16.mxu0 %v9459_v40 }
 0x2ee   : > { %v10957_v63 = vpop.f32.mrb[40].mxu1  ;;  %v4321_v55 = vrot.slane %v4320_v25, 2  ;;  %v3384_v51 = vrot.slane %v3043_v58, %v14461_v24  ;;  %v3630_v32 = vadd.f32 %v3376_v56, %v10876_v41  ;;  %v4657_v58 = vpack.c.bf16 %v4317_v45, %v4317_v45  ;;  %9201 = vmatpush3.bf16.msra.mxu0 %v9459_v40 }
 0x2ef   : > { %v10964_v22 = vpop.f32.mrb[41].mxu1  ;;  %v4308_v11 = vadd.f32 %v4307_v1, %v4306_v44  ;;  %v3633_v44 = vadd.f32 %v3388_v21, %v10922_v14  ;;  %v11042_v1 = vmul.f32 %v10843_v39, %v3757_v50  ;;  %v4783_v56 = vunpack.c.l.b16 %v4655_v13 }
 0x2f0   : > { %v10971_v5 = vpop.f32.mrb[42].mxu1  ;;  %v4322_v35 = vadd.f32 %v4321_v55, %v4320_v25  ;;  %v3632_v41 = vadd.f32 %v10864_v12, %v3384_v51  ;;  %v3694_v25 = vadd.f32 %v10661_v37, %v3630_v32  ;;  %v4286_v40 = vrot.slane %v10985_v48, 2 }
 0x2f1   : > { %v10978_v49 = vpop.f32.mrb[43].mxu1  ;;  %v4309_v59 = vrot.slane %v4308_v11, 1  ;;  %14519 = vst [vmem:[#allocation143_spill] sm:$0xff] %v11042_v1  ;;  %v3697_v14 = vadd.f32 %v10673_v18, %v3633_v44  ;;  %v4325_v21 = vsel %vm2503_vm5, %v11042_v1, 0.0 }
 0x2f2   : > { %v4323_v3 = vrot.slane %v4322_v35, 1  ;;  %v11059_v32 = vadd.f32 %v10661_v37, %v3632_v41  ;;  %v3758_v45 = vmax.f32 %v3694_v25, 0.0 }
 0x2f3   : > { %v4310_v38 = vadd.f32 %v4309_v59, %v4308_v11  ;;  %v3761_v59 = vmax.f32 %v3697_v14, 0.0  ;;  %v4276_v14 = vsel %vm2503_vm5, %v10993_v61, 0.0 }
 0x2f5   : > { %v4656_v11 = vpack.c.bf16 %v4310_v38, %v4310_v38 }
 0x2f6   : > { %v11007_v46 = vpop.f32.mrb[44].mxu1 }
 0x2f7   : > { %14514 = vst [vmem:[#allocation139_spill] sm:$0xff] %v11007_v46  ;;  %v11017_v43 = vpop.f32.mrb[45].mxu1  ;;  %v3396_v46 = vrot.slane %v3089_v4, %v14461_v24  ;;  %v11039_v4 = vmul.f32 %v11031_v20, %v3759_v2  ;;  %v4324_v2 = vadd.f32 %v4323_v3, %v4322_v35  ;;  %v4784_v39 = vunpack.c.l.b16 %v4656_v11 }
 0x2f8   : > { %v11019_v15 = vpop.f32.mrb[46].mxu1  ;;  %v4785_v35 = vunpack.c.l.b16 %v4657_v58  ;;  %v11065_v3 = vmul.f32 %v10966_v47, %v3758_v45  ;;  %v11077_v58 = vmul.f32 %v10610_v62, %v3761_v59  ;;  %v11094_v59 = vpop.permute.xlu0 %3918 }
 0x2f9   : > { %v11024_v10 = vpop.f32.mrb[47].mxu1  ;;  %14518 = vst [vmem:[#allocation142_spill] sm:$0xff] %v11039_v4  ;;  %v4339_v55 = vsel %vm2503_vm5, %v11039_v4, 0.0  ;;  %v4658_v20 = vpack.c.bf16 %v4324_v2, %v4324_v2  ;;  %v4852_v41 = vsel %vm4831_vm6, %v4784_v39, %v4783_v56  ;;  %v14525_v56 = vrot.slane %v10955_v17, 2  ;;  %14527 = vst [vmem:[#allocation150_spill] sm:$0xff] %v11094_v59 }
 0x2fa   : > { %14516 = vst [vmem:[#allocation140_spill] sm:$0xff] %v11024_v10  ;;  %v3635_v10 = vadd.f32 %v10913_v36, %v3396_v46  ;;  %v4340_v50 = vrot.slane %v4339_v55, 4  ;;  %14521 = vst [vmem:[#allocation145_spill] sm:$0xff] %v11065_v3  ;;  %v4353_v39 = vsel %vm2503_vm5, %v11077_v58, 0.0 }
 0x2fb   : > { %v4786_v37 = vunpack.c.l.b16 %v4658_v20  ;;  %14523 = vst [vmem:[#allocation147_spill] sm:$0xff] %v11077_v58  ;;  %v11086_v45 = vadd.f32 %v14525_v56, %v10955_v17 }
 0x2fc   : > { %v3699_v46 = vadd.f32 %v10673_v18, %v3635_v10  ;;  %v4326_v10 = vrot.slane %v4325_v21, 4  ;;  %v4341_v4 = vadd.f32 %v4340_v50, %v4339_v55  ;;  %v4853_v55 = vsel %vm4833_vm7, %v4785_v35, %v4852_v41 }
 0x2fd   : > { %v4854_v50 = vsel %vm4835_vm8, %v4786_v37, %v4853_v55  ;;  %v14528_v35 = vrot.slane %v10973_v0, 2  ;;  %v4277_v41 = vrot.slane %v4276_v14, 4 }
 0x2fe   : > { %v11048_v36 = vpop.f32.mrb[48].mxu1  ;;  %v3763_v13 = vmax.f32 %v3699_v46, 0.0  ;;  %v4327_v1 = vadd.f32 %v4326_v10, %v4325_v21  ;;  %v4342_v25 = vrot.slane %v4341_v4, 2  ;;  %v4332_v21 = vsel %vm2503_vm5, %v11065_v3, 0.0 }
 0x2ff   : > { %v11054_v12 = vpop.f32.mrb[49].mxu1  ;;  %v4333_v20 = vrot.slane %v4332_v21, 4  ;;  %v4273_v37 = vadd.f32 %v14528_v35, %v10973_v0 }
 0x300   : > { %v11056_v51 = vpop.f32.mrb[50].mxu1  ;;  %v11068_v38 = vmul.f32 %v10707_v53, %v3763_v13  ;;  %v4328_v46 = vrot.slane %v4327_v1, 2  ;;  %v4343_v2 = vadd.f32 %v4342_v25, %v4341_v4  ;;  %v4290_v13 = vsel %vm2503_vm5, %v11005_v27, 0.0 }
 0x301   : > { %v11061_v44 = vpop.f32.mrb[51].mxu1  ;;  %v14530_v53 = vcombine.high %v10736_v30, %v10736_v30  ;;  %v4291_v0 = vrot.slane %v4290_v13, 4 }
 0x302   : > { %14520 = vst [vmem:[#allocation144_spill] sm:$0xff] %v11061_v44  ;;  %14522 = vst [vmem:[#allocation146_spill] sm:$0xff] %v11068_v38  ;;  %v4329_v11 = vadd.f32 %v4328_v46, %v4327_v1  ;;  %v4367_v4 = vsel %vm2503_vm5, %v11068_v38, 0.0  ;;  %v4334_v46 = vadd.f32 %v4333_v20, %v4332_v21  ;;  %v4344_v55 = vrot.slane %v4343_v2, 1 }
 0x303   : > { %v4368_v56 = vrot.slane %v4367_v4, 4  ;;  %v3081_v62 = vrot.slane %v14530_v53, %v14458_v31  ;;  %v4287_v38 = vadd.f32 %v4286_v40, %v10985_v48  ;;  %v4354_v20 = vrot.slane %v4353_v39, 4  ;;  %v11113_v48 = vpop.permute.xlu0 %3963 }
 0x304   : > { %v4330_v25 = vrot.slane %v4329_v11, 1  ;;  %v4335_v3 = vrot.slane %v4334_v46, 2  ;;  %v4345_v44 = vadd.f32 %v4344_v55, %v4343_v2  ;;  %14532 = vst [vmem:[#allocation153_spill] sm:$0xff] %v11113_v48 }
 0x305   : > { %v4369_v21 = vadd.f32 %v4368_v56, %v4367_v4  ;;  %v3091_v27 = vcombine.high %v3081_v62, %v3081_v62  ;;  %v3392_v61 = vrot.slane %v3081_v62, %v14461_v24  ;;  %v4355_v30 = vadd.f32 %v4354_v20, %v4353_v39 }
 0x306   : > { %v11080_v10 = vpop.f32.mrb[52].mxu1  ;;  %v4331_v35 = vadd.f32 %v4330_v25, %v4329_v11  ;;  %v4288_v40 = vrot.slane %v4287_v38, 1  ;;  %v4292_v62 = vadd.f32 %v4291_v0, %v4290_v13  ;;  %v4661_v55 = vpack.c.bf16 %v4345_v44, %v4345_v44 }
 0x307   : > { %14524 = vst [vmem:[#allocation148_spill] sm:$0xff] %v11080_v10  ;;  %v11092_v1 = vpop.f32.mrb[53].mxu1  ;;  %v4278_v10 = vadd.f32 %v4277_v41, %v4276_v14  ;;  %v3400_v53 = vrot.slane %v3091_v27, %v14461_v24  ;;  %v4370_v25 = vrot.slane %v4369_v21, 2  ;;  %v4356_v14 = vrot.slane %v4355_v30, 2 }
 0x308   : > { %14526 = vst [vmem:[#allocation149_spill] sm:$0xff] %v11092_v1  ;;  %v11099_v17 = vpop.f32.mrb[54].mxu1  ;;  %v4659_v58 = vpack.c.bf16 %v4331_v35, %v4331_v35  ;;  %v4336_v1 = vadd.f32 %v4335_v3, %v4334_v46 }
 0x309   : > { %14529 = vst [vmem:[#allocation151_spill] sm:$0xff] %v11099_v17  ;;  %v11107_v47 = vpop.f32.mrb[55].mxu1  ;;  %v4274_v17 = vrot.slane %v4273_v37, 1  ;;  %v3636_v3 = vadd.f32 %v10930_v23, %v3400_v53  ;;  %v4279_v27 = vrot.slane %v4278_v10, 2 }
 0x30a   : > { %14531 = vst [vmem:[#allocation152_spill] sm:$0xff] %v11107_v47  ;;  %v3634_v47 = vadd.f32 %v3392_v61, %v10939_v26  ;;  %v4787_v11 = vunpack.c.l.b16 %v4659_v58  ;;  %v4337_v4 = vrot.slane %v4336_v1, 1  ;;  %v3074_v58 = vrot.slane %v10739_v7, %v14458_v31 }
 0x30b   : > { %v4275_v46 = vadd.f32 %v4274_v17, %v4273_v37  ;;  %v3700_v13 = vadd.f32 %v10673_v18, %v3636_v3  ;;  %v4289_v37 = vadd.f32 %v4288_v40, %v4287_v38  ;;  %v4280_v44 = vadd.f32 %v4279_v27, %v4278_v10 }
 0x30c   : > { %v3698_v2 = vadd.f32 %v10673_v18, %v3634_v47  ;;  %v4855_v26 = vsel %vm4837_vm9, %v4787_v11, %v4854_v50  ;;  %v4338_v61 = vadd.f32 %v4337_v4, %v4336_v1  ;;  %v4371_v47 = vadd.f32 %v4370_v25, %v4369_v21  ;;  %v11133_v4 = vpop.permute.xlu0 %4003 }
 0x30d   : > { %v3090_v20 = vcombine.high %v3074_v58, %v3074_v58  ;;  %v3404_v53 = vrot.slane %v3074_v58, %v14461_v24  ;;  %v4357_v50 = vadd.f32 %v4356_v14, %v4355_v30  ;;  %v3764_v1 = vmax.f32 %v3700_v13, 0.0  ;;  %14536 = vst [vmem:[#allocation157_spill] sm:$0xff] %v11133_v4 }
 0x30e   : > { %v11115_v56 = vpop.f32.mrb[56].mxu1  ;;  %v3762_v0 = vmax.f32 %v3698_v2, 0.0  ;;  %v4660_v23 = vpack.c.bf16 %v4338_v61, %v4338_v61  ;;  %v4651_v2 = vpack.c.bf16 %v4275_v46, %v4275_v46  ;;  %v4372_v14 = vrot.slane %v4371_v47, 1 }
 0x30f   : > { %14533 = vst [vmem:[#allocation154_spill] sm:$0xff] %v11115_v56  ;;  %v11119_v39 = vpop.f32.mrb[57].mxu1  ;;  %v4293_v56 = vrot.slane %v4292_v62, 2  ;;  %v3637_v3 = vadd.f32 %v3404_v53, %v10964_v22  ;;  %v11137_v21 = vmul.f32 %v10780_v29, %v3764_v1  ;;  %v3412_v58 = vrot.slane %v3090_v20, %v14461_v24 }
 0x310   : > { %v11124_v41 = vpop.f32.mrb[58].mxu1  ;;  %v11131_v11 = vmul.f32 %v10655_v34, %v3762_v0  ;;  %v4788_v17 = vunpack.c.l.b16 %v4660_v23  ;;  %v4358_v22 = vrot.slane %v4357_v50, 1  ;;  %v4281_v46 = vrot.slane %v4280_v44, 1  ;;  %v11163_v1 = vpop.permute.xlu0 %3973 }
 0x311   : > { %v11127_v35 = vpop.f32.mrb[59].mxu1  ;;  %14537 = vst [vmem:[#allocation158_spill] sm:$0xff] %v11137_v21  ;;  %v4294_v38 = vadd.f32 %v4293_v56, %v4292_v62  ;;  %v4374_v40 = vsel %vm2503_vm5, %v11137_v21, 0.0  ;;  %v4653_v53 = vpack.c.bf16 %v4289_v37, %v4289_v37  ;;  %v3701_v56 = vadd.f32 %v10673_v18, %v3637_v3  ;;  %14540 = vst [vmem:[#allocation160_spill] sm:$0xff] %v11163_v1 }
 0x312   : > { %14534 = vst [vmem:[#allocation155_spill] sm:$0xff] %v11127_v35  ;;  %14535 = vst [vmem:[#allocation156_spill] sm:$0xff] %v11131_v11  ;;  %v4789_v35 = vunpack.c.l.b16 %v4661_v55  ;;  %v4360_v25 = vsel %vm2503_vm5, %v11131_v11, 0.0  ;;  %v4856_v30 = vsel %vm4839_vm10, %v4788_v17, %v4855_v26  ;;  %v4375_v55 = vrot.slane %v4374_v40, 4 }
 0x313   : > { %v4361_v61 = vrot.slane %v4360_v25, 4  ;;  %v3639_v26 = vadd.f32 %v10957_v63, %v3412_v58  ;;  %v14539_v62 = vcombine.high %v10739_v7, %v10739_v7  ;;  %v4373_v17 = vadd.f32 %v4372_v14, %v4371_v47 }
 0x314   : > { %v11146_v10 = vsel %vm4841_vm11, %v4789_v35, %v4856_v30  ;;  %v4376_v30 = vadd.f32 %v4375_v55, %v4374_v40  ;;  %v4359_v58 = vadd.f32 %v4358_v22, %v4357_v50  ;;  %v3765_v20 = vmax.f32 %v3701_v56, 0.0 }
 0x315   : > { %v4362_v0 = vadd.f32 %v4361_v61, %v4360_v25  ;;  %v11161_v35 = vrot.slane %v14539_v62, %v14458_v31  ;;  %v3703_v63 = vadd.f32 %v10673_v18, %v3639_v26  ;;  %v11166_v61 = vunpack.c.l.b16 %v4651_v2  ;;  %v11179_v26 = vpop.permute.xlu1 %3953 }
 0x316   : > { %v11143_v13 = vpop.f32.mrb[60].mxu1  ;;  %v4295_v3 = vrot.slane %v4294_v38, 1  ;;  %v4282_v34 = vadd.f32 %v4281_v46, %v4280_v44  ;;  %v4377_v29 = vrot.slane %v4376_v30, 2  ;;  %v11172_v21 = vunpack.c.l.b16 %v4653_v53  ;;  %14543 = vst [vmem:[#allocation163_spill] sm:$0xff] %v11179_v26 }
 0x317   : > { %v11150_v27 = vpop.f32.mrb[61].mxu1  ;;  %v4363_v25 = vrot.slane %v4362_v0, 2  ;;  %v3092_v37 = vcombine.high %v11161_v35, %v11161_v35  ;;  %v3767_v47 = vmax.f32 %v3703_v63, 0.0  ;;  %v11175_v14 = vmul.f32 %v10866_v52, %v3765_v20 }
 0x318   : > { %v11153_v23 = vpop.f32.mrb[62].mxu1  ;;  %v3760_v50 = vmax.f32 %v11059_v32, 0.0  ;;  %v4665_v22 = vpack.c.bf16 %v4373_v17, %v4373_v17  ;;  %v4378_v40 = vadd.f32 %v4377_v29, %v4376_v30  ;;  %v4663_v44 = vpack.c.bf16 %v4359_v58, %v4359_v58 }
 0x319   : > { %14538 = vst [vmem:[#allocation159_spill] sm:$0xff] %v11153_v23  ;;  %v4364_v7 = vadd.f32 %v4363_v25, %v4362_v0  ;;  %v11170_v62 = vpop.f32.mrb[63].mxu1  ;;  %14542 = vst [vmem:[#allocation162_spill] sm:$0xff] %v11175_v14  ;;  %v3416_v2 = vrot.slane %v3092_v37, %v14461_v24  ;;  %v4381_v46 = vsel %vm2503_vm5, %v11175_v14, 0.0  ;;  %v14544_v53 = vrot.slane %v10870_v60, 4  ;;  %v11189_v25 = vpop.permute.xlu0 %4043 }
 0x31a   : > { %14541 = vst [vmem:[#allocation161_spill] sm:$0xff] %v11170_v62  ;;  %14546 = vst [vmem:[#allocation165_spill] sm:$0xff] %v11189_v25  ;;  %v11191_v32 = vadd.f32 %v4295_v3, %v4294_v38  ;;  %v4652_v29 = vpack.c.bf16 %v4282_v34, %v4282_v34  ;;  %v4379_v17 = vrot.slane %v4378_v40, 1  ;;  %v11194_v63 = vmul.f32 %v11179_v26, %v3767_v47 }
 0x31b   : > { %v4365_v55 = vrot.slane %v4364_v7, 1  ;;  %v3640_v0 = vadd.f32 %v10971_v5, %v3416_v2  ;;  %v4215_v20 = vadd.f32 %v14544_v53, %v10870_v60  ;;  %v4382_v58 = vrot.slane %v4381_v46, 4 }
 0x31c   : > { %14547 = vst [vmem:[#allocation166_spill] sm:$0xff] %v11194_v63  ;;  %v4209_v5 = vrot.slane %v10920_v54, 2  ;;  %v11201_v60 = vmul.f32 %v11094_v59, %v3760_v50  ;;  %v4380_v2 = vadd.f32 %v4379_v17, %v4378_v40  ;;  %v4220_v38 = vsel %vm2503_vm5, %v10840_v28, 0.0  ;;  %v11212_v40 = vpop.permute.xlu1 %3958 }
 0x31d   : > { %v4366_v30 = vadd.f32 %v4365_v55, %v4364_v7  ;;  %v11197_v37 = vadd.f32 %v10673_v18, %v3640_v0  ;;  %v4793_v3 = vunpack.c.l.b16 %v4665_v22  ;;  %v4791_v7 = vunpack.c.l.b16 %v4663_v44  ;;  %14552 = vst [vmem:[#allocation170_spill] sm:$0xff] %v11212_v40 }
 0x31e   : > { %v11187_v56 = vpop.f32.mrb[64].mxu1  ;;  %14548 = vst [vmem:[#allocation167_spill] sm:$0xff] %v11201_v60  ;;  %v4383_v47 = vadd.f32 %v4382_v58, %v4381_v46  ;;  %v4216_v55 = vrot.slane %v4215_v20, 2  ;;  %v4666_v0 = vpack.c.bf16 %v4380_v2, %v4380_v2  ;;  %v14551_v14 = vrot.slane %v10884_v16, 2  ;;  %v11222_v58 = vpop.permute.xlu0 %4083 }
 0x31f   : > { %14545 = vst [vmem:[#allocation164_spill] sm:$0xff] %v11187_v56  ;;  %v4664_v53 = vpack.c.bf16 %v4366_v30, %v4366_v30  ;;  %v11205_v34 = vpop.f32.mrb[65].mxu1  ;;  %v4221_v59 = vrot.slane %v4220_v38, 4  ;;  %v4395_v17 = vsel %vm2503_vm5, %v11194_v63, 0.0  ;;  %v14553_v22 = vmax.f32 %v10709_v9, 0.0  ;;  %14555 = vst [vmem:[#allocation172_spill] sm:$0xff] %v11222_v58 }
 0x320   : > { %14549 = vst [vmem:[#allocation168_spill] sm:$0xff] %v11205_v34  ;;  %v11207_v26 = vpop.f32.mrb[66].mxu1  ;;  %v4203_v50 = vadd.f32 %v14551_v14, %v10884_v16  ;;  %v4384_v30 = vrot.slane %v4383_v47, 2  ;;  %v4210_v46 = vadd.f32 %v4209_v5, %v10920_v54  ;;  %v4794_v2 = vunpack.c.l.b16 %v4666_v0 }
 0x321   : > { %14550 = vst [vmem:[#allocation169_spill] sm:$0xff] %v11207_v26  ;;  %v4792_v52 = vunpack.c.l.b16 %v4664_v53  ;;  %v11219_v44 = vmul.f32 %v11002_v57, %v14553_v22  ;;  %v4222_v16 = vadd.f32 %v4221_v59, %v4220_v38  ;;  %v4227_v14 = vsel %vm2503_vm5, %v10893_v8, 0.0  ;;  %v14556_v57 = vld [vmem:[#allocation128_spill] sm:$0xff] }
 0x322   : > { %v4385_v9 = vadd.f32 %v4384_v30, %v4383_v47  ;;  %v4217_v28 = vadd.f32 %v4216_v55, %v4215_v20  ;;  %v11230_v22 = vunpack.c.l.b16 %v4652_v29  ;;  %v11234_v54 = vsel %vm2503_vm5, %v11201_v60, 0.0  ;;  %v11245_v55 = vpop.f32.mrb[67].mxu1  ;;  %v11249_v58 = vpop.permute.xlu0 %3978 }
 0x323   : > { %14554 = vst [vmem:[#allocation171_spill] sm:$0xff] %v11219_v44  ;;  %v4859_v53 = vsel %vm4831_vm6, %v4792_v52, %v4791_v7  ;;  %v4204_v52 = vrot.slane %v4203_v50, 1  ;;  %v4396_v59 = vrot.slane %v4395_v17, 4  ;;  %v4223_v7 = vrot.slane %v4222_v16, 2  ;;  %14559 = vst [vmem:[#allocation128_spill] sm:$0xff] %v11245_v55 }
 0x324   : > { %v4860_v11 = vsel %vm4833_vm7, %v4793_v3, %v4859_v53  ;;  %v4386_v38 = vrot.slane %v4385_v9, 1  ;;  %v4228_v0 = vrot.slane %v4227_v14, 4  ;;  %v14557_v63 = vrot.slane %v14556_v57, 1  ;;  %14561 = vst [vmem:[#allocation174_spill] sm:$0xff] %v11249_v58 }
 0x325   : > { %v4861_v5 = vsel %vm4835_vm8, %v4794_v2, %v4860_v11  ;;  %v14558_v20 = vrot.slane %v10932_v33, 1  ;;  %v4211_v3 = vrot.slane %v4210_v46, 1  ;;  %v4234_v47 = vsel %vm2503_vm5, %v11219_v44, 0.0  ;;  %v11247_v11 = vpop.permute.xlu1 %3968 }
 0x326   : > { %v4191_v8 = vadd.f32 %v14557_v63, %v14556_v57  ;;  %14560 = vst [vmem:[#allocation173_spill] sm:$0xff] %v11247_v11  ;;  %v4387_v30 = vadd.f32 %v4386_v38, %v4385_v9  ;;  %v4218_v2 = vrot.slane %v4217_v28, 1  ;;  %v4224_v53 = vadd.f32 %v4223_v7, %v4222_v16 }
 0x327   : > { %v4198_v29 = vadd.f32 %v14558_v20, %v10932_v33  ;;  %v4229_v60 = vadd.f32 %v4228_v0, %v4227_v14  ;;  %v4205_v26 = vadd.f32 %v4204_v52, %v4203_v50  ;;  %v4235_v57 = vrot.slane %v4234_v47, 4  ;;  %v11258_v14 = vpop.f32.mrb[68].mxu1 }
 0x328   : > { %v14562_v63 = vrot.slane %v10961_v19, 2  ;;  %v4265_v20 = vrot.slane %v10968_v42, 2  ;;  %v11255_v56 = vadd.f32 %v4396_v59, %v4395_v17  ;;  %v4667_v44 = vpack.c.bf16 %v4387_v30, %v4387_v30  ;;  %14563 = vst [vmem:[#allocation175_spill] sm:$0xff] %v11258_v14 }
 0x329   : > { %v4225_v55 = vrot.slane %v4224_v53, 1  ;;  %v4230_v34 = vrot.slane %v4229_v60, 2  ;;  %v4212_v62 = vadd.f32 %v4211_v3, %v4210_v46  ;;  %v4236_v9 = vadd.f32 %v4235_v57, %v4234_v47  ;;  %v11266_v3 = vpop.permute.xlu1 %4008 }
 0x32a   : > { %v4259_v33 = vadd.f32 %v14562_v63, %v10961_v19  ;;  %v4266_v16 = vadd.f32 %v4265_v20, %v10968_v42  ;;  %v4795_v50 = vunpack.c.l.b16 %v4667_v44  ;;  %v4219_v52 = vadd.f32 %v4218_v2, %v4217_v28  ;;  %14566 = vst [vmem:[#allocation176_spill] sm:$0xff] %v11266_v3 }
 0x32b   : > { %v4226_v7 = vadd.f32 %v4225_v55, %v4224_v53  ;;  %v4231_v0 = vadd.f32 %v4230_v34, %v4229_v60  ;;  %v4237_v23 = vrot.slane %v4236_v9, 2  ;;  %v14564_v19 = vrot.slane %v10980_v6, 1  ;;  %v11271_v55 = vpop.permute.xlu0 %4053 }
 0x32c   : > { %v4260_v38 = vrot.slane %v4259_v33, 1  ;;  %v14565_v59 = vrot.slane %v11086_v45, 1  ;;  %v4267_v46 = vrot.slane %v4266_v16, 1  ;;  %v11269_v42 = vsel %vm4837_vm9, %v4795_v50, %v4861_v5  ;;  %14567 = vst [vmem:[#allocation177_spill] sm:$0xff] %v11271_v55 }
 0x32d   : > { %v4247_v17 = vadd.f32 %v14564_v19, %v10980_v6  ;;  %v4232_v47 = vrot.slane %v4231_v0, 1  ;;  %v4639_v28 = vpack.c.bf16 %v4191_v8, %v4191_v8  ;;  %v4238_v60 = vadd.f32 %v4237_v23, %v4236_v9  ;;  %v11273_v6 = vpop.f32.mrb[69].mxu1 }
 0x32e   : > { %v4254_v30 = vadd.f32 %v14565_v59, %v11086_v45  ;;  %v4261_v44 = vadd.f32 %v4260_v38, %v4259_v33  ;;  %v4268_v34 = vadd.f32 %v4267_v46, %v4266_v16  ;;  %v4640_v2 = vpack.c.bf16 %v4198_v29, %v4198_v29  ;;  %v11275_v19 = vpop.f32.mrb[70].mxu1 }
 0x32f   : > { %v4641_v53 = vpack.c.bf16 %v4205_v26, %v4205_v26  ;;  %v4233_v57 = vadd.f32 %v4232_v47, %v4231_v0  ;;  %v4642_v63 = vpack.c.bf16 %v4212_v62, %v4212_v62  ;;  %v4643_v45 = vpack.c.bf16 %v4219_v52, %v4219_v52  ;;  %v11279_v0 = vpop.permute.xlu1 %4013  ;;  %v11281_v47 = vpop.permute.xlu0 %3983 }
 0x330   : > { %v4644_v20 = vpack.c.bf16 %v4226_v7, %v4226_v7  ;;  %v4239_v50 = vrot.slane %v4238_v60, 1  ;;  %v4647_v59 = vpack.c.bf16 %v4247_v17, %v4247_v17  ;;  %v4648_v33 = vpack.c.bf16 %v4254_v30, %v4254_v30  ;;  %14568 = vst [vmem:[#allocation178_spill] sm:$0xff] %v11279_v0  ;;  %14569 = vst [vmem:[#allocation179_spill] sm:$0xff] %v11281_v47 }
 0x331   : > { %v4645_v8 = vpack.c.bf16 %v4233_v57, %v4233_v57  ;;  %v4649_v38 = vpack.c.bf16 %v4261_v44, %v4261_v44  ;;  %v4650_v14 = vpack.c.bf16 %v4268_v34, %v4268_v34  ;;  %v4767_v23 = vunpack.c.l.b16 %v4639_v28 }
 0x332   : > { %v4398_v29 = vrot.slane %v11255_v56, 2  ;;  %v4240_v26 = vadd.f32 %v4239_v50, %v4238_v60  ;;  %v4768_v9 = vunpack.c.l.b16 %v4640_v2  ;;  %v4769_v16 = vunpack.c.l.b16 %v4641_v53 }
 0x333   : > { %v4770_v62 = vunpack.c.l.b16 %v4642_v63  ;;  %v4771_v52 = vunpack.c.l.b16 %v4643_v45  ;;  %v4772_v7 = vunpack.c.l.b16 %v4644_v20  ;;  %v4773_v46 = vunpack.c.l.b16 %v4645_v8 }
 0x334   : > { %v4646_v5 = vpack.c.bf16 %v4240_v26, %v4240_v26  ;;  %v4775_v17 = vunpack.c.l.b16 %v4647_v59  ;;  %v4776_v30 = vunpack.c.l.b16 %v4648_v33  ;;  %v4777_v57 = vunpack.c.l.b16 %v4649_v38  ;;  %v14572_v38 = vld [vmem:[#allocation103_spill] sm:$0xff]  ;;  %v11304_v26 = vpop.permute.xlu1 %4048 }
 0x335   : > { %v4778_v44 = vunpack.c.l.b16 %v4650_v14  ;;  %v14570_v28 = vpack.c.bf16 %v11191_v32, %v11191_v32  ;;  %v4832_v60 = vsel %vm4831_vm6, %v4768_v9, %v4767_v23  ;;  %v3408_v45 = vrot.slane %v11161_v35, %v14461_v24  ;;  %v14571_v14 = vld [vmem:[#allocation112_spill] sm:$0xff] }
 0x336   : > { %v4774_v2 = vunpack.c.l.b16 %v4646_v5  ;;  %v4834_v53 = vsel %vm4833_vm7, %v4769_v16, %v4832_v60  ;;  %v4845_v63 = vsel %vm4831_vm6, %v4776_v30, %v4775_v17  ;;  %v3138_v59 = vcombine.high %v14571_v14, %v14571_v14  ;;  %14574 = vst [vmem:[#allocation112_spill] sm:$0xff] %v11304_v26  ;;  %v11311_v17 = vpop.permute.xlu0 %4058  ;;  %v14576_v60 = vld [vmem:[#allocation139_spill] sm:$0xff] }
 0x337   : > { %v4782_v34 = vunpack.c.l.b16 %v14570_v28  ;;  %v4836_v20 = vsel %vm4835_vm8, %v4770_v62, %v4834_v53  ;;  %v4846_v50 = vsel %vm4833_vm7, %v4777_v57, %v4845_v63  ;;  %v3420_v32 = vrot.slane %v14571_v14, %v14461_v24  ;;  %14575 = vst [vmem:[#allocation103_spill] sm:$0xff] %v11311_v17  ;;  %v11317_v28 = vpop.f32.mrb[71].mxu1 }
 0x338   : > { %v4838_v33 = vsel %vm4837_vm9, %v4771_v52, %v4836_v20  ;;  %v4847_v5 = vsel %vm4835_vm8, %v4778_v44, %v4846_v50  ;;  %v3638_v8 = vadd.f32 %v3408_v45, %v10978_v49  ;;  %v14573_v35 = vcombine.high %v14572_v38, %v14572_v38  ;;  %v11324_v45 = vpop.f32.mrb[72].mxu1 }
 0x339   : > { %v4840_v9 = vsel %vm4839_vm10, %v4772_v7, %v4838_v33  ;;  %v4848_v16 = vsel %vm4837_vm9, %v11166_v61, %v4847_v5  ;;  %v3428_v62 = vrot.slane %v3138_v59, %v14461_v24  ;;  %v3641_v52 = vadd.f32 %v3420_v32, %v11017_v43  ;;  %v14577_v43 = vld [vmem:[#allocation96_spill] sm:$0xff]  ;;  %14578 = vst [vmem:[#allocation139_spill] sm:$0xff] %v11324_v45  ;;  %v14580_v33 = vld [vmem:[#allocation131_spill] sm:$0xff] }
 0x33a   : > { %v3130_v23 = vrot.slane %v14573_v35, %v14458_v31  ;;  %v4842_v49 = vsel %vm4841_vm11, %v4773_v46, %v4840_v9  ;;  %v4849_v30 = vsel %vm4839_vm10, %v11230_v22, %v4848_v16  ;;  %v3702_v57 = vadd.f32 %v10673_v18, %v3638_v8  ;;  %v14579_v59 = vld [vmem:[#allocation104_spill] sm:$0xff]  ;;  %v11338_v35 = vpop.permute.xlu1 %4088 }
 0x33b   : > { %v4844_v7 = vsel %vm4843_vm12, %v4774_v2, %v4842_v49  ;;  %v4850_v61 = vsel %vm4841_vm11, %v11172_v21, %v4849_v30  ;;  %v3643_v53 = vadd.f32 %v14576_v60, %v3428_v62  ;;  %v3705_v63 = vadd.f32 %v3641_v52, %v14577_v43  ;;  %14583 = vst [vmem:[#allocation104_spill] sm:$0xff] %v11338_v35  ;;  %v11350_v49 = vpop.f32.mrb[73].mxu1 }
 0x33c   : > { %v3140_v44 = vcombine.high %v3130_v23, %v3130_v23  ;;  %v4851_v46 = vsel %vm4843_vm12, %v4782_v34, %v4850_v61  ;;  %v3766_v20 = vmax.f32 %v3702_v57, 0.0  ;;  %v3424_v18 = vrot.slane %v3130_v23, %v14461_v24  ;;  %v14582_v34 = vld [vmem:[#allocation140_spill] sm:$0xff]  ;;  %14587 = vst [vmem:[#allocation181_spill] sm:$0xff] %v11350_v49 }
 0x33d   : > { %v4894_v50 = vpack.c.b16 %v4851_v46, %v4844_v7  ;;  %v3707_v14 = vadd.f32 %v3643_v53, %v14577_v43  ;;  %v3769_v2 = vmax.f32 %v3705_v63, 0.0  ;;  %v3123_v21 = vrot.slane %v14579_v59, %v14458_v31 }
 0x33e   : > { %v3432_v22 = vrot.slane %v3140_v44, %v14461_v24  ;;  %v4347_v32 = vrot.slane %v11234_v54, 4  ;;  %v11334_v5 = vmul.f32 %v14580_v33, %v3766_v20  ;;  %v3642_v38 = vadd.f32 %v3424_v18, %v14582_v34 }
 0x33f   : > { %v4399_v23 = vadd.f32 %v4398_v29, %v11255_v56  ;;  %v14584_v9 = vmax.f32 %v11197_v37, 0.0  ;;  %9202 = vmatprep.mubr.msk.bf16.mxu0 %vm2503_vm5, %v4894_v50  ;;  %v11348_v62 = vmul.f32 %v11113_v48, %v3769_v2  ;;  %v3139_v52 = vcombine.high %v3123_v21, %v3123_v21  ;;  %v11358_v29 = vpop.f32.mrb[74].mxu1 }
 0x340   : > { %14581 = vst [vmem:[#allocation96_spill] sm:$0xff] %v11334_v5  ;;  %v3644_v8 = vadd.f32 %v11019_v15, %v3432_v22  ;;  %v11352_v15 = vpop.permute.xlu0 %3988  ;;  %v4388_v30 = vsel %vm2503_vm5, %v11334_v5, 0.0  ;;  %v3771_v57 = vmax.f32 %v3707_v14, 0.0  ;;  %v3706_v37 = vadd.f32 %v3642_v38, %v14577_v43  ;;  %14589 = vst [vmem:[#allocation183_spill] sm:$0xff] %v11358_v29 }
 0x341   : > { %v11344_v16 = vmul.f32 %v11212_v40, %v14584_v9  ;;  %14586 = vst [vmem:[#allocation180_spill] sm:$0xff] %v11348_v62  ;;  %14588 = vst [vmem:[#allocation182_spill] sm:$0xff] %v11352_v15  ;;  %v4389_v44 = vrot.slane %v4388_v30, 4  ;;  %v4409_v7 = vsel %vm2503_vm5, %v11348_v62, 0.0  ;;  %v3436_v61 = vrot.slane %v3123_v21, %v14461_v24 }
 0x342   : > { %v3708_v56 = vadd.f32 %v3644_v8, %v14577_v43  ;;  %v14590_v60 = vcombine.high %v14579_v59, %v14579_v59  ;;  %v4348_v63 = vadd.f32 %v4347_v32, %v11234_v54  ;;  %v4410_v46 = vrot.slane %v4409_v7, 4  ;;  %v11380_v54 = vpop.f32.mrb[75].mxu1 }
 0x343   : > { %14585 = vst [vmem:[#allocation140_spill] sm:$0xff] %v11344_v16  ;;  %v3770_v22 = vmax.f32 %v3706_v37, 0.0  ;;  %v4402_v18 = vsel %vm2503_vm5, %v11344_v16, 0.0  ;;  %v4390_v50 = vadd.f32 %v4389_v44, %v4388_v30  ;;  %v3444_v14 = vrot.slane %v3139_v52, %v14461_v24  ;;  %14593 = vst [vmem:[#allocation186_spill] sm:$0xff] %v11380_v54 }
 0x344   : > { %v11367_v53 = vrot.slane %v14590_v60, %v14458_v31  ;;  %v3772_v20 = vmax.f32 %v3708_v56, 0.0  ;;  %v3645_v2 = vadd.f32 %v3436_v61, %v11054_v12  ;;  %v4400_v21 = vrot.slane %v4399_v23, 1  ;;  %v11388_v12 = vpop.permute.xlu1 %4018  ;;  %v11390_v30 = vpop.permute.xlu0 %4063  ;;  %v14598_v56 = vld [vmem:[#allocation108_spill] sm:$0xff] }
 0x345   : > { %v11375_v8 = vmul.f32 %v11163_v1, %v3771_v57  ;;  %v4411_v59 = vadd.f32 %v4410_v46, %v4409_v7  ;;  %v11378_v34 = vmul.f32 %v11247_v11, %v3770_v22  ;;  %v4391_v32 = vrot.slane %v4390_v50, 2  ;;  %14594 = vst [vmem:[#allocation187_spill] sm:$0xff] %v11388_v12  ;;  %14595 = vst [vmem:[#allocation188_spill] sm:$0xff] %v11390_v30  ;;  %v14596_v57 = vld [vmem:[#allocation107_spill] sm:$0xff] }
 0x346   : > { %v3647_v38 = vadd.f32 %v11048_v36, %v3444_v14  ;;  %v11384_v9 = vadd.f32 %v3645_v2, %v14577_v43  ;;  %v3141_v52 = vcombine.high %v11367_v53, %v11367_v53  ;;  %v11396_v37 = vrot.slane %v14596_v57, %v14458_v31 }
 0x347   : > { %14591 = vst [vmem:[#allocation184_spill] sm:$0xff] %v11375_v8  ;;  %14592 = vst [vmem:[#allocation185_spill] sm:$0xff] %v11378_v34  ;;  %v4412_v44 = vrot.slane %v4411_v59, 2  ;;  %v11399_v36 = vmul.f32 %v11249_v58, %v3772_v20  ;;  %v4349_v7 = vrot.slane %v4348_v63, 2  ;;  %v4403_v61 = vrot.slane %v4402_v18, 4  ;;  %v14599_v58 = vld [vmem:[#allocation91_spill] sm:$0xff] }
 0x348   : > { %v4392_v60 = vadd.f32 %v4391_v32, %v4390_v50  ;;  %v4416_v46 = vsel %vm2503_vm5, %v11378_v34, 0.0  ;;  %v4401_v22 = vadd.f32 %v4400_v21, %v4399_v23  ;;  %v3711_v11 = vadd.f32 %v3647_v38, %v14577_v43  ;;  %v11414_v48 = vpop.permute.xlu1 %4093  ;;  %v11416_v62 = vpop.permute.xlu0 %3993 }
 0x349   : > { %14597 = vst [vmem:[#allocation107_spill] sm:$0xff] %v11399_v36  ;;  %v4413_v14 = vadd.f32 %v4412_v44, %v4411_v59  ;;  %v4417_v2 = vrot.slane %v4416_v46, 4  ;;  %v4423_v33 = vsel %vm2503_vm5, %v11375_v8, 0.0  ;;  %v3448_v20 = vrot.slane %v3141_v52, %v14461_v24  ;;  %14600 = vst [vmem:[#allocation108_spill] sm:$0xff] %v11414_v48  ;;  %v14602_v8 = vld [vmem:[#allocation92_spill] sm:$0xff] }
 0x34a   : > { %v4393_v1 = vrot.slane %v4392_v60, 1  ;;  %v3240_v50 = vcombine.high %v14599_v58, %v14599_v58  ;;  %v4430_v23 = vsel %vm2503_vm5, %v11399_v36, 0.0  ;;  %v4350_v59 = vadd.f32 %v4349_v7, %v4348_v63  ;;  %14601 = vst [vmem:[#allocation91_spill] sm:$0xff] %v11416_v62 }
 0x34b   : > { %v4414_v32 = vrot.slane %v4413_v14, 1  ;;  %v4418_v21 = vadd.f32 %v4417_v2, %v4416_v46  ;;  %v4404_v44 = vadd.f32 %v4403_v61, %v4402_v18  ;;  %v3648_v40 = vadd.f32 %v11056_v51, %v3448_v20 }
 0x34c   : > { %v4394_v38 = vadd.f32 %v4393_v1, %v4392_v60  ;;  %v3149_v52 = vrot.slane %v14602_v8, %v14458_v31  ;;  %v4669_v34 = vpack.c.bf16 %v4401_v22, %v4401_v22  ;;  %v4424_v16 = vrot.slane %v4423_v33, 4 }
 0x34d   : > { %v4419_v5 = vrot.slane %v4418_v21, 2  ;;  %v11422_v54 = vrot.slane %v14599_v58, %v14458_v31  ;;  %v4431_v63 = vrot.slane %v4430_v23, 4  ;;  %v3775_v18 = vmax.f32 %v3711_v11, 0.0  ;;  %v11433_v58 = vld [vmem:[%s13971_s13] sm:$0xff]  }
 0x34e   : > { %v4668_v46 = vpack.c.bf16 %v4394_v38, %v4394_v38  ;;  %v11425_v1 = vrot.slane %v3240_v50, %v14458_v31  ;;  %v3142_v51 = vcombine.high %v14602_v8, %v14602_v8  ;;  %v4415_v7 = vadd.f32 %v4414_v32, %v4413_v14  ;;  %9210 = vmatprep.subr.bf16.mxu0 %v11433_v58 }
 0x34f   : > { %v4420_v61 = vadd.f32 %v4419_v5, %v4418_v21  ;;  %v4351_v60 = vrot.slane %v4350_v59, 1  ;;  %v4405_v2 = vrot.slane %v4404_v44, 2  ;;  %v3773_v20 = vmax.f32 %v11384_v9, 0.0  ;;  %v11443_v9 = vpop.permute.xlu1 %4023  ;;  %v11445_v21 = vpop.permute.xlu0 %4068 }
 0x350   : > { %v4796_v22 = vunpack.c.l.b16 %v4668_v46  ;;  %v3165_v11 = vrot.slane %v3149_v52, %v14458_v31  ;;  %v4797_v38 = vunpack.c.l.b16 %v4669_v34  ;;  %v4425_v50 = vadd.f32 %v4424_v16, %v4423_v33  ;;  %14604 = vst [vmem:[#allocation189_spill] sm:$0xff] %v11443_v9  ;;  %14605 = vst [vmem:[#allocation190_spill] sm:$0xff] %v11445_v21 }
 0x351   : > { %v4421_v36 = vrot.slane %v4420_v61, 1  ;;  %v4432_v14 = vadd.f32 %v4431_v63, %v4430_v23  ;;  %v11439_v5 = vmul.f32 %v11416_v62, %v3775_v18  ;;  %v3712_v32 = vadd.f32 %v3648_v40, %v14577_v43 }
 0x352   : > { %v4863_v8 = vsel %vm4839_vm10, %v4796_v22, %v11269_v42  ;;  %v3157_v46 = vcombine.high %v3149_v52, %v3149_v52  ;;  %v4671_v33 = vpack.c.bf16 %v4415_v7, %v4415_v7  ;;  %v4352_v29 = vadd.f32 %v4351_v60, %v4350_v59  ;;  %v14607_v7 = vld [vmem:[#allocation144_spill] sm:$0xff]  ;;  %v14608_v60 = vld [vmem:[#allocation149_spill] sm:$0xff] }
 0x353   : > { %14603 = vst [vmem:[#allocation92_spill] sm:$0xff] %v11439_v5  ;;  %v11448_v34 = vsel %vm4841_vm11, %v4797_v38, %v4863_v8  ;;  %v4422_v16 = vadd.f32 %v4421_v36, %v4420_v61  ;;  %v4406_v42 = vadd.f32 %v4405_v2, %v4404_v44  ;;  %v11451_v23 = vmul.f32 %v11281_v47, %v3773_v20 }
 0x354   : > { %v3440_v40 = vrot.slane %v11367_v53, %v14461_v24  ;;  %v4426_v63 = vrot.slane %v4425_v50, 2  ;;  %v3187_v22 = vcombine.high %v3165_v11, %v3165_v11  ;;  %v3452_v62 = vrot.slane %v3165_v11, %v14461_v24 }
 0x355   : > { %14606 = vst [vmem:[#allocation191_spill] sm:$0xff] %v11451_v23  ;;  %v4672_v18 = vpack.c.bf16 %v4422_v16, %v4422_v16  ;;  %v4433_v35 = vrot.slane %v4432_v14, 2  ;;  %v4451_v52 = vsel %vm2503_vm5, %v11439_v5, 0.0  ;;  %v3776_v38 = vmax.f32 %v3712_v32, 0.0  ;;  %v11469_v32 = vpop.permute.xlu1 %4098  ;;  %v11471_v16 = vpop.permute.xlu0 %3998 }
 0x356   : > { %v3646_v36 = vadd.f32 %v3440_v40, %v14607_v7  ;;  %v4799_v59 = vunpack.c.l.b16 %v4671_v33  ;;  %v3460_v61 = vrot.slane %v3187_v22, %v14461_v24  ;;  %v3649_v2 = vadd.f32 %v3452_v62, %v14608_v60  ;;  %14609 = vst [vmem:[#allocation144_spill] sm:$0xff] %v11469_v32  ;;  %14610 = vst [vmem:[#allocation149_spill] sm:$0xff] %v11471_v16  ;;  %v14612_v62 = vld [vmem:[#allocation148_spill] sm:$0xff]  ;;  %v14614_v60 = vld [vmem:[#allocation99_spill] sm:$0xff] }
 0x357   : > { %v4800_v44 = vunpack.c.l.b16 %v4672_v18  ;;  %v11464_v20 = vrot.slane %v3142_v51, %v14458_v31  ;;  %v4437_v11 = vsel %vm2503_vm5, %v11451_v23, 0.0  ;;  %v4407_v33 = vrot.slane %v4406_v42, 1 }
 0x358   : > { %v3710_v8 = vadd.f32 %v3646_v36, %v14577_v43  ;;  %v4427_v40 = vadd.f32 %v4426_v63, %v4425_v50  ;;  %v3651_v22 = vadd.f32 %v14612_v62, %v3460_v61  ;;  %v4452_v7 = vrot.slane %v4451_v52, 4 }
 0x359   : > { %v11474_v18 = vsel %vm4831_vm6, %v4800_v44, %v4799_v59  ;;  %v11478_v51 = vmul.f32 %v11471_v16, %v3776_v38  ;;  %v3713_v53 = vadd.f32 %v3649_v2, %v14614_v60  ;;  %v3179_v47 = vrot.slane %v3157_v46, %v14458_v31 }
 0x35a   : > { %14611 = vst [vmem:[#allocation192_spill] sm:$0xff] %v11474_v18  ;;  %v4662_v43 = vpack.c.bf16 %v4352_v29, %v4352_v29  ;;  %v4434_v36 = vadd.f32 %v4433_v35, %v4432_v14  ;;  %v4438_v5 = vrot.slane %v4437_v11, 4  ;;  %v3715_v23 = vadd.f32 %v3651_v22, %v14614_v60 }
 0x35b   : > { %14613 = vst [vmem:[#allocation148_spill] sm:$0xff] %v11478_v51  ;;  %v11485_v50 = vrot.slane %v11422_v54, %v14458_v31  ;;  %v3774_v63 = vmax.f32 %v3710_v8, 0.0  ;;  %v3777_v59 = vmax.f32 %v3713_v53, 0.0  ;;  %v3189_v44 = vcombine.high %v3179_v47, %v3179_v47  ;;  %v11497_v8 = vpop.permute.xlu1 %4028 }
 0x35c   : > { %v3158_v61 = vcombine.high %v11464_v20, %v11464_v20  ;;  %v4408_v2 = vadd.f32 %v4407_v33, %v4406_v42  ;;  %v4428_v46 = vrot.slane %v4427_v40, 1  ;;  %v4453_v29 = vadd.f32 %v4452_v7, %v4451_v52  ;;  %14616 = vst [vmem:[#allocation193_spill] sm:$0xff] %v11497_v8  ;;  %v14617_v7 = vld [vmem:[#allocation152_spill] sm:$0xff] }
 0x35d   : > { %v4458_v35 = vsel %vm2503_vm5, %v11478_v51, 0.0  ;;  %v11494_v14 = vmul.f32 %v11133_v4, %v3777_v59  ;;  %v3456_v62 = vrot.slane %v3179_v47, %v14461_v24  ;;  %v11499_v53 = vunpack.c.l.b16 %v4662_v43 }
 0x35e   : > { %v4435_v22 = vrot.slane %v4434_v36, 1  ;;  %v4439_v38 = vadd.f32 %v4438_v5, %v4437_v11  ;;  %v3172_v16 = vrot.slane %v11464_v20, %v14458_v31  ;;  %v11504_v42 = vmul.f32 %v11352_v15, %v3774_v63  ;;  %v14618_v5 = vld [vmem:[#allocation151_spill] sm:$0xff] }
 0x35f   : > { %14615 = vst [vmem:[#allocation99_spill] sm:$0xff] %v11494_v14  ;;  %v4465_v52 = vsel %vm2503_vm5, %v11494_v14, 0.0  ;;  %v3464_v33 = vrot.slane %v3189_v44, %v14461_v24  ;;  %v3650_v59 = vadd.f32 %v3456_v62, %v14617_v7  ;;  %v4670_v47 = vpack.c.bf16 %v4408_v2, %v4408_v2 }
 0x360   : > { %v4429_v4 = vadd.f32 %v4428_v46, %v4427_v40  ;;  %v4459_v51 = vrot.slane %v4458_v35, 4  ;;  %v3779_v43 = vmax.f32 %v3715_v23, 0.0  ;;  %v4454_v18 = vrot.slane %v4453_v29, 2  ;;  %v11516_v46 = vpop.permute.xlu1 %4103 }
 0x361   : > { %v4466_v32 = vrot.slane %v4465_v52, 4  ;;  %v3652_v11 = vadd.f32 %v14618_v5, %v3464_v33  ;;  %v3714_v20 = vadd.f32 %v3650_v59, %v14614_v60  ;;  %v4436_v45 = vadd.f32 %v4435_v22, %v4434_v36  ;;  %14619 = vst [vmem:[#allocation152_spill] sm:$0xff] %v11516_v46  ;;  %v14622_v5 = vld [vmem:[#allocation154_spill] sm:$0xff] }
 0x362   : > { %v4440_v63 = vrot.slane %v4439_v38, 2  ;;  %v3188_v15 = vcombine.high %v3172_v16, %v3172_v16  ;;  %v3468_v49 = vrot.slane %v3172_v16, %v14461_v24  ;;  %v4444_v44 = vsel %vm2503_vm5, %v11504_v42, 0.0 }
 0x363   : > { %v4467_v14 = vadd.f32 %v4466_v32, %v4465_v52  ;;  %v3716_v2 = vadd.f32 %v3652_v11, %v14614_v60  ;;  %v3778_v40 = vmax.f32 %v3714_v20, 0.0  ;;  %v4460_v23 = vadd.f32 %v4459_v51, %v4458_v35 }
 0x364   : > { %v11519_v62 = vmul.f32 %v11279_v0, %v3779_v43  ;;  %v3476_v33 = vrot.slane %v3188_v15, %v14461_v24  ;;  %v3653_v36 = vadd.f32 %v3468_v49, %v11119_v39  ;;  %v4455_v22 = vadd.f32 %v4454_v18, %v4453_v29 }
 0x365   : > { %v4468_v7 = vrot.slane %v4467_v14, 2  ;;  %v3780_v16 = vmax.f32 %v3716_v2, 0.0  ;;  %v11524_v59 = vmul.f32 %v11266_v3, %v3778_v40  ;;  %v4673_v32 = vpack.c.bf16 %v4429_v4, %v4429_v4 }
 0x366   : > { %14620 = vst [vmem:[#allocation151_spill] sm:$0xff] %v11519_v62  ;;  %v4445_v52 = vrot.slane %v4444_v44, 4  ;;  %v3655_v11 = vadd.f32 %v14622_v5, %v3476_v33  ;;  %v3717_v20 = vadd.f32 %v3653_v36, %v14614_v60  ;;  %v4441_v51 = vadd.f32 %v4440_v63, %v4439_v38  ;;  %v11537_v38 = vpop.permute.xlu1 %4033 }
 0x367   : > { %14621 = vst [vmem:[#allocation194_spill] sm:$0xff] %v11524_v59  ;;  %v4469_v35 = vadd.f32 %v4468_v7, %v4467_v14  ;;  %v4472_v43 = vsel %vm2503_vm5, %v11524_v59, 0.0  ;;  %v3186_v15 = vrot.slane %v3158_v61, %v14458_v31  ;;  %v4461_v39 = vrot.slane %v4460_v23, 2  ;;  %14623 = vst [vmem:[#allocation154_spill] sm:$0xff] %v11537_v38 }
 0x368   : > { %v4479_v49 = vsel %vm2503_vm5, %v11519_v62, 0.0  ;;  %v4473_v18 = vrot.slane %v4472_v43, 4  ;;  %v3719_v29 = vadd.f32 %v3655_v11, %v14614_v60  ;;  %v4798_v4 = vunpack.c.l.b16 %v4670_v47 }
 0x369   : > { %v4674_v2 = vpack.c.bf16 %v4436_v45, %v4436_v45  ;;  %v4456_v40 = vrot.slane %v4455_v22, 1  ;;  %v11535_v33 = vmul.f32 %v11388_v12, %v3780_v16  ;;  %v4446_v14 = vadd.f32 %v4445_v52, %v4444_v44 }
 0x36a   : > { %v4470_v63 = vrot.slane %v4469_v35, 1  ;;  %v4474_v36 = vadd.f32 %v4473_v18, %v4472_v43  ;;  %v3783_v7 = vmax.f32 %v3719_v29, 0.0  ;;  %v4442_v61 = vrot.slane %v4441_v51, 1 }
 0x36b   : > { %v4480_v5 = vrot.slane %v4479_v49, 4  ;;  %v3781_v3 = vmax.f32 %v3717_v20, 0.0  ;;  %v3190_v0 = vcombine.high %v3186_v15, %v3186_v15  ;;  %v11539_v62 = vunpack.c.l.b16 %v4673_v32 }
 0x36c   : > { %v11541_v59 = vadd.f32 %v4461_v39, %v4460_v23  ;;  %v4475_v47 = vrot.slane %v4474_v36, 2  ;;  %v11544_v45 = vmul.f32 %v11537_v38, %v3783_v7  ;;  %v11546_v16 = vunpack.c.l.b16 %v4674_v2  ;;  %v11562_v2 = vpop.permute.xlu1 %4108 }
 0x36d   : > { %v11548_v11 = vadd.f32 %v4456_v40, %v4455_v22  ;;  %v4486_v44 = vsel %vm2503_vm5, %v11535_v33, 0.0  ;;  %v11553_v52 = vmul.f32 %v11443_v9, %v3781_v3  ;;  %v4447_v20 = vrot.slane %v4446_v14, 2  ;;  %14625 = vst [vmem:[#allocation196_spill] sm:$0xff] %v11562_v2 }
 0x36e   : > { %14624 = vst [vmem:[#allocation195_spill] sm:$0xff] %v11544_v45  ;;  %v4471_v43 = vadd.f32 %v4470_v63, %v4469_v35  ;;  %v4476_v32 = vadd.f32 %v4475_v47, %v4474_v36  ;;  %v4507_v23 = vsel %vm2503_vm5, %v11544_v45, 0.0  ;;  %v11557_v39 = vadd.f32 %v4442_v61, %v4441_v51  ;;  %v9461_v47 = vld [vmem:[%s13971_s13 + $0x8] sm:$0xff]  }
 0x36f   : > { %v4481_v18 = vadd.f32 %v4480_v5, %v4479_v49  ;;  %v4493_v29 = vsel %vm2503_vm5, %v11553_v52, 0.0  ;;  %v3480_v22 = vrot.slane %v3190_v0, %v14461_v24  ;;  %v4463_v40 = vrot.slane %v11541_v59, 1 }
 0x370   : > { %v4487_v3 = vrot.slane %v4486_v44, 4  ;;  %v4477_v7 = vrot.slane %v4476_v32, 1  ;;  %v4508_v9 = vrot.slane %v4507_v23, 4  ;;  %v4494_v35 = vrot.slane %v4493_v29, 4 }
 0x371   : > { %v3656_v63 = vadd.f32 %v11124_v41, %v3480_v22  ;;  %v4858_v51 = vsel %vm4843_vm12, %v11499_v53, %v11146_v10  ;;  %v4865_v49 = vsel %vm4843_vm12, %v4798_v4, %v11448_v34  ;;  %v4448_v36 = vadd.f32 %v4447_v20, %v4446_v14  ;;  %v14626_v20 = vld [vmem:[#allocation155_spill] sm:$0xff] }
 0x372   : > { %v4679_v61 = vpack.c.bf16 %v4471_v43, %v4471_v43  ;;  %v4478_v0 = vadd.f32 %v4477_v7, %v4476_v32  ;;  %v4895_v5 = vpack.c.b16 %v4865_v49, %v4858_v51  ;;  %v4482_v38 = vrot.slane %v4481_v18, 2 }
 0x373   : > { %v3720_v12 = vadd.f32 %v3656_v63, %v14614_v60  ;;  %v3472_v41 = vrot.slane %v3186_v15, %v14461_v24  ;;  %v3236_v22 = vcombine.high %v11396_v37, %v11396_v37  ;;  %v4488_v10 = vadd.f32 %v4487_v3, %v4486_v44  ;;  %v11584_v15 = vpop.permute.xlu1 %4038 }
 0x374   : > { %v4680_v53 = vpack.c.bf16 %v4478_v0, %v4478_v0  ;;  %v4509_v45 = vadd.f32 %v4508_v9, %v4507_v23  ;;  %9203 = vmatmul.mubr.msk.bf16.vlgmr.msra.gmra.mrb[84].mxu0 %vm2503_vm5, %v4895_v5  ;;  %v3484_v34 = vrot.slane %v11396_v37, %v14461_v24  ;;  %v4495_v4 = vadd.f32 %v4494_v35, %v4493_v29  ;;  %v11590_v37 = vld [vmem:[%s13968_s10 + $0x10] sm:$0xff]  }
 0x375   : > { %v3784_v14 = vmax.f32 %v3720_v12, 0.0  ;;  %v3654_v43 = vadd.f32 %v3472_v41, %v14626_v20  ;;  %v3492_v32 = vrot.slane %v3236_v22, %v14461_v24  ;;  %9211 = vmatpush3.bf16.msra.mxu0 %v11433_v58  ;;  %14627 = vst [vmem:[#allocation155_spill] sm:$0xff] %v11584_v15  ;;  %v4449_v7 = vrot.slane %v4448_v36, 1 }
 0x376   : > { %v4807_v63 = vunpack.c.l.b16 %v4679_v61  ;;  %v4808_v44 = vunpack.c.l.b16 %v4680_v53  ;;  %v3657_v9 = vadd.f32 %v3484_v34, %v11150_v27  ;;  %9212 = vmatprep.subr.bf16.mxu0 %v9461_v47  ;;  %v4483_v12 = vadd.f32 %v4482_v38, %v4481_v18  ;;  %v14628_v27 = vld [vmem:[#allocation95_spill] sm:$0xff] }
 0x377   : > { %v11593_v23 = vmul.f32 %v11584_v15, %v3784_v14  ;;  %v3718_v29 = vadd.f32 %v3654_v43, %v14614_v60  ;;  %v3659_v58 = vadd.f32 %v11143_v13, %v3492_v32  ;;  %v4489_v3 = vrot.slane %v4488_v10, 2  ;;  %v14635_v15 = vld [vmem:[#allocation164_spill] sm:$0xff] }
 0x378   : > { %v11598_v35 = vsel %vm4831_vm6, %v4808_v44, %v4807_v63  ;;  %v4510_v51 = vrot.slane %v4509_v45, 2  ;;  %v3721_v49 = vadd.f32 %v14628_v27, %v3657_v9  ;;  %v4677_v61 = vpack.c.bf16 %v11548_v11, %v11548_v11 }
 0x379   : > { %v4675_v38 = vpack.c.bf16 %v11557_v39, %v11557_v39  ;;  %v4496_v18 = vrot.slane %v4495_v4, 2  ;;  %v3782_v0 = vmax.f32 %v3718_v29, 0.0  ;;  %9213 = vmatpush3.bf16.msra.mxu0 %v9461_v47  ;;  %v11606_v60 = vadd.f32 %v4463_v40, %v11541_v59 }
 0x37a   : > { %v4450_v13 = vadd.f32 %v4449_v7, %v4448_v36  ;;  %v3723_v5 = vadd.f32 %v14628_v27, %v3659_v58  ;;  %v3785_v41 = vmax.f32 %v3721_v49, 0.0  ;;  %9222 = vmatprep.subr.bf16.mxu0 %v11590_v37  ;;  %v4484_v22 = vrot.slane %v4483_v12, 1 }
 0x37b   : > { %v4514_v53 = vsel %vm2503_vm5, %v11593_v23, 0.0  ;;  %v11613_v11 = vmul.f32 %v11497_v8, %v3782_v0  ;;  %v14629_v39 = vcombine.high %v14596_v57, %v14596_v57  ;;  %v4490_v59 = vadd.f32 %v4489_v3, %v4488_v10  ;;  %v14633_v0 = vld [vmem:[#allocation161_spill] sm:$0xff] }
 0x37c   : > { %v4511_v40 = vadd.f32 %v4510_v51, %v4509_v45  ;;  %v3787_v36 = vmax.f32 %v3723_v5, 0.0  ;;  %v11620_v34 = vmul.f32 %v11189_v25, %v3785_v41  ;;  %v11622_v14 = vunpack.c.l.b16 %v4677_v61 }
 0x37d   : > { %v3228_v47 = vrot.slane %v14629_v39, %v14458_v31  ;;  %v11624_v20 = vunpack.c.l.b16 %v4675_v38  ;;  %v4497_v43 = vadd.f32 %v4496_v18, %v4495_v4  ;;  %v4515_v63 = vrot.slane %v4514_v53, 4  ;;  %v14632_v38 = vld [vmem:[#allocation159_spill] sm:$0xff] }
 0x37e   : > { %14630 = vst [vmem:[#allocation95_spill] sm:$0xff] %v11620_v34  ;;  %v4500_v57 = vsel %vm2503_vm5, %v11613_v11, 0.0  ;;  %v3221_v45 = vrot.slane %v14598_v56, %v14458_v31  ;;  %v11633_v10 = vmul.f32 %v11271_v55, %v3787_v36  ;;  %v4521_v44 = vsel %vm2503_vm5, %v11620_v34, 0.0 }
 0x37f   : > { %v3238_v32 = vcombine.high %v3228_v47, %v3228_v47  ;;  %v3488_v4 = vrot.slane %v3228_v47, %v14461_v24  ;;  %v4676_v29 = vpack.c.bf16 %v4450_v13, %v4450_v13  ;;  %v4485_v58 = vadd.f32 %v4484_v22, %v4483_v12 }
 0x380   : > { %14631 = vst [vmem:[#allocation197_spill] sm:$0xff] %v11633_v10  ;;  %v4491_v3 = vrot.slane %v4490_v59, 1  ;;  %v4512_v51 = vrot.slane %v4511_v40, 1  ;;  %v4498_v49 = vrot.slane %v4497_v43, 1  ;;  %v4522_v61 = vrot.slane %v4521_v44, 4 }
 0x381   : > { %v3496_v9 = vrot.slane %v3238_v32, %v14461_v24  ;;  %v3658_v5 = vadd.f32 %v3488_v4, %v14633_v0  ;;  %v4516_v41 = vadd.f32 %v4515_v63, %v4514_v53  ;;  %v4501_v39 = vrot.slane %v4500_v57, 4 }
 0x382   : > { %v3237_v36 = vcombine.high %v3221_v45, %v3221_v45  ;;  %v3500_v7 = vrot.slane %v3221_v45, %v14461_v24  ;;  %v4535_v32 = vsel %vm2503_vm5, %v11633_v10, 0.0  ;;  %v4523_v55 = vadd.f32 %v4522_v61, %v4521_v44 }
 0x383   : > { %v3660_v18 = vadd.f32 %v14632_v38, %v3496_v9  ;;  %v3722_v12 = vadd.f32 %v14628_v27, %v3658_v5  ;;  %v4681_v22 = vpack.c.bf16 %v4485_v58, %v4485_v58  ;;  %v4492_v47 = vadd.f32 %v4491_v3, %v4490_v59  ;;  %v14634_v9 = vld [vmem:[#allocation168_spill] sm:$0xff] }
 0x384   : > { %v3508_v25 = vrot.slane %v3237_v36, %v14461_v24  ;;  %v3661_v38 = vadd.f32 %v3500_v7, %v14634_v9  ;;  %v4513_v4 = vadd.f32 %v4512_v51, %v4511_v40  ;;  %v4524_v53 = vrot.slane %v4523_v55, 2 }
 0x385   : > { %v3724_v13 = vadd.f32 %v14628_v27, %v3660_v18  ;;  %v3786_v0 = vmax.f32 %v3722_v12, 0.0  ;;  %v4502_v8 = vadd.f32 %v4501_v39, %v4500_v57  ;;  %v4536_v45 = vrot.slane %v4535_v32, 4 }
 0x386   : > { %v3663_v34 = vadd.f32 %v14635_v15, %v3508_v25  ;;  %v3725_v44 = vadd.f32 %v14628_v27, %v3661_v38  ;;  %v4499_v61 = vadd.f32 %v4498_v49, %v4497_v43  ;;  %v4517_v18 = vrot.slane %v4516_v41, 2 }
 0x387   : > { %v3788_v63 = vmax.f32 %v3724_v13, 0.0  ;;  %v11654_v59 = vmul.f32 %v11304_v26, %v3786_v0  ;;  %v4525_v58 = vadd.f32 %v4524_v53, %v4523_v55  ;;  %v14638_v57 = vcombine.high %v14598_v56, %v14598_v56  ;;  %v11669_v56 = vpop.permute.xlu0 %4073 }
 0x388   : > { %v3727_v40 = vadd.f32 %v14628_v27, %v3663_v34  ;;  %v3789_v7 = vmax.f32 %v3725_v44, 0.0  ;;  %v11661_v25 = vunpack.c.l.b16 %v4676_v29  ;;  %v4682_v15 = vpack.c.bf16 %v4492_v47, %v4492_v47  ;;  %14639 = vst [vmem:[#allocation168_spill] sm:$0xff] %v11669_v56 }
 0x389   : > { %v11651_v5 = vmul.f32 %v11311_v17, %v3788_v63  ;;  %14637 = vst [vmem:[#allocation161_spill] sm:$0xff] %v11654_v59  ;;  %v3235_v3 = vrot.slane %v14638_v57, %v14458_v31  ;;  %v4685_v43 = vpack.c.bf16 %v4513_v4, %v4513_v4  ;;  %v4503_v49 = vrot.slane %v4502_v8, 2 }
 0x38a   : > { %v4537_v39 = vadd.f32 %v4536_v45, %v4535_v32  ;;  %v4528_v55 = vsel %vm2503_vm5, %v11654_v59, 0.0  ;;  %v11667_v34 = vunpack.c.l.b16 %v4681_v22  ;;  %v4683_v13 = vpack.c.bf16 %v4499_v61, %v4499_v61  ;;  %v14646_v59 = vld [vmem:[#allocation97_spill] sm:$0xff] }
 0x38b   : > { %14636 = vst [vmem:[#allocation159_spill] sm:$0xff] %v11651_v5  ;;  %v4542_v51 = vsel %vm2503_vm5, %v11651_v5, 0.0  ;;  %v4529_v12 = vrot.slane %v4528_v55, 4  ;;  %v3791_v9 = vmax.f32 %v3727_v40, 0.0  ;;  %v4518_v29 = vadd.f32 %v4517_v18, %v4516_v41  ;;  %v11700_v10 = vpop.permute.xlu0 %4078 }
 0x38c   : > { %v4543_v36 = vrot.slane %v4542_v51, 4  ;;  %v4526_v38 = vrot.slane %v4525_v58, 1  ;;  %v11672_v47 = vmul.f32 %v11390_v30, %v3789_v7  ;;  %v3239_v4 = vcombine.high %v3235_v3, %v3235_v3 }
 0x38d   : > { %v11674_v53 = vunpack.c.l.b16 %v4682_v15  ;;  %v11676_v32 = vunpack.c.l.b16 %v4685_v43  ;;  %v4530_v63 = vadd.f32 %v4529_v12, %v4528_v55  ;;  %v11679_v0 = vmul.f32 %v11669_v56, %v3791_v9  ;;  %v14642_v9 = vld [vmem:[#allocation169_spill] sm:$0xff] }
 0x38e   : > { %14640 = vst [vmem:[#allocation164_spill] sm:$0xff] %v11672_v47  ;;  %v4504_v22 = vadd.f32 %v4503_v49, %v4502_v8  ;;  %v4538_v45 = vrot.slane %v4537_v39, 2  ;;  %v4544_v44 = vadd.f32 %v4543_v36, %v4542_v51  ;;  %v4549_v61 = vsel %vm2503_vm5, %v11672_v47, 0.0  ;;  %14645 = vst [vmem:[#allocation169_spill] sm:$0xff] %v11700_v10 }
 0x38f   : > { %14641 = vst [vmem:[#allocation198_spill] sm:$0xff] %v11679_v0  ;;  %v11683_v41 = vunpack.c.l.b16 %v4683_v13  ;;  %v4531_v18 = vrot.slane %v4530_v63, 2  ;;  %v4563_v40 = vsel %vm2503_vm5, %v11679_v0, 0.0  ;;  %v3512_v7 = vrot.slane %v3239_v4, %v14461_v24 }
 0x390   : > { %v4519_v57 = vrot.slane %v4518_v29, 1  ;;  %v4527_v15 = vadd.f32 %v4526_v38, %v4525_v58  ;;  %v4564_v43 = vrot.slane %v4563_v40, 4  ;;  %v4550_v55 = vrot.slane %v4549_v61, 4  ;;  %v14643_v58 = vld [vmem:[#allocation128_spill] sm:$0xff] }
 0x391   : > { %v4532_v12 = vadd.f32 %v4531_v18, %v4530_v63  ;;  %v3664_v8 = vadd.f32 %v14642_v9, %v3512_v7  ;;  %v3504_v51 = vrot.slane %v3235_v3, %v14461_v24  ;;  %v3285_v49 = vcombine.high %v11485_v50, %v11485_v50 }
 0x392   : > { %v4505_v36 = vrot.slane %v4504_v22, 1  ;;  %v4539_v13 = vadd.f32 %v4538_v45, %v4537_v39  ;;  %v4545_v30 = vrot.slane %v4544_v44, 2  ;;  %v3516_v56 = vrot.slane %v11485_v50, %v14461_v24  ;;  %v14644_v45 = vld [vmem:[#allocation175_spill] sm:$0xff] }
 0x393   : > { %v4533_v17 = vrot.slane %v4532_v12, 1  ;;  %v3728_v4 = vadd.f32 %v14628_v27, %v3664_v8  ;;  %v3662_v38 = vadd.f32 %v3504_v51, %v14643_v58  ;;  %v3524_v63 = vrot.slane %v3285_v49, %v14461_v24 }
 0x394   : > { %v4687_v18 = vpack.c.bf16 %v4527_v15, %v4527_v15  ;;  %v4565_v7 = vadd.f32 %v4564_v43, %v4563_v40  ;;  %v4551_v9 = vadd.f32 %v4550_v55, %v4549_v61  ;;  %v3665_v3 = vadd.f32 %v3516_v56, %v11273_v6 }
 0x395   : > { %v4534_v26 = vadd.f32 %v4533_v17, %v4532_v12  ;;  %v3792_v0 = vmax.f32 %v3728_v4, 0.0  ;;  %v3726_v39 = vadd.f32 %v14628_v27, %v3662_v38  ;;  %v3667_v47 = vadd.f32 %v14644_v45, %v3524_v63 }
 0x396   : > { %v4506_v50 = vadd.f32 %v4505_v36, %v4504_v22  ;;  %v4540_v5 = vrot.slane %v4539_v13, 1  ;;  %v4546_v8 = vadd.f32 %v4545_v30, %v4544_v44  ;;  %v3729_v51 = vadd.f32 %v14646_v59, %v3665_v3 }
 0x397   : > { %v4688_v58 = vpack.c.bf16 %v4534_v26, %v4534_v26  ;;  %v11704_v15 = vmul.f32 %v11700_v10, %v3792_v0  ;;  %v3790_v61 = vmax.f32 %v3726_v39, 0.0  ;;  %v3731_v6 = vadd.f32 %v14646_v59, %v3667_v47 }
 0x398   : > { %v11707_v17 = vadd.f32 %v4519_v57, %v4518_v29  ;;  %v4815_v56 = vunpack.c.l.b16 %v4687_v18  ;;  %v4566_v27 = vrot.slane %v4565_v7, 2  ;;  %v3793_v40 = vmax.f32 %v3729_v51, 0.0  ;;  %v14647_v57 = vld [vmem:[#allocation172_spill] sm:$0xff] }
 0x399   : > { %v4816_v43 = vunpack.c.l.b16 %v4688_v58  ;;  %v4552_v55 = vrot.slane %v4551_v9, 2  ;;  %v4570_v22 = vsel %vm2503_vm5, %v11704_v15, 0.0  ;;  %v11712_v30 = vmul.f32 %v11445_v21, %v3790_v61 }
 0x39a   : > { %v4684_v26 = vpack.c.bf16 %v4506_v50, %v4506_v50  ;;  %v11714_v44 = vadd.f32 %v4540_v5, %v4539_v13  ;;  %v4571_v0 = vrot.slane %v4570_v22, 4  ;;  %v3795_v12 = vmax.f32 %v3731_v6, 0.0 }
 0x39b   : > { %v4547_v49 = vrot.slane %v4546_v8, 1  ;;  %v11717_v29 = vsel %vm4831_vm6, %v4816_v43, %v4815_v56  ;;  %v4556_v47 = vsel %vm2503_vm5, %v11712_v30, 0.0  ;;  %v11722_v36 = vmul.f32 %v14647_v57, %v3793_v40 }
 0x39c   : > { %v4567_v38 = vadd.f32 %v4566_v27, %v4565_v7  ;;  %v4572_v63 = vadd.f32 %v4571_v0, %v4570_v22  ;;  %v4557_v18 = vrot.slane %v4556_v47, 4  ;;  %v4553_v5 = vadd.f32 %v4552_v55, %v4551_v9 }
 0x39d   : > { %v11727_v13 = vmul.f32 %v11414_v48, %v3795_v12  ;;  %v4577_v3 = vsel %vm2503_vm5, %v11722_v36, 0.0  ;;  %v14648_v39 = vcombine.high %v11422_v54, %v11422_v54  ;;  %v11735_v50 = vunpack.c.l.b16 %v4684_v26 }
 0x39e   : > { %v4689_v51 = vpack.c.bf16 %v11714_v44, %v11714_v44  ;;  %v4573_v7 = vrot.slane %v4572_v63, 2  ;;  %v4558_v58 = vadd.f32 %v4557_v18, %v4556_v47  ;;  %v4548_v61 = vadd.f32 %v4547_v49, %v4546_v8 }
 0x39f   : > { %v3277_v45 = vrot.slane %v14648_v39, %v14458_v31  ;;  %v4591_v9 = vsel %vm2503_vm5, %v11727_v13, 0.0  ;;  %v4578_v6 = vrot.slane %v4577_v3, 4  ;;  %v4568_v27 = vrot.slane %v4567_v38, 1 }
 0x3a0   : > { %v4559_v40 = vrot.slane %v4558_v58, 2  ;;  %v4592_v43 = vrot.slane %v4591_v9, 4  ;;  %v4554_v54 = vrot.slane %v4553_v5, 1  ;;  %v3270_v44 = vrot.slane %v11425_v1, %v14458_v31 }
 0x3a1   : > { %v3287_v56 = vcombine.high %v3277_v45, %v3277_v45  ;;  %v3520_v55 = vrot.slane %v3277_v45, %v14461_v24  ;;  %v4579_v22 = vadd.f32 %v4578_v6, %v4577_v3  ;;  %v4574_v0 = vadd.f32 %v4573_v7, %v4572_v63 }
 0x3a2   : > { %v4560_v12 = vadd.f32 %v4559_v40, %v4558_v58  ;;  %v4593_v8 = vadd.f32 %v4592_v43, %v4591_v9  ;;  %v3286_v39 = vcombine.high %v3270_v44, %v3270_v44  ;;  %v3532_v4 = vrot.slane %v3270_v44, %v14461_v24  ;;  %v14650_v58 = vld [vmem:[#allocation181_spill] sm:$0xff] }
 0x3a3   : > { %v3528_v26 = vrot.slane %v3287_v56, %v14461_v24  ;;  %v3666_v49 = vadd.f32 %v3520_v55, %v11317_v28  ;;  %v4580_v47 = vrot.slane %v4579_v22, 2  ;;  %v14649_v6 = vcombine.high %v11425_v1, %v11425_v1 }
 0x3a4   : > { %v4561_v57 = vrot.slane %v4560_v12, 1  ;;  %v4594_v45 = vrot.slane %v4593_v8, 2  ;;  %v3540_v28 = vrot.slane %v3286_v39, %v14461_v24  ;;  %v4690_v9 = vpack.c.bf16 %v4548_v61, %v4548_v61  ;;  %v14653_v39 = vld [vmem:[#allocation144_spill] sm:$0xff] }
 0x3a5   : > { %v3668_v18 = vadd.f32 %v11275_v19, %v3528_v26  ;;  %v3730_v3 = vadd.f32 %v14646_v59, %v3666_v49  ;;  %v11753_v56 = vrot.slane %v14649_v6, %v14458_v31  ;;  %v4581_v63 = vadd.f32 %v4580_v47, %v4579_v22  ;;  %v14651_v49 = vld [vmem:[#allocation139_spill] sm:$0xff]  ;;  %v14652_v47 = vld [vmem:[#allocation104_spill] sm:$0xff] }
 0x3a6   : > { %v3669_v19 = vadd.f32 %v3532_v4, %v14650_v58  ;;  %v4555_v40 = vadd.f32 %v4554_v54, %v4553_v5  ;;  %v4575_v43 = vrot.slane %v4574_v0, 1  ;;  %v4562_v26 = vadd.f32 %v4561_v57, %v4560_v12 }
 0x3a7   : > { %v3732_v7 = vadd.f32 %v14646_v59, %v3668_v18  ;;  %v3794_v55 = vmax.f32 %v3730_v3, 0.0  ;;  %v3671_v48 = vadd.f32 %v14651_v49, %v3540_v28  ;;  %v11760_v1 = vadd.f32 %v4568_v27, %v4567_v38 }
 0x3a8   : > { %v3733_v21 = vadd.f32 %v14646_v59, %v3669_v19  ;;  %v4595_v6 = vadd.f32 %v4594_v45, %v4593_v8  ;;  %v4582_v22 = vrot.slane %v4581_v63, 1  ;;  %v3288_v57 = vcombine.high %v11753_v56, %v11753_v56 }
 0x3a9   : > { %v3796_v44 = vmax.f32 %v3732_v7, 0.0  ;;  %v11763_v18 = vmul.f32 %v14652_v47, %v3794_v55  ;;  %v3735_v4 = vadd.f32 %v14646_v59, %v3671_v48  ;;  %v11771_v61 = vunpack.c.l.b16 %v4689_v51  ;;  %v11784_v51 = vpop.permute.xlu1 %4113 }
 0x3aa   : > { %v3797_v5 = vmax.f32 %v3733_v21, 0.0  ;;  %v11773_v54 = vunpack.c.l.b16 %v4690_v9  ;;  %v4691_v38 = vpack.c.bf16 %v4555_v40, %v4555_v40  ;;  %v11777_v12 = vadd.f32 %v4575_v43, %v4574_v0  ;;  %14654 = vst [vmem:[#allocation128_spill] sm:$0xff] %v11784_v51 }
 0x3ab   : > { %v11766_v10 = vmul.f32 %v14653_v39, %v3796_v44  ;;  %v4584_v27 = vsel %vm2503_vm5, %v11763_v18, 0.0  ;;  %v4692_v8 = vpack.c.bf16 %v4562_v26, %v4562_v26  ;;  %v4596_v48 = vrot.slane %v4595_v6, 1  ;;  %v14788_v39 = vld [vmem:[#allocation191_spill] sm:$0xff] }
 0x3ac   : > { %v4585_v3 = vrot.slane %v4584_v27, 4  ;;  %v3799_v7 = vmax.f32 %v3735_v4, 0.0  ;;  %v11782_v28 = vmul.f32 %v11516_v46, %v3797_v5  ;;  %v4583_v19 = vadd.f32 %v4582_v22, %v4581_v63  ;;  %v14655_v5 = vld [vmem:[#allocation183_spill] sm:$0xff] }
 0x3ad   : > { %v4598_v45 = vsel %vm2503_vm5, %v11766_v10, 0.0  ;;  %v3544_v0 = vrot.slane %v3288_v57, %v14461_v24  ;;  %v11789_v40 = vunpack.c.l.b16 %v4691_v38  ;;  %v11799_v63 = vunpack.c.l.b16 %v4692_v8 }
 0x3ae   : > { %v4599_v21 = vrot.slane %v4598_v45, 4  ;;  %v4586_v9 = vadd.f32 %v4585_v3, %v4584_v27  ;;  %v11792_v55 = vmul.f32 %v11784_v51, %v3799_v7  ;;  %v4605_v26 = vsel %vm2503_vm5, %v11782_v28, 0.0  ;;  %v14656_v51 = vld [vmem:[#allocation192_spill] sm:$0xff] }
 0x3af   : > { %v4606_v4 = vrot.slane %v4605_v26, 4  ;;  %v3672_v58 = vadd.f32 %v14655_v5, %v3544_v0  ;;  %v4597_v22 = vadd.f32 %v4596_v48, %v4595_v6  ;;  %v4695_v27 = vpack.c.bf16 %v4583_v19, %v4583_v19 }
 0x3b0   : > { %v4600_v43 = vadd.f32 %v4599_v21, %v4598_v45  ;;  %v4587_v49 = vrot.slane %v4586_v9, 2  ;;  %v4619_v38 = vsel %vm2503_vm5, %v11792_v55, 0.0  ;;  %v4867_v44 = vsel %vm4833_vm7, %v11539_v62, %v14656_v51  ;;  %v14658_v51 = vld [vmem:[#allocation186_spill] sm:$0xff] }
 0x3b1   : > { %v4607_v3 = vadd.f32 %v4606_v4, %v4605_v26  ;;  %v3736_v21 = vadd.f32 %v14646_v59, %v3672_v58  ;;  %v4874_v8 = vsel %vm4833_vm7, %v11667_v34, %v11598_v35  ;;  %v3536_v6 = vrot.slane %v11753_v56, %v14461_v24 }
 0x3b2   : > { %v4601_v57 = vrot.slane %v4600_v43, 2  ;;  %v4588_v45 = vadd.f32 %v4587_v49, %v4586_v9  ;;  %v4620_v0 = vrot.slane %v4619_v38, 4  ;;  %v11812_v9 = vpop.permute.xlu1 %4118  ;;  %v4868_v58 = vsel %vm4835_vm8, %v11546_v16, %v4867_v44 }
 0x3b3   : > { %v4608_v5 = vrot.slane %v4607_v3, 2  ;;  %v3800_v19 = vmax.f32 %v3736_v21, 0.0  ;;  %14657 = vst [vmem:[#allocation175_spill] sm:$0xff] %v11812_v9  ;;  %v4875_v62 = vsel %vm4835_vm8, %v11674_v53, %v4874_v8  ;;  %v4697_v49 = vpack.c.bf16 %v4597_v22, %v4597_v22 }
 0x3b4   : > { %v4602_v7 = vadd.f32 %v4601_v57, %v4600_v43  ;;  %v4589_v48 = vrot.slane %v4588_v45, 1  ;;  %v3670_v43 = vadd.f32 %v3536_v6, %v14658_v51  ;;  %v4869_v57 = vsel %vm4837_vm9, %v11624_v20, %v4868_v58 }
 0x3b5   : > { %v4609_v34 = vadd.f32 %v4608_v5, %v4607_v3  ;;  %v11820_v56 = vmul.f32 %v11812_v9, %v3800_v19  ;;  %v4876_v21 = vsel %vm4837_vm9, %v11683_v41, %v4875_v62  ;;  %v14659_v22 = vpack.c.bf16 %v11606_v60, %v11606_v60  ;;  %v14787_v9 = vld [vmem:[#allocation56_spill] sm:$0xff] }
 0x3b6   : > { %v4603_v26 = vrot.slane %v4602_v7, 1  ;;  %v4590_v35 = vadd.f32 %v4589_v48, %v4588_v45  ;;  %v3734_v16 = vadd.f32 %v14646_v59, %v3670_v43  ;;  %v4621_v8 = vadd.f32 %v4620_v0, %v4619_v38 }
 0x3b7   : > { %v4610_v46 = vrot.slane %v4609_v34, 1  ;;  %v4626_v53 = vsel %vm2503_vm5, %v11820_v56, 0.0  ;;  %v4806_v45 = vunpack.c.l.b16 %v14659_v22  ;;  %v4870_v20 = vsel %vm4839_vm10, %v11661_v25, %v4869_v57 }
 0x3b8   : > { %v4604_v4 = vadd.f32 %v4603_v26, %v4602_v7  ;;  %v4696_v44 = vpack.c.bf16 %v4590_v35, %v4590_v35  ;;  %v4627_v7 = vrot.slane %v4626_v53, 4  ;;  %v4823_v6 = vunpack.c.l.b16 %v4695_v27 }
 0x3b9   : > { %v4611_v41 = vadd.f32 %v4610_v46, %v4609_v34  ;;  %v4871_v59 = vsel %vm4841_vm11, %v11622_v14, %v4870_v20  ;;  %v14660_v19 = vpack.c.bf16 %v11707_v17, %v11707_v17  ;;  %v4877_v38 = vsel %vm4839_vm10, %v11735_v50, %v4876_v21 }
 0x3ba   : > { %v4698_v3 = vpack.c.bf16 %v4604_v4, %v4604_v4  ;;  %v4824_v48 = vunpack.c.l.b16 %v4696_v44  ;;  %v4628_v5 = vadd.f32 %v4627_v7, %v4626_v53  ;;  %v4872_v60 = vsel %vm4843_vm12, %v4806_v45, %v4871_v59 }
 0x3bb   : > { %v4814_v26 = vunpack.c.l.b16 %v14660_v19  ;;  %v4825_v0 = vunpack.c.l.b16 %v4697_v49  ;;  %v4699_v25 = vpack.c.bf16 %v4611_v41, %v4611_v41  ;;  %v4878_v46 = vsel %vm4841_vm11, %v11676_v32, %v4877_v38 }
 0x3bc   : > { %v4887_v58 = vsel %vm4831_vm6, %v4824_v48, %v4823_v6  ;;  %v4826_v27 = vunpack.c.l.b16 %v4698_v3  ;;  %v4622_v62 = vrot.slane %v4621_v8, 2  ;;  %v3798_v51 = vmax.f32 %v3734_v16, 0.0 }
 0x3bd   : > { %v4879_v14 = vsel %vm4843_vm12, %v4814_v26, %v4878_v46  ;;  %v4827_v43 = vunpack.c.l.b16 %v4699_v25  ;;  %v4629_v17 = vrot.slane %v4628_v5, 2  ;;  %v4881_v34 = vsel %vm4833_vm7, %v11771_v61, %v11717_v29 }
 0x3be   : > { %v4896_v35 = vpack.c.b16 %v4879_v14, %v4872_v60  ;;  %v11850_v50 = vmul.f32 %v11562_v2, %v3798_v51  ;;  %v4882_v49 = vsel %vm4835_vm8, %v11773_v54, %v4881_v34  ;;  %v4888_v32 = vsel %vm4833_vm7, %v4825_v0, %v4887_v58  ;;  %v14664_v14 = vld [vmem:[#allocation27_spill] sm:$0xff]  ;;  %v14665_v51 = vld [vmem:[#allocation32_spill] sm:$0xff]  ;;  %v9465_v34 = vld [vmem:[%s13969_s11 + $0x18] sm:$0xff]  }
 0x3bf   : > { %v14661_v4 = vpack.c.bf16 %v11760_v1, %v11760_v1  ;;  %v4883_v21 = vsel %vm4837_vm9, %v11789_v40, %v4882_v49  ;;  %v4889_v16 = vsel %vm4835_vm8, %v4826_v27, %v4888_v32  ;;  %v4623_v29 = vadd.f32 %v4622_v62, %v4621_v8  ;;  %v14663_v62 = vld [vmem:[#allocation26_spill] sm:$0xff]  ;;  %v11897_v49 = vpop.permute.xlu1 %5086  ;;  %v11899_v32 = vpop.permute.xlu0 %5082 }
 0x3c0   : > { %9206 = vmatprep.mubr.msk.bf16.mxu0 %vm2503_vm5, %v4896_v35  ;;  %v4612_v61 = vsel %vm2503_vm5, %v11850_v50, 0.0  ;;  %v14662_v54 = vpack.c.bf16 %v11777_v12, %v11777_v12  ;;  %v4884_v53 = vsel %vm4839_vm10, %v11799_v63, %v4883_v21  ;;  %v4630_v1 = vadd.f32 %v4629_v17, %v4628_v5  ;;  %v9463_v17 = vld [vmem:[%s13968_s10 + $0x18] sm:$0xff]   ;;  %v9464_v35 = vld [vmem:[%s13969_s11 + $0x10] sm:$0xff]   ;;  %14667 = vst [vmem:[#allocation97_spill] sm:$0xff] %v11897_v49 }
 0x3c1   : > { %v4821_v57 = vunpack.c.l.b16 %v14661_v4  ;;  %v4613_v22 = vrot.slane %v4612_v61, 4  ;;  %v4890_v3 = vsel %vm4837_vm9, %v4827_v43, %v4889_v16  ;;  %v4624_v8 = vrot.slane %v4623_v29, 1  ;;  %v14666_v43 = vld [vmem:[#allocation33_spill] sm:$0xff]  ;;  %9234 = vmatprep.subr.bf16.mxu1 %v9464_v35  ;;  %14668 = vst [vmem:[#allocation181_spill] sm:$0xff] %v11899_v32  ;;  %v8703_v4 = vld [vmem:[%s13973_s15] ss:$0 sm:$0xff] }
 0x3c2   : > { %v4822_v44 = vunpack.c.l.b16 %v14662_v54  ;;  %v4631_v20 = vrot.slane %v4630_v1, 1  ;;  %9235 = vmatpush3.bf16.msra.mxu1 %v9464_v35  ;;  %v12181_v47 = vadd.f32 %v14788_v39, %v14787_v9  ;;  %v14796_v39 = vld [vmem:[#allocation62_spill] sm:$0xff]  ;;  %v14797_v9 = vld [vmem:[#allocation92_spill] sm:$0xff] }
 0x3c3   : > { %v4885_v45 = vsel %vm4841_vm11, %v4821_v57, %v4884_v53  ;;  %v4614_v7 = vadd.f32 %v4613_v22, %v4612_v61  ;;  %v4625_v41 = vadd.f32 %v4624_v8, %v4623_v29  ;;  %9236 = vmatprep.subr.bf16.mxu1 %v9465_v34  ;;  %v11904_v21 = vpop.permute.xlu1 %5094  ;;  %v11906_v61 = vpop.permute.xlu0 %5090 }
 0x3c4   : > { %v4886_v40 = vsel %vm4843_vm12, %v4822_v44, %v4885_v45  ;;  %v4632_v59 = vadd.f32 %v4631_v20, %v4630_v1  ;;  %14669 = vst [vmem:[#allocation139_spill] sm:$0xff] %v11904_v21  ;;  %14670 = vst [vmem:[#allocation183_spill] sm:$0xff] %v11906_v61 }
 0x3c5   : > { %v4615_v6 = vrot.slane %v4614_v7, 2  ;;  %v4701_v26 = vpack.c.bf16 %v4625_v41, %v4625_v41 }
 0x3c6   : > { %v4702_v60 = vpack.c.bf16 %v4632_v59, %v4632_v59  ;;  %9237 = vmatpush3.bf16.msra.mxu1 %v9465_v34 }
 0x3c7   : > { %v4616_v48 = vadd.f32 %v4615_v6, %v4614_v7  ;;  %v4829_v38 = vunpack.c.l.b16 %v4701_v26  ;;  %v11909_v20 = vpop.permute.xlu1 %5102  ;;  %v11913_v41 = vpop.permute.xlu0 %5098 }
 0x3c8   : > { %v4830_v0 = vunpack.c.l.b16 %v4702_v60  ;;  %14671 = vst [vmem:[#allocation192_spill] sm:$0xff] %v11909_v20  ;;  %14672 = vst [vmem:[#allocation186_spill] sm:$0xff] %v11913_v41 }
 0x3c9   : > { %v4617_v12 = vrot.slane %v4616_v48, 1 }
 0x3cb   : > { %v4618_v19 = vadd.f32 %v4617_v12, %v4616_v48 }
 0x3cd   : > { %v4700_v63 = vpack.c.bf16 %v4618_v19, %v4618_v19  ;;  %v14673_v19 = vld [vmem:[#allocation22_spill] sm:$0xff] }
 0x3cf   : > { %v4828_v5 = vunpack.c.l.b16 %v4700_v63 }
 0x3d1   : > { %v4891_v58 = vsel %vm4839_vm10, %v4828_v5, %v4890_v3  ;;  %v14675_v5 = vld [vmem:[#allocation23_spill] sm:$0xff] }
 0x3d2   : > { %v4892_v25 = vsel %vm4841_vm11, %v4829_v38, %v4891_v58 }
 0x3d3   : > { %v4893_v46 = vsel %vm4843_vm12, %v4830_v0, %v4892_v25  ;;  %v14677_v0 = vld [vmem:[#allocation24_spill] sm:$0xff] }
 0x3d4   : > { %v4897_v27 = vpack.c.b16 %v4893_v46, %v4886_v40 }
 0x3d6   : > { %9207 = vmatmul.mubr.msk.bf16.gmra.mrb[88].mxu0 %vm2503_vm5, %v4897_v27  ;;  %v14679_v27 = vld [vmem:[#allocation25_spill] sm:$0xff] }
 0x3d7   : > { %9214 = vmatprep.mubr.msk.bf16.mxu0 %vm1706_vm4, %v14663_v62 }
 0x3de   : > { %9215 = vmatmul.mubr.msk.bf16.vlgmr.msra.gmra.mrb[84].mxu0 %vm1706_vm4, %v14664_v14 }
 0x3df   : > { %9218 = vmatprep.mubr.msk.bf16.mxu0 %vm1706_vm4, %v14665_v51  ;;  %9223 = vmatpush3.bf16.msra.mxu0 %v11590_v37  ;;  %v9466_v37 = vld [vmem:[%s13967_s9 + $0x8] sm:$0xff]  }
 0x3e0   : > { %9224 = vmatprep.subr.bf16.mxu0 %v9463_v17 }
 0x3e3   : > { %9225 = vmatpush3.bf16.msra.mxu0 %v9463_v17 }
 0x3e4   : > { %9246 = vmatprep.subr.bf16.mxu0 %v9466_v37 }
 0x3e6   : > { %9219 = vmatmul.mubr.msk.bf16.gmra.mrb[88].mxu0 %vm1706_vm4, %v14666_v43 }
 0x4b1   : > { %v9216_v57 = vpop.f32.mrb[84].mxu0 }
 0x4b2   : > { %v5067_v16 = vadd.f32 %v9216_v57, %v8703_v4  ;;  %v5027_v29 = vpop.f32.mrb[85].mxu0 }
 0x4b3   : > { %v5065_v54 = vadd.f32 %v8703_v4, %v5027_v29  ;;  %v9217_v44 = vpop.f32.mrb[86].mxu0  ;;  %v11936_v29 = vpop.permute.xlu1 %5110 }
 0x4b4   : > { %v5075_v53 = vmax.f32 %v5067_v16, 0.0  ;;  %v5068_v1 = vadd.f32 %v9217_v44, %v8703_v4  ;;  %v5030_v22 = vpop.f32.mrb[87].mxu0  ;;  %14683 = vst [vmem:[#allocation24_spill] sm:$0xff] %v11936_v29 }
 0x4b5   : > { %v5073_v45 = vmax.f32 %v5065_v54, 0.0  ;;  %v5066_v3 = vadd.f32 %v8703_v4, %v5030_v22  ;;  %v11938_v54 = vpop.permute.xlu0 %5106 }
 0x4b6   : > { %v5076_v40 = vmax.f32 %v5068_v1, 0.0  ;;  %v5115_v6 = vmul.f32 %v11906_v61, %v5075_v53  ;;  %14684 = vst [vmem:[#allocation25_spill] sm:$0xff] %v11938_v54  ;;  %v14765_v61 = vld [vmem:[#allocation162_spill] sm:$0xff] }
 0x4b7   : > { %v5113_v7 = vmul.f32 %v11899_v32, %v5073_v45  ;;  %v5074_v8 = vmax.f32 %v5066_v3, 0.0  ;;  %v14685_v45 = vld [vmem:[#allocation28_spill] sm:$0xff] }
 0x4b8   : > { %v5116_v48 = vmul.f32 %v11904_v21, %v5076_v40  ;;  %v11926_v62 = vadd.f32 %v5115_v6, %v14679_v27  ;;  %v14687_v40 = vld [vmem:[#allocation29_spill] sm:$0xff]  ;;  %v14699_v27 = vld [vmem:[#allocation6_spill] sm:$0xff]  ;;  %v14764_v32 = vld [vmem:[#allocation48_spill] sm:$0xff] }
 0x4b9   : > { %v5114_v59 = vmul.f32 %v11897_v49, %v5074_v8  ;;  %v9220_v12 = vpop.f32.mrb[88].mxu0  ;;  %v11920_v38 = vadd.f32 %v5113_v7, %v14675_v5  ;;  %v14689_v8 = vld [vmem:[#allocation30_spill] sm:$0xff]  ;;  %v14695_v5 = vld [vmem:[#allocation31_spill] sm:$0xff] }
 0x4ba   : > { %v11917_v26 = vadd.f32 %v5116_v48, %v14673_v19  ;;  %v5071_v60 = vadd.f32 %v9220_v12, %v8703_v4  ;;  %v5043_v63 = vpop.f32.mrb[89].mxu0  ;;  %14680 = vst [vmem:[#allocation33_spill] sm:$0xff] %v11926_v62  ;;  %v14691_v48 = vld [vmem:[#allocation7_spill] sm:$0xff]  ;;  %v14693_v19 = vld [vmem:[#allocation9_spill] sm:$0xff] }
 0x4bb   : > { %14676 = vst [vmem:[#allocation27_spill] sm:$0xff] %v11920_v38  ;;  %v11923_v58 = vadd.f32 %v5114_v59, %v14677_v0  ;;  %v5069_v25 = vadd.f32 %v8703_v4, %v5043_v63  ;;  %v9221_v46 = vpop.f32.mrb[90].mxu0  ;;  %v14692_v59 = vld [vmem:[#allocation105_spill] sm:$0xff] }
 0x4bc   : > { %14674 = vst [vmem:[#allocation26_spill] sm:$0xff] %v11917_v26  ;;  %v5079_v14 = vmax.f32 %v5071_v60, 0.0  ;;  %v5072_v51 = vadd.f32 %v9221_v46, %v8703_v4  ;;  %v5046_v43 = vpop.f32.mrb[91].mxu0  ;;  %v11934_v57 = vpack.c.bf16 %v11917_v26, %v11926_v62  ;;  %v11963_v12 = vadd.f32 %v14692_v59, %v14691_v48  ;;  %v14694_v60 = vld [vmem:[#allocation109_spill] sm:$0xff]  ;;  %v14708_v48 = vld [vmem:[#allocation122_spill] sm:$0xff]  ;;  %v14752_v26 = vld [vmem:[#allocation44_spill] sm:$0xff] }
 0x4bd   : > { %14678 = vst [vmem:[#allocation32_spill] sm:$0xff] %v11923_v58  ;;  %v11930_v17 = vpack.c.bf16 %v11923_v58, %v11920_v38  ;;  %v5077_v35 = vmax.f32 %v5069_v25, 0.0  ;;  %v5070_v34 = vadd.f32 %v8703_v4, %v5046_v43  ;;  %v11967_v63 = vadd.f32 %v14694_v60, %v14693_v19  ;;  %v14701_v43 = vld [vmem:[#allocation8_spill] sm:$0xff]  ;;  %v14710_v60 = vld [vmem:[#allocation171_spill] sm:$0xff] }
 0x4be   : > { %14682 = vst [vmem:[#allocation23_spill] sm:$0xff] %v11934_v57  ;;  %v5080_v16 = vmax.f32 %v5072_v51, 0.0  ;;  %v5119_v4 = vmul.f32 %v11938_v54, %v5079_v14  ;;  %v14700_v14 = vld [vmem:[#allocation110_spill] sm:$0xff]  ;;  %v14709_v19 = vld [vmem:[#allocation12_spill] sm:$0xff]  ;;  %v14741_v54 = vld [vmem:[#allocation143_spill] sm:$0xff] }
 0x4bf   : > { %14681 = vst [vmem:[#allocation22_spill] sm:$0xff] %v11930_v17  ;;  %v5117_v44 = vmul.f32 %v11913_v41, %v5077_v35  ;;  %v5078_v53 = vmax.f32 %v5070_v34, 0.0  ;;  %9226 = vmatprep.mubr.msk.bf16.mxu0 %vm1706_vm4, %v11930_v17  ;;  %9238 = vmatprep.mubr.msk.bf16.mxu1 %vm1706_vm4, %v11930_v17  ;;  %v5384_v46 = vpack.c.bf16 %v11967_v63, %v11963_v12  ;;  %v14702_v35 = vld [vmem:[#allocation113_spill] sm:$0xff]  ;;  %v14740_v41 = vld [vmem:[#allocation40_spill] sm:$0xff]  ;;  %v14753_v62 = vld [vmem:[#allocation147_spill] sm:$0xff] }
 0x4c0   : > { %v5120_v1 = vmul.f32 %v11936_v29, %v5080_v16  ;;  %9227 = vmatmul.mubr.msk.bf16.vlgmr.msra.gmra.mrb[92].mxu0 %vm1706_vm4, %v11934_v57  ;;  %9239 = vmatmul.mubr.msk.bf16.vlgmr.msra.gmra.mrb[76].mxu1 %vm1706_vm4, %v11934_v57  ;;  %v11970_v0 = vadd.f32 %v5119_v4, %v14695_v5  ;;  %v11993_v51 = vadd.f32 %v14700_v14, %v14699_v27  ;;  %v14703_v16 = vld [vmem:[#allocation11_spill] sm:$0xff]  ;;  %v14705_v4 = vld [vmem:[#allocation13_spill] sm:$0xff]  ;;  %v14712_v27 = vld [vmem:[#allocation118_spill] sm:$0xff] }
 0x4c1   : > { %v5118_v22 = vmul.f32 %v11909_v20, %v5078_v53  ;;  %9247 = vmatpush3.bf16.msra.mxu0 %v9466_v37  ;;  %v11956_v7 = vadd.f32 %v5117_v44, %v14687_v40  ;;  %v11997_v34 = vadd.f32 %v14702_v35, %v14701_v43  ;;  %v14704_v44 = vld [vmem:[#allocation115_spill] sm:$0xff]  ;;  %v12019_v5 = vadd.f32 %v14710_v60, %v14709_v19  ;;  %v14713_v43 = vld [vmem:[#allocation17_spill] sm:$0xff]  ;;  %v14714_v35 = vld [vmem:[#allocation120_spill] sm:$0xff] }
 0x4c2   : > { %v11953_v3 = vadd.f32 %v5120_v1, %v14685_v45  ;;  %14696 = vst [vmem:[#allocation7_spill] sm:$0xff] %v11970_v0  ;;  %v12001_v53 = vadd.f32 %v14704_v44, %v14703_v16  ;;  %v14706_v1 = vld [vmem:[#allocation116_spill] sm:$0xff]  ;;  %v12027_v16 = vadd.f32 %v14714_v35, %v14713_v43  ;;  %v14719_v60 = vld [vmem:[#allocation35_spill] sm:$0xff]  ;;  %v14721_v43 = vld [vmem:[#allocation34_spill] sm:$0xff]  ;;  %v12093_v58 = vadd.f32 %v14741_v54, %v14740_v41 }
 0x4c3   : > { %14688 = vst [vmem:[#allocation29_spill] sm:$0xff] %v11956_v7  ;;  %v11959_v6 = vadd.f32 %v5118_v22, %v14689_v8  ;;  %v12005_v22 = vadd.f32 %v14706_v1, %v14705_v4  ;;  %v5385_v45 = vpack.c.bf16 %v11997_v34, %v11993_v51  ;;  %v14707_v8 = vld [vmem:[#allocation10_spill] sm:$0xff]  ;;  %v12115_v49 = vadd.f32 %v14753_v62, %v14752_v26  ;;  %v14776_v57 = vld [vmem:[#allocation52_spill] sm:$0xff] }
 0x4c4   : > { %14686 = vst [vmem:[#allocation28_spill] sm:$0xff] %v11953_v3  ;;  %v11978_v25 = vpack.c.bf16 %v11953_v3, %v11970_v0  ;;  %v12015_v59 = vadd.f32 %v14708_v48, %v14707_v8  ;;  %v14715_v1 = vld [vmem:[#allocation14_spill] sm:$0xff]  ;;  %v14717_v8 = vld [vmem:[#allocation16_spill] sm:$0xff]  ;;  %v14718_v48 = vld [vmem:[#allocation125_spill] sm:$0xff] }
 0x4c5   : > { %14690 = vst [vmem:[#allocation30_spill] sm:$0xff] %v11959_v6  ;;  %v11974_v37 = vpack.c.bf16 %v11959_v6, %v11956_v7  ;;  %v5386_v40 = vpack.c.bf16 %v12005_v22, %v12001_v53  ;;  %v12041_v19 = vadd.f32 %v14718_v48, %v14717_v8  ;;  %v14722_v35 = vld [vmem:[#allocation126_spill] sm:$0xff]  ;;  %v14725_v48 = vld [vmem:[#allocation37_spill] sm:$0xff]  ;;  %v14730_v3 = vld [vmem:[#allocation36_spill] sm:$0xff] }
 0x4c6   : > { %14698 = vst [vmem:[#allocation9_spill] sm:$0xff] %v11978_v25  ;;  %v5387_v44 = vpack.c.bf16 %v12019_v5, %v12015_v59  ;;  %v12049_v6 = vadd.f32 %v14722_v35, %v14721_v43  ;;  %v14728_v43 = vld [vmem:[#allocation38_spill] sm:$0xff]  ;;  %v14729_v35 = vld [vmem:[#allocation129_spill] sm:$0xff]  ;;  %14742 = vst [vmem:[#allocation110_spill] sm:$0xff] %v12093_v58 }
 0x4c7   : > { %14697 = vst [vmem:[#allocation105_spill] sm:$0xff] %v11974_v37  ;;  %9230 = vmatprep.mubr.msk.bf16.mxu0 %vm1706_vm4, %v11974_v37  ;;  %9242 = vmatprep.mubr.msk.bf16.mxu1 %vm1706_vm4, %v11974_v37  ;;  %v12067_v7 = vadd.f32 %v14729_v35, %v14728_v43  ;;  %v14731_v0 = vld [vmem:[#allocation130_spill] sm:$0xff]  ;;  %v14736_v43 = vld [vmem:[#allocation145_spill] sm:$0xff]  ;;  %14754 = vst [vmem:[#allocation115_spill] sm:$0xff] %v12115_v49 }
 0x4c8   : > { %9231 = vmatmul.mubr.msk.bf16.gmra.mrb[96].mxu0 %vm1706_vm4, %v11978_v25  ;;  %9243 = vmatmul.mubr.msk.bf16.gmra.mrb[80].mxu1 %vm1706_vm4, %v11978_v25  ;;  %v12071_v20 = vadd.f32 %v14731_v0, %v14730_v3  ;;  %v14738_v3 = vld [vmem:[#allocation42_spill] sm:$0xff]  ;;  %v14739_v0 = vld [vmem:[#allocation124_spill] sm:$0xff]  ;;  %v12137_v25 = vadd.f32 %v14765_v61, %v14764_v32 }
 0x4c9   : > { %9248 = vmatprep.mubr.msk.bf16.mxu0 %vm2503_vm5, %v5384_v46  ;;  %v14711_v46 = vld [vmem:[#allocation15_spill] sm:$0xff]  ;;  %v12089_v29 = vadd.f32 %v14739_v0, %v14738_v3  ;;  %v14747_v3 = vld [vmem:[#allocation156_spill] sm:$0xff]  ;;  %v14749_v41 = vld [vmem:[#allocation46_spill] sm:$0xff] }
 0x4ca   : > { %v12023_v14 = vadd.f32 %v14712_v27, %v14711_v46  ;;  %v14720_v46 = vld [vmem:[#allocation135_spill] sm:$0xff]  ;;  %v14750_v54 = vld [vmem:[#allocation142_spill] sm:$0xff]  ;;  %14766 = vst [vmem:[#allocation122_spill] sm:$0xff] %v12137_v25  ;;  %v14777_v17 = vld [vmem:[#allocation180_spill] sm:$0xff] }
 0x4cb   : > { %v12045_v27 = vadd.f32 %v14720_v46, %v14719_v60  ;;  %v14726_v60 = vld [vmem:[#allocation133_spill] sm:$0xff]  ;;  %v12111_v38 = vadd.f32 %v14750_v54, %v14749_v41  ;;  %v14759_v41 = vld [vmem:[#allocation96_spill] sm:$0xff]  ;;  %v14761_v26 = vld [vmem:[#allocation50_spill] sm:$0xff]  ;;  %v12159_v2 = vadd.f32 %v14777_v17, %v14776_v57 }
 0x4cc   : > { %v5388_v4 = vpack.c.bf16 %v12027_v16, %v12023_v14  ;;  %v12063_v46 = vadd.f32 %v14726_v60, %v14725_v48  ;;  %v14735_v60 = vld [vmem:[#allocation41_spill] sm:$0xff]  ;;  %v14762_v62 = vld [vmem:[#allocation146_spill] sm:$0xff]  ;;  %v14785_v57 = vld [vmem:[#allocation184_spill] sm:$0xff] }
 0x4cd   : > { %v12085_v35 = vadd.f32 %v14736_v43, %v14735_v60  ;;  %v14746_v43 = vld [vmem:[#allocation45_spill] sm:$0xff]  ;;  %14751 = vst [vmem:[#allocation11_spill] sm:$0xff] %v12111_v38  ;;  %v12133_v21 = vadd.f32 %v14762_v62, %v14761_v26  ;;  %v14773_v32 = vld [vmem:[#allocation54_spill] sm:$0xff]  ;;  %14778 = vst [vmem:[#allocation118_spill] sm:$0xff] %v12159_v2 }
 0x4ce   : > { %14727 = vst [vmem:[#allocation109_spill] sm:$0xff] %v12063_v46  ;;  %v12107_v0 = vadd.f32 %v14747_v3, %v14746_v43  ;;  %v14758_v3 = vld [vmem:[#allocation49_spill] sm:$0xff]  ;;  %v14774_v61 = vld [vmem:[#allocation166_spill] sm:$0xff] }
 0x4cf   : > { %14737 = vst [vmem:[#allocation6_spill] sm:$0xff] %v12085_v35  ;;  %v12129_v54 = vadd.f32 %v14759_v41, %v14758_v3  ;;  %14763 = vst [vmem:[#allocation10_spill] sm:$0xff] %v12133_v21  ;;  %v14770_v41 = vld [vmem:[#allocation53_spill] sm:$0xff]  ;;  %v12155_v37 = vadd.f32 %v14774_v61, %v14773_v32  ;;  %v14784_v17 = vld [vmem:[#allocation58_spill] sm:$0xff] }
 0x4d0   : > { %9249 = vmatmul.mubr.msk.bf16.vlgmr.msra.gmra.mrb[100].mxu0 %vm2503_vm5, %v5385_v45  ;;  %v14716_v45 = vld [vmem:[#allocation123_spill] sm:$0xff]  ;;  %14748 = vst [vmem:[#allocation113_spill] sm:$0xff] %v12107_v0  ;;  %v14771_v26 = vld [vmem:[#allocation185_spill] sm:$0xff]  ;;  %v12177_v61 = vadd.f32 %v14785_v57, %v14784_v17  ;;  %v14794_v17 = vld [vmem:[#allocation194_spill] sm:$0xff] }
 0x4d1   : > { %9252 = vmatprep.mubr.msk.bf16.mxu0 %vm2503_vm5, %v5386_v40  ;;  %v12037_v40 = vadd.f32 %v14716_v45, %v14715_v1  ;;  %v14723_v1 = vld [vmem:[#allocation39_spill] sm:$0xff]  ;;  %v14724_v45 = vld [vmem:[#allocation138_spill] sm:$0xff]  ;;  %14760 = vst [vmem:[#allocation116_spill] sm:$0xff] %v12129_v54  ;;  %v12151_v62 = vadd.f32 %v14771_v26, %v14770_v41  ;;  %14775 = vst [vmem:[#allocation15_spill] sm:$0xff] %v12155_v37 }
 0x4d2   : > { %v12059_v8 = vadd.f32 %v14724_v45, %v14723_v1  ;;  %v14732_v1 = vld [vmem:[#allocation43_spill] sm:$0xff]  ;;  %v14733_v45 = vld [vmem:[#allocation134_spill] sm:$0xff]  ;;  %v14782_v26 = vld [vmem:[#allocation57_spill] sm:$0xff]  ;;  %14786 = vst [vmem:[#allocation14_spill] sm:$0xff] %v12177_v61 }
 0x4d3   : > { %v12081_v48 = vadd.f32 %v14733_v45, %v14732_v1  ;;  %v14743_v1 = vld [vmem:[#allocation47_spill] sm:$0xff]  ;;  %14772 = vst [vmem:[#allocation171_spill] sm:$0xff] %v12151_v62  ;;  %v12173_v32 = vadd.f32 %v11504_v42, %v14782_v26  ;;  %14789 = vst [vmem:[#allocation123_spill] sm:$0xff] %v12181_v47  ;;  %v14793_v26 = vld [vmem:[#allocation61_spill] sm:$0xff] }
 0x4d4   : > { %v14744_v45 = vld [vmem:[#allocation167_spill] sm:$0xff]  ;;  %v12195_v57 = vadd.f32 %v14794_v17, %v14793_v26  ;;  %v14804_v26 = vld [vmem:[#allocation65_spill] sm:$0xff] }
 0x4d5   : > { %14734 = vst [vmem:[#allocation31_spill] sm:$0xff] %v12081_v48  ;;  %v12103_v60 = vadd.f32 %v14744_v45, %v14743_v1  ;;  %v14755_v1 = vld [vmem:[#allocation51_spill] sm:$0xff]  ;;  %v14756_v45 = vld [vmem:[#allocation158_spill] sm:$0xff]  ;;  %14783 = vst [vmem:[#allocation120_spill] sm:$0xff] %v12173_v32  ;;  %v12217_v17 = vadd.f32 %v11613_v11, %v14804_v26 }
 0x4d6   : > { %v12125_v43 = vadd.f32 %v14756_v45, %v14755_v1  ;;  %v14767_v1 = vld [vmem:[#allocation55_spill] sm:$0xff]  ;;  %v14768_v45 = vld [vmem:[#allocation140_spill] sm:$0xff]  ;;  %14795 = vst [vmem:[#allocation125_spill] sm:$0xff] %v12195_v57  ;;  %v14814_v26 = vld [vmem:[#allocation161_spill] sm:$0xff] }
 0x4d7   : > { %14745 = vst [vmem:[#allocation8_spill] sm:$0xff] %v12103_v60  ;;  %v12147_v3 = vadd.f32 %v14768_v45, %v14767_v1  ;;  %v14779_v1 = vld [vmem:[#allocation59_spill] sm:$0xff]  ;;  %14805 = vst [vmem:[#allocation126_spill] sm:$0xff] %v12217_v17 }
 0x4d8   : > { %9253 = vmatmul.mubr.msk.bf16.gmra.mrb[104].mxu0 %vm2503_vm5, %v5387_v44  ;;  %v5389_v44 = vpack.c.bf16 %v12041_v19, %v12037_v40  ;;  %14757 = vst [vmem:[#allocation13_spill] sm:$0xff] %v12125_v43  ;;  %v14780_v45 = vld [vmem:[#allocation107_spill] sm:$0xff] }
 0x4d9   : > { %9256 = vmatprep.mubr.msk.bf16.mxu0 %vm2503_vm5, %v5388_v4  ;;  %v5390_v4 = vpack.c.bf16 %v12045_v27, %v12049_v6  ;;  %14769 = vst [vmem:[#allocation12_spill] sm:$0xff] %v12147_v3  ;;  %v12169_v41 = vadd.f32 %v14780_v45, %v14779_v1  ;;  %v14790_v42 = vld [vmem:[#allocation63_spill] sm:$0xff]  ;;  %v14791_v1 = vld [vmem:[#allocation148_spill] sm:$0xff] }
 0x4da   : > { %v12191_v45 = vadd.f32 %v14791_v1, %v14790_v42  ;;  %v14802_v42 = vld [vmem:[#allocation67_spill] sm:$0xff] }
 0x4db   : > { %14781 = vst [vmem:[#allocation17_spill] sm:$0xff] %v12169_v41  ;;  %v12213_v1 = vadd.f32 %v11535_v33, %v14802_v42  ;;  %v14811_v33 = vld [vmem:[#allocation71_spill] sm:$0xff]  ;;  %v14813_v42 = vld [vmem:[#allocation69_spill] sm:$0xff] }
 0x4dc   : > { %14792 = vst [vmem:[#allocation16_spill] sm:$0xff] %v12191_v45  ;;  %v12235_v11 = vadd.f32 %v11593_v23, %v14811_v33  ;;  %v14822_v23 = vld [vmem:[#allocation75_spill] sm:$0xff] }
 0x4dd   : > { %14803 = vst [vmem:[#allocation34_spill] sm:$0xff] %v12213_v1  ;;  %v14823_v33 = vld [vmem:[#allocation159_spill] sm:$0xff] }
 0x4de   : > { %14812 = vst [vmem:[#allocation37_spill] sm:$0xff] %v12235_v11 }
 0x4e0   : > { %9257 = vmatmul.mubr.msk.bf16.gmra.mrb[108].mxu0 %vm2503_vm5, %v5389_v44  ;;  %v5391_v44 = vpack.c.bf16 %v12059_v8, %v12067_v7 }
 0x4e1   : > { %9260 = vmatprep.mubr.msk.bf16.mxu0 %vm2503_vm5, %v5390_v4  ;;  %v5392_v4 = vpack.c.bf16 %v12063_v46, %v12071_v20  ;;  %v14879_v46 = vld [vmem:[#allocation121_spill] sm:$0xff] }
 0x4e8   : > { %9261 = vmatmul.mubr.msk.bf16.gmra.mrb[112].mxu0 %vm2503_vm5, %v5391_v44  ;;  %v5393_v44 = vpack.c.bf16 %v12081_v48, %v12089_v29 }
 0x4e9   : > { %9264 = vmatprep.mubr.msk.bf16.mxu0 %vm2503_vm5, %v5392_v4  ;;  %v5394_v4 = vpack.c.bf16 %v12085_v35, %v12093_v58 }
 0x4f0   : > { %9265 = vmatmul.mubr.msk.bf16.gmra.mrb[116].mxu0 %vm2503_vm5, %v5393_v44  ;;  %v5395_v44 = vpack.c.bf16 %v12103_v60, %v12111_v38 }
 0x4f1   : > { %9268 = vmatprep.mubr.msk.bf16.mxu0 %vm2503_vm5, %v5394_v4  ;;  %v5396_v4 = vpack.c.bf16 %v12107_v0, %v12115_v49 }
 0x4f8   : > { %9269 = vmatmul.mubr.msk.bf16.gmra.mrb[120].mxu0 %vm2503_vm5, %v5395_v44  ;;  %v5397_v44 = vpack.c.bf16 %v12125_v43, %v12133_v21 }
 0x4f9   : > { %9272 = vmatprep.mubr.msk.bf16.mxu0 %vm2503_vm5, %v5396_v4  ;;  %v5398_v4 = vpack.c.bf16 %v12129_v54, %v12137_v25 }
 0x500   : > { %9273 = vmatmul.mubr.msk.bf16.gmra.mrb[124].mxu0 %vm2503_vm5, %v5397_v44  ;;  %v5399_v44 = vpack.c.bf16 %v12147_v3, %v12155_v37 }
 0x501   : > { %9276 = vmatprep.mubr.msk.bf16.mxu0 %vm2503_vm5, %v5398_v4  ;;  %v5400_v4 = vpack.c.bf16 %v12151_v62, %v12159_v2  ;;  %v12199_v62 = vadd.f32 %v14797_v9, %v14796_v39  ;;  %v14800_v2 = vld [vmem:[#allocation99_spill] sm:$0xff]  ;;  %v14809_v9 = vld [vmem:[#allocation64_spill] sm:$0xff] }
 0x503   : > { %14798 = vst [vmem:[#allocation35_spill] sm:$0xff] %v12199_v62 }
 0x508   : > { %9277 = vmatmul.mubr.msk.bf16.gmra.mrb[128].mxu0 %vm2503_vm5, %v5399_v44  ;;  %v5401_v44 = vpack.c.bf16 %v12169_v41, %v12177_v61  ;;  %v14799_v41 = vld [vmem:[#allocation60_spill] sm:$0xff] }
 0x509   : > { %9280 = vmatprep.mubr.msk.bf16.mxu0 %vm2503_vm5, %v5400_v4  ;;  %v5402_v4 = vpack.c.bf16 %v12173_v32, %v12181_v47  ;;  %v12203_v61 = vadd.f32 %v14800_v2, %v14799_v41  ;;  %v14806_v2 = vld [vmem:[#allocation66_spill] sm:$0xff]  ;;  %v14807_v41 = vld [vmem:[#allocation151_spill] sm:$0xff]  ;;  %v12225_v32 = vadd.f32 %v11553_v52, %v14809_v9 }
 0x50a   : > { %v12221_v39 = vadd.f32 %v14807_v41, %v14806_v2  ;;  %v12239_v2 = vadd.f32 %v14814_v26, %v14813_v42  ;;  %v14816_v52 = vld [vmem:[#allocation70_spill] sm:$0xff]  ;;  %v14817_v41 = vld [vmem:[#allocation195_spill] sm:$0xff]  ;;  %v12257_v42 = vadd.f32 %v14823_v33, %v14822_v23  ;;  %v14825_v26 = vld [vmem:[#allocation73_spill] sm:$0xff] }
 0x50b   : > { %14801 = vst [vmem:[#allocation135_spill] sm:$0xff] %v12203_v61  ;;  %14810 = vst [vmem:[#allocation138_spill] sm:$0xff] %v12225_v32  ;;  %v12243_v9 = vadd.f32 %v14817_v41, %v14816_v52  ;;  %v12261_v52 = vadd.f32 %v11712_v30, %v14825_v26  ;;  %v14833_v30 = vld [vmem:[#allocation79_spill] sm:$0xff]  ;;  %v14835_v33 = vld [vmem:[#allocation77_spill] sm:$0xff] }
 0x50c   : > { %14808 = vst [vmem:[#allocation39_spill] sm:$0xff] %v12221_v39  ;;  %14815 = vst [vmem:[#allocation133_spill] sm:$0xff] %v12239_v2  ;;  %v12279_v23 = vadd.f32 %v11704_v15, %v14833_v30  ;;  %v12283_v26 = vadd.f32 %v11763_v18, %v14835_v33  ;;  %v14842_v15 = vld [vmem:[#allocation19_spill] sm:$0xff]  ;;  %v14844_v30 = vld [vmem:[#allocation81_spill] sm:$0xff] }
 0x50d   : > { %14818 = vst [vmem:[#allocation38_spill] sm:$0xff] %v12243_v9  ;;  %14824 = vst [vmem:[#allocation36_spill] sm:$0xff] %v12257_v42  ;;  %v12301_v18 = vadd.f32 %v11766_v10, %v14842_v15  ;;  %v12305_v33 = vadd.f32 %v11850_v50, %v14844_v30  ;;  %v14850_v10 = vld [vmem:[#allocation21_spill] sm:$0xff]  ;;  %v8709_v30 = vld [vmem:[%s13970_s12 + $0x1] ss:$0 sm:$0xff] }
 0x50e   : > { %14826 = vst [vmem:[#allocation130_spill] sm:$0xff] %v12261_v52  ;;  %14834 = vst [vmem:[#allocation41_spill] sm:$0xff] %v12279_v23  ;;  %v12323_v50 = vadd.f32 %v11820_v56, %v14850_v10 }
 0x50f   : > { %14836 = vst [vmem:[#allocation145_spill] sm:$0xff] %v12283_v26  ;;  %14843 = vst [vmem:[#allocation40_spill] sm:$0xff] %v12301_v18 }
 0x510   : > { %9281 = vmatmul.mubr.msk.bf16.gmra.mrb[132].mxu0 %vm2503_vm5, %v5401_v44  ;;  %v5403_v44 = vpack.c.bf16 %v12191_v45, %v12199_v62  ;;  %14845 = vst [vmem:[#allocation143_spill] sm:$0xff] %v12305_v33  ;;  %14851 = vst [vmem:[#allocation45_spill] sm:$0xff] %v12323_v50 }
 0x511   : > { %9284 = vmatprep.mubr.msk.bf16.mxu0 %vm2503_vm5, %v5402_v4  ;;  %v5404_v4 = vpack.c.bf16 %v12195_v57, %v12203_v61  ;;  %v14820_v57 = vld [vmem:[#allocation95_spill] sm:$0xff] }
 0x518   : > { %9285 = vmatmul.mubr.msk.bf16.gmra.mrb[136].mxu0 %vm2503_vm5, %v5403_v44  ;;  %v5405_v44 = vpack.c.bf16 %v12213_v1, %v12221_v39  ;;  %v14819_v1 = vld [vmem:[#allocation68_spill] sm:$0xff] }
 0x519   : > { %9288 = vmatprep.mubr.msk.bf16.mxu0 %vm2503_vm5, %v5404_v4  ;;  %v5406_v4 = vpack.c.bf16 %v12217_v17, %v12225_v32  ;;  %v12247_v61 = vadd.f32 %v14820_v57, %v14819_v1  ;;  %v14827_v57 = vld [vmem:[#allocation74_spill] sm:$0xff]  ;;  %v14828_v1 = vld [vmem:[#allocation197_spill] sm:$0xff]  ;;  %v14830_v17 = vld [vmem:[#allocation72_spill] sm:$0xff] }
 0x51a   : > { %v12265_v41 = vadd.f32 %v14828_v1, %v14827_v57  ;;  %v14840_v1 = vld [vmem:[#allocation76_spill] sm:$0xff] }
 0x51b   : > { %14821 = vst [vmem:[#allocation129_spill] sm:$0xff] %v12247_v61 }
 0x51c   : > { %14829 = vst [vmem:[#allocation43_spill] sm:$0xff] %v12265_v41 }
 0x520   : > { %9289 = vmatmul.mubr.msk.bf16.gmra.mrb[140].mxu0 %vm2503_vm5, %v5405_v44  ;;  %v5407_v44 = vpack.c.bf16 %v12235_v11, %v12243_v9  ;;  %v14831_v11 = vld [vmem:[#allocation164_spill] sm:$0xff] }
 0x521   : > { %9292 = vmatprep.mubr.msk.bf16.mxu0 %vm2503_vm5, %v5406_v4  ;;  %v5408_v4 = vpack.c.bf16 %v12239_v2, %v12247_v61  ;;  %v12269_v32 = vadd.f32 %v14831_v11, %v14830_v17  ;;  %v14837_v17 = vld [vmem:[#allocation78_spill] sm:$0xff] }
 0x522   : > { %v14838_v11 = vld [vmem:[#allocation198_spill] sm:$0xff] }
 0x523   : > { %14832 = vst [vmem:[#allocation134_spill] sm:$0xff] %v12269_v32  ;;  %v12287_v57 = vadd.f32 %v14838_v11, %v14837_v17  ;;  %v14848_v11 = vld [vmem:[#allocation80_spill] sm:$0xff] }
 0x525   : > { %14839 = vst [vmem:[#allocation42_spill] sm:$0xff] %v12287_v57 }
 0x528   : > { %9293 = vmatmul.mubr.msk.bf16.gmra.mrb[144].mxu0 %vm2503_vm5, %v5407_v44  ;;  %v5409_v44 = vpack.c.bf16 %v12257_v42, %v12265_v41  ;;  %v12291_v42 = vadd.f32 %v11722_v36, %v14840_v1  ;;  %v14846_v36 = vld [vmem:[#allocation18_spill] sm:$0xff]  ;;  %v12313_v1 = vadd.f32 %v11782_v28, %v14848_v11 }
 0x529   : > { %9296 = vmatprep.mubr.msk.bf16.mxu0 %vm2503_vm5, %v5408_v4  ;;  %v5410_v4 = vpack.c.bf16 %v12261_v52, %v12269_v32  ;;  %v12309_v17 = vadd.f32 %v11727_v13, %v14846_v36  ;;  %v14852_v13 = vld [vmem:[#allocation20_spill] sm:$0xff] }
 0x52a   : > { %14841 = vst [vmem:[#allocation124_spill] sm:$0xff] %v12291_v42  ;;  %14849 = vst [vmem:[#allocation167_spill] sm:$0xff] %v12313_v1  ;;  %v12327_v15 = vadd.f32 %v11792_v55, %v14852_v13 }
 0x52b   : > { %14847 = vst [vmem:[#allocation47_spill] sm:$0xff] %v12309_v17 }
 0x52c   : > { %14853 = vst [vmem:[#allocation156_spill] sm:$0xff] %v12327_v15  ;;  %v5415_v28 = vpack.c.bf16 %v12323_v50, %v12327_v15 }
 0x530   : > { %9297 = vmatmul.mubr.msk.bf16.gmra.mrb[148].mxu0 %vm2503_vm5, %v5409_v44  ;;  %v5411_v44 = vpack.c.bf16 %v12279_v23, %v12287_v57 }
 0x531   : > { %9300 = vmatprep.mubr.msk.bf16.mxu0 %vm2503_vm5, %v5410_v4  ;;  %v5412_v4 = vpack.c.bf16 %v12283_v26, %v12291_v42 }
 0x538   : > { %9301 = vmatmul.mubr.msk.bf16.gmra.mrb[152].mxu0 %vm2503_vm5, %v5411_v44  ;;  %v5413_v44 = vpack.c.bf16 %v12301_v18, %v12309_v17 }
 0x539   : > { %9304 = vmatprep.mubr.msk.bf16.mxu0 %vm2503_vm5, %v5412_v4  ;;  %v5414_v4 = vpack.c.bf16 %v12305_v33, %v12313_v1 }
 0x540   : > { %9305 = vmatmul.mubr.msk.bf16.gmra.mrb[156].mxu0 %vm2503_vm5, %v5413_v44 }
 0x541   : > { %9308 = vmatprep.mubr.msk.bf16.mxu0 %vm2503_vm5, %v5414_v4 }
 0x548   : > { %9309 = vmatmul.mubr.msk.bf16.gmra.mrb[160].mxu0 %vm2503_vm5, %v5415_v28 }
 0x593   : > { %v9228_v36 = vpop.f32.mrb[92].mxu0  ;;  %v12335_v11 = vpop.f32.mrb[76].mxu1 }
 0x594   : > { %v5277_v44 = vadd.f32 %v9228_v36, %v8709_v30  ;;  %v5268_v4 = vpop.f32.mrb[93].mxu0  ;;  %v12337_v56 = vpop.f32.mrb[77].mxu1 }
 0x595   : > { %v5269_v10 = vadd.f32 %v8709_v30, %v5268_v4  ;;  %v9229_v33 = vpop.f32.mrb[94].mxu0  ;;  %v12339_v55 = vpop.f32.mrb[78].mxu1 }
 0x596   : > { %14854 = vst [vmem:[#allocation46_spill] sm:$0xff] %v12339_v55  ;;  %v5913_v13 = vcombine.high %v5277_v44, %v5277_v44  ;;  %v5280_v1 = vadd.f32 %v9229_v33, %v8709_v30  ;;  %v5271_v50 = vpop.f32.mrb[95].mxu0  ;;  %v12341_v15 = vpop.f32.mrb[79].mxu1  ;;  %v12344_v28 = vrot.slane %v5277_v44, %v14458_v31 }
 0x597   : > { %v5815_v18 = vcombine.high %v5269_v10, %v5269_v10  ;;  %v5822_v26 = vrot.slane %v5269_v10, %v14458_v31  ;;  %v5272_v42 = vadd.f32 %v8709_v30, %v5271_v50 }
 0x598   : > { %v12348_v36 = vrot.slane %v5913_v13, %v14458_v31  ;;  %v5962_v17 = vcombine.high %v5280_v1, %v5280_v1  ;;  %v12355_v33 = vrot.slane %v5280_v1, %v14458_v31  ;;  %v12364_v10 = vrot.slane %v12344_v28, %v14458_v31 }
 0x599   : > { %v12351_v4 = vrot.slane %v5815_v18, %v14458_v31  ;;  %v5838_v52 = vrot.slane %v5822_v26, %v14458_v31  ;;  %v5830_v23 = vcombine.high %v5822_v26, %v5822_v26  ;;  %v5864_v32 = vcombine.high %v5272_v42, %v5272_v42 }
 0x59a   : > { %14855 = vst [vmem:[#allocation142_spill] sm:$0xff] %v12355_v33  ;;  %v12358_v44 = vrot.slane %v5962_v17, %v14458_v31  ;;  %v12375_v1 = vrot.slane %v5272_v42, %v14458_v31  ;;  %v12381_v61 = vrot.slane %v12355_v33, %v14458_v31 }
 0x59b   : > { %v9232_v13 = vpop.f32.mrb[96].mxu0  ;;  %v12366_v18 = vpop.f32.mrb[80].mxu1  ;;  %v5831_v26 = vcombine.high %v12351_v4, %v12351_v4  ;;  %v5860_v39 = vcombine.high %v5838_v52, %v5838_v52  ;;  %v12388_v17 = vrot.slane %v5864_v32, %v14458_v31  ;;  %v5852_v54 = vrot.slane %v5830_v23, %v14458_v31 }
 0x59c   : > { %14856 = vst [vmem:[#allocation44_spill] sm:$0xff] %v12358_v44  ;;  %14857 = vst [vmem:[#allocation147_spill] sm:$0xff] %v12366_v18  ;;  %v5284_v50 = vpop.f32.mrb[97].mxu0  ;;  %v12377_v2 = vpop.f32.mrb[81].mxu1  ;;  %v5293_v41 = vadd.f32 %v9232_v13, %v8709_v30  ;;  %v12406_v23 = vrot.slane %v12375_v1, %v14458_v31 }
 0x59d   : > { %14858 = vst [vmem:[#allocation51_spill] sm:$0xff] %v12377_v2  ;;  %v5285_v9 = vadd.f32 %v8709_v30, %v5284_v50  ;;  %v9233_v18 = vpop.f32.mrb[98].mxu0  ;;  %v12383_v57 = vpop.f32.mrb[82].mxu1  ;;  %v5862_v2 = vcombine.high %v5852_v54, %v5852_v54 }
 0x59e   : > { %14859 = vst [vmem:[#allocation158_spill] sm:$0xff] %v12383_v57  ;;  %v5296_v42 = vadd.f32 %v9233_v18, %v8709_v30  ;;  %v5287_v47 = vpop.f32.mrb[99].mxu0  ;;  %v12390_v62 = vpop.f32.mrb[83].mxu1  ;;  %v6109_v3 = vcombine.high %v5293_v41, %v5293_v41  ;;  %v12394_v13 = vrot.slane %v5293_v41, %v14458_v31  ;;  %v6218_v41 = vrot.slane %v5860_v39, %v14461_v24 }
 0x59f   : > { %14860 = vst [vmem:[#allocation49_spill] sm:$0xff] %v12390_v62  ;;  %v6011_v50 = vcombine.high %v5285_v9, %v5285_v9  ;;  %v12397_v57 = vrot.slane %v5285_v9, %v14458_v31  ;;  %v5288_v32 = vadd.f32 %v8709_v30, %v5287_v47  ;;  %v6210_v62 = vrot.slane %v5838_v52, %v14461_v24 }
 0x5a0   : > { %14861 = vst [vmem:[#allocation96_spill] sm:$0xff] %v12394_v13  ;;  %v6158_v37 = vcombine.high %v5296_v42, %v5296_v42  ;;  %v12400_v45 = vrot.slane %v5296_v42, %v14458_v31  ;;  %v12413_v25 = vrot.slane %v6109_v3, %v14458_v31  ;;  %v12419_v30 = vrot.slane %v12351_v4, %v14458_v31 }
 0x5a1   : > { %14862 = vst [vmem:[#allocation50_spill] sm:$0xff] %v12397_v57  ;;  %v12423_v42 = vrot.slane %v12394_v13, %v14458_v31  ;;  %v12426_v39 = vrot.slane %v6011_v50, %v14458_v31  ;;  %v12432_v3 = vrot.slane %v12397_v57, %v14458_v31  ;;  %v6060_v50 = vcombine.high %v5288_v32, %v5288_v32 }
 0x5a2   : > { %14863 = vst [vmem:[#allocation146_spill] sm:$0xff] %v12400_v45  ;;  %14864 = vst [vmem:[#allocation48_spill] sm:$0xff] %v12413_v25  ;;  %v12435_v47 = vrot.slane %v6158_v37, %v14458_v31  ;;  %v12441_v0 = vrot.slane %v5288_v32, %v14458_v31  ;;  %v6214_v57 = vrot.slane %v5852_v54, %v14461_v24 }
 0x5a3   : > { %14865 = vst [vmem:[#allocation162_spill] sm:$0xff] %v12423_v42  ;;  %14866 = vst [vmem:[#allocation55_spill] sm:$0xff] %v12426_v39  ;;  %v9250_v9 = vpop.f32.mrb[100].mxu0  ;;  %v6222_v42 = vrot.slane %v5862_v2, %v14461_v24  ;;  %v12453_v32 = vrot.slane %v12400_v45, %v14458_v31  ;;  %v6226_v4 = vrot.slane %v12419_v30, %v14461_v24  ;;  %v14875_v45 = vld [vmem:[#allocation90_spill] sm:$0xff] }
 0x5a4   : > { %14867 = vst [vmem:[#allocation140_spill] sm:$0xff] %v12432_v3  ;;  %14868 = vst [vmem:[#allocation53_spill] sm:$0xff] %v12435_v47  ;;  %v6529_v18 = vadd.f32 %v9250_v9, %v6218_v41  ;;  %v5552_v13 = vpop.f32.mrb[101].mxu0  ;;  %v5861_v41 = vcombine.high %v12419_v30, %v12419_v30 }
 0x5a5   : > { %14869 = vst [vmem:[#allocation185_spill] sm:$0xff] %v12441_v0  ;;  %v6527_v52 = vadd.f32 %v6210_v62, %v5552_v13  ;;  %v9251_v43 = vpop.f32.mrb[102].mxu0  ;;  %14870 = vst [vmem:[#allocation54_spill] sm:$0xff] %v12453_v32  ;;  %v14874_v13 = vld [vmem:[#allocation82_spill] sm:$0xff] }
 0x5a6   : > { %v6593_v37 = vadd.f32 %v6529_v18, %v12337_v56  ;;  %v6530_v21 = vadd.f32 %v9251_v43, %v6222_v42  ;;  %v5555_v49 = vpop.f32.mrb[103].mxu0  ;;  %v5859_v18 = vrot.slane %v5831_v26, %v14458_v31  ;;  %v12461_v42 = vrot.slane %v6060_v50, %v14458_v31 }
 0x5a7   : > { %v6591_v62 = vadd.f32 %v6527_v52, %v12337_v56  ;;  %v6528_v54 = vadd.f32 %v6214_v57, %v5555_v49  ;;  %v12468_v49 = vrot.slane %v12441_v0, %v14458_v31  ;;  %v14873_v57 = vld [vmem:[#allocation5_spill] sm:$0xff] }
 0x5a8   : > { %v6657_v9 = vmax.f32 %v6593_v37, 0.0  ;;  %v6594_v43 = vadd.f32 %v6530_v21, %v12337_v56  ;;  %14871 = vst [vmem:[#allocation166_spill] sm:$0xff] %v12461_v42  ;;  %v6234_v21 = vrot.slane %v5861_v41, %v14461_v24 }
 0x5a9   : > { %v6655_v3 = vmax.f32 %v6591_v62, 0.0  ;;  %v6592_v2 = vadd.f32 %v6528_v54, %v12337_v56  ;;  %14872 = vst [vmem:[#allocation52_spill] sm:$0xff] %v12468_v49  ;;  %v5909_v62 = vcombine.high %v12406_v23, %v12406_v23 }
 0x5aa   : > { %v6721_v52 = vmul.f32 %v6657_v9, %v14873_v57  ;;  %v6658_v37 = vmax.f32 %v6594_v43, 0.0  ;;  %v5863_v43 = vcombine.high %v5859_v18, %v5859_v18 }
 0x5ab   : > { %v12473_v26 = vmul.f32 %v6655_v3, %v14874_v13  ;;  %v6656_v50 = vmax.f32 %v6592_v2, 0.0  ;;  %v9254_v47 = vpop.f32.mrb[104].mxu0  ;;  %v14877_v2 = vld [vmem:[#allocation4_spill] sm:$0xff] }
 0x5ac   : > { %v6797_v54 = vsel %vm2503_vm5, %v6721_v52, 0.0  ;;  %v6722_v32 = vmul.f32 %v6658_v37, %v14875_v45  ;;  %v6533_v25 = vadd.f32 %v9254_v47, %v6234_v21  ;;  %v5568_v9 = vpop.f32.mrb[105].mxu0  ;;  %v12482_v41 = vadd.f32 %v6721_v52, %v11993_v51 }
 0x5ad   : > { %v6798_v57 = vrot.slane %v6797_v54, 4  ;;  %v6783_v3 = vsel %vm2503_vm5, %v12473_v26, 0.0  ;;  %v6720_v13 = vmul.f32 %v6656_v50, %v14877_v2  ;;  %v9255_v30 = vpop.f32.mrb[106].mxu0  ;;  %v6230_v52 = vrot.slane %v5859_v18, %v14461_v24 }
 0x5ae   : > { %14876 = vst [vmem:[#allocation180_spill] sm:$0xff] %v12482_v41  ;;  %v6784_v0 = vrot.slane %v6783_v3, 4  ;;  %v6804_v49 = vsel %vm2503_vm5, %v6722_v32, 0.0  ;;  %v12489_v39 = vadd.f32 %v6722_v32, %v11997_v34  ;;  %v6597_v45 = vadd.f32 %v6533_v25, %v12337_v56  ;;  %v5571_v47 = vpop.f32.mrb[107].mxu0 }
 0x5af   : > { %v6799_v37 = vadd.f32 %v6798_v57, %v6797_v54  ;;  %v6805_v21 = vrot.slane %v6804_v49, 4  ;;  %v6790_v51 = vsel %vm2503_vm5, %v6720_v13, 0.0  ;;  %v6531_v38 = vadd.f32 %v6226_v4, %v5568_v9 }
 0x5b0   : > { %14878 = vst [vmem:[#allocation59_spill] sm:$0xff] %v12489_v39  ;;  %v6785_v60 = vadd.f32 %v6784_v0, %v6783_v3  ;;  %v6791_v2 = vrot.slane %v6790_v51, 4  ;;  %v6661_v44 = vmax.f32 %v6597_v45, 0.0  ;;  %v6238_v34 = vrot.slane %v5863_v43, %v14461_v24 }
 0x5b1   : > { %v6800_v35 = vrot.slane %v6799_v37, 2  ;;  %v6806_v58 = vadd.f32 %v6805_v21, %v6804_v49  ;;  %v6532_v57 = vadd.f32 %v6230_v52, %v5571_v47  ;;  %v6595_v18 = vadd.f32 %v6531_v38, %v12337_v56  ;;  %v14880_v52 = vld [vmem:[#allocation100_spill] sm:$0xff] }
 0x5b2   : > { %v6786_v32 = vrot.slane %v6785_v60, 2  ;;  %v6792_v25 = vadd.f32 %v6791_v2, %v6790_v51  ;;  %v6725_v54 = vmul.f32 %v6661_v44, %v14879_v46  ;;  %v6534_v0 = vadd.f32 %v9255_v30, %v6238_v34 }
 0x5b3   : > { %v6801_v48 = vadd.f32 %v6800_v35, %v6799_v37  ;;  %v6807_v55 = vrot.slane %v6806_v58, 2  ;;  %v9258_v3 = vpop.f32.mrb[108].mxu0  ;;  %v6659_v21 = vmax.f32 %v6595_v18, 0.0  ;;  %v6242_v46 = vrot.slane %v12406_v23, %v14461_v24 }
 0x5b4   : > { %v6787_v45 = vadd.f32 %v6786_v32, %v6785_v60  ;;  %v6793_v41 = vrot.slane %v6792_v25, 2  ;;  %v6825_v4 = vsel %vm2503_vm5, %v6725_v54, 0.0  ;;  %v5584_v49 = vpop.f32.mrb[109].mxu0  ;;  %v6598_v30 = vadd.f32 %v6534_v0, %v12337_v56 }
 0x5b5   : > { %v6802_v9 = vrot.slane %v6801_v48, 1  ;;  %v6826_v43 = vrot.slane %v6825_v4, 4  ;;  %v12504_v35 = vpop.f32.mrb[110].mxu0  ;;  %v6596_v47 = vadd.f32 %v6532_v57, %v12337_v56  ;;  %v6808_v60 = vadd.f32 %v6807_v55, %v6806_v58 }
 0x5b6   : > { %v6788_v44 = vrot.slane %v6787_v45, 1  ;;  %v6794_v38 = vadd.f32 %v6793_v41, %v6792_v25  ;;  %v5587_v37 = vpop.f32.mrb[111].mxu0  ;;  %v6723_v2 = vmul.f32 %v6659_v21, %v14880_v52  ;;  %v6250_v34 = vrot.slane %v5909_v62, %v14461_v24 }
 0x5b7   : > { %v6827_v51 = vadd.f32 %v6826_v43, %v6825_v4  ;;  %v6662_v50 = vmax.f32 %v6598_v30, 0.0  ;;  %v6660_v39 = vmax.f32 %v6596_v47, 0.0  ;;  %v6803_v23 = vadd.f32 %v6802_v9, %v6801_v48 }
 0x5b8   : > { %v6789_v32 = vadd.f32 %v6788_v44, %v6787_v45  ;;  %v6795_v18 = vrot.slane %v6794_v38, 1  ;;  %v6811_v33 = vsel %vm2503_vm5, %v6723_v2, 0.0  ;;  %v14881_v41 = vcombine.high %v12375_v1, %v12375_v1  ;;  %v14884_v45 = vld [vmem:[#allocation137_spill] sm:$0xff]  ;;  %v14886_v44 = vld [vmem:[#allocation111_spill] sm:$0xff] }
 0x5b9   : > { %v6828_v42 = vrot.slane %v6827_v51, 2  ;;  %v12517_v58 = vadd.f32 %v12473_v26, %v11963_v12  ;;  %v6812_v62 = vrot.slane %v6811_v33, 4  ;;  %v6809_v57 = vrot.slane %v6808_v60, 1 }
 0x5ba   : > { %v5901_v56 = vrot.slane %v14881_v41, %v14458_v31  ;;  %v7239_v25 = vpack.c.bf16 %v6789_v32, %v6789_v32  ;;  %v6796_v55 = vadd.f32 %v6795_v18, %v6794_v38  ;;  %v12520_v0 = vadd.f32 %v6720_v13, %v11967_v63 }
 0x5bb   : > { %14882 = vst [vmem:[#allocation107_spill] sm:$0xff] %v12517_v58  ;;  %v6829_v48 = vadd.f32 %v6828_v42, %v6827_v51  ;;  %v6726_v4 = vmul.f32 %v6662_v50, %v14884_v45  ;;  %v12523_v9 = vpop.f32.mrb[112].mxu0  ;;  %v12526_v1 = vadd.f32 %v6725_v54, %v12015_v59  ;;  %v6813_v21 = vadd.f32 %v6812_v62, %v6811_v33 }
 0x5bc   : > { %14883 = vst [vmem:[#allocation57_spill] sm:$0xff] %v12520_v0  ;;  %v7240_v43 = vpack.c.bf16 %v6796_v55, %v6796_v55  ;;  %v6724_v30 = vmul.f32 %v6660_v39, %v14886_v44  ;;  %v12529_v12 = vpop.f32.mrb[113].mxu0  ;;  %v7241_v26 = vpack.c.bf16 %v6803_v23, %v6803_v23  ;;  %v7367_v38 = vunpack.c.l.b16 %v7239_v25 }
 0x5bd   : > { %14885 = vst [vmem:[#allocation58_spill] sm:$0xff] %v12526_v1  ;;  %v6830_v47 = vrot.slane %v6829_v48, 1  ;;  %v6832_v63 = vsel %vm2503_vm5, %v6726_v4, 0.0  ;;  %v12532_v13 = vpop.f32.mrb[114].mxu0  ;;  %v6814_v50 = vrot.slane %v6813_v21, 2  ;;  %v6810_v59 = vadd.f32 %v6809_v57, %v6808_v60 }
 0x5be   : > { %v7368_v42 = vunpack.c.l.b16 %v7240_v43  ;;  %v6833_v51 = vrot.slane %v6832_v63, 4  ;;  %v6818_v52 = vsel %vm2503_vm5, %v6724_v30, 0.0  ;;  %v12535_v32 = vpop.f32.mrb[115].mxu0  ;;  %v12538_v33 = vadd.f32 %v6723_v2, %v12001_v53 }
 0x5bf   : > { %v6819_v39 = vrot.slane %v6818_v52, 4  ;;  %v6537_v54 = vadd.f32 %v9258_v3, %v6250_v34  ;;  %v6815_v23 = vadd.f32 %v6814_v50, %v6813_v21  ;;  %v6535_v25 = vadd.f32 %v6242_v46, %v5584_v49  ;;  %v14888_v50 = vld [vmem:[#allocation87_spill] sm:$0xff] }
 0x5c0   : > { %14887 = vst [vmem:[#allocation184_spill] sm:$0xff] %v12538_v33  ;;  %v12541_v18 = vsel %vm4831_vm6, %v7368_v42, %v7367_v38  ;;  %v6834_v41 = vadd.f32 %v6833_v51, %v6832_v63  ;;  %v6831_v55 = vadd.f32 %v6830_v47, %v6829_v48  ;;  %v5911_v43 = vcombine.high %v5901_v56, %v5901_v56 }
 0x5c1   : > { %v6820_v62 = vadd.f32 %v6819_v39, %v6818_v52  ;;  %v6601_v45 = vadd.f32 %v6537_v54, %v12341_v15  ;;  %v6816_v44 = vrot.slane %v6815_v23, 1  ;;  %v6599_v60 = vadd.f32 %v6535_v25, %v12341_v15  ;;  %v14889_v39 = vld [vmem:[#allocation83_spill] sm:$0xff] }
 0x5c2   : > { %v6835_v1 = vrot.slane %v6834_v41, 2  ;;  %v6246_v53 = vrot.slane %v5901_v56, %v14461_v24  ;;  %v7242_v2 = vpack.c.bf16 %v6810_v59, %v6810_v59  ;;  %v6254_v34 = vrot.slane %v5911_v43, %v14461_v24 }
 0x5c3   : > { %v6821_v57 = vrot.slane %v6820_v62, 2  ;;  %v6665_v3 = vmax.f32 %v6601_v45, 0.0  ;;  %v12547_v38 = vpop.f32.mrb[116].mxu0  ;;  %v6817_v21 = vadd.f32 %v6816_v44, %v6815_v23  ;;  %v6663_v46 = vmax.f32 %v6599_v60, 0.0 }
 0x5c4   : > { %v6836_v49 = vadd.f32 %v6835_v1, %v6834_v41  ;;  %v6536_v48 = vadd.f32 %v6246_v53, %v5587_v37  ;;  %v12549_v47 = vpop.f32.mrb[117].mxu0  ;;  %v12551_v63 = vunpack.c.l.b16 %v7241_v26  ;;  %v7245_v42 = vpack.c.bf16 %v6831_v55, %v6831_v55 }
 0x5c5   : > { %v6729_v51 = vmul.f32 %v6665_v3, %v14888_v50  ;;  %v6538_v56 = vadd.f32 %v12504_v35, %v6254_v34  ;;  %v12555_v52 = vpop.f32.mrb[118].mxu0  ;;  %v6822_v59 = vadd.f32 %v6821_v57, %v6820_v62  ;;  %v6727_v54 = vmul.f32 %v6663_v46, %v14889_v39 }
 0x5c6   : > { %v6600_v25 = vadd.f32 %v6536_v48, %v12341_v15  ;;  %v5894_v1 = vrot.slane %v12388_v17, %v14458_v31  ;;  %v12561_v37 = vpop.f32.mrb[119].mxu0  ;;  %v12563_v23 = vunpack.c.l.b16 %v7242_v2  ;;  %v7243_v26 = vpack.c.bf16 %v6817_v21, %v6817_v21 }
 0x5c7   : > { %v6853_v41 = vsel %vm2503_vm5, %v6729_v51, 0.0  ;;  %v6602_v55 = vadd.f32 %v6538_v56, %v12341_v15  ;;  %v6837_v35 = vrot.slane %v6836_v49, 1  ;;  %v12568_v45 = vadd.f32 %v6726_v4, %v12019_v5  ;;  %v14893_v4 = vld [vmem:[#allocation93_spill] sm:$0xff] }
 0x5c8   : > { %v6854_v62 = vrot.slane %v6853_v41, 4  ;;  %v6839_v43 = vsel %vm2503_vm5, %v6727_v54, 0.0  ;;  %v12571_v44 = vunpack.c.l.b16 %v7245_v42  ;;  %v12574_v60 = vadd.f32 %v6724_v30, %v12005_v22  ;;  %v14894_v30 = vld [vmem:[#allocation85_spill] sm:$0xff] }
 0x5c9   : > { %14890 = vst [vmem:[#allocation56_spill] sm:$0xff] %v12568_v45  ;;  %v6840_v53 = vrot.slane %v6839_v43, 4  ;;  %v6666_v2 = vmax.f32 %v6602_v55, 0.0  ;;  %v6823_v57 = vrot.slane %v6822_v59, 1  ;;  %v6664_v34 = vmax.f32 %v6600_v25, 0.0 }
 0x5ca   : > { %14891 = vst [vmem:[#allocation191_spill] sm:$0xff] %v12574_v60  ;;  %v6855_v3 = vadd.f32 %v6854_v62, %v6853_v41  ;;  %v5910_v21 = vcombine.high %v5894_v1, %v5894_v1  ;;  %v12576_v46 = vunpack.c.l.b16 %v7243_v26  ;;  %v12579_v48 = vadd.f32 %v6729_v51, %v12037_v40 }
 0x5cb   : > { %v6841_v5 = vadd.f32 %v6840_v53, %v6839_v43  ;;  %v6730_v50 = vmul.f32 %v6666_v2, %v14893_v4  ;;  %v12582_v56 = vpop.f32.mrb[120].mxu0  ;;  %v12584_v42 = vadd.f32 %v6837_v35, %v6836_v49  ;;  %v6728_v39 = vmul.f32 %v6664_v34, %v14894_v30 }
 0x5cc   : > { %14892 = vst [vmem:[#allocation63_spill] sm:$0xff] %v12579_v48  ;;  %v6856_v22 = vrot.slane %v6855_v3, 2  ;;  %v14895_v25 = vcombine.high %v12388_v17, %v12388_v17  ;;  %v12591_v26 = vpop.f32.mrb[121].mxu0  ;;  %v6266_v51 = vrot.slane %v5910_v21, %v14461_v24  ;;  %v6258_v62 = vrot.slane %v5894_v1, %v14461_v24 }
 0x5cd   : > { %v6842_v55 = vrot.slane %v6841_v5, 2  ;;  %v6860_v40 = vsel %vm2503_vm5, %v6730_v50, 0.0  ;;  %v12596_v43 = vpop.f32.mrb[122].mxu0  ;;  %v6824_v49 = vadd.f32 %v6823_v57, %v6822_v59  ;;  %v6846_v2 = vsel %vm2503_vm5, %v6728_v39, 0.0 }
 0x5ce   : > { %v5908_v41 = vrot.slane %v14895_v25, %v14458_v31  ;;  %v6857_v35 = vadd.f32 %v6856_v22, %v6855_v3  ;;  %v6861_v53 = vrot.slane %v6860_v40, 4  ;;  %v12599_v34 = vpop.f32.mrb[123].mxu0  ;;  %v6847_v4 = vrot.slane %v6846_v2, 4 }
 0x5cf   : > { %v6843_v17 = vadd.f32 %v6842_v55, %v6841_v5  ;;  %v6541_v30 = vadd.f32 %v12523_v9, %v6266_v51  ;;  %v6539_v25 = vadd.f32 %v6258_v62, %v12529_v12  ;;  %v12604_v48 = vadd.f32 %v6727_v54, %v12023_v14 }
 0x5d0   : > { %v6862_v21 = vadd.f32 %v6861_v53, %v6860_v40  ;;  %v5912_v1 = vcombine.high %v5908_v41, %v5908_v41  ;;  %v6262_v45 = vrot.slane %v5908_v41, %v14461_v24  ;;  %v6848_v57 = vadd.f32 %v6847_v4, %v6846_v2 }
 0x5d1   : > { %14896 = vst [vmem:[#allocation148_spill] sm:$0xff] %v12604_v48  ;;  %v6844_v59 = vrot.slane %v6843_v17, 1  ;;  %v6605_v3 = vadd.f32 %v6541_v30, %v12341_v15  ;;  %v6603_v22 = vadd.f32 %v6539_v25, %v12341_v15  ;;  %v6858_v60 = vrot.slane %v6857_v35, 1 }
 0x5d2   : > { %v6863_v5 = vrot.slane %v6862_v21, 2  ;;  %v6270_v55 = vrot.slane %v5912_v1, %v14461_v24  ;;  %v6540_v9 = vadd.f32 %v6262_v45, %v12535_v32  ;;  %v7244_v12 = vpack.c.bf16 %v6824_v49, %v6824_v49  ;;  %v14897_v1 = vld [vmem:[#allocation127_spill] sm:$0xff]  ;;  %v14898_v45 = vld [vmem:[#allocation101_spill] sm:$0xff] }
 0x5d3   : > { %v6849_v51 = vrot.slane %v6848_v57, 2  ;;  %v6669_v14 = vmax.f32 %v6605_v3, 0.0  ;;  %v6667_v54 = vmax.f32 %v6603_v22, 0.0  ;;  %v12611_v40 = vpop.f32.mrb[124].mxu0  ;;  %v6845_v62 = vadd.f32 %v6844_v59, %v6843_v17 }
 0x5d4   : > { %v6864_v41 = vadd.f32 %v6863_v5, %v6862_v21  ;;  %v6542_v53 = vadd.f32 %v12532_v13, %v6270_v55  ;;  %v6604_v2 = vadd.f32 %v6540_v9, %v12341_v15  ;;  %v12615_v4 = vpop.f32.mrb[125].mxu0  ;;  %v6859_v17 = vadd.f32 %v6858_v60, %v6857_v35 }
 0x5d5   : > { %v6850_v25 = vadd.f32 %v6849_v51, %v6848_v57  ;;  %v12620_v32 = vmul.f32 %v6669_v14, %v14897_v1  ;;  %v12623_v49 = vmul.f32 %v6667_v54, %v14898_v45  ;;  %v12625_v3 = vpop.f32.mrb[126].mxu0  ;;  %v12630_v5 = vunpack.c.l.b16 %v7244_v12 }
 0x5d6   : > { %v6865_v21 = vrot.slane %v6864_v41, 1  ;;  %v6606_v13 = vadd.f32 %v6542_v53, %v12341_v15  ;;  %v6668_v59 = vmax.f32 %v6604_v2, 0.0  ;;  %v12628_v22 = vpop.f32.mrb[127].mxu0  ;;  %v12633_v55 = vadd.f32 %v6730_v50, %v12041_v19  ;;  %v14900_v2 = vld [vmem:[#allocation114_spill] sm:$0xff] }
 0x5d7   : > { %v6851_v57 = vrot.slane %v6850_v25, 1  ;;  %v6881_v9 = vsel %vm2503_vm5, %v12620_v32, 0.0  ;;  %v7247_v51 = vpack.c.bf16 %v6845_v62, %v6845_v62  ;;  %v6867_v60 = vsel %vm2503_vm5, %v12623_v49, 0.0 }
 0x5d8   : > { %14899 = vst [vmem:[#allocation61_spill] sm:$0xff] %v12633_v55  ;;  %v12637_v14 = vadd.f32 %v6865_v21, %v6864_v41  ;;  %v6882_v54 = vrot.slane %v6881_v9, 4  ;;  %v6868_v35 = vrot.slane %v6867_v60, 4  ;;  %v6670_v53 = vmax.f32 %v6606_v13, 0.0  ;;  %v14902_v21 = vld [vmem:[#allocation136_spill] sm:$0xff] }
 0x5d9   : > { %v6852_v15 = vadd.f32 %v6851_v57, %v6850_v25  ;;  %v6732_v12 = vmul.f32 %v6668_v59, %v14900_v2  ;;  %v7249_v1 = vpack.c.bf16 %v6859_v17, %v6859_v17  ;;  %v12643_v19 = vadd.f32 %v6728_v39, %v12027_v16 }
 0x5da   : > { %v6883_v50 = vadd.f32 %v6882_v54, %v6881_v9  ;;  %v5958_v45 = vcombine.high %v12364_v10, %v12364_v10  ;;  %v6869_v41 = vadd.f32 %v6868_v35, %v6867_v60  ;;  %v6734_v30 = vmul.f32 %v6670_v53, %v14902_v21 }
 0x5db   : > { %14901 = vst [vmem:[#allocation194_spill] sm:$0xff] %v12643_v19  ;;  %v7248_v62 = vpack.c.bf16 %v6852_v15, %v6852_v15  ;;  %v6874_v55 = vsel %vm2503_vm5, %v6732_v12, 0.0  ;;  %v12649_v48 = vpop.f32.mrb[128].mxu0  ;;  %v7375_v25 = vunpack.c.l.b16 %v7247_v51  ;;  %v7250_v13 = vpack.c.bf16 %v12637_v14, %v12637_v14 }
 0x5dc   : > { %v6884_v17 = vrot.slane %v6883_v50, 2  ;;  %v6875_v59 = vrot.slane %v6874_v55, 4  ;;  %v12653_v16 = vpop.f32.mrb[129].mxu0  ;;  %v6870_v57 = vrot.slane %v6869_v41, 2  ;;  %v6888_v9 = vsel %vm2503_vm5, %v6734_v30, 0.0 }
 0x5dd   : > { %v7376_v39 = vunpack.c.l.b16 %v7248_v62  ;;  %v6274_v54 = vrot.slane %v12364_v10, %v14461_v24  ;;  %v12658_v60 = vpop.f32.mrb[130].mxu0  ;;  %v6889_v35 = vrot.slane %v6888_v9, 4  ;;  %v6282_v51 = vrot.slane %v5958_v45, %v14461_v24 }
 0x5de   : > { %v6885_v15 = vadd.f32 %v6884_v17, %v6883_v50  ;;  %v6876_v53 = vadd.f32 %v6875_v59, %v6874_v55  ;;  %v12661_v2 = vpop.f32.mrb[131].mxu0  ;;  %v6871_v21 = vadd.f32 %v6870_v57, %v6869_v41  ;;  %v14904_v19 = vcombine.high %v12344_v28, %v12344_v28 }
 0x5df   : > { %14903 = vst [vmem:[#allocation62_spill] sm:$0xff] %v12661_v2  ;;  %v12664_v14 = vsel %vm4831_vm6, %v7376_v39, %v7375_v25  ;;  %v6543_v62 = vadd.f32 %v6274_v54, %v12549_v47  ;;  %v6890_v0 = vadd.f32 %v6889_v35, %v6888_v9  ;;  %v6545_v55 = vadd.f32 %v12547_v38, %v6282_v51 }
 0x5e0   : > { %v5950_v10 = vrot.slane %v14904_v19, %v14458_v31  ;;  %v6886_v33 = vrot.slane %v6885_v15, 1  ;;  %v6877_v50 = vrot.slane %v6876_v53, 2  ;;  %v6872_v17 = vrot.slane %v6871_v21, 1 }
 0x5e1   : > { %v6607_v45 = vadd.f32 %v12335_v11, %v6543_v62  ;;  %v6891_v41 = vrot.slane %v6890_v0, 2  ;;  %v6609_v47 = vadd.f32 %v12335_v11, %v6545_v55  ;;  %v12679_v38 = vunpack.c.l.b16 %v7249_v1  ;;  %v14908_v55 = vld [vmem:[#allocation94_spill] sm:$0xff] }
 0x5e2   : > { %v5960_v59 = vcombine.high %v5950_v10, %v5950_v10  ;;  %v6278_v25 = vrot.slane %v5950_v10, %v14461_v24  ;;  %v6887_v39 = vadd.f32 %v6886_v33, %v6885_v15  ;;  %v6878_v57 = vadd.f32 %v6877_v50, %v6876_v53  ;;  %v14906_v15 = vld [vmem:[#allocation84_spill] sm:$0xff] }
 0x5e3   : > { %v6873_v54 = vadd.f32 %v6872_v17, %v6871_v21  ;;  %v6671_v58 = vmax.f32 %v6607_v45, 0.0  ;;  %v12677_v9 = vpop.f32.mrb[132].mxu0  ;;  %v6892_v51 = vadd.f32 %v6891_v41, %v6890_v0  ;;  %v6673_v62 = vmax.f32 %v6609_v47, 0.0 }
 0x5e4   : > { %v6286_v28 = vrot.slane %v5960_v59, %v14461_v24  ;;  %v6544_v19 = vadd.f32 %v6278_v25, %v12561_v37  ;;  %v7253_v35 = vpack.c.bf16 %v6887_v39, %v6887_v39  ;;  %v12681_v2 = vpop.f32.mrb[133].mxu0  ;;  %v12685_v33 = vadd.f32 %v12620_v32, %v12067_v7 }
 0x5e5   : > { %v6735_v53 = vmul.f32 %v6671_v58, %v14906_v15  ;;  %v12690_v37 = vpop.f32.mrb[134].mxu0  ;;  %v7251_v50 = vpack.c.bf16 %v6873_v54, %v6873_v54  ;;  %v12694_v1 = vadd.f32 %v12623_v49, %v12049_v6  ;;  %v6879_v0 = vrot.slane %v6878_v57, 1  ;;  %v9467_v6 = vld [vmem:[%s13972_s14 + $0x8] sm:$0xff]  }
 0x5e6   : > { %14905 = vst [vmem:[#allocation92_spill] sm:$0xff] %v12685_v33  ;;  %v6546_v21 = vadd.f32 %v12555_v52, %v6286_v28  ;;  %v6608_v10 = vadd.f32 %v12335_v11, %v6544_v19  ;;  %v12697_v17 = vmul.f32 %v6673_v62, %v14908_v55  ;;  %v12699_v45 = vpop.f32.mrb[135].mxu0  ;;  %v12701_v7 = vunpack.c.l.b16 %v7250_v13  ;;  %9312 = vmatprep.subr.bf16.mxu1 %v9467_v6  ;;  %v14912_v62 = vld [vmem:[#allocation102_spill] sm:$0xff] }
 0x5e7   : > { %14907 = vst [vmem:[#allocation60_spill] sm:$0xff] %v12694_v1  ;;  %v12704_v58 = vadd.f32 %v6732_v12, %v12045_v27  ;;  %v6895_v52 = vsel %vm2503_vm5, %v6735_v53, 0.0  ;;  %v12711_v49 = vunpack.c.l.b16 %v7253_v35  ;;  %v6893_v59 = vrot.slane %v6892_v51, 1  ;;  %9313 = vmatpush3.bf16.msra.mxu1 %v9467_v6 }
 0x5e8   : > { %v6610_v32 = vadd.f32 %v12335_v11, %v6546_v21  ;;  %v12714_v25 = vadd.f32 %v6734_v30, %v12059_v8  ;;  %v6909_v13 = vsel %vm2503_vm5, %v12697_v17, 0.0  ;;  %v6896_v27 = vrot.slane %v6895_v52, 4  ;;  %v14913_v21 = vld [vmem:[#allocation88_spill] sm:$0xff] }
 0x5e9   : > { %14909 = vst [vmem:[#allocation99_spill] sm:$0xff] %v12704_v58  ;;  %v6910_v39 = vrot.slane %v6909_v13, 4  ;;  %v6672_v41 = vmax.f32 %v6608_v10, 0.0  ;;  %v12718_v47 = vunpack.c.l.b16 %v7251_v50  ;;  %v12720_v54 = vadd.f32 %v6879_v0, %v6878_v57 }
 0x5ea   : > { %14910 = vst [vmem:[#allocation67_spill] sm:$0xff] %v12714_v25  ;;  %v6674_v12 = vmax.f32 %v6610_v32, 0.0  ;;  %v5943_v28 = vrot.slane %v12348_v36, %v14458_v31  ;;  %v14911_v8 = vcombine.high %v12348_v36, %v12348_v36  ;;  %v6897_v35 = vadd.f32 %v6896_v27, %v6895_v52 }
 0x5eb   : > { %v6911_v19 = vadd.f32 %v6910_v39, %v6909_v13  ;;  %v12732_v10 = vmul.f32 %v6672_v41, %v14913_v21  ;;  %v12734_v50 = vpop.f32.mrb[136].mxu0  ;;  %v12736_v57 = vadd.f32 %v6893_v59, %v6892_v51  ;;  %v12739_v0 = vadd.f32 %v6735_v53, %v12071_v20 }
 0x5ec   : > { %v5957_v30 = vrot.slane %v14911_v8, %v14458_v31  ;;  %v12729_v15 = vmul.f32 %v6674_v12, %v14912_v62  ;;  %v5959_v55 = vcombine.high %v5943_v28, %v5943_v28  ;;  %v12741_v36 = vpop.f32.mrb[137].mxu0  ;;  %v6898_v13 = vrot.slane %v6897_v35, 2 }
 0x5ed   : > { %14914 = vst [vmem:[#allocation65_spill] sm:$0xff] %v12739_v0  ;;  %v6912_v6 = vrot.slane %v6911_v19, 2  ;;  %v6290_v39 = vrot.slane %v5943_v28, %v14461_v24  ;;  %v12746_v27 = vpop.f32.mrb[138].mxu0  ;;  %v6902_v51 = vsel %vm2503_vm5, %v12732_v10, 0.0 }
 0x5ee   : > { %v5961_v32 = vcombine.high %v5957_v30, %v5957_v30  ;;  %v6916_v52 = vsel %vm2503_vm5, %v12729_v15, 0.0  ;;  %14915 = vst [vmem:[#allocation66_spill] sm:$0xff] %v12746_v27  ;;  %v6298_v20 = vrot.slane %v5959_v55, %v14461_v24  ;;  %v6294_v53 = vrot.slane %v5957_v30, %v14461_v24  ;;  %v12752_v59 = vpop.f32.mrb[139].mxu0 }
 0x5ef   : > { %v6917_v12 = vrot.slane %v6916_v52, 4  ;;  %14916 = vst [vmem:[#allocation151_spill] sm:$0xff] %v12752_v59  ;;  %v6913_v41 = vadd.f32 %v6912_v6, %v6911_v19  ;;  %v6899_v8 = vadd.f32 %v6898_v13, %v6897_v35  ;;  %v6903_v62 = vrot.slane %v6902_v51, 4 }
 0x5f0   : > { %v6547_v21 = vadd.f32 %v6290_v39, %v12591_v26  ;;  %v6549_v28 = vadd.f32 %v12582_v56, %v6298_v20  ;;  %v6302_v25 = vrot.slane %v5961_v32, %v14461_v24  ;;  %v6548_v33 = vadd.f32 %v6294_v53, %v12599_v34 }
 0x5f1   : > { %v6918_v0 = vadd.f32 %v6917_v12, %v6916_v52  ;;  %v6914_v58 = vrot.slane %v6913_v41, 1  ;;  %v6900_v1 = vrot.slane %v6899_v8, 1  ;;  %v6904_v27 = vadd.f32 %v6903_v62, %v6902_v51 }
 0x5f2   : > { %v6611_v55 = vadd.f32 %v12335_v11, %v6547_v21  ;;  %v6613_v59 = vadd.f32 %v12335_v11, %v6549_v28  ;;  %v6550_v19 = vadd.f32 %v12596_v43, %v6302_v25  ;;  %v6612_v35 = vadd.f32 %v12335_v11, %v6548_v33  ;;  %v14917_v25 = vld [vmem:[#allocation117_spill] sm:$0xff] }
 0x5f3   : > { %v6919_v30 = vrot.slane %v6918_v0, 2  ;;  %v6915_v26 = vadd.f32 %v6914_v58, %v6913_v41  ;;  %v6901_v6 = vadd.f32 %v6900_v1, %v6899_v8  ;;  %v6905_v13 = vrot.slane %v6904_v27, 2  ;;  %v12762_v52 = vpop.f32.mrb[140].mxu0  ;;  %v14919_v41 = vld [vmem:[#allocation141_spill] sm:$0xff] }
 0x5f4   : > { %v6675_v56 = vmax.f32 %v6611_v55, 0.0  ;;  %v6677_v34 = vmax.f32 %v6613_v59, 0.0  ;;  %v6614_v39 = vadd.f32 %v12335_v11, %v6550_v19  ;;  %v6676_v12 = vmax.f32 %v6612_v35, 0.0  ;;  %v12765_v51 = vpop.f32.mrb[141].mxu0  ;;  %v14920_v59 = vld [vmem:[#allocation132_spill] sm:$0xff] }
 0x5f5   : > { %v6920_v32 = vadd.f32 %v6919_v30, %v6918_v0  ;;  %v7252_v20 = vpack.c.bf16 %v12720_v54, %v12720_v54  ;;  %v7257_v53 = vpack.c.bf16 %v6915_v26, %v6915_v26  ;;  %v6906_v43 = vadd.f32 %v6905_v13, %v6904_v27  ;;  %v12772_v1 = vpop.f32.mrb[142].mxu0 }
 0x5f6   : > { %v12770_v33 = vmul.f32 %v6675_v56, %v14917_v25  ;;  %14918 = vst [vmem:[#allocation64_spill] sm:$0xff] %v12772_v1  ;;  %v12775_v8 = vmul.f32 %v6677_v34, %v14919_v41  ;;  %v6678_v0 = vmax.f32 %v6614_v39, 0.0  ;;  %v12778_v11 = vmul.f32 %v6676_v12, %v14920_v59  ;;  %v12780_v62 = vpop.f32.mrb[143].mxu0  ;;  %v14923_v34 = vld [vmem:[#allocation150_spill] sm:$0xff] }
 0x5f7   : > { %v6921_v58 = vrot.slane %v6920_v32, 1  ;;  %14921 = vst [vmem:[#allocation71_spill] sm:$0xff] %v12780_v62  ;;  %v12784_v54 = vadd.f32 %v12697_v17, %v12089_v29  ;;  %v7255_v27 = vpack.c.bf16 %v6901_v6, %v6901_v6  ;;  %v6907_v21 = vrot.slane %v6906_v43, 1 }
 0x5f8   : > { %v6923_v28 = vsel %vm2503_vm5, %v12770_v33, 0.0  ;;  %v6937_v19 = vsel %vm2503_vm5, %v12775_v8, 0.0  ;;  %v12792_v26 = vunpack.c.l.b16 %v7252_v20  ;;  %v12795_v29 = vmul.f32 %v6678_v0, %v14923_v34  ;;  %v14927_v34 = vld [vmem:[#allocation142_spill] sm:$0xff] }
 0x5f9   : > { %14922 = vst [vmem:[#allocation69_spill] sm:$0xff] %v12784_v54  ;;  %v6922_v30 = vadd.f32 %v6921_v58, %v6920_v32  ;;  %v6924_v35 = vrot.slane %v6923_v28, 4  ;;  %v6908_v13 = vadd.f32 %v6907_v21, %v6906_v43  ;;  %v6938_v56 = vrot.slane %v6937_v19, 4 }
 0x5fa   : > { %v7385_v17 = vunpack.c.l.b16 %v7257_v53  ;;  %v6930_v12 = vsel %vm2503_vm5, %v12778_v11, 0.0  ;;  %v7383_v25 = vunpack.c.l.b16 %v7255_v27  ;;  %v6944_v58 = vsel %vm2503_vm5, %v12795_v29, 0.0 }
 0x5fb   : > { %v7258_v6 = vpack.c.bf16 %v6922_v30, %v6922_v30  ;;  %v6925_v39 = vadd.f32 %v6924_v35, %v6923_v28  ;;  %v7256_v41 = vpack.c.bf16 %v6908_v13, %v6908_v13  ;;  %v6939_v32 = vadd.f32 %v6938_v56, %v6937_v19  ;;  %v12801_v59 = vpop.f32.mrb[144].mxu0 }
 0x5fc   : > { %14924 = vst [vmem:[#allocation161_spill] sm:$0xff] %v12801_v59  ;;  %v6945_v21 = vrot.slane %v6944_v58, 4  ;;  %v6931_v55 = vrot.slane %v6930_v12, 4  ;;  %v12803_v0 = vpop.f32.mrb[145].mxu0  ;;  %v6007_v28 = vcombine.high %v12381_v61, %v12381_v61  ;;  %v6306_v27 = vrot.slane %v12381_v61, %v14461_v24 }
 0x5fd   : > { %v7386_v20 = vunpack.c.l.b16 %v7258_v6  ;;  %v6926_v43 = vrot.slane %v6925_v39, 2  ;;  %14925 = vst [vmem:[#allocation70_spill] sm:$0xff] %v12803_v0  ;;  %v7384_v53 = vunpack.c.l.b16 %v7256_v41  ;;  %v6940_v30 = vrot.slane %v6939_v32, 2  ;;  %v12809_v19 = vpop.f32.mrb[146].mxu0 }
 0x5fe   : > { %14926 = vst [vmem:[#allocation195_spill] sm:$0xff] %v12809_v19  ;;  %v6946_v13 = vadd.f32 %v6945_v21, %v6944_v58  ;;  %v6932_v56 = vadd.f32 %v6931_v55, %v6930_v12  ;;  %v14928_v6 = vcombine.high %v14927_v34, %v14927_v34  ;;  %v12815_v59 = vpop.f32.mrb[147].mxu0  ;;  %v6314_v1 = vrot.slane %v6007_v28, %v14461_v24  ;;  %v14929_v21 = vld [vmem:[#allocation46_spill] sm:$0xff] }
 0x5ff   : > { %v6927_v35 = vadd.f32 %v6926_v43, %v6925_v39  ;;  %v7445_v41 = vsel %vm4831_vm6, %v7384_v53, %v7383_v25  ;;  %v6941_v0 = vadd.f32 %v6940_v30, %v6939_v32  ;;  %v6551_v62 = vadd.f32 %v6306_v27, %v12615_v4 }
 0x600   : > { %v5999_v54 = vrot.slane %v14928_v6, %v14458_v31  ;;  %v7446_v61 = vsel %vm4833_vm7, %v7385_v17, %v7445_v41  ;;  %v6947_v39 = vrot.slane %v6946_v13, 2  ;;  %v6933_v58 = vrot.slane %v6932_v56, 2  ;;  %v14930_v6 = vld [vmem:[#allocation31_spill] sm:$0xff] }
 0x601   : > { %v6928_v19 = vrot.slane %v6927_v35, 1  ;;  %v6942_v55 = vrot.slane %v6941_v0, 1  ;;  %v7447_v12 = vsel %vm4835_vm8, %v7386_v20, %v7446_v61  ;;  %v6553_v43 = vadd.f32 %v12611_v40, %v6314_v1 }
 0x602   : > { %v6615_v34 = vadd.f32 %v14929_v21, %v6551_v62  ;;  %v12826_v25 = vadd.f32 %v12729_v15, %v14930_v6  ;;  %v6934_v53 = vadd.f32 %v6933_v58, %v6932_v56  ;;  %v6009_v30 = vcombine.high %v5999_v54, %v5999_v54  ;;  %v14932_v15 = vld [vmem:[#allocation109_spill] sm:$0xff]  ;;  %v14935_v6 = vld [vmem:[#allocation11_spill] sm:$0xff] }
 0x603   : > { %v6929_v32 = vadd.f32 %v6928_v19, %v6927_v35  ;;  %v6943_v4 = vadd.f32 %v6942_v55, %v6941_v0  ;;  %v6617_v17 = vadd.f32 %v14929_v21, %v6553_v43  ;;  %v6310_v27 = vrot.slane %v5999_v54, %v14461_v24  ;;  %v12830_v41 = vpop.f32.mrb[148].mxu0  ;;  %v14934_v0 = vld [vmem:[#allocation86_spill] sm:$0xff] }
 0x604   : > { %14931 = vst [vmem:[#allocation68_spill] sm:$0xff] %v12826_v25  ;;  %v6679_v28 = vmax.f32 %v6615_v34, 0.0  ;;  %v6948_v61 = vadd.f32 %v6947_v39, %v6946_v13  ;;  %v6935_v40 = vrot.slane %v6934_v53, 1  ;;  %v6318_v1 = vrot.slane %v6009_v30, %v14461_v24  ;;  %v12833_v62 = vpop.f32.mrb[149].mxu0 }
 0x605   : > { %v7259_v20 = vpack.c.bf16 %v6929_v32, %v6929_v32  ;;  %v12837_v19 = vadd.f32 %v12732_v10, %v14932_v15  ;;  %v6681_v35 = vmax.f32 %v6617_v17, 0.0  ;;  %v6552_v58 = vadd.f32 %v6310_v27, %v12628_v22  ;;  %v12841_v55 = vpop.f32.mrb[150].mxu0  ;;  %v14937_v10 = vld [vmem:[#allocation110_spill] sm:$0xff] }
 0x606   : > { %v6743_v56 = vmul.f32 %v6679_v28, %v14934_v0  ;;  %v7261_v54 = vpack.c.bf16 %v6943_v4, %v6943_v4  ;;  %v6936_v34 = vadd.f32 %v6935_v40, %v6934_v53  ;;  %v6554_v13 = vadd.f32 %v12625_v3, %v6318_v1  ;;  %v12844_v39 = vpop.f32.mrb[151].mxu0  ;;  %v14939_v17 = vld [vmem:[#allocation98_spill] sm:$0xff] }
 0x607   : > { %14933 = vst [vmem:[#allocation95_spill] sm:$0xff] %v12837_v19  ;;  %v7387_v43 = vunpack.c.l.b16 %v7259_v20  ;;  %v12848_v32 = vadd.f32 %v12775_v8, %v14935_v6  ;;  %v12852_v30 = vadd.f32 %v12770_v33, %v14937_v10  ;;  %v6745_v28 = vmul.f32 %v6681_v35, %v14939_v17  ;;  %v14940_v3 = vld [vmem:[#allocation6_spill] sm:$0xff] }
 0x608   : > { %v6951_v22 = vsel %vm2503_vm5, %v6743_v56, 0.0  ;;  %v6949_v27 = vrot.slane %v6948_v61, 1  ;;  %v7260_v53 = vpack.c.bf16 %v6936_v34, %v6936_v34  ;;  %v12859_v40 = vadd.f32 %v12778_v11, %v14940_v3 }
 0x609   : > { %14936 = vst [vmem:[#allocation75_spill] sm:$0xff] %v12848_v32  ;;  %14938 = vst [vmem:[#allocation159_spill] sm:$0xff] %v12852_v30  ;;  %v7448_v4 = vsel %vm4837_vm9, %v7387_v43, %v7447_v12  ;;  %v6952_v20 = vrot.slane %v6951_v22, 4  ;;  %v6965_v8 = vsel %vm2503_vm5, %v6745_v28, 0.0  ;;  %v6618_v1 = vadd.f32 %v14929_v21, %v6554_v13  ;;  %v14942_v12 = vld [vmem:[#allocation44_spill] sm:$0xff]  ;;  %v14945_v32 = vld [vmem:[#allocation89_spill] sm:$0xff] }
 0x60a   : > { %14941 = vst [vmem:[#allocation73_spill] sm:$0xff] %v12859_v40  ;;  %v6616_v33 = vadd.f32 %v14929_v21, %v6552_v58  ;;  %v7389_v15 = vunpack.c.l.b16 %v7261_v54  ;;  %v7388_v0 = vunpack.c.l.b16 %v7260_v53  ;;  %v6966_v35 = vrot.slane %v6965_v8, 4 }
 0x60b   : > { %v6953_v6 = vadd.f32 %v6952_v20, %v6951_v22  ;;  %v6682_v10 = vmax.f32 %v6618_v1, 0.0  ;;  %v5992_v43 = vrot.slane %v14942_v12, %v14458_v31  ;;  %v14943_v11 = vcombine.high %v14942_v12, %v14942_v12  ;;  %v12872_v3 = vpop.f32.mrb[152].mxu0  ;;  %v14944_v1 = vld [vmem:[#allocation106_spill] sm:$0xff] }
 0x60c   : > { %v6680_v17 = vmax.f32 %v6616_v33, 0.0  ;;  %v12874_v13 = vadd.f32 %v6949_v27, %v6948_v61  ;;  %v7449_v58 = vsel %vm4839_vm10, %v7388_v0, %v7448_v4  ;;  %v6967_v54 = vadd.f32 %v6966_v35, %v6965_v8  ;;  %v12877_v22 = vpop.f32.mrb[153].mxu0  ;;  %v14947_v61 = vld [vmem:[#allocation8_spill] sm:$0xff]  ;;  %v14950_v35 = vld [vmem:[#allocation115_spill] sm:$0xff] }
 0x60d   : > { %v12870_v34 = vrot.slane %v14943_v11, %v14458_v31  ;;  %v6954_v53 = vrot.slane %v6953_v6, 2  ;;  %v12880_v20 = vsel %vm4841_vm11, %v7389_v15, %v7449_v58  ;;  %v12883_v33 = vmul.f32 %v6682_v10, %v14944_v1  ;;  %v12888_v40 = vpop.f32.mrb[154].mxu0 }
 0x60e   : > { %v12886_v12 = vmul.f32 %v6680_v17, %v14945_v32  ;;  %v6008_v11 = vcombine.high %v5992_v43, %v5992_v43  ;;  %14946 = vst [vmem:[#allocation74_spill] sm:$0xff] %v12888_v40  ;;  %v12892_v27 = vadd.f32 %v12795_v29, %v14947_v61  ;;  %v6968_v4 = vrot.slane %v6967_v54, 2  ;;  %v12896_v15 = vpop.f32.mrb[155].mxu0 }
 0x60f   : > { %v6955_v8 = vadd.f32 %v6954_v53, %v6953_v6  ;;  %v6010_v0 = vcombine.high %v12870_v34, %v12870_v34  ;;  %14949 = vst [vmem:[#allocation72_spill] sm:$0xff] %v12896_v15  ;;  %v12899_v10 = vadd.f32 %v6743_v56, %v14950_v35  ;;  %v6972_v32 = vsel %vm2503_vm5, %v12883_v33, 0.0 }
 0x610   : > { %14948 = vst [vmem:[#allocation197_spill] sm:$0xff] %v12892_v27  ;;  %v6958_v17 = vsel %vm2503_vm5, %v12886_v12, 0.0  ;;  %v6322_v58 = vrot.slane %v5992_v43, %v14461_v24  ;;  %v6969_v29 = vadd.f32 %v6968_v4, %v6967_v54  ;;  %v6973_v61 = vrot.slane %v6972_v32, 4 }
 0x611   : > { %14951 = vst [vmem:[#allocation164_spill] sm:$0xff] %v12899_v10  ;;  %v6956_v1 = vrot.slane %v6955_v8, 1  ;;  %v6959_v6 = vrot.slane %v6958_v17, 4  ;;  %v6330_v27 = vrot.slane %v6008_v11, %v14461_v24  ;;  %v6334_v35 = vrot.slane %v6010_v0, %v14461_v24  ;;  %v14952_v11 = vld [vmem:[#allocation10_spill] sm:$0xff] }
 0x612   : > { %v6555_v56 = vadd.f32 %v6322_v58, %v12653_v16  ;;  %v6970_v10 = vrot.slane %v6969_v29, 1  ;;  %v6974_v25 = vadd.f32 %v6973_v61, %v6972_v32  ;;  %v7432_v4 = vsel %vm4833_vm7, %v12551_v63, %v12541_v18 }
 0x613   : > { %v6957_v30 = vadd.f32 %v6956_v1, %v6955_v8  ;;  %v6960_v19 = vadd.f32 %v6959_v6, %v6958_v17  ;;  %v6557_v15 = vadd.f32 %v12649_v48, %v6330_v27  ;;  %v6558_v54 = vadd.f32 %v12658_v60, %v6334_v35  ;;  %v12924_v27 = vpop.f32.mrb[156].mxu0  ;;  %v14957_v35 = vld [vmem:[#allocation170_spill] sm:$0xff] }
 0x614   : > { %v6619_v43 = vadd.f32 %v14929_v21, %v6555_v56  ;;  %v6971_v53 = vadd.f32 %v6970_v10, %v6969_v29  ;;  %v12918_v40 = vadd.f32 %v6745_v28, %v14952_v11  ;;  %v6975_v16 = vrot.slane %v6974_v25, 2  ;;  %v14954_v10 = vld [vmem:[#allocation119_spill] sm:$0xff] }
 0x615   : > { %v6961_v0 = vrot.slane %v6960_v19, 2  ;;  %v6621_v8 = vadd.f32 %v14929_v21, %v6557_v15  ;;  %v6622_v17 = vadd.f32 %v14929_v21, %v6558_v54  ;;  %v7433_v48 = vsel %vm4835_vm8, %v12563_v23, %v7432_v4 }
 0x616   : > { %14953 = vst [vmem:[#allocation79_spill] sm:$0xff] %v12918_v40  ;;  %v6683_v32 = vmax.f32 %v6619_v43, 0.0  ;;  %v7265_v60 = vpack.c.bf16 %v6971_v53, %v6971_v53  ;;  %v7263_v58 = vpack.c.bf16 %v6957_v30, %v6957_v30  ;;  %v6976_v1 = vadd.f32 %v6975_v16, %v6974_v25  ;;  %v14956_v30 = vld [vmem:[#allocation163_spill] sm:$0xff] }
 0x617   : > { %v6962_v18 = vadd.f32 %v6961_v0, %v6960_v19  ;;  %v6685_v63 = vmax.f32 %v6621_v8, 0.0  ;;  %v6686_v29 = vmax.f32 %v6622_v17, 0.0  ;;  %v7434_v15 = vsel %vm4837_vm9, %v12576_v46, %v7433_v48 }
 0x618   : > { %v12927_v28 = vmul.f32 %v6683_v32, %v14954_v10  ;;  %v6977_v61 = vrot.slane %v6976_v1, 1  ;;  %v14955_v56 = vpack.c.bf16 %v12584_v42, %v12584_v42  ;;  %v7435_v53 = vsel %vm4839_vm10, %v12630_v5, %v7434_v15  ;;  %v12949_v5 = vpop.f32.mrb[157].mxu0 }
 0x619   : > { %v6963_v6 = vrot.slane %v6962_v18, 1  ;;  %v12937_v25 = vmul.f32 %v6685_v63, %v14956_v30  ;;  %v12942_v43 = vmul.f32 %v6686_v29, %v14957_v35  ;;  %v14958_v46 = vpack.c.bf16 %v12736_v57, %v12736_v57  ;;  %v14959_v30 = vld [vmem:[#allocation62_spill] sm:$0xff] }
 0x61a   : > { %v7374_v23 = vunpack.c.l.b16 %v14955_v56  ;;  %v6979_v19 = vsel %vm2503_vm5, %v12927_v28, 0.0  ;;  %v6978_v4 = vadd.f32 %v6977_v61, %v6976_v1  ;;  %v7436_v16 = vsel %vm4841_vm11, %v12571_v44, %v7435_v53 }
 0x61b   : > { %v7382_v54 = vunpack.c.l.b16 %v14958_v46  ;;  %v6964_v11 = vadd.f32 %v6963_v6, %v6962_v18  ;;  %v6980_v42 = vrot.slane %v6979_v19, 4  ;;  %v7393_v0 = vunpack.c.l.b16 %v7265_v60 }
 0x61c   : > { %v7391_v8 = vunpack.c.l.b16 %v7263_v58  ;;  %v6993_v32 = vsel %vm2503_vm5, %v12937_v25, 0.0  ;;  %v7000_v17 = vsel %vm2503_vm5, %v12942_v43, 0.0  ;;  %v7266_v48 = vpack.c.bf16 %v6978_v4, %v6978_v4  ;;  %v12961_v58 = vpop.f32.mrb[158].mxu0 }
 0x61d   : > { %v7264_v63 = vpack.c.bf16 %v6964_v11, %v6964_v11  ;;  %v6994_v57 = vrot.slane %v6993_v32, 4  ;;  %v6981_v10 = vadd.f32 %v6980_v42, %v6979_v19  ;;  %v7001_v1 = vrot.slane %v7000_v17, 4 }
 0x61e   : > { %v7437_v18 = vsel %vm4843_vm12, %v7374_v23, %v7436_v16  ;;  %v7439_v44 = vsel %vm4833_vm7, %v12679_v38, %v12664_v14  ;;  %v6326_v60 = vrot.slane %v12870_v34, %v14461_v24  ;;  %v7394_v29 = vunpack.c.l.b16 %v7266_v48  ;;  %v14960_v23 = vld [vmem:[#allocation140_spill] sm:$0xff] }
 0x61f   : > { %v7392_v15 = vunpack.c.l.b16 %v7264_v63  ;;  %v6995_v61 = vadd.f32 %v6994_v57, %v6993_v32  ;;  %v6982_v6 = vrot.slane %v6981_v10, 2  ;;  %v7002_v56 = vadd.f32 %v7001_v1, %v7000_v17 }
 0x620   : > { %v7440_v53 = vsel %vm4835_vm8, %v12701_v7, %v7439_v44  ;;  %v6556_v19 = vadd.f32 %v6326_v60, %v14959_v30  ;;  %v6056_v35 = vcombine.high %v14960_v23, %v14960_v23  ;;  %v6338_v1 = vrot.slane %v14960_v23, %v14461_v24  ;;  %v14962_v44 = vld [vmem:[#allocation13_spill] sm:$0xff] }
 0x621   : > { %v7452_v14 = vsel %vm4831_vm6, %v7392_v15, %v7391_v8  ;;  %v6996_v38 = vrot.slane %v6995_v61, 2  ;;  %v6983_v46 = vadd.f32 %v6982_v6, %v6981_v10  ;;  %v7441_v34 = vsel %vm4837_vm9, %v12718_v47, %v7440_v53  ;;  %v14965_v15 = vld [vmem:[#allocation50_spill] sm:$0xff]  ;;  %v14967_v6 = vld [vmem:[#allocation113_spill] sm:$0xff] }
 0x622   : > { %v7453_v4 = vsel %vm4833_vm7, %v7393_v0, %v7452_v14  ;;  %v7003_v11 = vrot.slane %v7002_v56, 2  ;;  %v7442_v42 = vsel %vm4839_vm10, %v12792_v26, %v7441_v34  ;;  %v6620_v7 = vadd.f32 %v14929_v21, %v6556_v19  ;;  %v14968_v53 = vld [vmem:[#allocation122_spill] sm:$0xff]  ;;  %v13007_v19 = vpop.f32.mrb[159].mxu0  ;;  %v14970_v14 = vld [vmem:[#allocation51_spill] sm:$0xff] }
 0x623   : > { %v6997_v16 = vadd.f32 %v6996_v38, %v6995_v61  ;;  %v6984_v32 = vrot.slane %v6983_v46, 1  ;;  %v7454_v17 = vsel %vm4835_vm8, %v7394_v29, %v7453_v4  ;;  %v7443_v8 = vsel %vm4841_vm11, %v12711_v49, %v7442_v42  ;;  %v14964_v49 = vld [vmem:[#allocation131_spill] sm:$0xff] }
 0x624   : > { %v7004_v48 = vadd.f32 %v7003_v11, %v7002_v56  ;;  %v7444_v63 = vsel %vm4843_vm12, %v7382_v54, %v7443_v8  ;;  %v6684_v57 = vmax.f32 %v6620_v7, 0.0  ;;  %v6346_v47 = vrot.slane %v6056_v35, %v14461_v24  ;;  %v14972_v42 = vld [vmem:[#allocation15_spill] sm:$0xff] }
 0x625   : > { %v14961_v0 = vpack.c.bf16 %v12874_v13, %v12874_v13  ;;  %v6985_v26 = vadd.f32 %v6984_v32, %v6983_v46  ;;  %v7487_v21 = vpack.c.b16 %v7444_v63, %v7437_v18  ;;  %v12989_v60 = vadd.f32 %v12883_v33, %v14962_v44  ;;  %v13011_v46 = vpop.f32.mrb[160].mxu0 }
 0x626   : > { %v6748_v29 = vmul.f32 %v6684_v57, %v14964_v49  ;;  %v6561_v54 = vadd.f32 %v12677_v9, %v6346_v47  ;;  %v14966_v61 = vcombine.high %v14965_v15, %v14965_v15  ;;  %v12999_v56 = vadd.f32 %v12886_v12, %v14967_v6  ;;  %v14974_v57 = vld [vmem:[#allocation12_spill] sm:$0xff] }
 0x627   : > { %v12983_v10 = vunpack.c.l.b16 %v14961_v0  ;;  %14963 = vst [vmem:[#allocation77_spill] sm:$0xff] %v12989_v60  ;;  %v7267_v18 = vpack.c.bf16 %v6985_v26, %v6985_v26  ;;  %v13003_v30 = vadd.f32 %v12927_v28, %v14968_v53  ;;  %9314 = vmatprep.mubr.msk.bf16.mxu1 %vm2503_vm5, %v7487_v21  ;;  %v6559_v33 = vadd.f32 %v6338_v1, %v12681_v2  ;;  %v14971_v28 = vld [vmem:[#allocation55_spill] sm:$0xff]  ;;  %v14976_v1 = vld [vmem:[#allocation160_spill] sm:$0xff] }
 0x628   : > { %v6048_v13 = vrot.slane %v14966_v61, %v14458_v31  ;;  %v6998_v9 = vrot.slane %v6997_v16, 1  ;;  %v7005_v23 = vrot.slane %v7004_v48, 1  ;;  %v6986_v35 = vsel %vm2503_vm5, %v6748_v29, 0.0 }
 0x629   : > { %14969 = vst [vmem:[#allocation78_spill] sm:$0xff] %v13003_v30  ;;  %v6625_v38 = vadd.f32 %v6561_v54, %v14970_v14  ;;  %v7395_v12 = vunpack.c.l.b16 %v7267_v18  ;;  %v6987_v34 = vrot.slane %v6986_v35, 4  ;;  %v6623_v4 = vadd.f32 %v6559_v33, %v14970_v14  ;;  %v13029_v54 = vpop.f32.mrb[161].mxu0 }
 0x62a   : > { %v6041_v11 = vrot.slane %v14971_v28, %v14458_v31  ;;  %v13018_v2 = vadd.f32 %v12937_v25, %v14972_v42  ;;  %v6058_v32 = vcombine.high %v6048_v13, %v6048_v13  ;;  %v6342_v8 = vrot.slane %v6048_v13, %v14461_v24  ;;  %v14977_v13 = vld [vmem:[#allocation153_spill] sm:$0xff]  ;;  %v13032_v18 = vpop.f32.mrb[162].mxu0 }
 0x62b   : > { %v6689_v7 = vmax.f32 %v6625_v38, 0.0  ;;  %v7455_v63 = vsel %vm4837_vm9, %v7395_v12, %v7454_v17  ;;  %v13024_v47 = vadd.f32 %v12942_v43, %v14974_v57  ;;  %v6988_v0 = vadd.f32 %v6987_v34, %v6986_v35  ;;  %v14978_v43 = vld [vmem:[#allocation116_spill] sm:$0xff]  ;;  %v13040_v35 = vpop.f32.mrb[163].mxu0 }
 0x62c   : > { %14973 = vst [vmem:[#allocation198_spill] sm:$0xff] %v13018_v2  ;;  %v6687_v26 = vmax.f32 %v6623_v4, 0.0  ;;  %v6999_v21 = vadd.f32 %v6998_v9, %v6997_v16  ;;  %v6350_v49 = vrot.slane %v6058_v32, %v14461_v24  ;;  %v6560_v25 = vadd.f32 %v6342_v8, %v12699_v45 }
 0x62d   : > { %14975 = vst [vmem:[#allocation76_spill] sm:$0xff] %v13024_v47  ;;  %v6753_v44 = vmul.f32 %v6689_v7, %v14976_v1  ;;  %v7006_v15 = vadd.f32 %v7005_v23, %v7004_v48  ;;  %v6989_v61 = vrot.slane %v6988_v0, 2  ;;  %v6057_v17 = vcombine.high %v6041_v11, %v6041_v11  ;;  %v15015_v47 = vld [vmem:[#allocation176_spill] sm:$0xff] }
 0x62e   : > { %v6751_v6 = vmul.f32 %v6687_v26, %v14977_v13  ;;  %v13035_v53 = vadd.f32 %v6748_v29, %v14978_v43  ;;  %v6562_v33 = vadd.f32 %v12690_v37, %v6350_v49  ;;  %v6624_v9 = vadd.f32 %v6560_v25, %v14970_v14  ;;  %v14980_v26 = vld [vmem:[#allocation173_spill] sm:$0xff]  ;;  %v14981_v43 = vld [vmem:[#allocation174_spill] sm:$0xff] }
 0x62f   : > { %v7021_v16 = vsel %vm2503_vm5, %v6753_v44, 0.0  ;;  %v6990_v45 = vadd.f32 %v6989_v61, %v6988_v0  ;;  %v6354_v23 = vrot.slane %v6041_v11, %v14461_v24  ;;  %v6362_v29 = vrot.slane %v6057_v17, %v14461_v24 }
 0x630   : > { %14979 = vst [vmem:[#allocation19_spill] sm:$0xff] %v13035_v53  ;;  %v7022_v38 = vrot.slane %v7021_v16, 4  ;;  %v7007_v48 = vsel %vm2503_vm5, %v6751_v6, 0.0  ;;  %v6626_v34 = vadd.f32 %v6562_v33, %v14970_v14  ;;  %v6688_v4 = vmax.f32 %v6624_v9, 0.0  ;;  %v15016_v53 = vld [vmem:[#allocation161_spill] sm:$0xff] }
 0x631   : > { %v7008_v12 = vrot.slane %v7007_v48, 4  ;;  %v7269_v42 = vpack.c.bf16 %v6999_v21, %v6999_v21  ;;  %v6991_v7 = vrot.slane %v6990_v45, 1  ;;  %v6563_v37 = vadd.f32 %v6354_v23, %v12741_v36 }
 0x632   : > { %v7023_v32 = vadd.f32 %v7022_v38, %v7021_v16  ;;  %v6690_v57 = vmax.f32 %v6626_v34, 0.0  ;;  %v6752_v0 = vmul.f32 %v6688_v4, %v14980_v26  ;;  %v6565_v1 = vadd.f32 %v12734_v50, %v6362_v29 }
 0x633   : > { %v7009_v8 = vadd.f32 %v7008_v12, %v7007_v48  ;;  %v7270_v49 = vpack.c.bf16 %v7006_v15, %v7006_v15  ;;  %v6992_v25 = vadd.f32 %v6991_v7, %v6990_v45  ;;  %v6627_v61 = vadd.f32 %v6563_v37, %v14970_v14 }
 0x634   : > { %v7024_v11 = vrot.slane %v7023_v32, 2  ;;  %v13051_v33 = vmul.f32 %v6690_v57, %v14981_v43  ;;  %v7014_v21 = vsel %vm2503_vm5, %v6752_v0, 0.0  ;;  %v14982_v36 = vcombine.high %v14971_v28, %v14971_v28  ;;  %v14983_v28 = vld [vmem:[#allocation179_spill] sm:$0xff]  ;;  %v14985_v43 = vld [vmem:[#allocation14_spill] sm:$0xff] }
 0x635   : > { %v7010_v13 = vrot.slane %v7009_v8, 2  ;;  %v7268_v16 = vpack.c.bf16 %v6992_v25, %v6992_v25  ;;  %v7015_v38 = vrot.slane %v7014_v21, 4  ;;  %v6629_v50 = vadd.f32 %v6565_v1, %v14970_v14 }
 0x636   : > { %v6055_v17 = vrot.slane %v14982_v36, %v14458_v31  ;;  %v7025_v9 = vadd.f32 %v7024_v11, %v7023_v32  ;;  %v7397_v15 = vunpack.c.l.b16 %v7269_v42  ;;  %v7028_v48 = vsel %vm2503_vm5, %v13051_v33, 0.0 }
 0x637   : > { %v7011_v45 = vadd.f32 %v7010_v13, %v7009_v8  ;;  %v6691_v23 = vmax.f32 %v6627_v61, 0.0  ;;  %v13061_v12 = vunpack.c.l.b16 %v7270_v49  ;;  %v7396_v34 = vunpack.c.l.b16 %v7268_v16  ;;  %v14984_v49 = vld [vmem:[#allocation91_spill] sm:$0xff] }
 0x638   : > { %v7029_v4 = vrot.slane %v7028_v48, 4  ;;  %v7016_v29 = vadd.f32 %v7015_v38, %v7014_v21  ;;  %v6693_v37 = vmax.f32 %v6629_v50, 0.0  ;;  %v6059_v32 = vcombine.high %v6055_v17, %v6055_v17  ;;  %v14987_v50 = vld [vmem:[#allocation118_spill] sm:$0xff] }
 0x639   : > { %v7012_v7 = vrot.slane %v7011_v45, 1  ;;  %v13064_v57 = vmul.f32 %v6691_v23, %v14983_v28  ;;  %v7456_v26 = vsel %vm4839_vm10, %v7396_v34, %v7455_v63  ;;  %v7026_v1 = vrot.slane %v7025_v9, 1 }
 0x63a   : > { %v7030_v42 = vadd.f32 %v7029_v4, %v7028_v48  ;;  %v7017_v8 = vrot.slane %v7016_v29, 2  ;;  %v13068_v25 = vsel %vm4841_vm11, %v7397_v15, %v7456_v26  ;;  %v6757_v61 = vmul.f32 %v6693_v37, %v14984_v49  ;;  %v14989_v48 = vld [vmem:[#allocation171_spill] sm:$0xff]  ;;  %v14991_v26 = vld [vmem:[#allocation66_spill] sm:$0xff] }
 0x63b   : > { %v7013_v11 = vadd.f32 %v7012_v7, %v7011_v45  ;;  %v7035_v13 = vsel %vm2503_vm5, %v13064_v57, 0.0  ;;  %v13074_v21 = vadd.f32 %v6753_v44, %v14985_v43  ;;  %v13077_v63 = vadd.f32 %v6751_v6, %v14987_v50  ;;  %v14992_v50 = vld [vmem:[#allocation52_spill] sm:$0xff] }
 0x63c   : > { %v7031_v36 = vrot.slane %v7030_v42, 2  ;;  %v7018_v16 = vadd.f32 %v7017_v8, %v7016_v29  ;;  %v7036_v38 = vrot.slane %v7035_v13, 4  ;;  %v13080_v23 = vadd.f32 %v6752_v0, %v14989_v48 }
 0x63d   : > { %14986 = vst [vmem:[#allocation81_spill] sm:$0xff] %v13074_v21  ;;  %14988 = vst [vmem:[#allocation18_spill] sm:$0xff] %v13077_v63  ;;  %v7049_v15 = vsel %vm2503_vm5, %v6757_v61, 0.0  ;;  %v6366_v45 = vrot.slane %v6059_v32, %v14461_v24  ;;  %v7027_v34 = vadd.f32 %v7026_v1, %v7025_v9  ;;  %v7271_v28 = vpack.c.bf16 %v7013_v11, %v7013_v11  ;;  %v13091_v32 = vld [vmem:[%s13971_s13 + $0x10] sm:$0xff]  }
 0x63e   : > { %14990 = vst [vmem:[#allocation80_spill] sm:$0xff] %v13080_v23  ;;  %v7032_v4 = vadd.f32 %v7031_v36, %v7030_v42  ;;  %v7019_v7 = vrot.slane %v7018_v16, 1  ;;  %v7050_v37 = vrot.slane %v7049_v15, 4  ;;  %v7037_v44 = vadd.f32 %v7036_v38, %v7035_v13  ;;  %v14993_v42 = vld [vmem:[#allocation151_spill] sm:$0xff]  ;;  %9322 = vmatprep.subr.bf16.mxu1 %v13091_v32  ;;  %v14996_v23 = vld [vmem:[#allocation17_spill] sm:$0xff] }
 0x63f   : > { %v6566_v49 = vadd.f32 %v14991_v26, %v6366_v45  ;;  %v6358_v29 = vrot.slane %v6055_v17, %v14461_v24  ;;  %v6105_v0 = vcombine.high %v14992_v50, %v14992_v50  ;;  %v6370_v13 = vrot.slane %v14992_v50, %v14461_v24  ;;  %v14994_v50 = vld [vmem:[#allocation149_spill] sm:$0xff] }
 0x640   : > { %v7033_v8 = vrot.slane %v7032_v4, 1  ;;  %v7020_v6 = vadd.f32 %v7019_v7, %v7018_v16  ;;  %v7051_v43 = vadd.f32 %v7050_v37, %v7049_v15  ;;  %v7038_v9 = vrot.slane %v7037_v44, 2 }
 0x641   : > { %v6630_v1 = vadd.f32 %v6566_v49, %v14970_v14  ;;  %v6564_v11 = vadd.f32 %v6358_v29, %v14993_v42  ;;  %v6378_v38 = vrot.slane %v6105_v0, %v14461_v24  ;;  %v6567_v7 = vadd.f32 %v6370_v13, %v12765_v51 }
 0x642   : > { %v7034_v17 = vadd.f32 %v7033_v8, %v7032_v4  ;;  %v7272_v36 = vpack.c.bf16 %v7020_v6, %v7020_v6  ;;  %v7052_v16 = vrot.slane %v7051_v43, 2  ;;  %v7039_v48 = vadd.f32 %v7038_v9, %v7037_v44  ;;  %v14995_v6 = vld [vmem:[#allocation49_spill] sm:$0xff]  ;;  %v14998_v9 = vld [vmem:[#allocation182_spill] sm:$0xff] }
 0x643   : > { %v6694_v15 = vmax.f32 %v6630_v1, 0.0  ;;  %v6628_v45 = vadd.f32 %v6564_v11, %v14970_v14  ;;  %v7399_v37 = vunpack.c.l.b16 %v7271_v28  ;;  %v6569_v29 = vadd.f32 %v12762_v52, %v6378_v38  ;;  %v14999_v11 = vld [vmem:[#allocation35_spill] sm:$0xff] }
 0x644   : > { %v7400_v26 = vunpack.c.l.b16 %v7272_v36  ;;  %v7053_v49 = vadd.f32 %v7052_v16, %v7051_v43  ;;  %v7040_v42 = vrot.slane %v7039_v48, 1  ;;  %v6631_v21 = vadd.f32 %v6567_v7, %v14995_v6 }
 0x645   : > { %v6758_v4 = vmul.f32 %v6694_v15, %v14994_v50  ;;  %v6692_v8 = vmax.f32 %v6628_v45, 0.0  ;;  %v7273_v0 = vpack.c.bf16 %v7027_v34, %v7027_v34  ;;  %v13106_v44 = vadd.f32 %v13051_v33, %v14996_v23  ;;  %v15001_v33 = vld [vmem:[#allocation123_spill] sm:$0xff] }
 0x646   : > { %v13109_v14 = vsel %vm4831_vm6, %v7400_v26, %v7399_v37  ;;  %v6633_v51 = vadd.f32 %v6569_v29, %v14995_v6  ;;  %v7274_v28 = vpack.c.bf16 %v7034_v17, %v7034_v17  ;;  %v7054_v43 = vrot.slane %v7053_v49, 1  ;;  %v15003_v17 = vld [vmem:[#allocation185_spill] sm:$0xff]  ;;  %v15005_v29 = vld [vmem:[#allocation178_spill] sm:$0xff] }
 0x647   : > { %14997 = vst [vmem:[#allocation21_spill] sm:$0xff] %v13106_v44  ;;  %v7056_v52 = vsel %vm2503_vm5, %v6758_v4, 0.0  ;;  %v6756_v1 = vmul.f32 %v6692_v8, %v14998_v9  ;;  %v13115_v13 = vadd.f32 %v6757_v61, %v14999_v11  ;;  %v6695_v16 = vmax.f32 %v6631_v21, 0.0  ;;  %v15007_v9 = vld [vmem:[#allocation16_spill] sm:$0xff] }
 0x648   : > { %v7057_v36 = vrot.slane %v7056_v52, 4  ;;  %v6697_v34 = vmax.f32 %v6633_v51, 0.0  ;;  %v7041_v38 = vadd.f32 %v7040_v42, %v7039_v48  ;;  %v13119_v23 = vadd.f32 %v13064_v57, %v15001_v33  ;;  %v15006_v48 = vld [vmem:[#allocation157_spill] sm:$0xff] }
 0x649   : > { %15000 = vst [vmem:[#allocation20_spill] sm:$0xff] %v13115_v13  ;;  %v7042_v15 = vsel %vm2503_vm5, %v6756_v1, 0.0  ;;  %v15004_v45 = vcombine.high %v15003_v17, %v15003_v17  ;;  %v13126_v37 = vunpack.c.l.b16 %v7273_v0  ;;  %v13129_v8 = vunpack.c.l.b16 %v7274_v28 }
 0x64a   : > { %15002 = vst [vmem:[#allocation5_spill] sm:$0xff] %v13119_v23  ;;  %v7058_v26 = vadd.f32 %v7057_v36, %v7056_v52  ;;  %v7043_v61 = vrot.slane %v7042_v15, 4  ;;  %v6761_v50 = vmul.f32 %v6697_v34, %v15005_v29  ;;  %v7055_v21 = vadd.f32 %v7054_v43, %v7053_v49 }
 0x64b   : > { %v6097_v7 = vrot.slane %v15004_v45, %v14458_v31  ;;  %v6759_v42 = vmul.f32 %v6695_v16, %v15006_v48  ;;  %v13133_v11 = vadd.f32 %v6758_v4, %v15007_v9  ;;  %v7275_v45 = vpack.c.bf16 %v7041_v38, %v7041_v38  ;;  %v15009_v48 = vld [vmem:[#allocation71_spill] sm:$0xff]  ;;  %v15010_v4 = vld [vmem:[#allocation166_spill] sm:$0xff] }
 0x64c   : > { %v7059_v51 = vrot.slane %v7058_v26, 2  ;;  %v7044_v33 = vadd.f32 %v7043_v61, %v7042_v15  ;;  %v7077_v17 = vsel %vm2503_vm5, %v6761_v50, 0.0  ;;  %v7277_v43 = vpack.c.bf16 %v7055_v21, %v7055_v21 }
 0x64d   : > { %v6107_v57 = vcombine.high %v6097_v7, %v6097_v7  ;;  %15008 = vst [vmem:[#allocation82_spill] sm:$0xff] %v13133_v11  ;;  %v7078_v0 = vrot.slane %v7077_v17, 4  ;;  %v7063_v52 = vsel %vm2503_vm5, %v6759_v42, 0.0  ;;  %v6374_v36 = vrot.slane %v6097_v7, %v14461_v24  ;;  %v15011_v11 = vld [vmem:[#allocation64_spill] sm:$0xff] }
 0x64e   : > { %v7060_v34 = vadd.f32 %v7059_v51, %v7058_v26  ;;  %v7045_v28 = vrot.slane %v7044_v33, 2  ;;  %v7064_v29 = vrot.slane %v7063_v52, 4  ;;  %v6090_v15 = vrot.slane %v15010_v4, %v14458_v31 }
 0x64f   : > { %v6382_v49 = vrot.slane %v6107_v57, %v14461_v24  ;;  %v7079_v16 = vadd.f32 %v7078_v0, %v7077_v17  ;;  %v6568_v13 = vadd.f32 %v6374_v36, %v15009_v48  ;;  %v15012_v17 = vcombine.high %v15010_v4, %v15010_v4  ;;  %v15013_v36 = vld [vmem:[#allocation70_spill] sm:$0xff] }
 0x650   : > { %v7061_v61 = vrot.slane %v7060_v34, 1  ;;  %v7046_v9 = vadd.f32 %v7045_v28, %v7044_v33  ;;  %v7065_v38 = vadd.f32 %v7064_v29, %v7063_v52  ;;  %v6106_v26 = vcombine.high %v6090_v15, %v6090_v15 }
 0x651   : > { %v6570_v23 = vadd.f32 %v15011_v11, %v6382_v49  ;;  %v7080_v44 = vrot.slane %v7079_v16, 2  ;;  %v6632_v7 = vadd.f32 %v6568_v13, %v14995_v6  ;;  %v6386_v51 = vrot.slane %v6090_v15, %v14461_v24  ;;  %v15014_v49 = vld [vmem:[#allocation120_spill] sm:$0xff] }
 0x652   : > { %v7047_v63 = vrot.slane %v7046_v9, 1  ;;  %v7066_v57 = vrot.slane %v7065_v38, 2  ;;  %v13150_v0 = vrot.slane %v15012_v17, %v14458_v31  ;;  %v6394_v11 = vrot.slane %v6106_v26, %v14461_v24 }
 0x653   : > { %v6634_v21 = vadd.f32 %v6570_v23, %v14995_v6  ;;  %v7081_v33 = vadd.f32 %v7080_v44, %v7079_v16  ;;  %v6696_v52 = vmax.f32 %v6632_v7, 0.0  ;;  %v6571_v28 = vadd.f32 %v6386_v51, %v15013_v36  ;;  %v15017_v7 = vld [vmem:[#allocation187_spill] sm:$0xff] }
 0x654   : > { %v13154_v13 = vadd.f32 %v7061_v61, %v7060_v34  ;;  %v7048_v29 = vadd.f32 %v7047_v63, %v7046_v9  ;;  %v13157_v48 = vadd.f32 %v6756_v1, %v15014_v49  ;;  %v7067_v23 = vadd.f32 %v7066_v57, %v7065_v38  ;;  %v15018_v1 = vld [vmem:[#allocation39_spill] sm:$0xff] }
 0x655   : > { %v6698_v15 = vmax.f32 %v6634_v21, 0.0  ;;  %v6760_v2 = vmul.f32 %v6696_v52, %v15015_v47  ;;  %v6573_v4 = vadd.f32 %v15016_v53, %v6394_v11  ;;  %v6635_v17 = vadd.f32 %v6571_v28, %v14995_v6  ;;  %v15020_v38 = vld [vmem:[#allocation135_spill] sm:$0xff] }
 0x656   : > { %v13162_v44 = vunpack.c.l.b16 %v7275_v45  ;;  %v7082_v16 = vrot.slane %v7081_v33, 1  ;;  %v6108_v34 = vcombine.high %v13150_v0, %v13150_v0  ;;  %v13167_v63 = vunpack.c.l.b16 %v7277_v43 }
 0x657   : > { %v6762_v26 = vmul.f32 %v6698_v15, %v15017_v7  ;;  %v13170_v61 = vadd.f32 %v6761_v50, %v15018_v1  ;;  %v7070_v9 = vsel %vm2503_vm5, %v6760_v2, 0.0  ;;  %v6637_v47 = vadd.f32 %v6573_v4, %v14995_v6  ;;  %v15022_v4 = vld [vmem:[#allocation125_spill] sm:$0xff]  ;;  %v15024_v7 = vld [vmem:[#allocation154_spill] sm:$0xff] }
 0x658   : > { %v7276_v45 = vpack.c.bf16 %v7048_v29, %v7048_v29  ;;  %v13177_v51 = vadd.f32 %v6759_v42, %v15020_v38  ;;  %v7068_v21 = vrot.slane %v7067_v23, 1  ;;  %v7071_v43 = vrot.slane %v7070_v9, 4 }
 0x659   : > { %15019 = vst [vmem:[#allocation90_spill] sm:$0xff] %v13170_v61  ;;  %v7084_v57 = vsel %vm2503_vm5, %v6762_v26, 0.0  ;;  %v6701_v11 = vmax.f32 %v6637_v47, 0.0  ;;  %v13180_v36 = vadd.f32 %v7082_v16, %v7081_v33  ;;  %v6699_v50 = vmax.f32 %v6635_v17, 0.0  ;;  %v15025_v47 = vld [vmem:[#allocation189_spill] sm:$0xff]  ;;  %v15026_v17 = vld [vmem:[#allocation195_spill] sm:$0xff] }
 0x65a   : > { %15021 = vst [vmem:[#allocation4_spill] sm:$0xff] %v13177_v51  ;;  %v7085_v52 = vrot.slane %v7084_v57, 4  ;;  %v6398_v28 = vrot.slane %v6108_v34, %v14461_v24  ;;  %v7451_v49 = vsel %vm4843_vm12, %v12983_v10, %v12880_v20  ;;  %v7072_v29 = vadd.f32 %v7071_v43, %v7070_v9 }
 0x65b   : > { %v13187_v42 = vadd.f32 %v6760_v2, %v15022_v4  ;;  %v13190_v1 = vmul.f32 %v6701_v11, %v15024_v7  ;;  %v13192_v38 = vunpack.c.l.b16 %v7276_v45  ;;  %v13195_v33 = vmul.f32 %v6699_v50, %v15025_v47 }
 0x65c   : > { %v7086_v15 = vadd.f32 %v7085_v52, %v7084_v57  ;;  %v6574_v16 = vadd.f32 %v15026_v17, %v6398_v28  ;;  %v7458_v34 = vsel %vm4843_vm12, %v13061_v12, %v13068_v25  ;;  %v7069_v20 = vadd.f32 %v7068_v21, %v7067_v23  ;;  %v15027_v57 = vld [vmem:[#allocation34_spill] sm:$0xff] }
 0x65d   : > { %15023 = vst [vmem:[#allocation121_spill] sm:$0xff] %v13187_v42  ;;  %v7073_v9 = vrot.slane %v7072_v29, 2  ;;  %v7105_v2 = vsel %vm2503_vm5, %v13190_v1, 0.0  ;;  %v13204_v52 = vadd.f32 %v6762_v26, %v15027_v57  ;;  %v7091_v43 = vsel %vm2503_vm5, %v13195_v33, 0.0  ;;  %v9469_v12 = vld [vmem:[%s13971_s13 + $0x18] sm:$0xff]  }
 0x65e   : > { %v7087_v10 = vrot.slane %v7086_v15, 2  ;;  %v7106_v45 = vrot.slane %v7105_v2, 4  ;;  %v6638_v11 = vadd.f32 %v6574_v16, %v14995_v6  ;;  %v7092_v4 = vrot.slane %v7091_v43, 4  ;;  %v15029_v21 = vld [vmem:[#allocation162_spill] sm:$0xff]  ;;  %v15030_v16 = vld [vmem:[#allocation155_spill] sm:$0xff] }
 0x65f   : > { %15028 = vst [vmem:[#allocation100_spill] sm:$0xff] %v13204_v52  ;;  %v7074_v28 = vadd.f32 %v7073_v9, %v7072_v29  ;;  %v7488_v7 = vpack.c.b16 %v7458_v34, %v7451_v49  ;;  %v6390_v26 = vrot.slane %v13150_v0, %v14461_v24  ;;  %v6154_v47 = vcombine.high %v15029_v21, %v15029_v21 }
 0x660   : > { %v7088_v50 = vadd.f32 %v7087_v10, %v7086_v15  ;;  %v7107_v25 = vadd.f32 %v7106_v45, %v7105_v2  ;;  %v6702_v23 = vmax.f32 %v6638_v11, 0.0  ;;  %v7093_v53 = vadd.f32 %v7092_v4, %v7091_v43  ;;  %v13227_v43 = vld [vmem:[%s13974_s16] sm:$0xff]  }
 0x661   : > { %v7075_v57 = vrot.slane %v7074_v28, 1  ;;  %9315 = vmatmul.mubr.msk.bf16.vlgmr.msra.gmra.mrb[84].mxu1 %vm2503_vm5, %v7488_v7  ;;  %v6402_v49 = vrot.slane %v15029_v21, %v14461_v24  ;;  %v7279_v15 = vpack.c.bf16 %v7069_v20, %v7069_v20  ;;  %v6572_v10 = vadd.f32 %v6390_v26, %v12815_v59  ;;  %15031 = vst [vmem:[#allocation137_spill] sm:$0xff] %v13227_v43 }
 0x662   : > { %v7089_v17 = vrot.slane %v7088_v50, 1  ;;  %v7108_v29 = vrot.slane %v7107_v25, 2  ;;  %v6766_v34 = vmul.f32 %v6702_v23, %v15030_v16  ;;  %9323 = vmatpush3.bf16.msra.mxu1 %v13091_v32  ;;  %v7094_v9 = vrot.slane %v7093_v53, 2 }
 0x663   : > { %v7076_v0 = vadd.f32 %v7075_v57, %v7074_v28  ;;  %v6410_v2 = vrot.slane %v6154_v47, %v14461_v24  ;;  %v6575_v45 = vadd.f32 %v6402_v49, %v12833_v62  ;;  %9324 = vmatprep.subr.bf16.mxu1 %v9469_v12  ;;  %v6636_v59 = vadd.f32 %v6572_v10, %v14995_v6  ;;  %v15032_v47 = vld [vmem:[#allocation147_spill] sm:$0xff] }
 0x664   : > { %v7090_v20 = vadd.f32 %v7089_v17, %v7088_v50  ;;  %v7109_v11 = vadd.f32 %v7108_v29, %v7107_v25  ;;  %v7112_v4 = vsel %vm2503_vm5, %v6766_v34, 0.0  ;;  %v7281_v32 = vpack.c.bf16 %v13180_v36, %v13180_v36  ;;  %v15033_v29 = vld [vmem:[#allocation193_spill] sm:$0xff] }
 0x665   : > { %v7280_v28 = vpack.c.bf16 %v7076_v0, %v7076_v0  ;;  %v7095_v7 = vadd.f32 %v7094_v9, %v7093_v53  ;;  %v7113_v23 = vrot.slane %v7112_v4, 4  ;;  %v6700_v62 = vmax.f32 %v6636_v59, 0.0  ;;  %v15034_v9 = vld [vmem:[#allocation96_spill] sm:$0xff]  ;;  %v15137_v40 = vld [vmem:[#allocation121_spill] sm:$0xff] }
 0x666   : > { %v7110_v26 = vrot.slane %v7109_v11, 1  ;;  %v6577_v21 = vadd.f32 %v12830_v41, %v6410_v2  ;;  %v6639_v57 = vadd.f32 %v15032_v47, %v6575_v45  ;;  %9325 = vmatpush3.bf16.msra.mxu1 %v9469_v12  ;;  %v7407_v49 = vunpack.c.l.b16 %v7279_v15  ;;  %v15036_v45 = vld [vmem:[#allocation38_spill] sm:$0xff] }
 0x667   : > { %v7408_v50 = vunpack.c.l.b16 %v7280_v28  ;;  %v7096_v25 = vrot.slane %v7095_v7, 1  ;;  %v7114_v17 = vadd.f32 %v7113_v23, %v7112_v4  ;;  %9334 = vmatprep.subr.bf16.mxu1 %v13227_v43  ;;  %v7282_v6 = vpack.c.bf16 %v7090_v20, %v7090_v20  ;;  %v15038_v23 = vld [vmem:[#allocation138_spill] sm:$0xff] }
 0x668   : > { %v6764_v16 = vmul.f32 %v6700_v62, %v15033_v29  ;;  %v6641_v36 = vadd.f32 %v15032_v47, %v6577_v21  ;;  %v6703_v53 = vmax.f32 %v6639_v57, 0.0  ;;  %v7111_v0 = vadd.f32 %v7110_v26, %v7109_v11  ;;  %v15040_v26 = vld [vmem:[#allocation165_spill] sm:$0xff] }
 0x669   : > { %v13239_v10 = vsel %vm4831_vm6, %v7408_v50, %v7407_v49  ;;  %v7115_v41 = vrot.slane %v7114_v17, 2  ;;  %v15035_v12 = vcombine.high %v15034_v9, %v15034_v9  ;;  %v13245_v2 = vunpack.c.l.b16 %v7281_v32  ;;  %v15041_v49 = vld [vmem:[#allocation37_spill] sm:$0xff] }
 0x66a   : > { %v13249_v20 = vadd.f32 %v13190_v1, %v15036_v45  ;;  %v7098_v4 = vsel %vm2503_vm5, %v6764_v16, 0.0  ;;  %v6705_v59 = vmax.f32 %v6641_v36, 0.0  ;;  %v7097_v28 = vadd.f32 %v7096_v25, %v7095_v7  ;;  %v15043_v50 = vld [vmem:[#allocation177_spill] sm:$0xff]  ;;  %v15044_v25 = vld [vmem:[#allocation126_spill] sm:$0xff] }
 0x66b   : > { %v6146_v15 = vrot.slane %v15035_v12, %v14458_v31  ;;  %v13254_v62 = vadd.f32 %v13195_v33, %v15038_v23  ;;  %v7099_v11 = vrot.slane %v7098_v4, 4  ;;  %v6767_v21 = vmul.f32 %v6703_v53, %v15040_v26 }
 0x66c   : > { %15037 = vst [vmem:[#allocation111_spill] sm:$0xff] %v13249_v20  ;;  %v13257_v57 = vunpack.c.l.b16 %v7282_v6  ;;  %v13260_v32 = vadd.f32 %v6766_v34, %v15041_v49  ;;  %v6769_v29 = vmul.f32 %v6705_v59, %v15043_v50  ;;  %v7285_v9 = vpack.c.bf16 %v7111_v0, %v7111_v0 }
 0x66d   : > { %15039 = vst [vmem:[#allocation87_spill] sm:$0xff] %v13254_v62  ;;  %v6156_v1 = vcombine.high %v6146_v15, %v6146_v15  ;;  %v7116_v12 = vadd.f32 %v7115_v41, %v7114_v17  ;;  %v7100_v45 = vadd.f32 %v7099_v11, %v7098_v4  ;;  %v7119_v7 = vsel %vm2503_vm5, %v6767_v21, 0.0  ;;  %v15046_v17 = vld [vmem:[#allocation48_spill] sm:$0xff] }
 0x66e   : > { %15042 = vst [vmem:[#allocation83_spill] sm:$0xff] %v13260_v32  ;;  %v13265_v36 = vadd.f32 %v6764_v16, %v15044_v25  ;;  %v7133_v33 = vsel %vm2503_vm5, %v6769_v29, 0.0  ;;  %v7120_v23 = vrot.slane %v7119_v7, 4  ;;  %v6406_v6 = vrot.slane %v6146_v15, %v14461_v24 }
 0x66f   : > { %v7283_v53 = vpack.c.bf16 %v7097_v28, %v7097_v28  ;;  %v7101_v26 = vrot.slane %v7100_v45, 2  ;;  %v7134_v34 = vrot.slane %v7133_v33, 4  ;;  %v6414_v49 = vrot.slane %v6156_v1, %v14461_v24 }
 0x670   : > { %15045 = vst [vmem:[#allocation93_spill] sm:$0xff] %v13265_v36  ;;  %v7121_v59 = vadd.f32 %v7120_v23, %v7119_v7  ;;  %v6576_v0 = vadd.f32 %v6406_v6, %v12844_v39  ;;  %v6139_v41 = vrot.slane %v15046_v17, %v14458_v31  ;;  %v15047_v16 = vcombine.high %v15046_v17, %v15046_v17 }
 0x671   : > { %v7117_v11 = vrot.slane %v7116_v12, 1  ;;  %v7102_v50 = vadd.f32 %v7101_v26, %v7100_v45  ;;  %v7135_v25 = vadd.f32 %v7134_v34, %v7133_v33  ;;  %v6578_v15 = vadd.f32 %v12841_v55, %v6414_v49 }
 0x672   : > { %v6153_v4 = vrot.slane %v15047_v16, %v14458_v31  ;;  %v7122_v28 = vrot.slane %v7121_v59, 2  ;;  %v6640_v43 = vadd.f32 %v15032_v47, %v6576_v0  ;;  %v6155_v1 = vcombine.high %v6139_v41, %v6139_v41  ;;  %v15048_v0 = vld [vmem:[#allocation112_spill] sm:$0xff] }
 0x673   : > { %v6418_v7 = vrot.slane %v6139_v41, %v14461_v24  ;;  %v7103_v39 = vrot.slane %v7102_v50, 1  ;;  %v7136_v23 = vrot.slane %v7135_v25, 2  ;;  %v6642_v6 = vadd.f32 %v15032_v47, %v6578_v15 }
 0x674   : > { %v6157_v32 = vcombine.high %v6153_v4, %v6153_v4  ;;  %v7123_v20 = vadd.f32 %v7122_v28, %v7121_v59  ;;  %v6704_v36 = vmax.f32 %v6640_v43, 0.0  ;;  %v6426_v17 = vrot.slane %v6155_v1, %v14461_v24  ;;  %v15049_v59 = vld [vmem:[#allocation103_spill] sm:$0xff]  ;;  %v15050_v1 = vld [vmem:[#allocation74_spill] sm:$0xff] }
 0x675   : > { %v6579_v45 = vadd.f32 %v6418_v7, %v12877_v22  ;;  %v13283_v33 = vadd.f32 %v7117_v11, %v7116_v12  ;;  %v7137_v55 = vadd.f32 %v7136_v23, %v7135_v25  ;;  %v6706_v26 = vmax.f32 %v6642_v6, 0.0  ;;  %v15051_v11 = vld [vmem:[#allocation43_spill] sm:$0xff] }
 0x676   : > { %v6430_v34 = vrot.slane %v6157_v32, %v14461_v24  ;;  %v7104_v49 = vadd.f32 %v7103_v39, %v7102_v50  ;;  %v6768_v41 = vmul.f32 %v6704_v36, %v15048_v0  ;;  %v6581_v16 = vadd.f32 %v12872_v3, %v6426_v17  ;;  %v15058_v3 = vld [vmem:[#allocation188_spill] sm:$0xff] }
 0x677   : > { %v6643_v15 = vadd.f32 %v15032_v47, %v6579_v45  ;;  %v13289_v62 = vunpack.c.l.b16 %v7285_v9  ;;  %v7124_v43 = vrot.slane %v7123_v20, 1  ;;  %v6770_v28 = vmul.f32 %v6706_v26, %v15049_v59  ;;  %v15053_v9 = vld [vmem:[#allocation129_spill] sm:$0xff] }
 0x678   : > { %v6582_v22 = vadd.f32 %v15050_v1, %v6430_v34  ;;  %v13293_v12 = vunpack.c.l.b16 %v7283_v53  ;;  %v13296_v25 = vadd.f32 %v6769_v29, %v15051_v11  ;;  %v7126_v32 = vsel %vm2503_vm5, %v6768_v41, 0.0  ;;  %v15055_v59 = vld [vmem:[#allocation133_spill] sm:$0xff]  ;;  %v15057_v11 = vld [vmem:[#allocation168_spill] sm:$0xff] }
 0x679   : > { %v6645_v36 = vadd.f32 %v15032_v47, %v6581_v16  ;;  %v7138_v50 = vrot.slane %v7137_v55, 1  ;;  %v13303_v7 = vadd.f32 %v6767_v21, %v15053_v9  ;;  %v7140_v39 = vsel %vm2503_vm5, %v6770_v28, 0.0 }
 0x67a   : > { %15052 = vst [vmem:[#allocation85_spill] sm:$0xff] %v13296_v25  ;;  %v7284_v23 = vpack.c.bf16 %v7104_v49, %v7104_v49  ;;  %v7141_v6 = vrot.slane %v7140_v39, 4  ;;  %v7127_v53 = vrot.slane %v7126_v32, 4  ;;  %v7125_v45 = vadd.f32 %v7124_v43, %v7123_v20 }
 0x67b   : > { %15054 = vst [vmem:[#allocation127_spill] sm:$0xff] %v13303_v7  ;;  %v6709_v17 = vmax.f32 %v6645_v36, 0.0  ;;  %v6707_v29 = vmax.f32 %v6643_v15, 0.0  ;;  %v6646_v26 = vadd.f32 %v15032_v47, %v6582_v22  ;;  %v6422_v34 = vrot.slane %v6153_v4, %v14461_v24  ;;  %v15059_v7 = vld [vmem:[#allocation72_spill] sm:$0xff] }
 0x67c   : > { %v7142_v0 = vadd.f32 %v7141_v6, %v7140_v39  ;;  %v7128_v16 = vadd.f32 %v7127_v53, %v7126_v32  ;;  %v13309_v1 = vadd.f32 %v6768_v41, %v15055_v59  ;;  %v7139_v9 = vadd.f32 %v7138_v50, %v7137_v55  ;;  %v15060_v41 = vld [vmem:[#allocation169_spill] sm:$0xff] }
 0x67d   : > { %v6773_v21 = vmul.f32 %v6709_v17, %v15057_v11  ;;  %v6771_v25 = vmul.f32 %v6707_v29, %v15058_v3  ;;  %v6710_v49 = vmax.f32 %v6646_v26, 0.0  ;;  %v6580_v52 = vadd.f32 %v6422_v34, %v15059_v7 }
 0x67e   : > { %15056 = vst [vmem:[#allocation101_spill] sm:$0xff] %v13309_v1  ;;  %v13314_v36 = vunpack.c.l.b16 %v7284_v23  ;;  %v7143_v20 = vrot.slane %v7142_v0, 2  ;;  %v7129_v15 = vrot.slane %v7128_v16, 2  ;;  %v7287_v4 = vpack.c.bf16 %v7125_v45, %v7125_v45  ;;  %v15061_v23 = vld [vmem:[#allocation54_spill] sm:$0xff] }
 0x67f   : > { %v7161_v43 = vsel %vm2503_vm5, %v6773_v21, 0.0  ;;  %v7147_v32 = vsel %vm2503_vm5, %v6771_v25, 0.0  ;;  %v6774_v39 = vmul.f32 %v6710_v49, %v15060_v41  ;;  %v6644_v3 = vadd.f32 %v15032_v47, %v6580_v52 }
 0x680   : > { %v7162_v22 = vrot.slane %v7161_v43, 4  ;;  %v7144_v6 = vadd.f32 %v7143_v20, %v7142_v0  ;;  %v7130_v53 = vadd.f32 %v7129_v15, %v7128_v16  ;;  %v7148_v55 = vrot.slane %v7147_v32, 4  ;;  %v15062_v15 = vld [vmem:[#allocation190_spill] sm:$0xff] }
 0x681   : > { %v7289_v50 = vpack.c.bf16 %v7139_v9, %v7139_v9  ;;  %v7168_v7 = vsel %vm2503_vm5, %v6774_v39, 0.0  ;;  %v6203_v29 = vcombine.high %v15061_v23, %v15061_v23  ;;  %v6708_v1 = vmax.f32 %v6644_v3, 0.0 }
 0x682   : > { %v7163_v17 = vadd.f32 %v7162_v22, %v7161_v43  ;;  %v7145_v26 = vrot.slane %v7144_v6, 1  ;;  %v7131_v34 = vrot.slane %v7130_v53, 1  ;;  %v7149_v45 = vadd.f32 %v7148_v55, %v7147_v32  ;;  %v15063_v32 = vld [vmem:[#allocation36_spill] sm:$0xff] }
 0x683   : > { %v7169_v59 = vrot.slane %v7168_v7, 4  ;;  %v6442_v49 = vrot.slane %v6203_v29, %v14461_v24  ;;  %v6434_v0 = vrot.slane %v15061_v23, %v14461_v24  ;;  %v6772_v43 = vmul.f32 %v6708_v1, %v15062_v15  ;;  %v15065_v1 = vld [vmem:[#allocation42_spill] sm:$0xff]  ;;  %v15071_v15 = vld [vmem:[#allocation108_spill] sm:$0xff] }
 0x684   : > { %v7164_v11 = vrot.slane %v7163_v17, 2  ;;  %v7146_v16 = vadd.f32 %v7145_v26, %v7144_v6  ;;  %v7132_v52 = vadd.f32 %v7131_v34, %v7130_v53  ;;  %v7150_v47 = vrot.slane %v7149_v45, 2  ;;  %v15064_v53 = vld [vmem:[#allocation158_spill] sm:$0xff] }
 0x685   : > { %v7170_v9 = vadd.f32 %v7169_v59, %v7168_v7  ;;  %v6585_v22 = vadd.f32 %v12924_v27, %v6442_v49  ;;  %v6583_v41 = vadd.f32 %v6434_v0, %v12949_v5  ;;  %v13330_v55 = vadd.f32 %v6770_v28, %v15063_v32  ;;  %v15067_v49 = vld [vmem:[#allocation146_spill] sm:$0xff] }
 0x686   : > { %v7165_v20 = vadd.f32 %v7164_v11, %v7163_v17  ;;  %v7288_v3 = vpack.c.bf16 %v7132_v52, %v7132_v52  ;;  %v7151_v61 = vadd.f32 %v7150_v47, %v7149_v45  ;;  %v7415_v42 = vunpack.c.l.b16 %v7287_v4  ;;  %v15069_v52 = vld [vmem:[#allocation134_spill] sm:$0xff] }
 0x687   : > { %v7171_v29 = vrot.slane %v7170_v9, 2  ;;  %v7154_v6 = vsel %vm2503_vm5, %v6772_v43, 0.0  ;;  %v6649_v23 = vadd.f32 %v15064_v53, %v6585_v22  ;;  %v13334_v7 = vunpack.c.l.b16 %v7289_v50 }
 0x688   : > { %v7166_v51 = vrot.slane %v7165_v20, 1  ;;  %v7416_v17 = vunpack.c.l.b16 %v7288_v3  ;;  %v13337_v26 = vadd.f32 %v6773_v21, %v15065_v1  ;;  %v7152_v27 = vrot.slane %v7151_v61, 1  ;;  %v15072_v3 = vld [vmem:[#allocation41_spill] sm:$0xff] }
 0x689   : > { %v7290_v5 = vpack.c.bf16 %v7146_v16, %v7146_v16  ;;  %v7155_v34 = vrot.slane %v7154_v6, 4  ;;  %v6713_v28 = vmax.f32 %v6649_v23, 0.0  ;;  %v6647_v59 = vadd.f32 %v15064_v53, %v6583_v41 }
 0x68a   : > { %15066 = vst [vmem:[#allocation114_spill] sm:$0xff] %v13337_v26  ;;  %v13341_v45 = vsel %vm4831_vm6, %v7416_v17, %v7415_v42  ;;  %v7167_v4 = vadd.f32 %v7166_v51, %v7165_v20  ;;  %v7172_v11 = vadd.f32 %v7171_v29, %v7170_v9  ;;  %v15068_v50 = vcombine.high %v15067_v49, %v15067_v49  ;;  %v15074_v42 = vld [vmem:[#allocation130_spill] sm:$0xff] }
 0x68b   : > { %v13348_v47 = vadd.f32 %v6771_v25, %v15069_v52  ;;  %v7156_v21 = vadd.f32 %v7155_v34, %v7154_v6  ;;  %v6777_v16 = vmul.f32 %v6713_v28, %v15071_v15  ;;  %v6711_v22 = vmax.f32 %v6647_v59, 0.0  ;;  %v15076_v34 = vld [vmem:[#allocation172_spill] sm:$0xff] }
 0x68c   : > { %v6195_v0 = vrot.slane %v15068_v50, %v14458_v31  ;;  %v7153_v32 = vadd.f32 %v7152_v27, %v7151_v61  ;;  %v13352_v41 = vadd.f32 %v6774_v39, %v15072_v3  ;;  %v13355_v23 = vadd.f32 %v6772_v43, %v15074_v42  ;;  %v15077_v43 = vld [vmem:[#allocation53_spill] sm:$0xff] }
 0x68d   : > { %15070 = vst [vmem:[#allocation136_spill] sm:$0xff] %v13348_v47  ;;  %v13357_v9 = vunpack.c.l.b16 %v7290_v5  ;;  %v7157_v20 = vrot.slane %v7156_v21, 2  ;;  %v7189_v29 = vsel %vm2503_vm5, %v6777_v16, 0.0  ;;  %v7293_v17 = vpack.c.bf16 %v7167_v4, %v7167_v4 }
 0x68e   : > { %15073 = vst [vmem:[#allocation84_spill] sm:$0xff] %v13352_v41  ;;  %15075 = vst [vmem:[#allocation94_spill] sm:$0xff] %v13355_v23  ;;  %v6205_v51 = vcombine.high %v6195_v0, %v6195_v0  ;;  %v6438_v25 = vrot.slane %v6195_v0, %v14461_v24  ;;  %v7173_v6 = vrot.slane %v7172_v11, 1  ;;  %v7190_v1 = vrot.slane %v7189_v29, 4 }
 0x68f   : > { %v6775_v28 = vmul.f32 %v6711_v22, %v15076_v34  ;;  %v7158_v61 = vadd.f32 %v7157_v20, %v7156_v21  ;;  %v6188_v59 = vrot.slane %v15077_v43, %v14458_v31  ;;  %v7291_v5 = vpack.c.bf16 %v7153_v32, %v7153_v32 }
 0x690   : > { %v6446_v39 = vrot.slane %v6205_v51, %v14461_v24  ;;  %v6584_v27 = vadd.f32 %v6438_v25, %v13007_v19  ;;  %v7191_v49 = vadd.f32 %v7190_v1, %v7189_v29  ;;  %v15078_v4 = vcombine.high %v15077_v43, %v15077_v43 }
 0x691   : > { %v7175_v50 = vsel %vm2503_vm5, %v6775_v28, 0.0  ;;  %v7159_v52 = vrot.slane %v7158_v61, 1  ;;  %v6204_v3 = vcombine.high %v6188_v59, %v6188_v59  ;;  %v6450_v42 = vrot.slane %v6188_v59, %v14461_v24  ;;  %v15079_v59 = vld [vmem:[#allocation104_spill] sm:$0xff] }
 0x692   : > { %v13371_v0 = vrot.slane %v15078_v4, %v14458_v31  ;;  %v7176_v15 = vrot.slane %v7175_v50, 4  ;;  %v6586_v21 = vadd.f32 %v12961_v58, %v6446_v39  ;;  %v6648_v22 = vadd.f32 %v15064_v53, %v6584_v27 }
 0x693   : > { %v7192_v19 = vrot.slane %v7191_v49, 2  ;;  %v7160_v51 = vadd.f32 %v7159_v52, %v7158_v61  ;;  %v6458_v1 = vrot.slane %v6204_v3, %v14461_v24  ;;  %v6587_v34 = vadd.f32 %v6450_v42, %v13029_v54 }
 0x694   : > { %v6206_v32 = vcombine.high %v13371_v0, %v13371_v0  ;;  %v7177_v20 = vadd.f32 %v7176_v15, %v7175_v50  ;;  %v6650_v29 = vadd.f32 %v15064_v53, %v6586_v21  ;;  %v6712_v25 = vmax.f32 %v6648_v22, 0.0  ;;  %v15080_v21 = vld [vmem:[#allocation144_spill] sm:$0xff] }
 0x695   : > { %v7193_v31 = vadd.f32 %v7192_v19, %v7191_v49  ;;  %v13382_v39 = vadd.f32 %v7173_v6, %v7172_v11  ;;  %v13385_v41 = vunpack.c.l.b16 %v7293_v17  ;;  %v6589_v61 = vadd.f32 %v13011_v46, %v6458_v1  ;;  %v15081_v6 = vld [vmem:[#allocation47_spill] sm:$0xff] }
 0x696   : > { %v6462_v58 = vrot.slane %v6206_v32, %v14461_v24  ;;  %v7178_v27 = vrot.slane %v7177_v20, 2  ;;  %v6714_v43 = vmax.f32 %v6650_v29, 0.0  ;;  %v6776_v4 = vmul.f32 %v6712_v25, %v15079_v59 }
 0x697   : > { %v6651_v50 = vadd.f32 %v15064_v53, %v6587_v34  ;;  %v7194_v52 = vrot.slane %v7193_v31, 1  ;;  %v7292_v11 = vpack.c.bf16 %v7160_v51, %v7160_v51  ;;  %v13393_v19 = vadd.f32 %v6777_v16, %v15081_v6  ;;  %v15083_v51 = vld [vmem:[#allocation124_spill] sm:$0xff] }
 0x698   : > { %v6590_v49 = vadd.f32 %v13032_v18, %v6462_v58  ;;  %v7179_v15 = vadd.f32 %v7178_v27, %v7177_v20  ;;  %v6778_v54 = vmul.f32 %v6714_v43, %v15080_v21  ;;  %v7182_v22 = vsel %vm2503_vm5, %v6776_v4, 0.0  ;;  %v15085_v16 = vld [vmem:[#allocation152_spill] sm:$0xff] }
 0x699   : > { %15082 = vst [vmem:[#allocation102_spill] sm:$0xff] %v13393_v19  ;;  %v7183_v3 = vrot.slane %v7182_v22, 4  ;;  %v6653_v17 = vadd.f32 %v15064_v53, %v6589_v61  ;;  %v13396_v42 = vunpack.c.l.b16 %v7291_v5  ;;  %v6715_v29 = vmax.f32 %v6651_v50, 0.0  ;;  %v15086_v21 = vld [vmem:[#allocation128_spill] sm:$0xff]  ;;  %v15087_v19 = vld [vmem:[#allocation145_spill] sm:$0xff] }
 0x69a   : > { %v7180_v46 = vrot.slane %v7179_v15, 1  ;;  %v7196_v32 = vsel %vm2503_vm5, %v6778_v54, 0.0  ;;  %v7195_v34 = vadd.f32 %v7194_v52, %v7193_v31  ;;  %v13402_v58 = vadd.f32 %v6775_v28, %v15083_v51  ;;  %v15088_v28 = vld [vmem:[#allocation40_spill] sm:$0xff] }
 0x69b   : > { %v7197_v20 = vrot.slane %v7196_v32, 4  ;;  %v7184_v25 = vadd.f32 %v7183_v3, %v7182_v22  ;;  %v6717_v1 = vmax.f32 %v6653_v17, 0.0  ;;  %v6779_v27 = vmul.f32 %v6715_v29, %v15085_v16 }
 0x69c   : > { %15084 = vst [vmem:[#allocation88_spill] sm:$0xff] %v13402_v58  ;;  %v6654_v43 = vadd.f32 %v15064_v53, %v6590_v49  ;;  %v13406_v5 = vunpack.c.l.b16 %v7292_v11  ;;  %v7181_v6 = vadd.f32 %v7180_v46, %v7179_v15  ;;  %v13410_v18 = vadd.f32 %v6776_v4, %v15087_v19 }
 0x69d   : > { %v7198_v59 = vadd.f32 %v7197_v20, %v7196_v32  ;;  %v7185_v61 = vrot.slane %v7184_v25, 2  ;;  %v6781_v50 = vmul.f32 %v6717_v1, %v15086_v21  ;;  %v7203_v22 = vsel %vm2503_vm5, %v6779_v27, 0.0  ;;  %v15090_v20 = vld [vmem:[#allocation175_spill] sm:$0xff] }
 0x69e   : > { %v6718_v31 = vmax.f32 %v6654_v43, 0.0  ;;  %v13414_v3 = vadd.f32 %v6778_v54, %v15088_v28  ;;  %v7297_v11 = vpack.c.bf16 %v7195_v34, %v7195_v34  ;;  %v7204_v32 = vrot.slane %v7203_v22, 4 }
 0x69f   : > { %v7199_v52 = vrot.slane %v7198_v59, 2  ;;  %v7186_v17 = vadd.f32 %v7185_v61, %v7184_v25  ;;  %v7217_v49 = vsel %vm2503_vm5, %v6781_v50, 0.0  ;;  %v15091_v4 = vpack.c.bf16 %v13154_v13, %v13154_v13 }
 0x6a0   : > { %15089 = vst [vmem:[#allocation117_spill] sm:$0xff] %v13414_v3  ;;  %v7218_v29 = vrot.slane %v7217_v49, 4  ;;  %v6782_v51 = vmul.f32 %v6718_v31, %v15090_v20  ;;  %v7460_v46 = vsel %vm4833_vm7, %v13126_v37, %v13109_v14  ;;  %v7295_v54 = vpack.c.bf16 %v7181_v6, %v7181_v6 }
 0x6a1   : > { %v7200_v1 = vadd.f32 %v7199_v52, %v7198_v59  ;;  %v7187_v15 = vrot.slane %v7186_v17, 1  ;;  %v7406_v19 = vunpack.c.l.b16 %v15091_v4  ;;  %v7205_v25 = vadd.f32 %v7204_v32, %v7203_v22  ;;  %v15092_v32 = vld [vmem:[#allocation167_spill] sm:$0xff] }
 0x6a2   : > { %v7219_v16 = vadd.f32 %v7218_v29, %v7217_v49  ;;  %v7224_v43 = vsel %vm2503_vm5, %v6782_v51, 0.0  ;;  %v7461_v59 = vsel %vm4835_vm8, %v13129_v8, %v7460_v46  ;;  %v7425_v31 = vunpack.c.l.b16 %v7297_v11 }
 0x6a3   : > { %v7201_v34 = vrot.slane %v7200_v1, 1  ;;  %v7188_v61 = vadd.f32 %v7187_v15, %v7186_v17  ;;  %v7225_v21 = vrot.slane %v7224_v43, 4  ;;  %v7206_v52 = vrot.slane %v7205_v25, 2 }
 0x6a4   : > { %v7462_v13 = vsel %vm4837_vm9, %v13162_v44, %v7461_v59  ;;  %v7467_v14 = vsel %vm4833_vm7, %v13245_v2, %v13239_v10  ;;  %v7220_v17 = vrot.slane %v7219_v16, 2  ;;  %v7423_v29 = vunpack.c.l.b16 %v7295_v54 }
 0x6a5   : > { %v7202_v37 = vadd.f32 %v7201_v34, %v7200_v1  ;;  %v7296_v6 = vpack.c.bf16 %v7188_v61, %v7188_v61  ;;  %v7226_v22 = vadd.f32 %v7225_v21, %v7224_v43  ;;  %v7463_v28 = vsel %vm4839_vm10, %v13192_v38, %v7462_v13  ;;  %v15095_v43 = vld [vmem:[#allocation156_spill] sm:$0xff]  ;;  %v15135_v13 = vld [vmem:[#allocation82_spill] sm:$0xff] }
 0x6a6   : > { %v7207_v49 = vadd.f32 %v7206_v52, %v7205_v25  ;;  %v7464_v8 = vsel %vm4841_vm11, %v13167_v63, %v7463_v28  ;;  %v7468_v11 = vsel %vm4835_vm8, %v13257_v57, %v7467_v14  ;;  %v13439_v20 = vadd.f32 %v6779_v27, %v15092_v32  ;;  %v15099_v52 = vld [vmem:[#allocation107_spill] sm:$0xff] }
 0x6a7   : > { %v7424_v44 = vunpack.c.l.b16 %v7296_v6  ;;  %v7465_v10 = vsel %vm4843_vm12, %v7406_v19, %v7464_v8  ;;  %v7298_v2 = vpack.c.bf16 %v7202_v37, %v7202_v37  ;;  %v7469_v38 = vsel %vm4837_vm9, %v13293_v12, %v7468_v11  ;;  %v15103_v28 = vld [vmem:[#allocation191_spill] sm:$0xff] }
 0x6a8   : > { %15093 = vst [vmem:[#allocation141_spill] sm:$0xff] %v13439_v20  ;;  %v7208_v1 = vrot.slane %v7207_v49, 1  ;;  %v6454_v15 = vrot.slane %v13371_v0, %v14461_v24  ;;  %v7227_v4 = vrot.slane %v7226_v22, 2  ;;  %v15094_v57 = vpack.c.bf16 %v13283_v33, %v13283_v33  ;;  %v15097_v0 = vld [vmem:[#allocation45_spill] sm:$0xff]  ;;  %v15144_v32 = vld [vmem:[#allocation127_spill] sm:$0xff] }
 0x6a9   : > { %v7480_v63 = vsel %vm4831_vm6, %v7424_v44, %v7423_v29  ;;  %v7470_v27 = vsel %vm4839_vm10, %v13314_v36, %v7469_v38  ;;  %v13452_v54 = vadd.f32 %v7220_v17, %v7219_v16  ;;  %v13458_v24 = vadd.f32 %v6781_v50, %v15095_v43  ;;  %v15106_v44 = vld [vmem:[#allocation56_spill] sm:$0xff]  ;;  %v15109_v38 = vld [vmem:[#allocation63_spill] sm:$0xff] }
 0x6aa   : > { %v7414_v46 = vunpack.c.l.b16 %v15094_v57  ;;  %v7209_v19 = vadd.f32 %v7208_v1, %v7207_v49  ;;  %v7471_v25 = vsel %vm4841_vm11, %v13289_v62, %v7470_v27  ;;  %v6588_v12 = vadd.f32 %v6454_v15, %v13040_v35  ;;  %v15104_v49 = vld [vmem:[#allocation196_spill] sm:$0xff]  ;;  %v15110_v15 = vld [vmem:[#allocation61_spill] sm:$0xff]  ;;  %v15111_v57 = vld [vmem:[#allocation143_spill] sm:$0xff] }
 0x6ab   : > { %15096 = vst [vmem:[#allocation132_spill] sm:$0xff] %v13458_v24  ;;  %v13461_v34 = vadd.f32 %v6782_v51, %v15097_v0  ;;  %v7474_v36 = vsel %vm4833_vm7, %v13334_v7, %v13341_v45  ;;  %v7426_v16 = vunpack.c.l.b16 %v7298_v2  ;;  %v7228_v62 = vadd.f32 %v7227_v4, %v7226_v22  ;;  %v15100_v51 = vld [vmem:[#allocation57_spill] sm:$0xff]  ;;  %v15102_v22 = vld [vmem:[#allocation184_spill] sm:$0xff]  ;;  %v15114_v27 = vld [vmem:[#allocation99_spill] sm:$0xff] }
 0x6ac   : > { %v7472_v33 = vsel %vm4843_vm12, %v7414_v46, %v7471_v25  ;;  %v7299_v61 = vpack.c.bf16 %v7209_v19, %v7209_v19  ;;  %v6652_v59 = vadd.f32 %v15064_v53, %v6588_v12  ;;  %v7475_v35 = vsel %vm4835_vm8, %v13357_v9, %v7474_v36  ;;  %v15107_v2 = vld [vmem:[#allocation148_spill] sm:$0xff]  ;;  %v15116_v12 = vld [vmem:[#allocation67_spill] sm:$0xff]  ;;  %v15149_v1 = vld [vmem:[#allocation22_spill] sm:$0xff] }
 0x6ad   : > { %15098 = vst [vmem:[#allocation150_spill] sm:$0xff] %v13461_v34  ;;  %v7489_v21 = vpack.c.b16 %v7472_v33, %v7465_v10  ;;  %v7481_v50 = vsel %vm4833_vm7, %v7425_v31, %v7480_v63  ;;  %v7222_v14 = vrot.slane %v13452_v54, 1  ;;  %v7476_v45 = vsel %vm4837_vm9, %v13396_v42, %v7475_v35  ;;  %v15105_v42 = vld [vmem:[#allocation58_spill] sm:$0xff]  ;;  %v15115_v25 = vld [vmem:[#allocation92_spill] sm:$0xff]  ;;  %v15117_v33 = vld [vmem:[#allocation65_spill] sm:$0xff] }
 0x6ae   : > { %v7427_v37 = vunpack.c.l.b16 %v7299_v61  ;;  %v6716_v7 = vmax.f32 %v6652_v59, 0.0  ;;  %v15101_v53 = vpack.c.bf16 %v13382_v39, %v13382_v39  ;;  %v7477_v9 = vsel %vm4839_vm10, %v13406_v5, %v7476_v45  ;;  %v15108_v5 = vld [vmem:[#allocation194_spill] sm:$0xff]  ;;  %v15118_v36 = vld [vmem:[#allocation95_spill] sm:$0xff]  ;;  %v15119_v61 = vld [vmem:[#allocation69_spill] sm:$0xff] }
 0x6af   : > { %9318 = vmatprep.mubr.msk.bf16.mxu1 %vm2503_vm5, %v7489_v21  ;;  %v7482_v31 = vsel %vm4835_vm8, %v7426_v16, %v7481_v50  ;;  %v7478_v11 = vsel %vm4841_vm11, %v13385_v41, %v7477_v9  ;;  %v7229_v39 = vrot.slane %v7228_v62, 1  ;;  %v15113_v41 = vld [vmem:[#allocation60_spill] sm:$0xff]  ;;  %v15121_v35 = vld [vmem:[#allocation159_spill] sm:$0xff]  ;;  %v15122_v50 = vld [vmem:[#allocation73_spill] sm:$0xff] }
 0x6b0   : > { %v7422_v6 = vunpack.c.l.b16 %v15101_v53  ;;  %v6780_v8 = vmul.f32 %v6716_v7, %v15104_v49  ;;  %v7483_v29 = vsel %vm4837_vm9, %v7427_v37, %v7482_v31  ;;  %v15120_v21 = vld [vmem:[#allocation68_spill] sm:$0xff]  ;;  %v15123_v7 = vld [vmem:[#allocation75_spill] sm:$0xff]  ;;  %v15124_v45 = vld [vmem:[#allocation197_spill] sm:$0xff]  ;;  %v7223_v53 = vadd.f32 %v7222_v14, %v13452_v54 }
 0x6b1   : > { %v15126_v49 = vld [vmem:[#allocation19_spill] sm:$0xff]  ;;  %v15134_v9 = vld [vmem:[#allocation20_spill] sm:$0xff]  ;;  %v15145_v37 = vld [vmem:[#allocation101_spill] sm:$0xff]  ;;  %v7230_v17 = vadd.f32 %v7229_v39, %v7228_v62 }
 0x6b2   : > { %v7479_v10 = vsel %vm4843_vm12, %v7422_v6, %v7478_v11  ;;  %v7210_v4 = vsel %vm2503_vm5, %v6780_v8, 0.0  ;;  %v13498_v46 = vadd.f32 %v6780_v8, %v15111_v57  ;;  %v15141_v57 = vld [vmem:[#allocation93_spill] sm:$0xff]  ;;  %v15142_v63 = vld [vmem:[#allocation111_spill] sm:$0xff]  ;;  %v7301_v23 = vpack.c.bf16 %v7223_v53, %v7223_v53 }
 0x6b3   : > { %v7211_v0 = vrot.slane %v7210_v4, 4  ;;  %v15143_v59 = vld [vmem:[#allocation83_spill] sm:$0xff]  ;;  %v7302_v31 = vpack.c.bf16 %v7230_v17, %v7230_v17  ;;  %v15151_v62 = vld [vmem:[#allocation105_spill] sm:$0xff] }
 0x6b4   : > { %15112 = vst [vmem:[#allocation142_spill] sm:$0xff] %v13498_v46  ;;  %v15150_v54 = vld [vmem:[#allocation23_spill] sm:$0xff] }
 0x6b5   : > { %v7212_v11 = vadd.f32 %v7211_v0, %v7210_v4  ;;  %v15139_v4 = vld [vmem:[#allocation100_spill] sm:$0xff]  ;;  %v7429_v0 = vunpack.c.l.b16 %v7301_v23  ;;  %v9472_v23 = vld [vmem:[%s13978_s20] sm:$0xff]  }
 0x6b6   : > { %v15160_v16 = vld [vmem:[#allocation27_spill] sm:$0xff] }
 0x6b7   : > { %v7213_v30 = vrot.slane %v7212_v11, 2 }
 0x6b9   : > { %v7214_v8 = vadd.f32 %v7213_v30, %v7212_v11  ;;  %v7430_v30 = vunpack.c.l.b16 %v7302_v31  ;;  %v15154_v31 = vld [vmem:[#allocation183_spill] sm:$0xff] }
 0x6bb   : > { %v7215_v6 = vrot.slane %v7214_v8, 1 }
 0x6bd   : > { %v7216_v47 = vadd.f32 %v7215_v6, %v7214_v8 }
 0x6bf   : > { %v7300_v26 = vpack.c.bf16 %v7216_v47, %v7216_v47  ;;  %v15153_v47 = vld [vmem:[#allocation9_spill] sm:$0xff] }
 0x6c1   : > { %v7428_v60 = vunpack.c.l.b16 %v7300_v26  ;;  %v15152_v26 = vld [vmem:[#allocation137_spill] sm:$0xff] }
 0x6c3   : > { %v7484_v11 = vsel %vm4839_vm10, %v7428_v60, %v7483_v29  ;;  %v9471_v60 = vld [vmem:[%s13974_s16 + $0x8] sm:$0xff]  }
 0x6c4   : > { %v7485_v43 = vsel %vm4841_vm11, %v7429_v0, %v7484_v11 }
 0x6c5   : > { %v7486_v19 = vsel %vm4843_vm12, %v7430_v30, %v7485_v43  ;;  %v15155_v30 = vld [vmem:[#allocation181_spill] sm:$0xff] }
 0x6c6   : > { %v7490_v20 = vpack.c.b16 %v7486_v19, %v7479_v10 }
 0x6c8   : > { %9319 = vmatmul.mubr.msk.bf16.gmra.mrb[88].mxu1 %vm2503_vm5, %v7490_v20  ;;  %v8779_v20 = vld [vmem:[%s13973_s15 + $0x1] ss:$0 sm:$0xff] }
 0x6c9   : > { %9326 = vmatprep.mubr.msk.bf16.mxu1 %vm1706_vm4, %v15149_v1 }
 0x6d0   : > { %9327 = vmatmul.mubr.msk.bf16.vlgmr.msra.gmra.mrb[84].mxu1 %vm1706_vm4, %v15150_v54 }
 0x6d1   : > { %9330 = vmatprep.mubr.msk.bf16.mxu1 %vm1706_vm4, %v15151_v62  ;;  %9335 = vmatpush3.bf16.msra.mxu1 %v15152_v26  ;;  %v15156_v62 = vld [vmem:[#allocation139_spill] sm:$0xff] }
 0x6d2   : > { %9336 = vmatprep.subr.bf16.mxu1 %v9471_v60 }
 0x6d5   : > { %9337 = vmatpush3.bf16.msra.mxu1 %v9471_v60 }
 0x6d6   : > { %9346 = vmatprep.subr.bf16.mxu1 %v9472_v23 }
 0x6d8   : > { %9331 = vmatmul.mubr.msk.bf16.gmra.mrb[88].mxu1 %vm1706_vm4, %v15153_v47  ;;  %v15157_v47 = vld [vmem:[#allocation97_spill] sm:$0xff] }
 0x7a3   : > { %v9328_v14 = vpop.f32.mrb[84].mxu1 }
 0x7a4   : > { %v7661_v17 = vadd.f32 %v9328_v14, %v8779_v20  ;;  %v7620_v29 = vpop.f32.mrb[85].mxu1  ;;  %v15158_v14 = vld [vmem:[#allocation33_spill] sm:$0xff] }
 0x7a5   : > { %v7659_v39 = vadd.f32 %v8779_v20, %v7620_v29  ;;  %v9329_v10 = vpop.f32.mrb[86].mxu1  ;;  %v15159_v29 = vld [vmem:[#allocation26_spill] sm:$0xff] }
 0x7a6   : > { %v7669_v1 = vmax.f32 %v7661_v17, 0.0  ;;  %v7662_v19 = vadd.f32 %v9329_v10, %v8779_v20  ;;  %v7623_v43 = vpop.f32.mrb[87].mxu1 }
 0x7a7   : > { %v7667_v53 = vmax.f32 %v7659_v39, 0.0  ;;  %v7660_v6 = vadd.f32 %v8779_v20, %v7623_v43  ;;  %v15161_v43 = vld [vmem:[#allocation32_spill] sm:$0xff] }
 0x7a8   : > { %v7677_v8 = vmul.f32 %v7669_v1, %v15154_v31  ;;  %v7670_v0 = vmax.f32 %v7662_v19, 0.0 }
 0x7a9   : > { %v7675_v11 = vmul.f32 %v7667_v53, %v15155_v30  ;;  %v7668_v54 = vmax.f32 %v7660_v6, 0.0 }
 0x7aa   : > { %v7678_v26 = vmul.f32 %v7670_v0, %v15156_v62  ;;  %v7685_v34 = vadd.f32 %v7677_v8, %v15158_v14  ;;  %v15163_v14 = vld [vmem:[#allocation186_spill] sm:$0xff] }
 0x7ab   : > { %v7676_v60 = vmul.f32 %v7668_v54, %v15157_v47  ;;  %v9332_v24 = vpop.f32.mrb[88].mxu1  ;;  %v7683_v39 = vadd.f32 %v7675_v11, %v15160_v16  ;;  %v15162_v47 = vld [vmem:[#allocation25_spill] sm:$0xff]  ;;  %v15164_v16 = vld [vmem:[#allocation24_spill] sm:$0xff] }
 0x7ac   : > { %v7686_v46 = vadd.f32 %v7678_v26, %v15159_v29  ;;  %v7665_v17 = vadd.f32 %v9332_v24, %v8779_v20  ;;  %v7636_v10 = vpop.f32.mrb[89].mxu1 }
 0x7ad   : > { %v7684_v3 = vadd.f32 %v7676_v60, %v15161_v43  ;;  %v7663_v1 = vadd.f32 %v8779_v20, %v7636_v10  ;;  %v9333_v19 = vpop.f32.mrb[90].mxu1  ;;  %v15165_v60 = vld [vmem:[#allocation192_spill] sm:$0xff] }
 0x7ae   : > { %v7760_v31 = vpack.c.bf16 %v7686_v46, %v7685_v34  ;;  %v7673_v53 = vmax.f32 %v7665_v17, 0.0  ;;  %v7666_v6 = vadd.f32 %v9333_v19, %v8779_v20  ;;  %v7639_v30 = vpop.f32.mrb[91].mxu1  ;;  %v15166_v46 = vld [vmem:[#allocation7_spill] sm:$0xff] }
 0x7af   : > { %v7759_v0 = vpack.c.bf16 %v7684_v3, %v7683_v39  ;;  %v7671_v62 = vmax.f32 %v7663_v1, 0.0  ;;  %v7664_v54 = vadd.f32 %v8779_v20, %v7639_v30  ;;  %v15167_v3 = vld [vmem:[#allocation28_spill] sm:$0xff]  ;;  %v15168_v20 = vld [vmem:[#allocation29_spill] sm:$0xff]  ;;  %v15169_v39 = vld [vmem:[#allocation30_spill] sm:$0xff]  ;;  %v15175_v30 = vpack.c.bf16 %v15106_v44, %v15105_v42 }
 0x7b0   : > { %v7681_v58 = vmul.f32 %v7673_v53, %v15162_v47  ;;  %v7674_v8 = vmax.f32 %v7666_v6, 0.0  ;;  %v15172_v53 = vld [vmem:[#allocation180_spill] sm:$0xff]  ;;  %v15174_v6 = vpack.c.bf16 %v15103_v28, %v15102_v22  ;;  %v15178_v22 = vpack.c.bf16 %v15114_v27, %v15113_v41  ;;  %v15186_v41 = vld [vmem:[#allocation77_spill] sm:$0xff]  ;;  %v15187_v27 = vld [vmem:[#allocation79_spill] sm:$0xff] }
 0x7b1   : > { %v7679_v26 = vmul.f32 %v7671_v62, %v15163_v14  ;;  %v7672_v24 = vmax.f32 %v7664_v54, 0.0  ;;  %9338 = vmatprep.mubr.msk.bf16.mxu1 %vm1706_vm4, %v7759_v0  ;;  %v15179_v28 = vpack.c.bf16 %v15116_v12, %v15115_v25  ;;  %v15180_v42 = vpack.c.bf16 %v15118_v36, %v15117_v33  ;;  %v15189_v12 = vld [vmem:[#allocation78_spill] sm:$0xff]  ;;  %v15191_v36 = vld [vmem:[#allocation76_spill] sm:$0xff]  ;;  %v15200_v62 = vld [vmem:[#allocation5_spill] sm:$0xff] }
 0x7b2   : > { %v7682_v11 = vmul.f32 %v7674_v8, %v15164_v16  ;;  %9339 = vmatmul.mubr.msk.bf16.vlgmr.msra.gmra.mrb[92].mxu1 %vm1706_vm4, %v7760_v31  ;;  %v7689_v29 = vadd.f32 %v7681_v58, %v15166_v46  ;;  %v15170_v31 = vpack.c.bf16 %v15100_v51, %v15099_v52  ;;  %v15176_v52 = vpack.c.bf16 %v15108_v5, %v15107_v2  ;;  %v15203_v47 = vld [vmem:[#allocation4_spill] sm:$0xff]  ;;  %v15205_v14 = vld [vmem:[#allocation90_spill] sm:$0xff] }
 0x7b3   : > { %v7680_v34 = vmul.f32 %v7672_v24, %v15165_v60  ;;  %9347 = vmatpush3.bf16.msra.mxu1 %v9472_v23  ;;  %v7687_v10 = vadd.f32 %v7679_v26, %v15168_v20  ;;  %v15171_v23 = vld [vmem:[#allocation59_spill] sm:$0xff]  ;;  %v15177_v51 = vpack.c.bf16 %v15110_v15, %v15109_v38  ;;  %v15181_v44 = vpack.c.bf16 %v15120_v21, %v15119_v61  ;;  %v15184_v38 = vld [vmem:[#allocation164_spill] sm:$0xff]  ;;  %v15192_v61 = vld [vmem:[#allocation198_spill] sm:$0xff] }
 0x7b4   : > { %v7690_v17 = vadd.f32 %v7682_v11, %v15167_v3  ;;  %v15173_v58 = vpack.c.bf16 %v15171_v23, %v15172_v53  ;;  %v15182_v2 = vpack.c.bf16 %v15122_v50, %v15121_v35  ;;  %v15183_v5 = vpack.c.bf16 %v15124_v45, %v15123_v7  ;;  %v15194_v35 = vld [vmem:[#allocation80_spill] sm:$0xff]  ;;  %v15195_v50 = vld [vmem:[#allocation18_spill] sm:$0xff]  ;;  %v15197_v7 = vld [vmem:[#allocation21_spill] sm:$0xff] }
 0x7b5   : > { %v7688_v43 = vadd.f32 %v7680_v34, %v15169_v39  ;;  %v15185_v15 = vpack.c.bf16 %v12999_v56, %v15184_v38  ;;  %v15188_v25 = vpack.c.bf16 %v15186_v41, %v15187_v27  ;;  %v15190_v33 = vpack.c.bf16 %v15126_v49, %v15189_v12  ;;  %v15198_v45 = vld [vmem:[#allocation81_spill] sm:$0xff]  ;;  %v15207_v24 = vld [vmem:[#allocation87_spill] sm:$0xff]  ;;  %v15213_v16 = vld [vmem:[#allocation94_spill] sm:$0xff] }
 0x7b6   : > { %v7762_v1 = vpack.c.bf16 %v7690_v17, %v7689_v29  ;;  %v15193_v21 = vpack.c.bf16 %v15191_v36, %v15192_v61  ;;  %v15196_v56 = vpack.c.bf16 %v15194_v35, %v15195_v50  ;;  %v15199_v0 = vpack.c.bf16 %v15197_v7, %v15198_v45  ;;  %v15214_v11 = vld [vmem:[#allocation136_spill] sm:$0xff]  ;;  %v15217_v34 = vld [vmem:[#allocation114_spill] sm:$0xff]  ;;  %v15225_v3 = vld [vmem:[#allocation141_spill] sm:$0xff] }
 0x7b7   : > { %v7761_v19 = vpack.c.bf16 %v7688_v43, %v7687_v10  ;;  %v15201_v49 = vpack.c.bf16 %v13157_v48, %v15200_v62  ;;  %v15202_v54 = vpack.c.bf16 %v15135_v13, %v15134_v9  ;;  %v15204_v8 = vpack.c.bf16 %v15137_v40, %v15203_v47  ;;  %v15211_v9 = vld [vmem:[#allocation85_spill] sm:$0xff]  ;;  %v15216_v60 = vld [vmem:[#allocation84_spill] sm:$0xff]  ;;  %v15222_v46 = vld [vmem:[#allocation102_spill] sm:$0xff] }
 0x7b8   : > { %v15206_v26 = vpack.c.bf16 %v15139_v4, %v15205_v14  ;;  %v15208_v48 = vpack.c.bf16 %v15141_v57, %v15207_v24  ;;  %v15209_v13 = vpack.c.bf16 %v15143_v59, %v15142_v63  ;;  %v15210_v40 = vpack.c.bf16 %v15145_v37, %v15144_v32  ;;  %v15219_v59 = vld [vmem:[#allocation88_spill] sm:$0xff]  ;;  %v15221_v37 = vld [vmem:[#allocation117_spill] sm:$0xff]  ;;  %v15224_v29 = vld [vmem:[#allocation142_spill] sm:$0xff] }
 0x7b9   : > { %9342 = vmatprep.mubr.msk.bf16.mxu1 %vm1706_vm4, %v7761_v19  ;;  %v15212_v4 = vpack.c.bf16 %v13330_v55, %v15211_v9  ;;  %v15215_v57 = vpack.c.bf16 %v15213_v16, %v15214_v11  ;;  %v15218_v63 = vpack.c.bf16 %v15216_v60, %v15217_v34  ;;  %v15220_v32 = vpack.c.bf16 %v13410_v18, %v15219_v59  ;;  %v15227_v20 = vld [vmem:[#allocation150_spill] sm:$0xff]  ;;  %v15228_v10 = vld [vmem:[#allocation132_spill] sm:$0xff] }
 0x7ba   : > { %9343 = vmatmul.mubr.msk.bf16.gmra.mrb[96].mxu1 %vm1706_vm4, %v7762_v1  ;;  %v15223_v55 = vpack.c.bf16 %v15221_v37, %v15222_v46  ;;  %v15226_v17 = vpack.c.bf16 %v15224_v29, %v15225_v3  ;;  %v15229_v39 = vpack.c.bf16 %v15227_v20, %v15228_v10  ;;  %v8780_v18 = vld [vmem:[%s13975_s17] ss:$0 sm:$0xff] }
 0x7bb   : > { %9348 = vmatprep.mubr.msk.bf16.mxu1 %vm2503_vm5, %v15170_v31  ;;  %v8787_v53 = vld [vmem:[%s13976_s18] ss:$0 sm:$0xff] }
 0x7c2   : > { %9349 = vmatmul.mubr.msk.bf16.vlgmr.msra.gmra.mrb[100].mxu1 %vm2503_vm5, %v15173_v58 }
 0x7c3   : > { %9352 = vmatprep.mubr.msk.bf16.mxu1 %vm2503_vm5, %v15174_v6 }
 0x7ca   : > { %9353 = vmatmul.mubr.msk.bf16.gmra.mrb[104].mxu1 %vm2503_vm5, %v15175_v30 }
 0x7cb   : > { %9356 = vmatprep.mubr.msk.bf16.mxu1 %vm2503_vm5, %v15176_v52 }
 0x7d2   : > { %9357 = vmatmul.mubr.msk.bf16.gmra.mrb[108].mxu1 %vm2503_vm5, %v15177_v51 }
 0x7d3   : > { %9360 = vmatprep.mubr.msk.bf16.mxu1 %vm2503_vm5, %v15178_v22 }
 0x7da   : > { %9361 = vmatmul.mubr.msk.bf16.gmra.mrb[112].mxu1 %vm2503_vm5, %v15179_v28 }
 0x7db   : > { %9364 = vmatprep.mubr.msk.bf16.mxu1 %vm2503_vm5, %v15180_v42 }
 0x7e2   : > { %9365 = vmatmul.mubr.msk.bf16.gmra.mrb[116].mxu1 %vm2503_vm5, %v15181_v44 }
 0x7e3   : > { %9368 = vmatprep.mubr.msk.bf16.mxu1 %vm2503_vm5, %v15182_v2 }
 0x7ea   : > { %9369 = vmatmul.mubr.msk.bf16.gmra.mrb[120].mxu1 %vm2503_vm5, %v15183_v5 }
 0x7eb   : > { %9372 = vmatprep.mubr.msk.bf16.mxu1 %vm2503_vm5, %v15185_v15 }
 0x7f2   : > { %9373 = vmatmul.mubr.msk.bf16.gmra.mrb[124].mxu1 %vm2503_vm5, %v15188_v25 }
 0x7f3   : > { %9376 = vmatprep.mubr.msk.bf16.mxu1 %vm2503_vm5, %v15190_v33 }
 0x7fa   : > { %9377 = vmatmul.mubr.msk.bf16.gmra.mrb[128].mxu1 %vm2503_vm5, %v15193_v21 }
 0x7fb   : > { %9380 = vmatprep.mubr.msk.bf16.mxu1 %vm2503_vm5, %v15196_v56 }
 0x802   : > { %9381 = vmatmul.mubr.msk.bf16.gmra.mrb[132].mxu1 %vm2503_vm5, %v15199_v0  ;;  %v13735_v0 = vld [vmem:[%s13979_s21] ss:$0 sm:$0xff] }
 0x803   : > { %9384 = vmatprep.mubr.msk.bf16.mxu1 %vm2503_vm5, %v15201_v49 }
 0x80a   : > { %9385 = vmatmul.mubr.msk.bf16.gmra.mrb[136].mxu1 %vm2503_vm5, %v15202_v54 }
 0x80b   : > { %9388 = vmatprep.mubr.msk.bf16.mxu1 %vm2503_vm5, %v15204_v8 }
 0x812   : > { %9389 = vmatmul.mubr.msk.bf16.gmra.mrb[140].mxu1 %vm2503_vm5, %v15206_v26 }
 0x813   : > { %9392 = vmatprep.mubr.msk.bf16.mxu1 %vm2503_vm5, %v15208_v48 }
 0x81a   : > { %9393 = vmatmul.mubr.msk.bf16.gmra.mrb[144].mxu1 %vm2503_vm5, %v15209_v13 }
 0x81b   : > { %9396 = vmatprep.mubr.msk.bf16.mxu1 %vm2503_vm5, %v15210_v40 }
 0x822   : > { %9397 = vmatmul.mubr.msk.bf16.gmra.mrb[148].mxu1 %vm2503_vm5, %v15212_v4 }
 0x823   : > { %9400 = vmatprep.mubr.msk.bf16.mxu1 %vm2503_vm5, %v15215_v57 }
 0x82a   : > { %9401 = vmatmul.mubr.msk.bf16.gmra.mrb[152].mxu1 %vm2503_vm5, %v15218_v63 }
 0x82b   : > { %9404 = vmatprep.mubr.msk.bf16.mxu1 %vm2503_vm5, %v15220_v32 }
 0x832   : > { %9405 = vmatmul.mubr.msk.bf16.gmra.mrb[156].mxu1 %vm2503_vm5, %v15223_v55 }
 0x833   : > { %9408 = vmatprep.mubr.msk.bf16.mxu1 %vm2503_vm5, %v15226_v17 }
 0x83a   : > { %9409 = vmatmul.mubr.msk.bf16.gmra.mrb[160].mxu1 %vm2503_vm5, %v15229_v39 }
 0x885   : > { %v9340_v43 = vpop.f32.mrb[92].mxu1 }
 0x886   : > { %v7837_v1 = vadd.f32 %v9340_v43, %v8780_v18  ;;  %v7828_v19 = vpop.f32.mrb[93].mxu1 }
 0x887   : > { %v7829_v31 = vadd.f32 %v8780_v18, %v7828_v19  ;;  %v9341_v23 = vpop.f32.mrb[94].mxu1 }
 0x888   : > { %v7861_v58 = vmax.f32 %v7837_v1, 0.0  ;;  %v7840_v6 = vadd.f32 %v9341_v23, %v8780_v18  ;;  %v7831_v30 = vpop.f32.mrb[95].mxu1 }
 0x889   : > { %v7859_v52 = vmax.f32 %v7829_v31, 0.0  ;;  %v7832_v51 = vadd.f32 %v8780_v18, %v7831_v30 }
 0x88a   : > { %v7876_v22 = vmul.f32 %v8787_v53, %v7861_v58  ;;  %v7862_v42 = vmax.f32 %v7840_v6, 0.0 }
 0x88b   : > { %v7860_v28 = vmax.f32 %v7832_v51, 0.0  ;;  %v7874_v2 = vmul.f32 %v8787_v53, %v7859_v52 }
 0x88c   : > { %v7888_v44 = vsel %vm1706_vm4, %v7876_v22, 0.0  ;;  %v7877_v35 = vmul.f32 %v8787_v53, %v7862_v42 }
 0x88d   : > { %7889 = vadd.xlane.f32.xlu0 %v7888_v44  ;;  %v9344_v5 = vpop.f32.mrb[96].mxu1  ;;  %v7875_v38 = vmul.f32 %v8787_v53, %v7860_v28  ;;  %v7882_v21 = vsel %vm1706_vm4, %v7874_v2, 0.0 }
 0x88e   : > { %v7853_v15 = vadd.f32 %v9344_v5, %v8780_v18  ;;  %v7844_v41 = vpop.f32.mrb[97].mxu1  ;;  %v7891_v49 = vsel %vm1706_vm4, %v7877_v35, 0.0 }
 0x88f   : > { %v7845_v27 = vadd.f32 %v8780_v18, %v7844_v41  ;;  %v9345_v25 = vpop.f32.mrb[98].mxu1  ;;  %v7885_v12 = vsel %vm1706_vm4, %v7875_v38, 0.0 }
 0x890   : > { %v7865_v33 = vmax.f32 %v7853_v15, 0.0  ;;  %v7856_v36 = vadd.f32 %v9345_v25, %v8780_v18  ;;  %7886 = vadd.xlane.f32.xlu1 %v7885_v12  ;;  %v7847_v61 = vpop.f32.mrb[99].mxu1 }
 0x891   : > { %v7863_v50 = vmax.f32 %v7845_v27, 0.0  ;;  %v7848_v56 = vadd.f32 %v8780_v18, %v7847_v61  ;;  %7883 = vadd.xlane.f32.xlu0 %v7882_v21  ;;  %v8788_v18 = vld [vmem:[#allocation2] ss:$0 sm:$0xff] }
 0x892   : > { %v7880_v7 = vmul.f32 %v8787_v53, %v7865_v33  ;;  %v7866_v62 = vmax.f32 %v7856_v36, 0.0 }
 0x893   : > { %v7864_v45 = vmax.f32 %v7848_v56, 0.0  ;;  %v7878_v47 = vmul.f32 %v8787_v53, %v7863_v50 }
 0x894   : > { %v7900_v54 = vsel %vm1706_vm4, %v7880_v7, 0.0  ;;  %v7881_v11 = vmul.f32 %v8787_v53, %v7866_v62 }
 0x895   : > { %7892 = vadd.xlane.f32.xlu0 %v7891_v49  ;;  %7901 = vadd.xlane.f32.xlu1 %v7900_v54  ;;  %v9350_v8 = vpop.f32.mrb[100].mxu1  ;;  %v7879_v14 = vmul.f32 %v8787_v53, %v7864_v45  ;;  %v7894_v16 = vsel %vm1706_vm4, %v7878_v47, 0.0 }
 0x896   : > { %v8162_v26 = vadd.f32 %v9350_v8, %v13735_v0  ;;  %v8153_v24 = vpop.f32.mrb[101].mxu1  ;;  %v7903_v60 = vsel %vm1706_vm4, %v7881_v11, 0.0 }
 0x897   : > { %v8154_v48 = vadd.f32 %v13735_v0, %v8153_v24  ;;  %v9351_v13 = vpop.f32.mrb[102].mxu1  ;;  %v7897_v40 = vsel %vm1706_vm4, %v7879_v14, 0.0 }
 0x898   : > { %8410 = vst.msk [vmem:[%s13744_s5 + $0x10] sm:$0xff] %vm1888_vm3, %v8162_v26  ;;  %v8165_v9 = vadd.f32 %v9351_v13, %v13735_v0  ;;  %v8156_v4 = vpop.f32.mrb[103].mxu1 }
 0x899   : > { %8408 = vst.msk [vmem:[%s13744_s5] sm:$0xff] %vm1888_vm3, %v8154_v48  ;;  %v8157_v57 = vadd.f32 %v13735_v0, %v8156_v4  ;;  %7898 = vadd.xlane.f32.xlu0 %v7897_v40  ;;  %7895 = vadd.xlane.f32.xlu1 %v7894_v16 }
 0x89a   : > { %8411 = vst.msk [vmem:[%s13744_s5 + $0x18] sm:$0xff] %vm1888_vm3, %v8165_v9 }
 0x89b   : > { %8409 = vst.msk [vmem:[%s13744_s5 + $0x8] sm:$0xff] %vm1888_vm3, %v8157_v57 }
 0x89d   : > { %v9354_v34 = vpop.f32.mrb[104].mxu1  ;;  %7904 = vadd.xlane.f32.xlu0 %v7903_v60 }
 0x89e   : > { %v8178_v63 = vadd.f32 %v9354_v34, %v13735_v0  ;;  %v8169_v59 = vpop.f32.mrb[105].mxu1 }
 0x89f   : > { %v8170_v32 = vadd.f32 %v13735_v0, %v8169_v59  ;;  %v9355_v37 = vpop.f32.mrb[106].mxu1 }
 0x8a0   : > { %8414 = vst.msk [vmem:[%s13744_s5 + $0x30] sm:$0xff] %vm1888_vm3, %v8178_v63  ;;  %v8181_v46 = vadd.f32 %v9355_v37, %v13735_v0  ;;  %v8172_v55 = vpop.f32.mrb[107].mxu1 }
 0x8a1   : > { %8412 = vst.msk [vmem:[%s13744_s5 + $0x20] sm:$0xff] %vm1888_vm3, %v8170_v32  ;;  %v8173_v29 = vadd.f32 %v13735_v0, %v8172_v55 }
 0x8a2   : > { %8415 = vst.msk [vmem:[%s13744_s5 + $0x38] sm:$0xff] %vm1888_vm3, %v8181_v46 }
 0x8a3   : > { %8413 = vst.msk [vmem:[%s13744_s5 + $0x28] sm:$0xff] %vm1888_vm3, %v8173_v29 }
 0x8a5   : > { %v9358_v3 = vpop.f32.mrb[108].mxu1 }
 0x8a6   : > { %v8194_v17 = vadd.f32 %v9358_v3, %v13735_v0  ;;  %v8185_v20 = vpop.f32.mrb[109].mxu1 }
 0x8a7   : > { %v8186_v10 = vadd.f32 %v13735_v0, %v8185_v20  ;;  %v9359_v39 = vpop.f32.mrb[110].mxu1 }
 0x8a8   : > { %8418 = vst.msk [vmem:[%s13744_s5 + $0x50] sm:$0xff] %vm1888_vm3, %v8194_v17  ;;  %v8197_v43 = vadd.f32 %v9359_v39, %v13735_v0  ;;  %v8188_v1 = vpop.f32.mrb[111].mxu1 }
 0x8a9   : > { %8416 = vst.msk [vmem:[%s13744_s5 + $0x40] sm:$0xff] %vm1888_vm3, %v8186_v10  ;;  %v8189_v19 = vadd.f32 %v13735_v0, %v8188_v1 }
 0x8aa   : > { %8419 = vst.msk [vmem:[%s13744_s5 + $0x58] sm:$0xff] %vm1888_vm3, %v8197_v43  ;;  %7913 = vperm.xlu1 %9443, %v8788_v18  }
 0x8ab   : > { %8417 = vst.msk [vmem:[%s13744_s5 + $0x48] sm:$0xff] %vm1888_vm3, %v8189_v19 }
 0x8ad   : > { %v9362_v31 = vpop.f32.mrb[112].mxu1 }
 0x8ae   : > { %v8210_v23 = vadd.f32 %v9362_v31, %v13735_v0  ;;  %v8201_v53 = vpop.f32.mrb[113].mxu1 }
 0x8af   : > { %v8202_v58 = vadd.f32 %v13735_v0, %v8201_v53  ;;  %v9363_v6 = vpop.f32.mrb[114].mxu1 }
 0x8b0   : > { %8422 = vst.msk [vmem:[%s13744_s5 + $0x70] sm:$0xff] %vm1888_vm3, %v8210_v23  ;;  %v8213_v30 = vadd.f32 %v9363_v6, %v13735_v0  ;;  %v8204_v52 = vpop.f32.mrb[115].mxu1 }
 0x8b1   : > { %8420 = vst.msk [vmem:[%s13744_s5 + $0x60] sm:$0xff] %vm1888_vm3, %v8202_v58  ;;  %v8205_v51 = vadd.f32 %v13735_v0, %v8204_v52 }
 0x8b2   : > { %8423 = vst.msk [vmem:[%s13744_s5 + $0x78] sm:$0xff] %vm1888_vm3, %v8213_v30 }
 0x8b3   : > { %8421 = vst.msk [vmem:[%s13744_s5 + $0x68] sm:$0xff] %vm1888_vm3, %v8205_v51 }
 0x8b5   : > { %v9366_v22 = vpop.f32.mrb[116].mxu1 }
 0x8b6   : > { %v8226_v28 = vadd.f32 %v9366_v22, %v13735_v0  ;;  %v8217_v42 = vpop.f32.mrb[117].mxu1 }
 0x8b7   : > { %v8218_v44 = vadd.f32 %v13735_v0, %v8217_v42  ;;  %v9367_v2 = vpop.f32.mrb[118].mxu1 }
 0x8b8   : > { %8426 = vst.msk [vmem:[%s13744_s5 + $0x90] sm:$0xff] %vm1888_vm3, %v8226_v28  ;;  %v8229_v5 = vadd.f32 %v9367_v2, %v13735_v0  ;;  %v8220_v38 = vpop.f32.mrb[119].mxu1 }
 0x8b9   : > { %8424 = vst.msk [vmem:[%s13744_s5 + $0x80] sm:$0xff] %vm1888_vm3, %v8218_v44  ;;  %v8221_v15 = vadd.f32 %v13735_v0, %v8220_v38 }
 0x8ba   : > { %8427 = vst.msk [vmem:[%s13744_s5 + $0x98] sm:$0xff] %vm1888_vm3, %v8229_v5 }
 0x8bb   : > { %8425 = vst.msk [vmem:[%s13744_s5 + $0x88] sm:$0xff] %vm1888_vm3, %v8221_v15 }
 0x8bd   : > { %v9370_v41 = vpop.f32.mrb[120].mxu1 }
 0x8be   : > { %v8242_v27 = vadd.f32 %v9370_v41, %v13735_v0  ;;  %v8233_v25 = vpop.f32.mrb[121].mxu1 }
 0x8bf   : > { %v8234_v12 = vadd.f32 %v13735_v0, %v8233_v25  ;;  %v9371_v33 = vpop.f32.mrb[122].mxu1 }
 0x8c0   : > { %8430 = vst.msk [vmem:[%s13744_s5 + $0xb0] sm:$0xff] %vm1888_vm3, %v8242_v27  ;;  %v8245_v36 = vadd.f32 %v9371_v33, %v13735_v0  ;;  %v8236_v61 = vpop.f32.mrb[123].mxu1 }
 0x8c1   : > { %8428 = vst.msk [vmem:[%s13744_s5 + $0xa0] sm:$0xff] %vm1888_vm3, %v8234_v12  ;;  %v8237_v21 = vadd.f32 %v13735_v0, %v8236_v61 }
 0x8c2   : > { %8431 = vst.msk [vmem:[%s13744_s5 + $0xb8] sm:$0xff] %vm1888_vm3, %v8245_v36 }
 0x8c3   : > { %8429 = vst.msk [vmem:[%s13744_s5 + $0xa8] sm:$0xff] %vm1888_vm3, %v8237_v21 }
 0x8c5   : > { %v9374_v35 = vpop.f32.mrb[124].mxu1 }
 0x8c6   : > { %v8258_v50 = vadd.f32 %v9374_v35, %v13735_v0  ;;  %v8249_v56 = vpop.f32.mrb[125].mxu1 }
 0x8c7   : > { %v8250_v7 = vadd.f32 %v13735_v0, %v8249_v56  ;;  %v9375_v45 = vpop.f32.mrb[126].mxu1 }
 0x8c8   : > { %8434 = vst.msk [vmem:[%s13744_s5 + $0xd0] sm:$0xff] %vm1888_vm3, %v8258_v50  ;;  %v8261_v62 = vadd.f32 %v9375_v45, %v13735_v0  ;;  %v8252_v49 = vpop.f32.mrb[127].mxu1 }
 0x8c9   : > { %8432 = vst.msk [vmem:[%s13744_s5 + $0xc0] sm:$0xff] %vm1888_vm3, %v8250_v7  ;;  %v8253_v54 = vadd.f32 %v13735_v0, %v8252_v49 }
 0x8ca   : > { %8435 = vst.msk [vmem:[%s13744_s5 + $0xd8] sm:$0xff] %vm1888_vm3, %v8261_v62 }
 0x8cb   : > { %8433 = vst.msk [vmem:[%s13744_s5 + $0xc8] sm:$0xff] %vm1888_vm3, %v8253_v54 }
 0x8cd   : > { %v9378_v47 = vpop.f32.mrb[128].mxu1 }
 0x8ce   : > { %v8274_v8 = vadd.f32 %v9378_v47, %v13735_v0  ;;  %v8265_v14 = vpop.f32.mrb[129].mxu1 }
 0x8cf   : > { %v8266_v26 = vadd.f32 %v13735_v0, %v8265_v14  ;;  %v9379_v24 = vpop.f32.mrb[130].mxu1 }
 0x8d0   : > { %8438 = vst.msk [vmem:[%s13744_s5 + $0xf0] sm:$0xff] %vm1888_vm3, %v8274_v8  ;;  %v8277_v48 = vadd.f32 %v9379_v24, %v13735_v0  ;;  %v8268_v13 = vpop.f32.mrb[131].mxu1 }
 0x8d1   : > { %8436 = vst.msk [vmem:[%s13744_s5 + $0xe0] sm:$0xff] %vm1888_vm3, %v8266_v26  ;;  %v8269_v40 = vadd.f32 %v13735_v0, %v8268_v13 }
 0x8d2   : > { %8439 = vst.msk [vmem:[%s13744_s5 + $0xf8] sm:$0xff] %vm1888_vm3, %v8277_v48 }
 0x8d3   : > { %8437 = vst.msk [vmem:[%s13744_s5 + $0xe8] sm:$0xff] %vm1888_vm3, %v8269_v40 }
 0x8d5   : > { %v9382_v9 = vpop.f32.mrb[132].mxu1 }
 0x8d6   : > { %v8290_v4 = vadd.f32 %v9382_v9, %v13735_v0  ;;  %v8281_v16 = vpop.f32.mrb[133].mxu1 }
 0x8d7   : > { %v8282_v11 = vadd.f32 %v13735_v0, %v8281_v16  ;;  %v9383_v57 = vpop.f32.mrb[134].mxu1 }
 0x8d8   : > { %8442 = vst.msk [vmem:[%s13744_s5 + $0x110] sm:$0xff] %vm1888_vm3, %v8290_v4  ;;  %v8293_v60 = vadd.f32 %v9383_v57, %v13735_v0  ;;  %v8284_v34 = vpop.f32.mrb[135].mxu1 }
 0x8d9   : > { %8440 = vst.msk [vmem:[%s13744_s5 + $0x100] sm:$0xff] %vm1888_vm3, %v8282_v11  ;;  %v8285_v63 = vadd.f32 %v13735_v0, %v8284_v34  ;;  %v15230_v34 = vlaneseq }
 0x8da   : > { %8443 = vst.msk [vmem:[%s13744_s5 + $0x118] sm:$0xff] %vm1888_vm3, %v8293_v60 }
 0x8db   : > { %8441 = vst.msk [vmem:[%s13744_s5 + $0x108] sm:$0xff] %vm1888_vm3, %v8285_v63  ;;  %v7933_v63 = vand.u32 127, %v15230_v34 }
 0x8dd   : > { %v9386_v59 = vpop.f32.mrb[136].mxu1 }
 0x8de   : > { %v8306_v32 = vadd.f32 %v9386_v59, %v13735_v0  ;;  %v8297_v37 = vpop.f32.mrb[137].mxu1 }
 0x8df   : > { %v8298_v46 = vadd.f32 %v13735_v0, %v8297_v37  ;;  %v9387_v55 = vpop.f32.mrb[138].mxu1  ;;  %v15231_v37 = vld [vmem:[#allocation3_spill] sm:$0xff] }
 0x8e0   : > { %8446 = vst.msk [vmem:[%s13744_s5 + $0x130] sm:$0xff] %vm1888_vm3, %v8306_v32  ;;  %v8309_v29 = vadd.f32 %v9387_v55, %v13735_v0  ;;  %v8300_v3 = vpop.f32.mrb[139].mxu1 }
 0x8e1   : > { %8444 = vst.msk [vmem:[%s13744_s5 + $0x120] sm:$0xff] %vm1888_vm3, %v8298_v46  ;;  %v8301_v17 = vadd.f32 %v13735_v0, %v8300_v3  ;;  %v7936_v46 = vsub.s32 %v7933_v63, %v15231_v37 }
 0x8e2   : > { %8447 = vst.msk [vmem:[%s13744_s5 + $0x138] sm:$0xff] %vm1888_vm3, %v8309_v29 }
 0x8e3   : > { %8445 = vst.msk [vmem:[%s13744_s5 + $0x128] sm:$0xff] %vm1888_vm3, %v8301_v17 }
 0x8e5   : > { %v9390_v20 = vpop.f32.mrb[140].mxu1 }
 0x8e6   : > { %v8322_v10 = vadd.f32 %v9390_v20, %v13735_v0  ;;  %v8313_v39 = vpop.f32.mrb[141].mxu1 }
 0x8e7   : > { %v8314_v18 = vadd.f32 %v13735_v0, %v8313_v39  ;;  %v9391_v43 = vpop.f32.mrb[142].mxu1 }
 0x8e8   : > { %8450 = vst.msk [vmem:[%s13744_s5 + $0x150] sm:$0xff] %vm1888_vm3, %v8322_v10  ;;  %v8325_v1 = vadd.f32 %v9391_v43, %v13735_v0  ;;  %v8316_v19 = vpop.f32.mrb[143].mxu1 }
 0x8e9   : > { %8448 = vst.msk [vmem:[%s13744_s5 + $0x140] sm:$0xff] %vm1888_vm3, %v8314_v18  ;;  %v8317_v31 = vadd.f32 %v13735_v0, %v8316_v19 }
 0x8ea   : > { %8451 = vst.msk [vmem:[%s13744_s5 + $0x158] sm:$0xff] %vm1888_vm3, %v8325_v1 }
 0x8eb   : > { %8449 = vst.msk [vmem:[%s13744_s5 + $0x148] sm:$0xff] %vm1888_vm3, %v8317_v31 }
 0x8ed   : > { %v9394_v23 = vpop.f32.mrb[144].mxu1 }
 0x8ee   : > { %v8338_v53 = vadd.f32 %v9394_v23, %v13735_v0  ;;  %v8329_v58 = vpop.f32.mrb[145].mxu1 }
 0x8ef   : > { %v8330_v6 = vadd.f32 %v13735_v0, %v8329_v58  ;;  %v9395_v30 = vpop.f32.mrb[146].mxu1 }
 0x8f0   : > { %8454 = vst.msk [vmem:[%s13744_s5 + $0x170] sm:$0xff] %vm1888_vm3, %v8338_v53  ;;  %v8341_v52 = vadd.f32 %v9395_v30, %v13735_v0  ;;  %v8332_v51 = vpop.f32.mrb[147].mxu1 }
 0x8f1   : > { %8452 = vst.msk [vmem:[%s13744_s5 + $0x160] sm:$0xff] %vm1888_vm3, %v8330_v6  ;;  %v8333_v22 = vadd.f32 %v13735_v0, %v8332_v51 }
 0x8f2   : > { %8455 = vst.msk [vmem:[%s13744_s5 + $0x178] sm:$0xff] %vm1888_vm3, %v8341_v52 }
 0x8f3   : > { %8453 = vst.msk [vmem:[%s13744_s5 + $0x168] sm:$0xff] %vm1888_vm3, %v8333_v22 }
 0x8f5   : > { %v9398_v28 = vpop.f32.mrb[148].mxu1 }
 0x8f6   : > { %v8354_v42 = vadd.f32 %v9398_v28, %v13735_v0  ;;  %v8345_v44 = vpop.f32.mrb[149].mxu1 }
 0x8f7   : > { %v8346_v2 = vadd.f32 %v13735_v0, %v8345_v44  ;;  %v9399_v5 = vpop.f32.mrb[150].mxu1 }
 0x8f8   : > { %8458 = vst.msk [vmem:[%s13744_s5 + $0x190] sm:$0xff] %vm1888_vm3, %v8354_v42  ;;  %v8357_v38 = vadd.f32 %v9399_v5, %v13735_v0  ;;  %v8348_v15 = vpop.f32.mrb[151].mxu1 }
 0x8f9   : > { %8456 = vst.msk [vmem:[%s13744_s5 + $0x180] sm:$0xff] %vm1888_vm3, %v8346_v2  ;;  %v8349_v41 = vadd.f32 %v13735_v0, %v8348_v15 }
 0x8fa   : > { %8459 = vst.msk [vmem:[%s13744_s5 + $0x198] sm:$0xff] %vm1888_vm3, %v8357_v38 }
 0x8fb   : > { %8457 = vst.msk [vmem:[%s13744_s5 + $0x188] sm:$0xff] %vm1888_vm3, %v8349_v41 }
 0x8fd   : > { %v9402_v27 = vpop.f32.mrb[152].mxu1 }
 0x8fe   : > { %v8370_v25 = vadd.f32 %v9402_v27, %v13735_v0  ;;  %v8361_v12 = vpop.f32.mrb[153].mxu1 }
 0x8ff   : > { %v8362_v33 = vadd.f32 %v13735_v0, %v8361_v12  ;;  %v9403_v36 = vpop.f32.mrb[154].mxu1 }
 0x900   : > { %8462 = vst.msk [vmem:[%s13744_s5 + $0x1b0] sm:$0xff] %vm1888_vm3, %v8370_v25  ;;  %v8373_v61 = vadd.f32 %v9403_v36, %v13735_v0  ;;  %v8364_v21 = vpop.f32.mrb[155].mxu1 }
 0x901   : > { %8460 = vst.msk [vmem:[%s13744_s5 + $0x1a0] sm:$0xff] %vm1888_vm3, %v8362_v33  ;;  %v8365_v35 = vadd.f32 %v13735_v0, %v8364_v21 }
 0x902   : > { %8463 = vst.msk [vmem:[%s13744_s5 + $0x1b8] sm:$0xff] %vm1888_vm3, %v8373_v61 }
 0x903   : > { %8461 = vst.msk [vmem:[%s13744_s5 + $0x1a8] sm:$0xff] %vm1888_vm3, %v8365_v35 }
 0x905   : > { %v9406_v50 = vpop.f32.mrb[156].mxu1 }
 0x906   : > { %v8386_v56 = vadd.f32 %v9406_v50, %v13735_v0  ;;  %v8377_v7 = vpop.f32.mrb[157].mxu1 }
 0x907   : > { %v8378_v45 = vadd.f32 %v13735_v0, %v8377_v7  ;;  %v9407_v62 = vpop.f32.mrb[158].mxu1 }
 0x908   : > { %8466 = vst.msk [vmem:[%s13744_s5 + $0x1d0] sm:$0xff] %vm1888_vm3, %v8386_v56  ;;  %v8389_v49 = vadd.f32 %v9407_v62, %v13735_v0  ;;  %v8380_v54 = vpop.f32.mrb[159].mxu1 }
 0x909   : > { %8464 = vst.msk [vmem:[%s13744_s5 + $0x1c0] sm:$0xff] %vm1888_vm3, %v8378_v45  ;;  %v8381_v47 = vadd.f32 %v13735_v0, %v8380_v54 }
 0x90a   : > { %8467 = vst.msk [vmem:[%s13744_s5 + $0x1d8] sm:$0xff] %vm1888_vm3, %v8389_v49 }
 0x90b   : > { %8465 = vst.msk [vmem:[%s13744_s5 + $0x1c8] sm:$0xff] %vm1888_vm3, %v8381_v47 }
 0x90d   : > { %v9410_v8 = vpop.f32.mrb[160].mxu1 }
 0x90e   : > { %v8402_v14 = vadd.f32 %v9410_v8, %v13735_v0  ;;  %v8393_v26 = vpop.f32.mrb[161].mxu1 }
 0x90f   : > { %v8394_v24 = vadd.f32 %v13735_v0, %v8393_v26  ;;  %v9411_v48 = vpop.f32.mrb[162].mxu1 }
 0x910   : > { %8470 = vst.msk [vmem:[%s13744_s5 + $0x1f0] sm:$0xff] %vm1888_vm3, %v8402_v14  ;;  %v8405_v13 = vadd.f32 %v9411_v48, %v13735_v0  ;;  %v8396_v40 = vpop.f32.mrb[163].mxu1 }
 0x911   : > { %8468 = vst.msk [vmem:[%s13744_s5 + $0x1e0] sm:$0xff] %vm1888_vm3, %v8394_v24  ;;  %v8397_v9 = vadd.f32 %v13735_v0, %v8396_v40 }
 0x912   : > { %8471 = vst.msk [vmem:[%s13744_s5 + $0x1f8] sm:$0xff] %vm1888_vm3, %v8405_v13 }
 0x913   : > { %8469 = vst.msk [vmem:[%s13744_s5 + $0x1e8] sm:$0xff] %vm1888_vm3, %v8397_v9 }
 0x91a   : > { %v7890_v4 = vpop.xlane.xlu0 %7889 }
 0x91d   : > { %v7887_v16 = vpop.xlane.xlu1 %7886 }
 0x91e   : > { %v7884_v11 = vpop.xlane.xlu0 %7883 }
 0x922   : > { %v7893_v57 = vpop.xlane.xlu0 %7892  ;;  %v7902_v60 = vpop.xlane.xlu1 %7901 }
 0x926   : > { %v7899_v59 = vpop.xlane.xlu0 %7898  ;;  %v7896_v32 = vpop.xlane.xlu1 %7895 }
 0x92a   : > { %v7914_v55 = vpop.permute.xlu1 %7913  ;;  %v7905_v20 = vpop.xlane.xlu0 %7904 }
 0x92b   : > { %v7916_v29 = vadd.f32 %v7914_v55, %v7884_v11  ;;  %v7917_v0 = vadd.f32 %v7914_v55, %v7887_v16  ;;  %v7918_v3 = vadd.f32 %v7914_v55, %v7890_v4  ;;  %v7919_v17 = vadd.f32 %v7914_v55, %v7893_v57 }
 0x92c   : > { %v7920_v10 = vadd.f32 %v7914_v55, %v7896_v32  ;;  %v7921_v39 = vadd.f32 %v7914_v55, %v7899_v59  ;;  %v7922_v19 = vadd.f32 %v7914_v55, %v7902_v60  ;;  %v7923_v31 = vadd.f32 %v7914_v55, %v7905_v20 }
 0x92d   : > { %v7937_v18 = vrot.slane %v7916_v29, %v7936_v46  ;;  %v7941_v43 = vrot.slane %v7917_v0, %v7936_v46  ;;  %v7945_v1 = vrot.slane %v7918_v3, %v7936_v46  ;;  %v7949_v23 = vrot.slane %v7919_v17, %v7936_v46 }
 0x92e   : > { %v7953_v58 = vrot.slane %v7920_v10, %v7936_v46  ;;  %v7957_v30 = vrot.slane %v7921_v39, %v7936_v46  ;;  %v7961_v51 = vrot.slane %v7922_v19, %v7936_v46  ;;  %v7965_v28 = vrot.slane %v7923_v31, %v7936_v46 }
 0x92f   : > { %v7966_v53 = vsel %vm4831_vm6, %v7941_v43, %v7937_v18 }
 0x930   : > { %v7967_v6 = vsel %vm4833_vm7, %v7945_v1, %v7966_v53 }
 0x931   : > { %v7968_v52 = vsel %vm4835_vm8, %v7949_v23, %v7967_v6 }
 0x932   : > { %v7969_v22 = vsel %vm4837_vm9, %v7953_v58, %v7968_v52 }
 0x933   : > { %v7970_v42 = vsel %vm4839_vm10, %v7957_v30, %v7969_v22 }
 0x934   : > { %v7971_v44 = vsel %vm4841_vm11, %v7961_v51, %v7970_v42 }
 0x935   : > { %v7972_v2 = vsel %vm4843_vm12, %v7965_v28, %v7971_v44 }
 0x936   : > { %7975 = vst.msk [vmem:[%s768_s19] sm:$0xff] %vm7974_vm13, %v7972_v2 }
 0x937 PF: > { %s36_s24 = sadd.s32 1, %s9480_s24  }
 0x938   : > { %p33_p5 = scmp.ge.s32.totalorder %s36_s24, 4  }
 0x93a   :  { %35 = sbr.rel (!%p33_p5) target bundleno = 9 (0x9), region = 163 }

</bundles_post_ra>
